<compile_context>
chip_gen: v7x
topology: tpu7x:2x2x1
jax: 0.10.0
libtpu: 0.0.40
codegen_flags: <defaults>
</compile_context>

<pallas_src>
import functools

import jax
import jax.numpy as jnp
import numpy as np
from jax.experimental import pallas as pl
from jax.experimental.pallas import tpu as pltpu

BN_EPS = 1e-5


# ------------------------------ Pallas kernels ------------------------------ #

def _fc_block_kernel(z_ref, w1_ref, b1_ref, w2_ref, b2_ref, o_ref, *, eps):
    """Fused Linear -> BN1d -> ReLU -> Linear -> BN1d -> ReLU.

    Dot operands are bf16 (MXU native), accumulation and all BN math in f32.
    Training-mode BN: batch statistics over axis 0, gamma=1, beta=0.
    """
    def bn_relu(x):
        m = jnp.mean(x, axis=0, keepdims=True)
        v = jnp.mean(jnp.square(x - m), axis=0, keepdims=True)
        return jnp.maximum((x - m) * jax.lax.rsqrt(v + eps), 0.0)

    h = jnp.dot(z_ref[...], w1_ref[...], preferred_element_type=jnp.float32)
    h = bn_relu(h + b1_ref[...])
    h = jnp.dot(h.astype(jnp.bfloat16), w2_ref[...],
                preferred_element_type=jnp.float32)
    h = bn_relu(h + b2_ref[...])
    o_ref[...] = h.astype(o_ref.dtype)


def fc_block(z, w1, b1, w2, b2):
    B = z.shape[0]
    n2 = w2.shape[1]
    # Everything (w2 is 4 MB in bf16) fits in VMEM as full-array blocks.
    return pl.pallas_call(
        functools.partial(_fc_block_kernel, eps=BN_EPS),
        out_shape=jax.ShapeDtypeStruct((B, n2), jnp.bfloat16),
    )(z.astype(jnp.bfloat16),
      w1.astype(jnp.bfloat16), b1.reshape(1, -1).astype(jnp.float32),
      w2.astype(jnp.bfloat16), b2.reshape(1, -1).astype(jnp.float32))


def _deconv_bn_relu_kernel(w_ref, p_ref, b_ref, o_ref, *, eps):
    """out(Cout, M) = W(Cout, Cin*K*K) @ P(Cin*K*K, M) + b, then per-channel
    (per-row) BatchNorm2d over the lane axis M = N*OH*OW, then ReLU."""
    acc = jnp.dot(w_ref[...], p_ref[...], preferred_element_type=jnp.float32)
    acc = acc + b_ref[...]
    m = jnp.mean(acc, axis=-1, keepdims=True)
    v = jnp.mean(jnp.square(acc - m), axis=-1, keepdims=True)
    o_ref[...] = jnp.maximum((acc - m) * jax.lax.rsqrt(v + eps),
                             0.0).astype(o_ref.dtype)


def deconv_bn_relu(wmat_t, patches_t, bias):
    """ConvTranspose2d (as transposed im2col GEMM) fused with BN2d + ReLU."""
    # BN needs the full M = N*OH*OW extent per channel in one block, so this
    # kernel is not M-tiled (fine at these sizes: ~1.3 MiB working set).
    # TODO(synk): two-pass (stats, then normalize) M-tiled variant for large M.
    cout = wmat_t.shape[0]
    m = patches_t.shape[1]
    return pl.pallas_call(
        functools.partial(_deconv_bn_relu_kernel, eps=BN_EPS),
        out_shape=jax.ShapeDtypeStruct((cout, m), jnp.bfloat16),
    )(wmat_t.astype(jnp.bfloat16), patches_t.astype(jnp.bfloat16),
      bias.reshape(-1, 1).astype(jnp.float32))


def _deconv_tanh_kernel(w_ref, p_ref, b_ref, o_ref):
    acc = jnp.dot(w_ref[...], p_ref[...], preferred_element_type=jnp.float32)
    o_ref[...] = jnp.tanh(acc + b_ref[...]).astype(o_ref.dtype)


def deconv_tanh(wmat_t, patches_t, bias):
    """Final ConvTranspose2d (transposed im2col GEMM) + bias + tanh,
    tiled over the lane-dense M = N*OH*OW axis ("parallel" for megacore)."""
    cout, k = wmat_t.shape
    m = patches_t.shape[1]
    if m % 128 == 0 and m > 512:
        tm = 512
        while m % tm:
            tm //= 2
    else:
        tm = m
    grid = (m // tm,)
    return pl.pallas_call(
        _deconv_tanh_kernel,
        out_shape=jax.ShapeDtypeStruct((cout, m), jnp.float32),
        grid=grid,
        in_specs=[
            pl.BlockSpec((cout, k), lambda j: (0, 0)),
            pl.BlockSpec((k, tm), lambda j: (0, j)),
            pl.BlockSpec((cout, 1), lambda j: (0, 0)),
        ],
        out_specs=pl.BlockSpec((cout, tm), lambda j: (0, j)),
        compiler_params=pltpu.CompilerParams(
            dimension_semantics=("parallel",)),
    )(wmat_t.astype(jnp.bfloat16), patches_t.astype(jnp.bfloat16),
      bias.reshape(-1, 1).astype(jnp.float32))


# ----------------------- ConvTranspose2d lowering glue ---------------------- #

def _convtranspose_patches_T(x_cnhw, K=4, stride=2, pad=1):
    """Lower ConvTranspose2d(k=4, s=2, p=1) input given in (C, N, H, W) layout
    to TRANSPOSED im2col patches of the equivalent stride-1 conv
    (zero-insertion + pad by K-1-pad, flipped kernel).

    Returns (C*K*K, N*OH*OW) bf16 with rows ordered (Cin, KH, KW) and columns
    ordered (N, OH, OW), plus (N, OH, OW)."""
    # TODO(synk): build patches in-kernel via strided DMA to avoid the K*K=16x
    # HBM expansion at large shapes.
    C, N, H, W = x_cnhw.shape
    OH, OW = H * stride, W * stride
    x = x_cnhw.astype(jnp.bfloat16)
    xd = jnp.zeros((C, N, (H - 1) * stride + 1, (W - 1) * stride + 1),
                   jnp.bfloat16)
    xd = xd.at[:, :, ::stride, ::stride].set(x)
    p_lo = K - 1 - pad
    pad_hi_h = OH + K - 1 - xd.shape[2] - p_lo
    pad_hi_w = OW + K - 1 - xd.shape[3] - p_lo
    xdp = jnp.pad(xd, ((0, 0), (0, 0), (p_lo, pad_hi_h), (p_lo, pad_hi_w)))
    cols = [xdp[:, :, kh:kh + OH, kw:kw + OW]
            for kh in range(K) for kw in range(K)]
    pch = jnp.stack(cols, axis=1)             # (C, K*K, N, OH, OW)
    return pch.reshape(C * K * K, N * OH * OW), (N, OH, OW)


def _convtranspose_weight_T(w):
    """PyTorch ConvTranspose2d weight (Cin, Cout, K, K) -> (Cout, Cin*K*K)
    matrix whose columns follow the flipped-kernel im2col row ordering."""
    cin, cout, K, _ = w.shape
    wflip = w[:, :, ::-1, ::-1]
    return wflip.transpose(1, 0, 2, 3).reshape(cout, cin * K * K)


# --------------------------------- Generator -------------------------------- #

def generator_forward(params, z, input_size, output_dim):
    B = z.shape[0]
    s4 = input_size // 4

    # Fused FC block: (B, input_dim) -> (B, 128*s4*s4), bf16.
    h = fc_block(z, params["w1"], params["b1"], params["w2"], params["b2"])

    # To channel-first / batch-second (C, N, H, W); both the im2col lowering
    # and the transposed-GEMM outputs use this layout, so there are no
    # relayout transposes between the two deconv stages.
    x = h.reshape(B, 128, s4, s4).transpose(1, 0, 2, 3)      # (128, B, s4, s4)

    # deconv1: ConvTranspose2d(128 -> 64, 4, 2, 1) fused with BN2d + ReLU.
    p1, (n, oh, ow) = _convtranspose_patches_T(x)
    y1 = deconv_bn_relu(_convtranspose_weight_T(params["dw1"]), p1,
                        params["db1"])                        # (64, B*oh*ow)
    x2 = y1.reshape(64, n, oh, ow)                            # already (C,N,H,W)

    # deconv2: ConvTranspose2d(64 -> output_dim, 4, 2, 1) + Tanh.
    p2, (n2, oh2, ow2) = _convtranspose_patches_T(x2)
    y2 = deconv_tanh(_convtranspose_weight_T(params["dw2"]), p2,
                     params["db2"])                           # (Cout, B*S*S)
    return y2.reshape(output_dim, n2, oh2, ow2).transpose(1, 0, 2, 3)


# Plain-JAX reference of the same math (bf16 matmul operands, f32 accumulation
# and BN/tanh math, training-mode BatchNorm).  Uses lax.conv_general_dilated
# for the transposed convolutions as an independent check of the im2col
# lowering used by the Pallas path.
def generator_forward_ref(params, z, input_size, output_dim):
    bf = jnp.bfloat16

    def bn_relu(x, axes):
        m = x.mean(axes, keepdims=True)
        v = jnp.square(x - m).mean(axes, keepdims=True)
        return jnp.maximum((x - m) * jax.lax.rsqrt(v + BN_EPS), 0.0)

    def deconv(x, w, b):          # w: (Cin, Cout, K, K), stride 2, pad 1
        wf = jnp.transpose(w, (1, 0, 2, 3))[:, :, ::-1, ::-1]   # (Cout,Cin,K,K)
        y = jax.lax.conv_general_dilated(
            x.astype(bf), wf.astype(bf), window_strides=(1, 1),
            padding=((2, 2), (2, 2)), lhs_dilation=(2, 2),
            dimension_numbers=("NCHW", "OIHW", "NCHW"),
            preferred_element_type=jnp.float32)
        return y + b.reshape(1, -1, 1, 1)

    B = z.shape[0]
    s4 = input_size // 4
    h = jnp.dot(z.astype(bf), params["w1"].astype(bf),
                preferred_element_type=jnp.float32) + params["b1"]
    h = bn_relu(h, 0)
    h = jnp.dot(h.astype(bf), params["w2"].astype(bf),
                preferred_element_type=jnp.float32) + params["b2"]
    h = bn_relu(h, 0)
    x = h.reshape(B, 128, s4, s4)
    y = bn_relu(deconv(x, params["dw1"], params["db1"]), (0, 2, 3))
    return jnp.tanh(deconv(y, params["dw2"], params["db2"]))


# ----------------------------------- main ----------------------------------- #

if __name__ == "__main__":
    # Small shapes consistent with the module: input_dim=100, output_dim=1,
    # input_size=16 (so fc2 -> 128*4*4 = 2048), batch=4.
    input_dim, output_dim, input_size, batch = 100, 1, 16, 4
    s4 = input_size // 4

    key = jax.random.PRNGKey(0)
    ks = jax.random.split(key, 5)
    std = 0.02  # initialize_weights(): normal_(0, 0.02), biases zero
    params = {
        "w1": std * jax.random.normal(ks[0], (input_dim, 1024), jnp.float32),
        "b1": jnp.zeros((1024,), jnp.float32),
        "w2": std * jax.random.normal(ks[1], (1024, 128 * s4 * s4), jnp.float32),
        "b2": jnp.zeros((128 * s4 * s4,), jnp.float32),
        "dw1": std * jax.random.normal(ks[2], (128, 64, 4, 4), jnp.float32),
        "db1": jnp.zeros((64,), jnp.float32),
        "dw2": std * jax.random.normal(ks[3], (64, output_dim, 4, 4), jnp.float32),
        "db2": jnp.zeros((output_dim,), jnp.float32),
    }
    z = jax.random.normal(ks[4], (batch, input_dim), jnp.float32)

    fwd = jax.jit(functools.partial(generator_forward,
                                    input_size=input_size,
                                    output_dim=output_dim))
    out = jax.block_until_ready(fwd(params, z))
    assert out.shape == (batch, output_dim, input_size, input_size), out.shape

    ref = jax.block_until_ready(
        generator_forward_ref(params, z, input_size, output_dim))
    np.testing.assert_allclose(np.asarray(out, dtype=np.float32),
                               np.asarray(ref, dtype=np.float32),
                               rtol=1e-2, atol=1e-2)

    print("KERNEL_OK")
</pallas_src>

<mosaic_0001>
module attributes {stable_mosaic.version = 11 : i64} {
  func.func @_fc_block_kernel(%arg0: memref<4x100xbf16, #tpu.memory_space<vmem>>, %arg1: memref<100x1024xbf16, #tpu.memory_space<vmem>>, %arg2: memref<1x1024xf32, #tpu.memory_space<vmem>>, %arg3: memref<1024x2048xbf16, #tpu.memory_space<vmem>>, %arg4: memref<1x2048xf32, #tpu.memory_space<vmem>>, %arg5: memref<4x2048xbf16, #tpu.memory_space<vmem>>) attributes {dimension_semantics = [], scalar_prefetch = 0 : i64, scratch_operands = 0 : i64, tpu.core_type = #tpu.core_type<tc>} {
    %c0 = arith.constant 0 : index
    %c0_0 = arith.constant 0 : index
    %0 = vector.load %arg0[%c0, %c0_0] : memref<4x100xbf16, #tpu.memory_space<vmem>>, vector<4x100xbf16>
    %c0_1 = arith.constant 0 : index
    %c0_2 = arith.constant 0 : index
    %1 = vector.load %arg1[%c0_1, %c0_2] : memref<100x1024xbf16, #tpu.memory_space<vmem>>, vector<100x1024xbf16>
    %cst = arith.constant dense<0.000000e+00> : vector<4x1024xf32>
    %2 = tpu.matmul %0, %1, %cst {dimension_numbers = #tpu.dot_dimension_numbers<[1], [0], [0], [1], [0, 0, 1, 1], [], []>} : vector<4x100xbf16>, vector<100x1024xbf16>, vector<4x1024xf32> -> vector<4x1024xf32>
    %c0_3 = arith.constant 0 : index
    %c0_4 = arith.constant 0 : index
    %3 = vector.load %arg2[%c0_3, %c0_4] : memref<1x1024xf32, #tpu.memory_space<vmem>>, vector<1x1024xf32>
    %4 = vector.broadcast %3 : vector<1x1024xf32> to vector<4x1024xf32>
    %5 = arith.addf %2, %4 : vector<4x1024xf32>
    %cst_5 = arith.constant dense<0.000000e+00> : vector<1024xf32>
    %6 = vector.multi_reduction <add>, %5, %cst_5 [0] : vector<4x1024xf32> to vector<1024xf32>
    %7 = vector.shape_cast %6 : vector<1024xf32> to vector<1x1024xf32>
    %cst_6 = arith.constant 4.000000e+00 : f32
    %8 = vector.broadcast %cst_6 : f32 to vector<1x1024xf32>
    %9 = arith.divf %7, %8 : vector<1x1024xf32>
    %10 = vector.broadcast %9 : vector<1x1024xf32> to vector<4x1024xf32>
    %11 = arith.subf %5, %10 : vector<4x1024xf32>
    %12 = arith.mulf %11, %11 : vector<4x1024xf32>
    %cst_7 = arith.constant dense<0.000000e+00> : vector<1024xf32>
    %13 = vector.multi_reduction <add>, %12, %cst_7 [0] : vector<4x1024xf32> to vector<1024xf32>
    %14 = vector.shape_cast %13 : vector<1024xf32> to vector<1x1024xf32>
    %cst_8 = arith.constant 4.000000e+00 : f32
    %15 = vector.broadcast %cst_8 : f32 to vector<1x1024xf32>
    %16 = arith.divf %14, %15 : vector<1x1024xf32>
    %17 = vector.broadcast %9 : vector<1x1024xf32> to vector<4x1024xf32>
    %18 = arith.subf %5, %17 : vector<4x1024xf32>
    %cst_9 = arith.constant 9.99999974E-6 : f32
    %19 = vector.broadcast %cst_9 : f32 to vector<1x1024xf32>
    %20 = arith.addf %16, %19 : vector<1x1024xf32>
    %21 = math.rsqrt %20 : vector<1x1024xf32>
    %22 = vector.broadcast %21 : vector<1x1024xf32> to vector<4x1024xf32>
    %23 = arith.mulf %18, %22 : vector<4x1024xf32>
    %cst_10 = arith.constant 0.000000e+00 : f32
    %24 = vector.broadcast %cst_10 : f32 to vector<4x1024xf32>
    %25 = arith.maximumf %23, %24 : vector<4x1024xf32>
    %26 = arith.truncf %25 : vector<4x1024xf32> to vector<4x1024xbf16>
    %c0_11 = arith.constant 0 : index
    %c0_12 = arith.constant 0 : index
    %27 = vector.load %arg3[%c0_11, %c0_12] : memref<1024x2048xbf16, #tpu.memory_space<vmem>>, vector<1024x2048xbf16>
    %cst_13 = arith.constant dense<0.000000e+00> : vector<4x2048xf32>
    %28 = tpu.matmul %26, %27, %cst_13 {dimension_numbers = #tpu.dot_dimension_numbers<[1], [0], [0], [1], [0, 0, 1, 1], [], []>} : vector<4x1024xbf16>, vector<1024x2048xbf16>, vector<4x2048xf32> -> vector<4x2048xf32>
    %c0_14 = arith.constant 0 : index
    %c0_15 = arith.constant 0 : index
    %29 = vector.load %arg4[%c0_14, %c0_15] : memref<1x2048xf32, #tpu.memory_space<vmem>>, vector<1x2048xf32>
    %30 = vector.broadcast %29 : vector<1x2048xf32> to vector<4x2048xf32>
    %31 = arith.addf %28, %30 : vector<4x2048xf32>
    %cst_16 = arith.constant dense<0.000000e+00> : vector<2048xf32>
    %32 = vector.multi_reduction <add>, %31, %cst_16 [0] : vector<4x2048xf32> to vector<2048xf32>
    %33 = vector.shape_cast %32 : vector<2048xf32> to vector<1x2048xf32>
    %cst_17 = arith.constant 4.000000e+00 : f32
    %34 = vector.broadcast %cst_17 : f32 to vector<1x2048xf32>
    %35 = arith.divf %33, %34 : vector<1x2048xf32>
    %36 = vector.broadcast %35 : vector<1x2048xf32> to vector<4x2048xf32>
    %37 = arith.subf %31, %36 : vector<4x2048xf32>
    %38 = arith.mulf %37, %37 : vector<4x2048xf32>
    %cst_18 = arith.constant dense<0.000000e+00> : vector<2048xf32>
    %39 = vector.multi_reduction <add>, %38, %cst_18 [0] : vector<4x2048xf32> to vector<2048xf32>
    %40 = vector.shape_cast %39 : vector<2048xf32> to vector<1x2048xf32>
    %cst_19 = arith.constant 4.000000e+00 : f32
    %41 = vector.broadcast %cst_19 : f32 to vector<1x2048xf32>
    %42 = arith.divf %40, %41 : vector<1x2048xf32>
    %43 = vector.broadcast %35 : vector<1x2048xf32> to vector<4x2048xf32>
    %44 = arith.subf %31, %43 : vector<4x2048xf32>
    %cst_20 = arith.constant 9.99999974E-6 : f32
    %45 = vector.broadcast %cst_20 : f32 to vector<1x2048xf32>
    %46 = arith.addf %42, %45 : vector<1x2048xf32>
    %47 = math.rsqrt %46 : vector<1x2048xf32>
    %48 = vector.broadcast %47 : vector<1x2048xf32> to vector<4x2048xf32>
    %49 = arith.mulf %44, %48 : vector<4x2048xf32>
    %cst_21 = arith.constant 0.000000e+00 : f32
    %50 = vector.broadcast %cst_21 : f32 to vector<4x2048xf32>
    %51 = arith.maximumf %49, %50 : vector<4x2048xf32>
    %52 = arith.truncf %51 : vector<4x2048xf32> to vector<4x2048xbf16>
    %c0_22 = arith.constant 0 : index
    %c0_23 = arith.constant 0 : index
    %53 = vector.load %arg5[%c0_22, %c0_23] : memref<4x2048xbf16, #tpu.memory_space<vmem>>, vector<4x2048xbf16>
    tpu.vector_store %arg5[%c0_22, %c0_23], %52 {strides = array<i32>} : memref<4x2048xbf16, #tpu.memory_space<vmem>>, vector<4x2048xbf16>,
    return
  }
}

module attributes {stable_mosaic.version = 11 : i64} {
  func.func @_deconv_bn_relu_kernel(%arg0: memref<64x2048xbf16, #tpu.memory_space<vmem>>, %arg1: memref<2048x256xbf16, #tpu.memory_space<vmem>>, %arg2: memref<64x1xf32, #tpu.memory_space<vmem>>, %arg3: memref<64x256xbf16, #tpu.memory_space<vmem>>) attributes {dimension_semantics = [], scalar_prefetch = 0 : i64, scratch_operands = 0 : i64, tpu.core_type = #tpu.core_type<tc>} {
    %c0 = arith.constant 0 : index
    %c0_0 = arith.constant 0 : index
    %0 = vector.load %arg0[%c0, %c0_0] : memref<64x2048xbf16, #tpu.memory_space<vmem>>, vector<64x2048xbf16>
    %c0_1 = arith.constant 0 : index
    %c0_2 = arith.constant 0 : index
    %1 = vector.load %arg1[%c0_1, %c0_2] : memref<2048x256xbf16, #tpu.memory_space<vmem>>, vector<2048x256xbf16>
    %cst = arith.constant dense<0.000000e+00> : vector<64x256xf32>
    %2 = tpu.matmul %0, %1, %cst {dimension_numbers = #tpu.dot_dimension_numbers<[1], [0], [0], [1], [0, 0, 1, 1], [], []>} : vector<64x2048xbf16>, vector<2048x256xbf16>, vector<64x256xf32> -> vector<64x256xf32>
    %c0_3 = arith.constant 0 : index
    %c0_4 = arith.constant 0 : index
    %3 = vector.load %arg2[%c0_3, %c0_4] : memref<64x1xf32, #tpu.memory_space<vmem>>, vector<64x1xf32>
    %4 = vector.broadcast %3 : vector<64x1xf32> to vector<64x256xf32>
    %5 = arith.addf %2, %4 : vector<64x256xf32>
    %cst_5 = arith.constant dense<0.000000e+00> : vector<64xf32>
    %6 = vector.multi_reduction <add>, %5, %cst_5 [1] : vector<64x256xf32> to vector<64xf32>
    %7 = vector.shape_cast %6 : vector<64xf32> to vector<64x1xf32>
    %cst_6 = arith.constant 2.560000e+02 : f32
    %8 = vector.broadcast %cst_6 : f32 to vector<64x1xf32>
    %9 = arith.divf %7, %8 : vector<64x1xf32>
    %10 = vector.broadcast %9 : vector<64x1xf32> to vector<64x256xf32>
    %11 = arith.subf %5, %10 : vector<64x256xf32>
    %12 = arith.mulf %11, %11 : vector<64x256xf32>
    %cst_7 = arith.constant dense<0.000000e+00> : vector<64xf32>
    %13 = vector.multi_reduction <add>, %12, %cst_7 [1] : vector<64x256xf32> to vector<64xf32>
    %14 = vector.shape_cast %13 : vector<64xf32> to vector<64x1xf32>
    %cst_8 = arith.constant 2.560000e+02 : f32
    %15 = vector.broadcast %cst_8 : f32 to vector<64x1xf32>
    %16 = arith.divf %14, %15 : vector<64x1xf32>
    %17 = vector.broadcast %9 : vector<64x1xf32> to vector<64x256xf32>
    %18 = arith.subf %5, %17 : vector<64x256xf32>
    %cst_9 = arith.constant 9.99999974E-6 : f32
    %19 = vector.broadcast %cst_9 : f32 to vector<64x1xf32>
    %20 = arith.addf %16, %19 : vector<64x1xf32>
    %21 = math.rsqrt %20 : vector<64x1xf32>
    %22 = vector.broadcast %21 : vector<64x1xf32> to vector<64x256xf32>
    %23 = arith.mulf %18, %22 : vector<64x256xf32>
    %cst_10 = arith.constant 0.000000e+00 : f32
    %24 = vector.broadcast %cst_10 : f32 to vector<64x256xf32>
    %25 = arith.maximumf %23, %24 : vector<64x256xf32>
    %26 = arith.truncf %25 : vector<64x256xf32> to vector<64x256xbf16>
    %c0_11 = arith.constant 0 : index
    %c0_12 = arith.constant 0 : index
    %27 = vector.load %arg3[%c0_11, %c0_12] : memref<64x256xbf16, #tpu.memory_space<vmem>>, vector<64x256xbf16>
    tpu.vector_store %arg3[%c0_11, %c0_12], %26 {strides = array<i32>} : memref<64x256xbf16, #tpu.memory_space<vmem>>, vector<64x256xbf16>,
    return
  }
}

module attributes {stable_mosaic.version = 11 : i64} {
  func.func @_deconv_tanh_kernel(%arg0: i32, %arg1: memref<1x1024xbf16, #tpu.memory_space<vmem>>, %arg2: memref<1024x512xbf16, #tpu.memory_space<vmem>>, %arg3: memref<1x1xf32, #tpu.memory_space<vmem>>, %arg4: memref<1x512xf32, #tpu.memory_space<vmem>>) attributes {dimension_semantics = [#tpu.dimension_semantics<parallel>], iteration_bounds = array<i64: 2>, scalar_prefetch = 0 : i64, scratch_operands = 0 : i64, tpu.core_type = #tpu.core_type<tc>, window_params = [{pipeline_mode = #tpu.pipeline_mode<synchronous>, transform_indices = @transform_0, window_bounds = array<i64: 1, 1024>}, {transform_indices = @transform_1, window_bounds = array<i64: 1024, 512>}, {pipeline_mode = #tpu.pipeline_mode<synchronous>, transform_indices = @transform_2, window_bounds = array<i64: 1, 1>}, {transform_indices = @transform_3, window_bounds = array<i64: 1, 512>}]} {
    %c0 = arith.constant 0 : index
    %c0_0 = arith.constant 0 : index
    %0 = vector.load %arg1[%c0, %c0_0] : memref<1x1024xbf16, #tpu.memory_space<vmem>>, vector<1x1024xbf16>
    %c0_1 = arith.constant 0 : index
    %c0_2 = arith.constant 0 : index
    %1 = vector.load %arg2[%c0_1, %c0_2] : memref<1024x512xbf16, #tpu.memory_space<vmem>>, vector<1024x512xbf16>
    %cst = arith.constant dense<0.000000e+00> : vector<1x512xf32>
    %2 = tpu.matmul %0, %1, %cst {dimension_numbers = #tpu.dot_dimension_numbers<[1], [0], [0], [1], [0, 0, 1, 1], [], []>} : vector<1x1024xbf16>, vector<1024x512xbf16>, vector<1x512xf32> -> vector<1x512xf32>
    %c0_3 = arith.constant 0 : index
    %c0_4 = arith.constant 0 : index
    %3 = vector.load %arg3[%c0_3, %c0_4] : memref<1x1xf32, #tpu.memory_space<vmem>>, vector<1x1xf32>
    %4 = vector.broadcast %3 : vector<1x1xf32> to vector<1x512xf32>
    %5 = arith.addf %2, %4 : vector<1x512xf32>
    %6 = math.tanh %5 : vector<1x512xf32>
    %c0_5 = arith.constant 0 : index
    %c0_6 = arith.constant 0 : index
    %7 = vector.load %arg4[%c0_5, %c0_6] : memref<1x512xf32, #tpu.memory_space<vmem>>, vector<1x512xf32>
    tpu.vector_store %arg4[%c0_5, %c0_6], %6 {strides = array<i32>} : memref<1x512xf32, #tpu.memory_space<vmem>>, vector<1x512xf32>,
    return
  }
  func.func @transform_0(%arg0: i32) -> (i32, i32) {
    %c0_i32 = arith.constant 0 : i32
    %c0_i32_0 = arith.constant 0 : i32
    %c0_i32_1 = arith.constant 0 : i32
    return %c0_i32, %c0_i32_0 : i32, i32
  }
  func.func @transform_1(%arg0: i32) -> (i32, i32) {
    %c0_i32 = arith.constant 0 : i32
    %c0_i32_0 = arith.constant 0 : i32
    return %c0_i32, %arg0 : i32, i32
  }
  func.func @transform_2(%arg0: i32) -> (i32, i32) {
    %c0_i32 = arith.constant 0 : i32
    %c0_i32_0 = arith.constant 0 : i32
    %c0_i32_1 = arith.constant 0 : i32
    return %c0_i32, %c0_i32_0 : i32, i32
  }
  func.func @transform_3(%arg0: i32) -> (i32, i32) {
    %c0_i32 = arith.constant 0 : i32
    %c0_i32_0 = arith.constant 0 : i32
    return %c0_i32, %arg0 : i32, i32
  }
}

</mosaic_0001>

<bundles_post_ra>
// kernel: generator_forward.3
= control target key start
LH: loop header
LB: loop body
LE: loop exit
PB: predicated region body
PF: predicated region fallthrough
CT: control target
= control target key end

     0   :  { %v10026_v3 = vmov 0   ;;  %vm380_vm0 = vcmask 1041408   ;;  %vm376_vm1 = vcmask 818176   ;;  %vm569_vm2 = vcmask 1043456   ;;  %s13739_s1 = inlined_call_operand.vmem [shape: bf16[100,1024], index: 1, kind: input, shape index: {}]   ;;  %s13740_s0 = inlined_call_operand.vmem [shape: bf16[4,100], index: 0, kind: input, shape index: {}]   ;;  %s13741_s3 = inlined_call_operand.vmem [shape: bf16[1024,2048], index: 3, kind: input, shape index: {}]   ;;  %s13742_s2 = inlined_call_operand.vmem [shape: f32[1,1024], index: 2, kind: input, shape index: {}]   ;;  %s13743_s4 = inlined_call_operand.vmem [shape: f32[1,2048], index: 4, kind: input, shape index: {}]   ;;  %s13744_s5 = inlined_call_operand.vmem [shape: bf16[4,2048], index: 5, kind: output, shape index: {}]  }
   0x1   :  { %v22_v0 = vld [vmem:[%s13739_s1] sm:$0xff]  ;;  %437 = vmatprep.mubr.bf16.mxu0 %v10026_v3  ;;  %478 = vmatprep.mubr.bf16.mxu1 %v10026_v3  ;;  %v23_v10 = vld [vmem:[%s13739_s1 + $0x8] sm:$0xff]  ;;  %v24_v52 = vld [vmem:[%s13739_s1 + $0x10] sm:$0xff] }
   0x2   :  { %v26_v1 = vld [vmem:[%s13739_s1 + $0x20] sm:$0xff]  ;;  %v27_v11 = vld [vmem:[%s13739_s1 + $0x28] sm:$0xff]  ;;  %v28_v53 = vld [vmem:[%s13739_s1 + $0x30] sm:$0xff] }
   0x3   :  { %v30_v2 = vld [vmem:[%s13739_s1 + $0x40] sm:$0xff]  ;;  %v8760_v4 = vcombine.high %v22_v0, %v26_v1  ;;  %v8759_v5 = vcombine.low %v22_v0, %v26_v1  ;;  %v8762_v13 = vcombine.high %v23_v10, %v27_v11  ;;  %v8761_v14 = vcombine.low %v23_v10, %v27_v11  ;;  %v31_v15 = vld [vmem:[%s13739_s1 + $0x48] sm:$0xff]  ;;  %v32_v59 = vld [vmem:[%s13739_s1 + $0x50] sm:$0xff] }
   0x4   :  { %v34_v6 = vld [vmem:[%s13739_s1 + $0x60] sm:$0xff]  ;;  %v35_v17 = vld [vmem:[%s13739_s1 + $0x68] sm:$0xff]  ;;  %v8764_v58 = vcombine.high %v24_v52, %v28_v53  ;;  %v36_v60 = vld [vmem:[%s13739_s1 + $0x70] sm:$0xff]  ;;  %v8763_v1 = vcombine.low %v24_v52, %v28_v53 }
   0x5   :  { %v8768_v7 = vcombine.high %v30_v2, %v34_v6  ;;  %v38_v8 = vld [vmem:[%s13739_s1 + $0x80] sm:$0xff]  ;;  %405 = vmatprep.subr.bf16.mxu0 %v8760_v4  ;;  %v8767_v12 = vcombine.low %v30_v2, %v34_v6  ;;  %v39_v18 = vld [vmem:[%s13739_s1 + $0x88] sm:$0xff]  ;;  %446 = vmatprep.subr.bf16.mxu1 %v8762_v13  ;;  %v8770_v21 = vcombine.high %v31_v15, %v35_v17  ;;  %v25_v61 = vld [vmem:[%s13739_s1 + $0x18] sm:$0xff] }
   0x6   :  { %v42_v9 = vld [vmem:[%s13739_s1 + $0xa0] sm:$0xff]  ;;  %406 = vmatpush1.bf16.msra.mxu0 %v8759_v5  ;;  %v43_v22 = vld [vmem:[%s13739_s1 + $0xa8] sm:$0xff]  ;;  %447 = vmatpush1.bf16.msra.mxu1 %v8761_v14  ;;  %v8769_v23 = vcombine.low %v31_v15, %v35_v17  ;;  %v29_v62 = vld [vmem:[%s13739_s1 + $0x38] sm:$0xff]  ;;  %v8772_v2 = vcombine.high %v32_v59, %v36_v60  ;;  %v8771_v10 = vcombine.low %v32_v59, %v36_v60 }
   0x7   :  { %407 = vmatprep.subr.bf16.mxu0 %v8768_v7  ;;  %v8776_v16 = vcombine.high %v38_v8, %v42_v9  ;;  %v46_v19 = vld [vmem:[%s13739_s1 + $0xc0] sm:$0xff]  ;;  %v8775_v24 = vcombine.low %v38_v8, %v42_v9  ;;  %448 = vmatprep.subr.bf16.mxu1 %v8770_v21  ;;  %v8778_v25 = vcombine.high %v39_v18, %v43_v22  ;;  %v47_v27 = vld [vmem:[%s13739_s1 + $0xc8] sm:$0xff]  ;;  %v33_v5 = vld [vmem:[%s13739_s1 + $0x58] sm:$0xff] }
   0x8   :  { %v50_v20 = vld [vmem:[%s13739_s1 + $0xe0] sm:$0xff]  ;;  %v51_v28 = vld [vmem:[%s13739_s1 + $0xe8] sm:$0xff]  ;;  %v8777_v31 = vcombine.low %v39_v18, %v43_v22  ;;  %v8766_v4 = vcombine.high %v25_v61, %v29_v62  ;;  %v37_v6 = vld [vmem:[%s13739_s1 + $0x78] sm:$0xff]  ;;  %v8765_v9 = vcombine.low %v25_v61, %v29_v62 }
   0x9   :  { %v8784_v26 = vcombine.high %v46_v19, %v50_v20  ;;  %v54_v29 = vld [vmem:[%s13739_s1 + $0x100] sm:$0xff]  ;;  %v8783_v32 = vcombine.low %v46_v19, %v50_v20  ;;  %v8786_v33 = vcombine.high %v47_v27, %v51_v28  ;;  %v55_v35 = vld [vmem:[%s13739_s1 + $0x108] sm:$0xff]  ;;  %v8785_v39 = vcombine.low %v47_v27, %v51_v28  ;;  %v40_v7 = vld [vmem:[%s13739_s1 + $0x90] sm:$0xff] }
   0xa   :  { %408 = vmatpush1.bf16.msra.mxu0 %v8767_v12  ;;  %v58_v30 = vld [vmem:[%s13739_s1 + $0x120] sm:$0xff]  ;;  %449 = vmatpush1.bf16.msra.mxu1 %v8769_v23  ;;  %v59_v36 = vld [vmem:[%s13739_s1 + $0x128] sm:$0xff]  ;;  %v44_v8 = vld [vmem:[%s13739_s1 + $0xb0] sm:$0xff]  ;;  %v8774_v11 = vcombine.high %v33_v5, %v37_v6  ;;  %v8773_v17 = vcombine.low %v33_v5, %v37_v6 }
   0xb   :  { %409 = vmatprep.subr.bf16.mxu0 %v8776_v16  ;;  %450 = vmatprep.subr.bf16.mxu1 %v8778_v25  ;;  %v8792_v34 = vcombine.high %v54_v29, %v58_v30  ;;  %v62_v37 = vld [vmem:[%s13739_s1 + $0x140] sm:$0xff]  ;;  %v8791_v40 = vcombine.low %v54_v29, %v58_v30  ;;  %v8794_v41 = vcombine.high %v55_v35, %v59_v36  ;;  %v63_v43 = vld [vmem:[%s13739_s1 + $0x148] sm:$0xff]  ;;  %v41_v13 = vld [vmem:[%s13739_s1 + $0x98] sm:$0xff] }
   0xc   :  { %v66_v38 = vld [vmem:[%s13739_s1 + $0x160] sm:$0xff]  ;;  %v67_v44 = vld [vmem:[%s13739_s1 + $0x168] sm:$0xff]  ;;  %v8793_v46 = vcombine.low %v55_v35, %v59_v36  ;;  %v8780_v12 = vcombine.high %v40_v7, %v44_v8  ;;  %v45_v14 = vld [vmem:[%s13739_s1 + $0xb8] sm:$0xff]  ;;  %v8779_v18 = vcombine.low %v40_v7, %v44_v8 }
   0xd   :  { %v8800_v42 = vcombine.high %v62_v37, %v66_v38  ;;  %v70_v45 = vld [vmem:[%s13739_s1 + $0x180] sm:$0x33]  ;;  %v8799_v47 = vcombine.low %v62_v37, %v66_v38  ;;  %v8802_v48 = vcombine.high %v63_v43, %v67_v44  ;;  %v71_v51 = vld [vmem:[%s13739_s1 + $0x188] sm:$0x33]  ;;  %v8801_v54 = vcombine.low %v63_v43, %v67_v44  ;;  %v48_v15 = vld [vmem:[%s13739_s1 + $0xd0] sm:$0xff] }
   0xe   :  { %410 = vmatpush1.bf16.msra.mxu0 %v8775_v24  ;;  %451 = vmatpush1.bf16.msra.mxu1 %v8777_v31  ;;  %v8808_v49 = vcombine.high %v70_v45, %v70_v45  ;;  %v8807_v50 = vcombine.low %v70_v45, %v70_v45  ;;  %v8810_v55 = vcombine.high %v71_v51, %v71_v51  ;;  %v10161_v63 = vld [vmem:[%s13740_s0] sm:$0x3]  ;;  %v52_v16 = vld [vmem:[%s13739_s1 + $0xf0] sm:$0xff]  ;;  %v49_v21 = vld [vmem:[%s13739_s1 + $0xd8] sm:$0xff] }
   0xf   :  { %411 = vmatprep.subr.bf16.mxu0 %v8784_v26  ;;  %452 = vmatprep.subr.bf16.mxu1 %v8786_v33  ;;  %v8809_v56 = vcombine.low %v71_v51, %v71_v51  ;;  %v8782_v19 = vcombine.high %v41_v13, %v45_v14  ;;  %v8788_v20 = vcombine.high %v48_v15, %v52_v16  ;;  %v53_v22 = vld [vmem:[%s13739_s1 + $0xf8] sm:$0xff]  ;;  %v56_v23 = vld [vmem:[%s13739_s1 + $0x110] sm:$0xff]  ;;  %v755_v45 = vld [vmem:[%s13741_s3] sm:$0xff] }
  0x10   :  { %v382_v57 = vsel %vm380_vm0, %v8807_v50, 0  ;;  %v8781_v24 = vcombine.low %v41_v13, %v45_v14  ;;  %v8787_v25 = vcombine.low %v48_v15, %v52_v16  ;;  %v8790_v26 = vcombine.high %v49_v21, %v53_v22  ;;  %v57_v28 = vld [vmem:[%s13739_s1 + $0x118] sm:$0xff]  ;;  %v64_v30 = vld [vmem:[%s13739_s1 + $0x150] sm:$0xff]  ;;  %v756_v52 = vld [vmem:[%s13741_s3 + $0x8] sm:$0xff] }
  0x11   :  { %v388_v0 = vsel %vm380_vm0, %v8809_v56, 0  ;;  %v61_v29 = vld [vmem:[%s13739_s1 + $0x138] sm:$0xff]  ;;  %v68_v31 = vld [vmem:[%s13739_s1 + $0x170] sm:$0xff]  ;;  %v764_v53 = vld [vmem:[%s13741_s3 + $0x48] sm:$0xff] }
  0x12   :  { %412 = vmatpush1.bf16.msra.mxu0 %v8783_v32  ;;  %453 = vmatpush1.bf16.msra.mxu1 %v8785_v39  ;;  %v8789_v32 = vcombine.low %v49_v21, %v53_v22  ;;  %v8804_v35 = vcombine.high %v64_v30, %v68_v31  ;;  %v65_v36 = vld [vmem:[%s13739_s1 + $0x158] sm:$0xff]  ;;  %v72_v38 = vld [vmem:[%s13739_s1 + $0x190] sm:$0x33]  ;;  %v8797_v39 = vcombine.low %v57_v28, %v61_v29  ;;  %v772_v60 = vld [vmem:[%s13741_s3 + $0x88] sm:$0xff] }
  0x13   :  { %413 = vmatprep.subr.bf16.mxu0 %v8792_v34  ;;  %454 = vmatprep.subr.bf16.mxu1 %v8794_v41  ;;  %v8798_v34 = vcombine.high %v57_v28, %v61_v29  ;;  %v69_v37 = vld [vmem:[%s13739_s1 + $0x178] sm:$0xff]  ;;  %v8811_v43 = vcombine.low %v72_v38, %v72_v38  ;;  %v780_v61 = vld [vmem:[%s13741_s3 + $0xc8] sm:$0xff]  ;;  %v8825_v62 = vcombine.low %v756_v52, %v764_v53  ;;  %v795_v5 = vld [vmem:[%s13741_s3 + $0x140] sm:$0xff] }
  0x14   :  { %v8806_v41 = vcombine.high %v65_v36, %v69_v37  ;;  %v73_v44 = vld [vmem:[%s13739_s1 + $0x198] sm:$0x33]  ;;  %v788_v6 = vld [vmem:[%s13741_s3 + $0x108] sm:$0xff] }
  0x15   :  { %v394_v50 = vsel %vm380_vm0, %v8811_v43, 0  ;;  %v804_v13 = vld [vmem:[%s13741_s3 + $0x188] sm:$0xff]  ;;  %v875_v43 = vld [vmem:[%s13741_s3 + $0x3c0] sm:$0xff] }
  0x16   :  { %414 = vmatpush1.bf16.msra.mxu0 %v8791_v40  ;;  %455 = vmatpush1.bf16.msra.mxu1 %v8793_v46  ;;  %v8803_v40 = vcombine.low %v64_v30, %v68_v31  ;;  %v763_v46 = vld [vmem:[%s13741_s3 + $0x40] sm:$0xff]  ;;  %v812_v15 = vld [vmem:[%s13741_s3 + $0x1c8] sm:$0xff] }
  0x17   :  { %415 = vmatprep.subr.bf16.mxu0 %v8800_v42  ;;  %456 = vmatprep.subr.bf16.mxu1 %v8802_v48  ;;  %v8812_v42 = vcombine.high %v72_v38, %v72_v38  ;;  %v8814_v48 = vcombine.high %v73_v44, %v73_v44  ;;  %v8824_v51 = vcombine.high %v755_v45, %v763_v46  ;;  %v820_v21 = vld [vmem:[%s13741_s3 + $0x208] sm:$0xff] }
  0x18   :  { %v836_v28 = vld [vmem:[%s13741_s3 + $0x288] sm:$0xff] }
  0x19   :  { %v844_v30 = vld [vmem:[%s13741_s3 + $0x2c8] sm:$0xff] }
  0x1a   :  { %416 = vmatpush1.bf16.msra.mxu0 %v8799_v47  ;;  %457 = vmatpush1.bf16.msra.mxu1 %v8801_v54  ;;  %v8805_v47 = vcombine.low %v65_v36, %v69_v37  ;;  %v771_v54 = vld [vmem:[%s13741_s3 + $0x80] sm:$0xff]  ;;  %v852_v36 = vld [vmem:[%s13741_s3 + $0x308] sm:$0xff] }
  0x1b   :  { %8815 = vmatprep.subr.msk.bf16.mxu0 %vm380_vm0, %v8808_v49  ;;  %8817 = vmatprep.subr.msk.bf16.mxu1 %vm380_vm0, %v8810_v55  ;;  %v8813_v49 = vcombine.low %v73_v44, %v73_v44  ;;  %v779_v55 = vld [vmem:[%s13741_s3 + $0xc0] sm:$0xff]  ;;  %v860_v38 = vld [vmem:[%s13741_s3 + $0x348] sm:$0xff] }
  0x1c   :  { %v8840_v59 = vcombine.high %v771_v54, %v779_v55  ;;  %v868_v44 = vld [vmem:[%s13741_s3 + $0x388] sm:$0xff] }
  0x1d   :  { %v400_v56 = vsel %vm380_vm0, %v8813_v49, 0 }
  0x1e   :  { %418 = vmatpush1.bf16.msra.mxu0 %v382_v57  ;;  %459 = vmatpush1.bf16.msra.mxu1 %v388_v0  ;;  %v8823_v57 = vcombine.low %v755_v45, %v763_v46  ;;  %v8839_v0 = vcombine.low %v771_v54, %v779_v55  ;;  %v876_v46 = vld [vmem:[%s13741_s3 + $0x3c8] sm:$0xff] }
  0x1f   :  { %487 = vmatprep.subr.bf16.mxu0 %v8764_v58  ;;  %528 = vmatprep.subr.bf16.mxu1 %v8766_v4  ;;  %v8826_v58 = vcombine.high %v756_v52, %v764_v53  ;;  %v787_v4 = vld [vmem:[%s13741_s3 + $0x100] sm:$0xff]  ;;  %v8938_v49 = vcombine.high %v868_v44, %v876_v46  ;;  %v884_v52 = vld [vmem:[%s13741_s3 + $0x408] sm:$0xff] }
  0x20   :  { %v8856_v7 = vcombine.high %v787_v4, %v795_v5  ;;  %v8855_v8 = vcombine.low %v787_v4, %v795_v5  ;;  %v892_v54 = vld [vmem:[%s13741_s3 + $0x448] sm:$0xff]  ;;  %v915_v4 = vld [vmem:[%s13741_s3 + $0x500] sm:$0xff] }
  0x21   :  { %8816 = vmatmul.mubr.msk.bf16.vlgmr.msra.gmra.mrb[0].mxu0 %vm376_vm1, %v10161_v63  ;;  %8818 = vmatmul.mubr.msk.bf16.vlgmr.msra.gmra.mrb[0].mxu1 %vm376_vm1, %v10161_v63  ;;  %v923_v5 = vld [vmem:[%s13741_s3 + $0x540] sm:$0xff] }
  0x22   :  { %488 = vmatpush1.bf16.msra.mxu0 %v8763_v1  ;;  %519 = vmatprep.mubr.bf16.mxu0 %v10026_v3  ;;  %v8842_v1 = vcombine.high %v772_v60, %v780_v61 }
  0x23   :  { %489 = vmatprep.subr.bf16.mxu0 %v8772_v2  ;;  %529 = vmatpush1.bf16.msra.mxu1 %v8765_v9  ;;  %v8841_v2 = vcombine.low %v772_v60, %v780_v61  ;;  %v900_v60 = vld [vmem:[%s13741_s3 + $0x488] sm:$0xff] }
  0x24   :  { %560 = vmatprep.mubr.bf16.mxu1 %v10026_v3  ;;  %530 = vmatprep.subr.bf16.mxu1 %v8774_v11  ;;  %v60_v3 = vld [vmem:[%s13739_s1 + $0x130] sm:$0xff]  ;;  %v803_v11 = vld [vmem:[%s13741_s3 + $0x180] sm:$0xff] }
  0x25   :  { %v8796_v27 = vcombine.high %v56_v23, %v60_v3  ;;  %v8795_v33 = vcombine.low %v56_v23, %v60_v3  ;;  %v828_v23 = vld [vmem:[%s13741_s3 + $0x248] sm:$0xff] }
  0x26   :  { %490 = vmatpush1.bf16.msra.mxu0 %v8771_v10 }
  0x27   :  { %491 = vmatprep.subr.bf16.mxu0 %v8780_v12  ;;  %531 = vmatpush1.bf16.msra.mxu1 %v8773_v17  ;;  %v811_v12 = vld [vmem:[%s13741_s3 + $0x1c0] sm:$0xff]  ;;  %v8873_v17 = vcombine.low %v804_v13, %v812_v15 }
  0x28   :  { %532 = vmatprep.subr.bf16.mxu1 %v8782_v19  ;;  %v8872_v14 = vcombine.high %v803_v11, %v811_v12  ;;  %v8871_v16 = vcombine.low %v803_v11, %v811_v12  ;;  %v819_v19 = vld [vmem:[%s13741_s3 + $0x200] sm:$0xff] }
  0x29   :  { %v931_v11 = vld [vmem:[%s13741_s3 + $0x580] sm:$0xff] }
  0x2a   :  { %492 = vmatpush1.bf16.msra.mxu0 %v8779_v18  ;;  %v8874_v18 = vcombine.high %v804_v13, %v812_v15  ;;  %v939_v12 = vld [vmem:[%s13741_s3 + $0x5c0] sm:$0xff]  ;;  %v932_v13 = vld [vmem:[%s13741_s3 + $0x588] sm:$0xff] }
  0x2b   :  { %493 = vmatprep.subr.bf16.mxu0 %v8788_v20  ;;  %533 = vmatpush1.bf16.msra.mxu1 %v8781_v24  ;;  %v827_v20 = vld [vmem:[%s13741_s3 + $0x240] sm:$0xff]  ;;  %v8889_v24 = vcombine.low %v820_v21, %v828_v23  ;;  %v940_v15 = vld [vmem:[%s13741_s3 + $0x5c8] sm:$0xff] }
  0x2c   :  { %534 = vmatprep.subr.bf16.mxu1 %v8790_v26  ;;  %v8888_v22 = vcombine.high %v819_v19, %v827_v20  ;;  %v8887_v3 = vcombine.low %v819_v19, %v827_v20  ;;  %v835_v26 = vld [vmem:[%s13741_s3 + $0x280] sm:$0xff] }
  0x2d   :  { %v947_v19 = vld [vmem:[%s13741_s3 + $0x600] sm:$0xff] }
  0x2e   :  { %494 = vmatpush1.bf16.msra.mxu0 %v8787_v25  ;;  %v8890_v25 = vcombine.high %v820_v21, %v828_v23  ;;  %v955_v20 = vld [vmem:[%s13741_s3 + $0x640] sm:$0xff]  ;;  %v948_v21 = vld [vmem:[%s13741_s3 + $0x608] sm:$0xff] }
  0x2f   :  { %495 = vmatprep.subr.bf16.mxu0 %v8796_v27  ;;  %535 = vmatpush1.bf16.msra.mxu1 %v8789_v32  ;;  %v843_v27 = vld [vmem:[%s13741_s3 + $0x2c0] sm:$0xff]  ;;  %v8905_v32 = vcombine.low %v836_v28, %v844_v30  ;;  %v956_v23 = vld [vmem:[%s13741_s3 + $0x648] sm:$0xff] }
  0x30   :  { %536 = vmatprep.subr.bf16.mxu1 %v8798_v34  ;;  %v8904_v29 = vcombine.high %v835_v26, %v843_v27  ;;  %v8903_v31 = vcombine.low %v835_v26, %v843_v27  ;;  %v851_v34 = vld [vmem:[%s13741_s3 + $0x300] sm:$0xff] }
  0x31   :  { %v963_v26 = vld [vmem:[%s13741_s3 + $0x680] sm:$0xff] }
  0x32   :  { %496 = vmatpush1.bf16.msra.mxu0 %v8795_v33  ;;  %v8906_v33 = vcombine.high %v836_v28, %v844_v30  ;;  %v971_v27 = vld [vmem:[%s13741_s3 + $0x6c0] sm:$0xff]  ;;  %v964_v28 = vld [vmem:[%s13741_s3 + $0x688] sm:$0xff] }
  0x33   :  { %497 = vmatprep.subr.bf16.mxu0 %v8804_v35  ;;  %537 = vmatpush1.bf16.msra.mxu1 %v8797_v39  ;;  %v859_v35 = vld [vmem:[%s13741_s3 + $0x340] sm:$0xff]  ;;  %v972_v30 = vld [vmem:[%s13741_s3 + $0x6c8] sm:$0xff] }
  0x34   :  { %538 = vmatprep.subr.bf16.mxu1 %v8806_v41  ;;  %v8920_v37 = vcombine.high %v851_v34, %v859_v35  ;;  %v8919_v39 = vcombine.low %v851_v34, %v859_v35  ;;  %v8922_v41 = vcombine.high %v852_v36, %v860_v38  ;;  %v979_v34 = vld [vmem:[%s13741_s3 + $0x700] sm:$0xff] }
  0x35   :  { %v987_v35 = vld [vmem:[%s13741_s3 + $0x740] sm:$0xff] }
  0x36   :  { %498 = vmatpush1.bf16.msra.mxu0 %v8803_v40  ;;  %v8921_v40 = vcombine.low %v852_v36, %v860_v38  ;;  %v980_v36 = vld [vmem:[%s13741_s3 + $0x708] sm:$0xff] }
  0x37   :  { %8819 = vmatprep.subr.msk.bf16.mxu0 %vm380_vm0, %v8812_v42  ;;  %539 = vmatpush1.bf16.msra.mxu1 %v8805_v47  ;;  %v867_v42 = vld [vmem:[%s13741_s3 + $0x380] sm:$0xff]  ;;  %v988_v38 = vld [vmem:[%s13741_s3 + $0x748] sm:$0xff] }
  0x38   :  { %8821 = vmatprep.subr.msk.bf16.mxu1 %vm380_vm0, %v8814_v48  ;;  %v8936_v45 = vcombine.high %v867_v42, %v875_v43  ;;  %v8935_v47 = vcombine.low %v867_v42, %v875_v43  ;;  %v8937_v48 = vcombine.low %v868_v44, %v876_v46  ;;  %v995_v42 = vld [vmem:[%s13741_s3 + $0x780] sm:$0xff]  ;;  %v996_v44 = vld [vmem:[%s13741_s3 + $0x788] sm:$0xff] }
  0x39   :  { %v1003_v43 = vld [vmem:[%s13741_s3 + $0x7c0] sm:$0xff]  ;;  %v1004_v46 = vld [vmem:[%s13741_s3 + $0x7c8] sm:$0xff] }
  0x3a   :  { %500 = vmatpush1.bf16.msra.mxu0 %v394_v50  ;;  %v883_v50 = vld [vmem:[%s13741_s3 + $0x400] sm:$0xff] }
  0x3b   :  { %6983 = vmatprep.subr.bf16.mxu0 %v8824_v51  ;;  %541 = vmatpush1.bf16.msra.mxu1 %v400_v56  ;;  %v891_v51 = vld [vmem:[%s13741_s3 + $0x440] sm:$0xff]  ;;  %v8953_v56 = vcombine.low %v884_v52, %v892_v54 }
  0x3c   :  { %7147 = vmatprep.subr.bf16.mxu1 %v8826_v58  ;;  %v8952_v53 = vcombine.high %v883_v50, %v891_v51  ;;  %v8951_v55 = vcombine.low %v883_v50, %v891_v51  ;;  %v899_v58 = vld [vmem:[%s13741_s3 + $0x480] sm:$0xff] }
  0x3d   :  { %8820 = vmatmul.mubr.msk.bf16.vlgmr.msra.gmra.mrb[4].mxu0 %vm376_vm1, %v10161_v63  ;;  %v10434_v50 = vld [vmem:[%s13741_s3 + $0x800] sm:$0xff] }
  0x3e   :  { %6984 = vmatpush1.bf16.msra.mxu0 %v8823_v57  ;;  %8822 = vmatmul.mubr.msk.bf16.vlgmr.msra.gmra.mrb[4].mxu1 %vm376_vm1, %v10161_v63  ;;  %v796_v63 = vld [vmem:[%s13741_s3 + $0x148] sm:$0xff]  ;;  %v8954_v57 = vcombine.high %v884_v52, %v892_v54  ;;  %v10439_v51 = vld [vmem:[%s13741_s3 + $0x840] sm:$0xff] }
  0x3f   :  { %6985 = vmatprep.subr.bf16.mxu0 %v8840_v59  ;;  %7148 = vmatpush1.bf16.msra.mxu1 %v8825_v62  ;;  %v8857_v9 = vcombine.low %v788_v6, %v796_v63  ;;  %v8858_v10 = vcombine.high %v788_v6, %v796_v63  ;;  %v907_v59 = vld [vmem:[%s13741_s3 + $0x4c0] sm:$0xff]  ;;  %v908_v62 = vld [vmem:[%s13741_s3 + $0x4c8] sm:$0xff] }
  0x40   :  { %7149 = vmatprep.subr.bf16.mxu1 %v8842_v1  ;;  %v8968_v61 = vcombine.high %v899_v58, %v907_v59  ;;  %v8969_v1 = vcombine.low %v900_v60, %v908_v62  ;;  %v916_v6 = vld [vmem:[%s13741_s3 + $0x508] sm:$0xff] }
  0x41   :  { %v924_v63 = vld [vmem:[%s13741_s3 + $0x548] sm:$0xff] }
  0x42   :  { %6986 = vmatpush1.bf16.msra.mxu0 %v8839_v0  ;;  %v8967_v0 = vcombine.low %v899_v58, %v907_v59  ;;  %v10444_v52 = vld [vmem:[%s13741_s3 + $0x808] sm:$0xff]  ;;  %v76_v58 = vlaneseq }
  0x43   :  { %7150 = vmatpush1.bf16.msra.mxu1 %v8841_v2  ;;  %6987 = vmatprep.subr.bf16.mxu0 %v8856_v7  ;;  %v8970_v2 = vcombine.high %v900_v60, %v908_v62  ;;  %v8984_v7 = vcombine.high %v915_v4, %v923_v5  ;;  %v10451_v54 = vld [vmem:[%s13741_s3 + $0x848] sm:$0xff] }
  0x44   :  { %7151 = vmatprep.subr.bf16.mxu1 %v8858_v10  ;;  %v8986_v10 = vcombine.high %v916_v6, %v924_v63  ;;  %v10459_v59 = vshrl.u32 %v76_v58, 7 }
  0x46   :  { %6988 = vmatpush1.bf16.msra.mxu0 %v8855_v8  ;;  %v8983_v8 = vcombine.low %v915_v4, %v923_v5  ;;  %v10462_v60 = vsub.s32 0, %v10459_v59  ;;  %v10470_v62 = vsub.s32 1, %v10459_v59 }
  0x47   :  { %7152 = vmatpush1.bf16.msra.mxu1 %v8857_v9  ;;  %6989 = vmatprep.subr.bf16.mxu0 %v8872_v14  ;;  %v8985_v9 = vcombine.low %v916_v6, %v924_v63  ;;  %v9000_v14 = vcombine.high %v931_v11, %v939_v12 }
  0x48   :  { %7153 = vmatprep.subr.bf16.mxu1 %v8874_v18  ;;  %v9002_v18 = vcombine.high %v932_v13, %v940_v15 }
  0x4a   :  { %6990 = vmatpush1.bf16.msra.mxu0 %v8871_v16  ;;  %v8999_v16 = vcombine.low %v931_v11, %v939_v12 }
  0x4b   :  { %7154 = vmatpush1.bf16.msra.mxu1 %v8873_v17  ;;  %6991 = vmatprep.subr.bf16.mxu0 %v8888_v22  ;;  %v9001_v17 = vcombine.low %v932_v13, %v940_v15  ;;  %v9016_v22 = vcombine.high %v947_v19, %v955_v20 }
  0x4c   :  { %7155 = vmatprep.subr.bf16.mxu1 %v8890_v25  ;;  %v9018_v25 = vcombine.high %v948_v21, %v956_v23 }
  0x4e   :  { %6992 = vmatpush1.bf16.msra.mxu0 %v8887_v3  ;;  %v9015_v3 = vcombine.low %v947_v19, %v955_v20 }
  0x4f   :  { %7156 = vmatpush1.bf16.msra.mxu1 %v8889_v24  ;;  %6993 = vmatprep.subr.bf16.mxu0 %v8904_v29  ;;  %v9017_v24 = vcombine.low %v948_v21, %v956_v23  ;;  %v9032_v29 = vcombine.high %v963_v26, %v971_v27 }
  0x50   :  { %7157 = vmatprep.subr.bf16.mxu1 %v8906_v33  ;;  %v9034_v33 = vcombine.high %v964_v28, %v972_v30 }
  0x52   :  { %6994 = vmatpush1.bf16.msra.mxu0 %v8903_v31  ;;  %v9031_v31 = vcombine.low %v963_v26, %v971_v27 }
  0x53   :  { %7158 = vmatpush1.bf16.msra.mxu1 %v8905_v32  ;;  %6995 = vmatprep.subr.bf16.mxu0 %v8920_v37  ;;  %v9033_v32 = vcombine.low %v964_v28, %v972_v30  ;;  %v9048_v37 = vcombine.high %v979_v34, %v987_v35  ;;  %v10485_v30 = vsub.s32 2, %v10459_v59 }
  0x54   :  { %7159 = vmatprep.subr.bf16.mxu1 %v8922_v41  ;;  %v9050_v41 = vcombine.high %v980_v36, %v988_v38 }
  0x56   :  { %6996 = vmatpush1.bf16.msra.mxu0 %v8919_v39  ;;  %v9047_v39 = vcombine.low %v979_v34, %v987_v35 }
  0x57   :  { %7160 = vmatpush1.bf16.msra.mxu1 %v8921_v40  ;;  %6997 = vmatprep.subr.bf16.mxu0 %v8936_v45  ;;  %v9049_v40 = vcombine.low %v980_v36, %v988_v38  ;;  %v9064_v45 = vcombine.high %v995_v42, %v1003_v43 }
  0x58   :  { %7161 = vmatprep.subr.bf16.mxu1 %v8938_v49  ;;  %v9066_v49 = vcombine.high %v996_v44, %v1004_v46 }
  0x5a   :  { %6998 = vmatpush1.bf16.msra.mxu0 %v8935_v47  ;;  %v9063_v47 = vcombine.low %v995_v42, %v1003_v43 }
  0x5b   :  { %7162 = vmatpush1.bf16.msra.mxu1 %v8937_v48  ;;  %6999 = vmatprep.subr.bf16.mxu0 %v8952_v53  ;;  %v9065_v48 = vcombine.low %v996_v44, %v1004_v46  ;;  %v9080_v53 = vcombine.high %v10434_v50, %v10439_v51 }
  0x5c   :  { %7163 = vmatprep.subr.bf16.mxu1 %v8954_v57  ;;  %v9082_v57 = vcombine.high %v10444_v52, %v10451_v54 }
  0x5e   :  { %7000 = vmatpush1.bf16.msra.mxu0 %v8951_v55  ;;  %v9079_v55 = vcombine.low %v10434_v50, %v10439_v51  ;;  %v1067_v50 = vld [vmem:[%s13741_s3 + $0x9c0] sm:$0xff]  ;;  %v1060_v51 = vld [vmem:[%s13741_s3 + $0x988] sm:$0xff] }
  0x5f   :  { %7164 = vmatpush1.bf16.msra.mxu1 %v8953_v56  ;;  %7001 = vmatprep.subr.bf16.mxu0 %v8968_v61  ;;  %v9081_v56 = vcombine.low %v10444_v52, %v10451_v54  ;;  %v10467_v61 = vld [vmem:[%s13742_s2] sm:$0xff]  ;;  %v1068_v52 = vld [vmem:[%s13741_s3 + $0x9c8] sm:$0xff] }
  0x60   :  { %7165 = vmatprep.subr.bf16.mxu1 %v8970_v2  ;;  %v83_v2 = vrot.slane %v10467_v61, %v10470_v62 }
  0x62   :  { %7002 = vmatpush1.bf16.msra.mxu0 %v8967_v0  ;;  %v79_v0 = vrot.slane %v10467_v61, %v10462_v60 }
  0x63   :  { %7166 = vmatpush1.bf16.msra.mxu1 %v8969_v1  ;;  %7003 = vmatprep.subr.bf16.mxu0 %v8984_v7  ;;  %v10475_v1 = vsub.s32 3, %v10459_v59 }
  0x64   :  { %7167 = vmatprep.subr.bf16.mxu1 %v8986_v10 }
  0x65   :  { %v91_v7 = vrot.slane %v10467_v61, %v10475_v1 }
  0x66   :  { %7004 = vmatpush1.bf16.msra.mxu0 %v8983_v8 }
  0x67   :  { %7168 = vmatpush1.bf16.msra.mxu1 %v8985_v9  ;;  %7005 = vmatprep.subr.bf16.mxu0 %v9000_v14 }
  0x68   :  { %7169 = vmatprep.subr.bf16.mxu1 %v9002_v18 }
  0x6a   :  { %7006 = vmatpush1.bf16.msra.mxu0 %v8999_v16 }
  0x6b   :  { %7170 = vmatpush1.bf16.msra.mxu1 %v9001_v17  ;;  %7007 = vmatprep.subr.bf16.mxu0 %v9016_v22 }
  0x6c   :  { %7171 = vmatprep.subr.bf16.mxu1 %v9018_v25 }
  0x6e   :  { %7008 = vmatpush1.bf16.msra.mxu0 %v9015_v3 }
  0x6f   :  { %7172 = vmatpush1.bf16.msra.mxu1 %v9017_v24  ;;  %7009 = vmatprep.subr.bf16.mxu0 %v9032_v29 }
  0x70   :  { %7173 = vmatprep.subr.bf16.mxu1 %v9034_v33 }
  0x72   :  { %7010 = vmatpush1.bf16.msra.mxu0 %v9031_v31 }
  0x73   :  { %7174 = vmatpush1.bf16.msra.mxu1 %v9033_v32  ;;  %7011 = vmatprep.subr.bf16.mxu0 %v9048_v37  ;;  %v87_v37 = vrot.slane %v10467_v61, %v10485_v30 }
  0x74   :  { %7175 = vmatprep.subr.bf16.mxu1 %v9050_v41 }
  0x76   :  { %7012 = vmatpush1.bf16.msra.mxu0 %v9047_v39 }
  0x77   :  { %7176 = vmatpush1.bf16.msra.mxu1 %v9049_v40  ;;  %7013 = vmatprep.subr.bf16.mxu0 %v9064_v45 }
  0x78   :  { %7177 = vmatprep.subr.bf16.mxu1 %v9066_v49 }
  0x7a   :  { %7014 = vmatpush1.bf16.msra.mxu0 %v9063_v47  ;;  %v10503_v47 = vsub.s32 5, %v10459_v59 }
  0x7b   :  { %7178 = vmatpush1.bf16.msra.mxu1 %v9065_v48  ;;  %7024 = vmatprep.subr.bf16.mxu0 %v9080_v53 }
  0x7c   :  { %7188 = vmatprep.subr.bf16.mxu1 %v9082_v57 }
  0xf4   :  { %v439_v4 = vpop.f32.mrb[0].mxu0  ;;  %v480_v11 = vpop.f32.mrb[0].mxu1 }
  0xf5   :  { %v440_v5 = vadd.f32 %v439_v4, %v79_v0  ;;  %v441_v6 = vpop.f32.mrb[1].mxu0  ;;  %v482_v14 = vpop.f32.mrb[1].mxu1  ;;  %v10497_v44 = vadd.f32 %v480_v11, %v87_v37 }
  0xf6   :  { %v442_v63 = vadd.f32 %v441_v6, %v83_v2  ;;  %v443_v8 = vpop.f32.mrb[2].mxu0  ;;  %v483_v16 = vadd.f32 %v482_v14, %v91_v7  ;;  %v484_v17 = vpop.f32.mrb[2].mxu1 }
  0xf7   :  { %v570_v9 = vsel %vm569_vm2, %v440_v5, 0.0  ;;  %v444_v10 = vpop.f32.mrb[3].mxu0  ;;  %v485_v19 = vpop.f32.mrb[3].mxu1  ;;  %v584_v0 = vsel %vm569_vm2, %v10497_v44, 0.0 }
  0xf8   :  { %v571_v12 = vrot.slane %v570_v9, 4  ;;  %v577_v13 = vsel %vm569_vm2, %v442_v63, 0.0  ;;  %v591_v21 = vsel %vm569_vm2, %v483_v16, 0.0  ;;  %v585_v8 = vrot.slane %v584_v0, 4 }
  0xf9   :  { %v578_v15 = vrot.slane %v577_v13, 4  ;;  %v592_v23 = vrot.slane %v591_v21, 4 }
  0xfa   :  { %v572_v18 = vadd.f32 %v571_v12, %v570_v9 }
  0xfb   :  { %v579_v20 = vadd.f32 %v578_v15, %v577_v13  ;;  %v593_v25 = vadd.f32 %v592_v23, %v591_v21  ;;  %v586_v21 = vadd.f32 %v585_v8, %v584_v0 }
  0xfc   :  { %v573_v22 = vrot.slane %v572_v18, 2 }
  0xfd   :  { %v580_v3 = vrot.slane %v579_v20, 2  ;;  %v594_v28 = vrot.slane %v593_v25, 2 }
  0xfe   :  { %v574_v24 = vadd.f32 %v573_v22, %v572_v18 }
  0xff   :  { %v581_v26 = vadd.f32 %v580_v3, %v579_v20  ;;  %v595_v32 = vadd.f32 %v594_v28, %v593_v25 }
 0x100   :  { %v575_v27 = vrot.slane %v574_v24, 1 }
 0x101   :  { %v582_v29 = vrot.slane %v581_v26, 1  ;;  %v596_v35 = vrot.slane %v595_v32, 1 }
 0x102   :  { %v576_v31 = vadd.f32 %v575_v27, %v574_v24 }
 0x103   :  { %v583_v33 = vadd.f32 %v582_v29, %v581_v26  ;;  %v597_v39 = vadd.f32 %v596_v35, %v595_v32 }
 0x104   :  { %v627_v34 = vmul.f32 0.25, %v576_v31 }
 0x105   :  { %v628_v36 = vmul.f32 0.25, %v583_v33  ;;  %v630_v42 = vmul.f32 0.25, %v597_v39 }
 0x106   :  { %v10489_v38 = vsub.f32 %v440_v5, %v627_v34  ;;  %v99_v5 = vrot.slane %v10467_v61, %v10503_v47  ;;  %v587_v34 = vrot.slane %v586_v21, 2 }
 0x107   :  { %v10491_v40 = vsub.f32 %v442_v63, %v628_v36  ;;  %v10500_v46 = vsub.f32 %v483_v16, %v630_v42 }
 0x108   :  { %v643_v41 = vmul.f32 %v10489_v38, %v10489_v38  ;;  %v588_v42 = vadd.f32 %v587_v34, %v586_v21  ;;  %v1043_v21 = vld [vmem:[%s13741_s3 + $0x900] sm:$0xff] }
 0x109   :  { %v644_v43 = vmul.f32 %v10491_v40, %v10491_v40  ;;  %v646_v57 = vmul.f32 %v10500_v46, %v10500_v46  ;;  %v1075_v34 = vld [vmem:[%s13741_s3 + $0xa00] sm:$0xff] }
 0x10a   :  { %v651_v45 = vsel %vm569_vm2, %v643_v41, 0.0 }
 0x10b   :  { %v652_v48 = vrot.slane %v651_v45, 4  ;;  %v658_v49 = vsel %vm569_vm2, %v644_v43, 0.0  ;;  %v672_v4 = vsel %vm569_vm2, %v646_v57, 0.0 }
 0x10c   :  { %v659_v53 = vrot.slane %v658_v49, 4  ;;  %v673_v7 = vrot.slane %v672_v4, 4 }
 0x10d   :  { %v653_v58 = vadd.f32 %v652_v48, %v651_v45  ;;  %v589_v48 = vrot.slane %v588_v42, 1 }
 0x10e   :  { %v660_v2 = vadd.f32 %v659_v53, %v658_v49  ;;  %v674_v11 = vadd.f32 %v673_v7, %v672_v4  ;;  %v1027_v7 = vld [vmem:[%s13741_s3 + $0x880] sm:$0xff] }
 0x10f   :  { %v654_v6 = vrot.slane %v653_v58, 2  ;;  %v590_v53 = vadd.f32 %v589_v48, %v588_v42 }
 0x110   :  { %v661_v63 = vrot.slane %v660_v2, 2  ;;  %v10513_v9 = vpop.f32.mrb[4].mxu0  ;;  %v675_v17 = vrot.slane %v674_v11, 2 }
 0x111   :  { %v655_v10 = vadd.f32 %v654_v6, %v653_v58  ;;  %v523_v12 = vpop.f32.mrb[5].mxu0  ;;  %v10515_v19 = vpop.f32.mrb[4].mxu1  ;;  %v629_v6 = vmul.f32 0.25, %v590_v53 }
 0x112   :  { %v662_v13 = vadd.f32 %v661_v63, %v660_v2  ;;  %v524_v14 = vadd.f32 %v523_v12, %v99_v5  ;;  %v525_v15 = vpop.f32.mrb[6].mxu0  ;;  %v10518_v23 = vpop.f32.mrb[5].mxu1  ;;  %v676_v24 = vadd.f32 %v675_v17, %v674_v11  ;;  %v1035_v63 = vld [vmem:[%s13741_s3 + $0x8c0] sm:$0xff]  ;;  %v1028_v11 = vld [vmem:[%s13741_s3 + $0x888] sm:$0xff] }
 0x113   :  { %v656_v16 = vrot.slane %v655_v10, 1  ;;  %v526_v18 = vpop.f32.mrb[7].mxu0  ;;  %v566_v26 = vpop.f32.mrb[6].mxu1  ;;  %v9096_v15 = vcombine.high %v1027_v7, %v1035_v63  ;;  %v10540_v17 = vsub.f32 %v10497_v44, %v629_v6  ;;  %v1052_v44 = vld [vmem:[%s13741_s3 + $0x948] sm:$0xff] }
 0x114   :  { %v663_v20 = vrot.slane %v662_v13, 1  ;;  %v605_v22 = vsel %vm569_vm2, %v524_v14, 0.0  ;;  %v567_v28 = vpop.f32.mrb[7].mxu1  ;;  %v677_v31 = vrot.slane %v676_v24, 1 }
 0x115   :  { %v657_v3 = vadd.f32 %v656_v16, %v655_v10  ;;  %v606_v25 = vrot.slane %v605_v22, 4 }
 0x116   :  { %v664_v27 = vadd.f32 %v663_v20, %v662_v13  ;;  %v678_v36 = vadd.f32 %v677_v31, %v676_v24 }
 0x117   :  { %v707_v29 = vmul.f32 0.25, %v657_v3  ;;  %v607_v32 = vadd.f32 %v606_v25, %v605_v22  ;;  %v1044_v22 = vld [vmem:[%s13741_s3 + $0x908] sm:$0xff]  ;;  %v9095_v25 = vcombine.low %v1027_v7, %v1035_v63  ;;  %v1107_v63 = vld [vmem:[%s13741_s3 + $0xb00] sm:$0xff] }
 0x118   :  { %v708_v33 = vmul.f32 0.25, %v664_v27  ;;  %v710_v41 = vmul.f32 0.25, %v678_v36  ;;  %v9114_v28 = vcombine.high %v1044_v22, %v1052_v44  ;;  %v1076_v36 = vld [vmem:[%s13741_s3 + $0xa08] sm:$0xff] }
 0x119   :  { %v715_v35 = vadd.f32 1e-05, %v707_v29  ;;  %v608_v37 = vrot.slane %v607_v32, 2  ;;  %v1059_v29 = vld [vmem:[%s13741_s3 + $0x980] sm:$0xff] }
 0x11a   :  { %v716_v39 = vadd.f32 1e-05, %v708_v33  ;;  %v718_v43 = vadd.f32 1e-05, %v710_v41  ;;  %v9130_v33 = vcombine.high %v1060_v51, %v1068_v52  ;;  %v9127_v42 = vcombine.low %v1059_v29, %v1067_v50 }
 0x11b   :  { %9977 = vrsqrt.f32 %v715_v35  ;;  %v609_v45 = vadd.f32 %v608_v37, %v607_v32  ;;  %v9128_v32 = vcombine.high %v1059_v29, %v1067_v50  ;;  %v1083_v35 = vld [vmem:[%s13741_s3 + $0xa40] sm:$0xff]  ;;  %v1084_v37 = vld [vmem:[%s13741_s3 + $0xa48] sm:$0xff] }
 0x11c   :  { %9979 = vrsqrt.f32 %v716_v39  ;;  %v9146_v48 = vcombine.high %v1076_v36, %v1084_v37 }
 0x11d   :  { %9981 = vrsqrt.f32 %v718_v43  ;;  %v610_v49 = vrot.slane %v609_v45, 1  ;;  %v9129_v43 = vcombine.low %v1060_v51, %v1068_v52 }
 0x11f   :  { %v611_v58 = vadd.f32 %v610_v49, %v609_v45  ;;  %v9144_v45 = vcombine.high %v1075_v34, %v1083_v35  ;;  %v1091_v49 = vld [vmem:[%s13741_s3 + $0xa80] sm:$0xff] }
 0x125   :  { %v9978_v57 = vpop.eup %9977 }
 0x126   :  { %v9980_v0 = vpop.eup %9979  ;;  %v731_v2 = vmul.f32 %v9978_v57, %v10489_v38  ;;  %v1036_v38 = vld [vmem:[%s13741_s3 + $0x8c8] sm:$0xff]  ;;  %v1099_v57 = vld [vmem:[%s13741_s3 + $0xac0] sm:$0xff] }
 0x127   :  { %v732_v4 = vmul.f32 %v9980_v0, %v10491_v40  ;;  %v9982_v8 = vpop.eup %9981  ;;  %v632_v40 = vmul.f32 0.25, %v611_v58  ;;  %v9098_v20 = vcombine.high %v1028_v11, %v1036_v38  ;;  %v9097_v26 = vcombine.low %v1028_v11, %v1036_v38  ;;  %v1092_v58 = vld [vmem:[%s13741_s3 + $0xa88] sm:$0xff] }
 0x128   :  { %v739_v5 = vmax.f32 %v731_v2, 0.0  ;;  %v734_v12 = vmul.f32 %v9982_v8, %v10500_v46  ;;  %v1051_v46 = vld [vmem:[%s13741_s3 + $0x940] sm:$0xff]  ;;  %v1100_v0 = vld [vmem:[%s13741_s3 + $0xac8] sm:$0xff]  ;;  %v9160_v6 = vcombine.high %v1091_v49, %v1099_v57 }
 0x129   :  { %v740_v10 = vmax.f32 %v732_v4, 0.0  ;;  %v10556_v3 = vsub.f32 %v524_v14, %v632_v40  ;;  %v645_v14 = vmul.f32 %v10540_v17, %v10540_v17  ;;  %v9112_v27 = vcombine.high %v1043_v21, %v1051_v46  ;;  %v1108_v11 = vld [vmem:[%s13741_s3 + $0xb08] sm:$0xff] }
 0x12a   :  { %v10537_v16 = vpack.c.bf16 %v739_v5, %v739_v5  ;;  %v742_v18 = vmax.f32 %v734_v12, 0.0  ;;  %v9143_v4 = vcombine.low %v1075_v34, %v1083_v35  ;;  %v9145_v5 = vcombine.low %v1076_v36, %v1084_v37  ;;  %v1116_v38 = vld [vmem:[%s13741_s3 + $0xb48] sm:$0xff] }
 0x12b   :  { %v10535_v13 = vpack.c.bf16 %v740_v10, %v740_v10  ;;  %v648_v54 = vmul.f32 %v10556_v3, %v10556_v3  ;;  %v665_v31 = vsel %vm569_vm2, %v645_v14, 0.0  ;;  %v9162_v7 = vcombine.high %v1092_v58, %v1100_v0  ;;  %v1115_v10 = vld [vmem:[%s13741_s3 + $0xb40] sm:$0xff] }
 0x12c   :  { %v10558_v24 = vpack.c.bf16 %v742_v18, %v742_v18  ;;  %v666_v41 = vrot.slane %v665_v31, 4  ;;  %v9159_v12 = vcombine.low %v1091_v49, %v1099_v57  ;;  %v9176_v18 = vcombine.high %v1107_v63, %v1115_v10  ;;  %v1164_v49 = vld [vmem:[%s13741_s3 + $0xcc8] sm:$0xff] }
 0x12d   :  { %7015 = vmatprep.mubr.bf16.mxu0 %v10535_v13  ;;  %7179 = vmatprep.mubr.bf16.mxu1 %v10535_v13  ;;  %v686_v39 = vsel %vm569_vm2, %v648_v54, 0.0  ;;  %v10640_v14 = vsub.s32 7, %v10459_v59  ;;  %v9177_v29 = vcombine.low %v1108_v11, %v1116_v38  ;;  %v1139_v54 = vld [vmem:[%s13741_s3 + $0xc00] sm:$0xff] }
 0x12e   :  { %7016 = vmatmul.mubr.bf16.vlgmr.msra.gmra.mrb[8].mxu0 %v10537_v16  ;;  %7180 = vmatmul.mubr.bf16.vlgmr.msra.gmra.mrb[8].mxu1 %v10537_v16  ;;  %v687_v53 = vrot.slane %v686_v39, 4  ;;  %v667_v2 = vadd.f32 %v666_v41, %v665_v31  ;;  %v1140_v31 = vld [vmem:[%s13741_s3 + $0xc08] sm:$0xff] }
 0x12f   :  { %7025 = vmatpush1.bf16.msra.mxu0 %v9079_v55  ;;  %7189 = vmatpush1.bf16.msra.mxu1 %v9081_v56  ;;  %v9111_v55 = vcombine.low %v1043_v21, %v1051_v46  ;;  %v9113_v56 = vcombine.low %v1044_v22, %v1052_v44  ;;  %v1123_v46 = vld [vmem:[%s13741_s3 + $0xb80] sm:$0xff]  ;;  %v10628_v22 = vsub.s32 4, %v10459_v59 }
 0x130   :  { %7026 = vmatprep.subr.bf16.mxu0 %v9096_v15  ;;  %7190 = vmatprep.subr.bf16.mxu1 %v9098_v20  ;;  %v688_v8 = vadd.f32 %v687_v53, %v686_v39  ;;  %v668_v40 = vrot.slane %v667_v2, 2  ;;  %v9161_v15 = vcombine.low %v1092_v58, %v1100_v0  ;;  %v9178_v20 = vcombine.high %v1108_v11, %v1116_v38  ;;  %v1131_v44 = vld [vmem:[%s13741_s3 + $0xbc0] sm:$0xff] }
 0x131   :  { %7056 = vmatprep.mubr.bf16.mxu0 %v10558_v24  ;;  %7220 = vmatprep.mubr.bf16.mxu1 %v10558_v24  ;;  %v9192_v51 = vcombine.high %v1123_v46, %v1131_v44  ;;  %v9191_v35 = vcombine.low %v1123_v46, %v1131_v44  ;;  %v1188_v46 = vld [vmem:[%s13741_s3 + $0xd88] sm:$0xff] }
 0x132   :  { %v689_v21 = vrot.slane %v688_v8, 2  ;;  %v1196_v44 = vld [vmem:[%s13741_s3 + $0xdc8] sm:$0xff] }
 0x133   :  { %7027 = vmatpush1.bf16.msra.mxu0 %v9095_v25  ;;  %7191 = vmatpush1.bf16.msra.mxu1 %v9097_v26  ;;  %v1124_v25 = vld [vmem:[%s13741_s3 + $0xb88] sm:$0xff] }
 0x134   :  { %7028 = vmatprep.subr.bf16.mxu0 %v9112_v27  ;;  %7192 = vmatprep.subr.bf16.mxu1 %v9114_v28  ;;  %v1132_v26 = vld [vmem:[%s13741_s3 + $0xbc8] sm:$0xff]  ;;  %v669_v27 = vadd.f32 %v668_v40, %v667_v2  ;;  %v9175_v28 = vcombine.low %v1107_v63, %v1115_v10  ;;  %v690_v50 = vadd.f32 %v689_v21, %v688_v8  ;;  %v1195_v21 = vld [vmem:[%s13741_s3 + $0xdc0] sm:$0xff] }
 0x135   :  { %v9194_v52 = vcombine.high %v1124_v25, %v1132_v26  ;;  %v9193_v36 = vcombine.low %v1124_v25, %v1132_v26  ;;  %v1180_v63 = vld [vmem:[%s13741_s3 + $0xd48] sm:$0xff] }
 0x136   :  { %v670_v34 = vrot.slane %v669_v27, 1  ;;  %v691_v37 = vrot.slane %v690_v50, 1 }
 0x137   :  { %7029 = vmatpush1.bf16.msra.mxu0 %v9111_v55  ;;  %7193 = vmatpush1.bf16.msra.mxu1 %v9113_v56  ;;  %v95_v55 = vrot.slane %v10467_v61, %v10628_v22  ;;  %v1147_v56 = vld [vmem:[%s13741_s3 + $0xc40] sm:$0xff] }
 0x138   :  { %7030 = vmatprep.subr.bf16.mxu0 %v9128_v32  ;;  %7194 = vmatprep.subr.bf16.mxu1 %v9130_v33  ;;  %v1148_v32 = vld [vmem:[%s13741_s3 + $0xc48] sm:$0xff]  ;;  %v107_v33 = vrot.slane %v10467_v61, %v10640_v14  ;;  %v9208_v39 = vcombine.high %v1139_v54, %v1147_v56  ;;  %v671_v57 = vadd.f32 %v670_v34, %v669_v27 }
 0x139   :  { %v9210_v41 = vcombine.high %v1140_v31, %v1148_v32  ;;  %v9209_v58 = vcombine.low %v1140_v31, %v1148_v32  ;;  %v692_v0 = vadd.f32 %v691_v37, %v690_v50  ;;  %v1212_v31 = vld [vmem:[%s13741_s3 + $0xe48] sm:$0xff]  ;;  %v9257_v34 = vcombine.low %v1188_v46, %v1196_v44 }
 0x13a   :  { %v10674_v53 = vadd.f32 %v10518_v23, %v107_v33  ;;  %v1179_v23 = vld [vmem:[%s13741_s3 + $0xd40] sm:$0xff]  ;;  %v709_v10 = vmul.f32 0.25, %v671_v57 }
 0x13b   :  { %7031 = vmatpush1.bf16.msra.mxu0 %v9127_v42  ;;  %7195 = vmatpush1.bf16.msra.mxu1 %v9129_v43  ;;  %v1155_v42 = vld [vmem:[%s13741_s3 + $0xc80] sm:$0xff]  ;;  %v10662_v43 = vadd.f32 %v10513_v9, %v95_v55  ;;  %v9207_v9 = vcombine.low %v1139_v54, %v1147_v56  ;;  %v1204_v56 = vld [vmem:[%s13741_s3 + $0xe08] sm:$0xff] }
 0x13c   :  { %7032 = vmatprep.subr.bf16.mxu0 %v9144_v45  ;;  %7196 = vmatprep.subr.bf16.mxu1 %v9146_v48  ;;  %v1163_v45 = vld [vmem:[%s13741_s3 + $0xcc0] sm:$0xff]  ;;  %v1156_v48 = vld [vmem:[%s13741_s3 + $0xc88] sm:$0xff]  ;;  %v619_v8 = vsel %vm569_vm2, %v10674_v53, 0.0  ;;  %v717_v26 = vadd.f32 1e-05, %v709_v10  ;;  %v9274_v37 = vcombine.high %v1204_v56, %v1212_v31  ;;  %v9273_v57 = vcombine.low %v1204_v56, %v1212_v31 }
 0x13d   :  { %v9224_v2 = vcombine.high %v1155_v42, %v1163_v45  ;;  %v9223_v11 = vcombine.low %v1155_v42, %v1163_v45  ;;  %v9225_v38 = vcombine.low %v1156_v48, %v1164_v49  ;;  %v620_v25 = vrot.slane %v619_v8, 4  ;;  %v1203_v54 = vld [vmem:[%s13741_s3 + $0xe00] sm:$0xff]  ;;  %v1220_v42 = vld [vmem:[%s13741_s3 + $0xe88] sm:$0xff] }
 0x13e   :  { %v1211_v55 = vld [vmem:[%s13741_s3 + $0xe40] sm:$0xff]  ;;  %9983 = vrsqrt.f32 %v717_v26  ;;  %v1228_v45 = vld [vmem:[%s13741_s3 + $0xec8] sm:$0xff] }
 0x13f   :  { %7033 = vmatpush1.bf16.msra.mxu0 %v9143_v4  ;;  %7197 = vmatpush1.bf16.msra.mxu1 %v9145_v5  ;;  %v9226_v4 = vcombine.high %v1156_v48, %v1164_v49  ;;  %v1171_v5 = vld [vmem:[%s13741_s3 + $0xd00] sm:$0xff]  ;;  %v621_v32 = vadd.f32 %v620_v25, %v619_v8  ;;  %v9271_v49 = vcombine.low %v1203_v54, %v1211_v55 }
 0x140   :  { %7034 = vmatprep.subr.bf16.mxu0 %v9160_v6  ;;  %7198 = vmatprep.subr.bf16.mxu1 %v9162_v7  ;;  %v598_v6 = vsel %vm569_vm2, %v10662_v43, 0.0  ;;  %v1172_v7 = vld [vmem:[%s13741_s3 + $0xd08] sm:$0xff]  ;;  %v9239_v27 = vcombine.low %v1171_v5, %v1179_v23 }
 0x141   :  { %v599_v40 = vrot.slane %v598_v6, 4  ;;  %v622_v48 = vrot.slane %v621_v32, 2 }
 0x143   :  { %7035 = vmatpush1.bf16.msra.mxu0 %v9159_v12  ;;  %7199 = vmatpush1.bf16.msra.mxu1 %v9161_v15  ;;  %v712_v12 = vmul.f32 0.25, %v692_v0  ;;  %v9240_v15 = vcombine.high %v1171_v5, %v1179_v23  ;;  %v9290_v0 = vcombine.high %v1220_v42, %v1228_v45  ;;  %v1236_v5 = vld [vmem:[%s13741_s3 + $0xf08] sm:$0xff]  ;;  %v623_v23 = vadd.f32 %v622_v48, %v621_v32 }
 0x144   :  { %7036 = vmatprep.subr.bf16.mxu0 %v9176_v18  ;;  %7200 = vmatprep.subr.bf16.mxu1 %v9178_v20  ;;  %v9242_v18 = vcombine.high %v1172_v7, %v1180_v63  ;;  %v1187_v20 = vld [vmem:[%s13741_s3 + $0xd80] sm:$0xff] }
 0x145   :  { %v720_v50 = vadd.f32 1e-05, %v712_v12  ;;  %v9255_v33 = vcombine.low %v1187_v20, %v1195_v21 }
 0x147   :  { %7037 = vmatpush1.bf16.msra.mxu0 %v9175_v28  ;;  %7201 = vmatpush1.bf16.msra.mxu1 %v9177_v29  ;;  %v9241_v28 = vcombine.low %v1172_v7, %v1180_v63  ;;  %v600_v29 = vadd.f32 %v599_v40, %v598_v6  ;;  %9985 = vrsqrt.f32 %v720_v50  ;;  %v1244_v6 = vld [vmem:[%s13741_s3 + $0xf48] sm:$0xff]  ;;  %v9289_v63 = vcombine.low %v1220_v42, %v1228_v45  ;;  %v1259_v40 = vld [vmem:[%s13741_s3 + $0xfc0] sm:$0xff] }
 0x148   :  { %7038 = vmatprep.subr.bf16.mxu0 %v9192_v51  ;;  %7202 = vmatprep.subr.bf16.mxu1 %v9194_v52  ;;  %v9256_v51 = vcombine.high %v1187_v20, %v1195_v21  ;;  %v9258_v52 = vcombine.high %v1188_v46, %v1196_v44  ;;  %v9984_v12 = vpop.eup %9983  ;;  %v624_v20 = vrot.slane %v623_v23, 1  ;;  %v9305_v44 = vcombine.low %v1236_v5, %v1244_v6 }
 0x149   :  { %v733_v26 = vmul.f32 %v9984_v12, %v10540_v17  ;;  %v1276_v17 = vld [vmem:[%s13741_s3 + $0x1048] sm:$0xff] }
 0x14b   :  { %7039 = vmatpush1.bf16.msra.mxu0 %v9191_v35  ;;  %7203 = vmatpush1.bf16.msra.mxu1 %v9193_v36  ;;  %v601_v35 = vrot.slane %v600_v29, 2  ;;  %v9272_v36 = vcombine.high %v1203_v54, %v1211_v55  ;;  %v625_v54 = vadd.f32 %v624_v20, %v623_v23  ;;  %v741_v31 = vmax.f32 %v733_v26, 0.0  ;;  %v1340_v26 = vld [vmem:[%s13741_s3 + $0x1248] sm:$0xff] }
 0x14c   :  { %7040 = vmatprep.subr.bf16.mxu0 %v9208_v39  ;;  %7204 = vmatprep.subr.bf16.mxu1 %v9210_v41  ;;  %v1219_v39 = vld [vmem:[%s13741_s3 + $0xe80] sm:$0xff] }
 0x14d   :  { %v1227_v41 = vld [vmem:[%s13741_s3 + $0xec0] sm:$0xff] }
 0x14e   :  { %v9287_v7 = vcombine.low %v1219_v39, %v1227_v41 }
 0x14f   :  { %7041 = vmatpush1.bf16.msra.mxu0 %v9207_v9  ;;  %7205 = vmatpush1.bf16.msra.mxu1 %v9209_v58  ;;  %v602_v9 = vadd.f32 %v601_v35, %v600_v29  ;;  %v9288_v58 = vcombine.high %v1219_v39, %v1227_v41  ;;  %v1267_v29 = vld [vmem:[%s13741_s3 + $0x1000] sm:$0xff]  ;;  %v1292_v39 = vld [vmem:[%s13741_s3 + $0x10c8] sm:$0xff]  ;;  %v634_v41 = vmul.f32 0.25, %v625_v54 }
 0x150   :  { %7042 = vmatprep.subr.bf16.mxu0 %v9224_v2  ;;  %7206 = vmatprep.subr.bf16.mxu1 %v9226_v4  ;;  %v1235_v2 = vld [vmem:[%s13741_s3 + $0xf00] sm:$0xff] }
 0x151   :  { %v1243_v4 = vld [vmem:[%s13741_s3 + $0xf40] sm:$0xff]  ;;  %v603_v8 = vrot.slane %v602_v9, 1  ;;  %v9986_v21 = vpop.eup %9985 }
 0x152   :  { %v9304_v10 = vcombine.high %v1235_v2, %v1243_v4  ;;  %v9303_v46 = vcombine.low %v1235_v2, %v1243_v4  ;;  %v736_v50 = vmul.f32 %v9986_v21, %v10556_v3  ;;  %v1291_v35 = vld [vmem:[%s13741_s3 + $0x10c0] sm:$0xff]  ;;  %v1300_v4 = vld [vmem:[%s13741_s3 + $0x1108] sm:$0xff] }
 0x153   :  { %7043 = vmatpush1.bf16.msra.mxu0 %v9223_v11  ;;  %7207 = vmatpush1.bf16.msra.mxu1 %v9225_v38  ;;  %v9306_v11 = vcombine.high %v1236_v5, %v1244_v6  ;;  %v1251_v38 = vld [vmem:[%s13741_s3 + $0xf80] sm:$0xff]  ;;  %v10798_v5 = vsub.f32 %v10674_v53, %v634_v41  ;;  %v1364_v41 = vld [vmem:[%s13741_s3 + $0x1308] sm:$0xff] }
 0x154   :  { %7044 = vmatprep.subr.bf16.mxu0 %v9240_v15  ;;  %7208 = vmatprep.subr.bf16.mxu1 %v9242_v18  ;;  %v1252_v15 = vld [vmem:[%s13741_s3 + $0xf88] sm:$0xff]  ;;  %v9320_v25 = vcombine.high %v1251_v38, %v1259_v40  ;;  %v9319_v55 = vcombine.low %v1251_v38, %v1259_v40  ;;  %v1307_v2 = vld [vmem:[%s13741_s3 + $0x1140] sm:$0xff] }
 0x155   :  { %v1260_v18 = vld [vmem:[%s13741_s3 + $0xfc8] sm:$0xff]  ;;  %v1315_v53 = vld [vmem:[%s13741_s3 + $0x1180] sm:$0xff]  ;;  %v650_v40 = vmul.f32 %v10798_v5, %v10798_v5 }
 0x156   :  { %v9321_v56 = vcombine.low %v1252_v15, %v1260_v18  ;;  %v1324_v38 = vld [vmem:[%s13741_s3 + $0x11c8] sm:$0xff] }
 0x157   :  { %7045 = vmatpush1.bf16.msra.mxu0 %v9239_v27  ;;  %7209 = vmatpush1.bf16.msra.mxu1 %v9241_v28  ;;  %v604_v27 = vadd.f32 %v603_v8, %v602_v9  ;;  %v9322_v28 = vcombine.high %v1252_v15, %v1260_v18 }
 0x158   :  { %7046 = vmatprep.subr.bf16.mxu0 %v9256_v51  ;;  %7210 = vmatprep.subr.bf16.mxu1 %v9258_v52  ;;  %v1275_v51 = vld [vmem:[%s13741_s3 + $0x1040] sm:$0xff]  ;;  %v1268_v52 = vld [vmem:[%s13741_s3 + $0x1008] sm:$0xff] }
 0x159   :  { %v631_v32 = vmul.f32 0.25, %v604_v27  ;;  %v9336_v3 = vcombine.high %v1267_v29, %v1275_v51  ;;  %v9335_v42 = vcombine.low %v1267_v29, %v1275_v51  ;;  %v9337_v45 = vcombine.low %v1268_v52, %v1276_v17 }
 0x15a   :  { %v700_v27 = vsel %vm569_vm2, %v650_v40, 0.0 }
 0x15b   :  { %7047 = vmatpush1.bf16.msra.mxu0 %v9255_v33  ;;  %7211 = vmatpush1.bf16.msra.mxu1 %v9257_v34  ;;  %v9338_v33 = vcombine.high %v1268_v52, %v1276_v17  ;;  %v1283_v34 = vld [vmem:[%s13741_s3 + $0x1080] sm:$0xff]  ;;  %v701_v54 = vrot.slane %v700_v27, 4 }
 0x15c   :  { %7048 = vmatprep.subr.bf16.mxu0 %v9272_v36  ;;  %7212 = vmatprep.subr.bf16.mxu1 %v9274_v37  ;;  %v744_v36 = vmax.f32 %v736_v50, 0.0  ;;  %v1284_v37 = vld [vmem:[%s13741_s3 + $0x1088] sm:$0xff]  ;;  %v9352_v48 = vcombine.high %v1283_v34, %v1291_v35  ;;  %v9351_v6 = vcombine.low %v1283_v34, %v1291_v35  ;;  %v1347_v17 = vld [vmem:[%s13741_s3 + $0x1280] sm:$0xff] }
 0x15d   :  { %v9354_v9 = vcombine.high %v1284_v37, %v1292_v39  ;;  %v9353_v23 = vcombine.low %v1284_v37, %v1292_v39  ;;  %v702_v37 = vadd.f32 %v701_v54, %v700_v27  ;;  %v1371_v39 = vld [vmem:[%s13741_s3 + $0x1340] sm:$0xff] }
 0x15f   :  { %7049 = vmatpush1.bf16.msra.mxu0 %v9271_v49  ;;  %7213 = vmatpush1.bf16.msra.mxu1 %v9273_v57  ;;  %v10778_v49 = vpack.c.bf16 %v741_v31, %v741_v31  ;;  %v10781_v57 = vsub.f32 %v10662_v43, %v631_v32  ;;  %v1308_v43 = vld [vmem:[%s13741_s3 + $0x1148] sm:$0xff] }
 0x160   :  { %7050 = vmatprep.subr.bf16.mxu0 %v9288_v58  ;;  %7214 = vmatprep.subr.bf16.mxu1 %v9290_v0  ;;  %v1299_v58 = vld [vmem:[%s13741_s3 + $0x1100] sm:$0xff]  ;;  %v10786_v0 = vpack.c.bf16 %v744_v36, %v744_v36  ;;  %v9370_v8 = vcombine.high %v1300_v4, %v1308_v43  ;;  %v9369_v15 = vcombine.low %v1300_v4, %v1308_v43  ;;  %v1356_v31 = vld [vmem:[%s13741_s3 + $0x12c8] sm:$0xff]  ;;  %v703_v43 = vrot.slane %v702_v37, 2 }
 0x161   :  { %v9367_v12 = vcombine.low %v1299_v58, %v1307_v2  ;;  %v1363_v36 = vld [vmem:[%s13741_s3 + $0x1300] sm:$0xff] }
 0x163   :  { %7051 = vmatpush1.bf16.msra.mxu0 %v9287_v7  ;;  %7215 = vmatpush1.bf16.msra.mxu1 %v9289_v63  ;;  %v647_v7 = vmul.f32 %v10781_v57, %v10781_v57  ;;  %v9368_v63 = vcombine.high %v1299_v58, %v1307_v2  ;;  %v10859_v58 = vsub.s32 6, %v10459_v59  ;;  %v9432_v2 = vcombine.high %v1363_v36, %v1371_v39 }
 0x164   :  { %7052 = vmatprep.subr.bf16.mxu0 %v9304_v10  ;;  %7216 = vmatprep.subr.bf16.mxu1 %v9306_v11  ;;  %v1323_v10 = vld [vmem:[%s13741_s3 + $0x11c0] sm:$0xff]  ;;  %v1316_v11 = vld [vmem:[%s13741_s3 + $0x1188] sm:$0xff] }
 0x165   :  { %v679_v18 = vsel %vm569_vm2, %v647_v7, 0.0  ;;  %v9384_v20 = vcombine.high %v1315_v53, %v1323_v10  ;;  %v9386_v21 = vcombine.high %v1316_v11, %v1324_v38  ;;  %v9383_v29 = vcombine.low %v1315_v53, %v1323_v10  ;;  %v1380_v7 = vld [vmem:[%s13741_s3 + $0x1388] sm:$0xff] }
 0x166   :  { %v9385_v50 = vcombine.low %v1316_v11, %v1324_v38  ;;  %v103_v11 = vrot.slane %v10467_v61, %v10859_v58  ;;  %v704_v38 = vadd.f32 %v703_v43, %v702_v37  ;;  %v1404_v61 = vld [vmem:[%s13741_s3 + $0x1448] sm:$0xff] }
 0x167   :  { %7053 = vmatpush1.bf16.msra.mxu0 %v9303_v46  ;;  %7217 = vmatpush1.bf16.msra.mxu1 %v9305_v44  ;;  %v1331_v46 = vld [vmem:[%s13741_s3 + $0x1200] sm:$0xff]  ;;  %v1452_v43 = vld [vmem:[%s13741_s3 + $0x15c8] sm:$0xff] }
 0x168   :  { %7054 = vmatprep.subr.bf16.mxu0 %v9320_v25  ;;  %7218 = vmatprep.subr.bf16.mxu1 %v9322_v28  ;;  %v1339_v44 = vld [vmem:[%s13741_s3 + $0x1240] sm:$0xff]  ;;  %v1332_v25 = vld [vmem:[%s13741_s3 + $0x1208] sm:$0xff]  ;;  %v680_v28 = vrot.slane %v679_v18, 4 }
 0x169   :  { %v9400_v51 = vcombine.high %v1331_v46, %v1339_v44  ;;  %v9402_v52 = vcombine.high %v1332_v25, %v1340_v26 }
 0x16a   :  { %v681_v32 = vadd.f32 %v680_v28, %v679_v18  ;;  %v1403_v18 = vld [vmem:[%s13741_s3 + $0x1440] sm:$0xff] }
 0x16b   :  { %7055 = vmatpush1.bf16.msra.mxu0 %v9319_v55  ;;  %7219 = vmatpush1.bf16.msra.mxu1 %v9321_v56  ;;  %v1355_v55 = vld [vmem:[%s13741_s3 + $0x12c0] sm:$0xff]  ;;  %v1348_v56 = vld [vmem:[%s13741_s3 + $0x1288] sm:$0xff] }
 0x16c   :  { %7065 = vmatprep.subr.bf16.mxu0 %v9336_v3  ;;  %7229 = vmatprep.subr.bf16.mxu1 %v9338_v33  ;;  %v9399_v3 = vcombine.low %v1331_v46, %v1339_v44  ;;  %v9401_v33 = vcombine.low %v1332_v25, %v1340_v26  ;;  %v9416_v34 = vcombine.high %v1347_v17, %v1355_v55  ;;  %v705_v26 = vrot.slane %v704_v38, 1 }
 0x16d   :  { %v9418_v35 = vcombine.high %v1348_v56, %v1356_v31  ;;  %v10888_v25 = vadd.f32 %v10515_v19, %v103_v11  ;;  %v1420_v19 = vld [vmem:[%s13741_s3 + $0x14c8] sm:$0xff]  ;;  %v1459_v11 = vld [vmem:[%s13741_s3 + $0x1600] sm:$0xff] }
 0x16e   :  { %7057 = vmatmul.mubr.bf16.vlgmr.msra.gmra.mrb[8].mxu0 %v10778_v49  ;;  %7221 = vmatmul.mubr.bf16.vlgmr.msra.gmra.mrb[8].mxu1 %v10778_v49 }
 0x16f   :  { %7066 = vmatpush1.bf16.msra.mxu0 %v9335_v42  ;;  %7230 = vmatpush1.bf16.msra.mxu1 %v9337_v45  ;;  %v1372_v42 = vld [vmem:[%s13741_s3 + $0x1348] sm:$0xff]  ;;  %v682_v45 = vrot.slane %v681_v32, 2 }
 0x170   :  { %7067 = vmatprep.subr.bf16.mxu0 %v9352_v48  ;;  %7231 = vmatprep.subr.bf16.mxu1 %v9354_v9  ;;  %v9415_v48 = vcombine.low %v1347_v17, %v1355_v55  ;;  %v9417_v9 = vcombine.low %v1348_v56, %v1356_v31  ;;  %v9434_v4 = vcombine.high %v1364_v41, %v1372_v42  ;;  %v612_v55 = vsel %vm569_vm2, %v10888_v25, 0.0 }
 0x171   :  { %7097 = vmatprep.mubr.bf16.mxu0 %v10786_v0  ;;  %7261 = vmatprep.mubr.bf16.mxu1 %v10786_v0  ;;  %v683_v53 = vadd.f32 %v682_v45, %v681_v32  ;;  %v9433_v10 = vcombine.low %v1364_v41, %v1372_v42  ;;  %v706_v56 = vadd.f32 %v705_v26, %v704_v38  ;;  %v613_v37 = vrot.slane %v612_v55, 4  ;;  %v1467_v38 = vld [vmem:[%s13741_s3 + $0x1640] sm:$0xff]  ;;  %v1476_v26 = vld [vmem:[%s13741_s3 + $0x1688] sm:$0xff] }
 0x173   :  { %7068 = vmatpush1.bf16.msra.mxu0 %v9351_v6  ;;  %7232 = vmatpush1.bf16.msra.mxu1 %v9353_v23  ;;  %v1379_v6 = vld [vmem:[%s13741_s3 + $0x1380] sm:$0xff]  ;;  %v714_v42 = vmul.f32 0.25, %v706_v56 }
 0x174   :  { %7069 = vmatprep.subr.bf16.mxu0 %v9368_v63  ;;  %7233 = vmatprep.subr.bf16.mxu1 %v9370_v8  ;;  %v1387_v23 = vld [vmem:[%s13741_s3 + $0x13c0] sm:$0xff]  ;;  %v1388_v63 = vld [vmem:[%s13741_s3 + $0x13c8] sm:$0xff]  ;;  %v9431_v8 = vcombine.low %v1363_v36, %v1371_v39 }
 0x175   :  { %v9448_v40 = vcombine.high %v1379_v6, %v1387_v23  ;;  %v9447_v46 = vcombine.low %v1379_v6, %v1387_v23  ;;  %v9449_v44 = vcombine.low %v1380_v7, %v1388_v63  ;;  %v614_v23 = vadd.f32 %v613_v37, %v612_v55  ;;  %v1500_v55 = vld [vmem:[%s13741_s3 + $0x1748] sm:$0xff] }
 0x176   :  { %v1508_v37 = vld [vmem:[%s13741_s3 + $0x1788] sm:$0xff] }
 0x177   :  { %7070 = vmatpush1.bf16.msra.mxu0 %v9367_v12  ;;  %7234 = vmatpush1.bf16.msra.mxu1 %v9369_v15  ;;  %v9450_v12 = vcombine.high %v1380_v7, %v1388_v63  ;;  %v1395_v15 = vld [vmem:[%s13741_s3 + $0x1400] sm:$0xff] }
 0x178   :  { %7071 = vmatprep.subr.bf16.mxu0 %v9384_v20  ;;  %7235 = vmatprep.subr.bf16.mxu1 %v9386_v21  ;;  %v1396_v20 = vld [vmem:[%s13741_s3 + $0x1408] sm:$0xff]  ;;  %v684_v21 = vrot.slane %v683_v53, 1  ;;  %v9464_v27 = vcombine.high %v1395_v15, %v1403_v18  ;;  %v9463_v17 = vcombine.low %v1395_v15, %v1403_v18  ;;  %v615_v15 = vrot.slane %v614_v23, 2 }
 0x179   :  { %v9466_v28 = vcombine.high %v1396_v20, %v1404_v61  ;;  %v9465_v54 = vcombine.low %v1396_v20, %v1404_v61  ;;  %v9528_v61 = vcombine.high %v1459_v11, %v1467_v38 }
 0x17b   :  { %7072 = vmatpush1.bf16.msra.mxu0 %v9383_v29  ;;  %7236 = vmatpush1.bf16.msra.mxu1 %v9385_v50  ;;  %v1411_v29 = vld [vmem:[%s13741_s3 + $0x1480] sm:$0xff] }
 0x17c   :  { %7073 = vmatprep.subr.bf16.mxu0 %v9400_v51  ;;  %7237 = vmatprep.subr.bf16.mxu1 %v9402_v52  ;;  %v1419_v50 = vld [vmem:[%s13741_s3 + $0x14c0] sm:$0xff]  ;;  %v1412_v51 = vld [vmem:[%s13741_s3 + $0x1488] sm:$0xff]  ;;  %v685_v52 = vadd.f32 %v684_v21, %v683_v53 }
 0x17d   :  { %v9480_v31 = vcombine.high %v1411_v29, %v1419_v50  ;;  %v9482_v32 = vcombine.high %v1412_v51, %v1420_v19  ;;  %v9479_v39 = vcombine.low %v1411_v29, %v1419_v50  ;;  %v9481_v41 = vcombine.low %v1412_v51, %v1420_v19 }
 0x17e   :  { %v711_v36 = vmul.f32 0.25, %v685_v52  ;;  %v9527_v29 = vcombine.low %v1459_v11, %v1467_v38  ;;  %v1491_v52 = vld [vmem:[%s13741_s3 + $0x1700] sm:$0xff] }
 0x17f   :  { %7074 = vmatpush1.bf16.msra.mxu0 %v9399_v3  ;;  %7238 = vmatpush1.bf16.msra.mxu1 %v9401_v33  ;;  %v1427_v3 = vld [vmem:[%s13741_s3 + $0x1500] sm:$0xff] }
 0x180   :  { %7075 = vmatprep.subr.bf16.mxu0 %v9416_v34  ;;  %7239 = vmatprep.subr.bf16.mxu1 %v9418_v35  ;;  %v1435_v33 = vld [vmem:[%s13741_s3 + $0x1540] sm:$0xff]  ;;  %v1428_v34 = vld [vmem:[%s13741_s3 + $0x1508] sm:$0xff]  ;;  %v719_v6 = vadd.f32 1e-05, %v711_v36 }
 0x181   :  { %v1436_v35 = vld [vmem:[%s13741_s3 + $0x1548] sm:$0xff]  ;;  %v9496_v45 = vcombine.high %v1427_v3, %v1435_v33  ;;  %v9495_v7 = vcombine.low %v1427_v3, %v1435_v33  ;;  %v1515_v36 = vld [vmem:[%s13741_s3 + $0x17c0] sm:$0xff] }
 0x182   :  { %v9497_v63 = vcombine.low %v1428_v34, %v1436_v35  ;;  %9987 = vrsqrt.f32 %v719_v6  ;;  %v1539_v38 = vld [vmem:[%s13741_s3 + $0x1880] sm:$0xff] }
 0x183   :  { %7076 = vmatpush1.bf16.msra.mxu0 %v9415_v48  ;;  %7240 = vmatpush1.bf16.msra.mxu1 %v9417_v9  ;;  %v9498_v48 = vcombine.high %v1428_v34, %v1436_v35  ;;  %v1443_v9 = vld [vmem:[%s13741_s3 + $0x1580] sm:$0xff] }
 0x184   :  { %7077 = vmatprep.subr.bf16.mxu0 %v9432_v2  ;;  %7241 = vmatprep.subr.bf16.mxu1 %v9434_v4  ;;  %v1451_v2 = vld [vmem:[%s13741_s3 + $0x15c0] sm:$0xff]  ;;  %v1444_v4 = vld [vmem:[%s13741_s3 + $0x1588] sm:$0xff] }
 0x185   :  { %v9512_v53 = vcombine.high %v1443_v9, %v1451_v2  ;;  %v9511_v18 = vcombine.low %v1443_v9, %v1451_v2  ;;  %v9513_v20 = vcombine.low %v1444_v4, %v1452_v43  ;;  %v1507_v34 = vld [vmem:[%s13741_s3 + $0x1780] sm:$0xff] }
 0x186   :  { %v9576_v2 = vcombine.high %v1507_v34, %v1515_v36 }
 0x187   :  { %7078 = vmatpush1.bf16.msra.mxu0 %v9431_v8  ;;  %7242 = vmatpush1.bf16.msra.mxu1 %v9433_v10  ;;  %v722_v8 = vadd.f32 1e-05, %v714_v42  ;;  %v9514_v10 = vcombine.high %v1444_v4, %v1452_v43  ;;  %v1523_v43 = vld [vmem:[%s13741_s3 + $0x1800] sm:$0xff] }
 0x188   :  { %7079 = vmatprep.subr.bf16.mxu0 %v9448_v40  ;;  %7243 = vmatprep.subr.bf16.mxu1 %v9450_v12  ;;  %v1460_v40 = vld [vmem:[%s13741_s3 + $0x1608] sm:$0xff] }
 0x189   :  { %v1468_v12 = vld [vmem:[%s13741_s3 + $0x1648] sm:$0xff]  ;;  %9989 = vrsqrt.f32 %v722_v8  ;;  %v9575_v8 = vcombine.low %v1507_v34, %v1515_v36 }
 0x18a   :  { %v9530_v21 = vcombine.high %v1460_v40, %v1468_v12  ;;  %v9529_v50 = vcombine.low %v1460_v40, %v1468_v12  ;;  %v1547_v12 = vld [vmem:[%s13741_s3 + $0x18c0] sm:$0xff] }
 0x18b   :  { %7080 = vmatpush1.bf16.msra.mxu0 %v9447_v46  ;;  %7244 = vmatpush1.bf16.msra.mxu1 %v9449_v44  ;;  %v1475_v46 = vld [vmem:[%s13741_s3 + $0x1680] sm:$0xff] }
 0x18c   :  { %7081 = vmatprep.subr.bf16.mxu0 %v9464_v27  ;;  %7245 = vmatprep.subr.bf16.mxu1 %v9466_v28  ;;  %v1483_v44 = vld [vmem:[%s13741_s3 + $0x16c0] sm:$0xff]  ;;  %v1484_v27 = vld [vmem:[%s13741_s3 + $0x16c8] sm:$0xff]  ;;  %v616_v28 = vadd.f32 %v615_v15, %v614_v23  ;;  %v9988_v35 = vpop.eup %9987 }
 0x18d   :  { %v9544_v51 = vcombine.high %v1475_v46, %v1483_v44  ;;  %v9546_v19 = vcombine.high %v1476_v26, %v1484_v27  ;;  %v735_v9 = vmul.f32 %v9988_v35, %v10781_v57  ;;  %v1531_v23 = vld [vmem:[%s13741_s3 + $0x1840] sm:$0xff]  ;;  %v1532_v57 = vld [vmem:[%s13741_s3 + $0x1848] sm:$0xff] }
 0x18e   :  { %v617_v56 = vrot.slane %v616_v28, 1  ;;  %v1540_v15 = vld [vmem:[%s13741_s3 + $0x1888] sm:$0xff] }
 0x18f   :  { %7082 = vmatpush1.bf16.msra.mxu0 %v9463_v17  ;;  %7246 = vmatpush1.bf16.msra.mxu1 %v9465_v54  ;;  %v1499_v17 = vld [vmem:[%s13741_s3 + $0x1740] sm:$0xff]  ;;  %v1492_v54 = vld [vmem:[%s13741_s3 + $0x1708] sm:$0xff] }
 0x190   :  { %7083 = vmatprep.subr.bf16.mxu0 %v9480_v31  ;;  %7247 = vmatprep.subr.bf16.mxu1 %v9482_v32  ;;  %v9543_v31 = vcombine.low %v1475_v46, %v1483_v44  ;;  %v9545_v32 = vcombine.low %v1476_v26, %v1484_v27  ;;  %v9560_v3 = vcombine.high %v1491_v52, %v1499_v17  ;;  %v1555_v27 = vld [vmem:[%s13741_s3 + $0x1900] sm:$0xff] }
 0x191   :  { %v9562_v33 = vcombine.high %v1492_v54, %v1500_v55  ;;  %v618_v42 = vadd.f32 %v617_v56, %v616_v28  ;;  %v9608_v44 = vcombine.high %v1539_v38, %v1547_v12  ;;  %v1579_v56 = vld [vmem:[%s13741_s3 + $0x19c0] sm:$0xff] }
 0x193   :  { %7084 = vmatpush1.bf16.msra.mxu0 %v9479_v39  ;;  %7248 = vmatpush1.bf16.msra.mxu1 %v9481_v41  ;;  %v1516_v39 = vld [vmem:[%s13741_s3 + $0x17c8] sm:$0xff]  ;;  %v9990_v41 = vpop.eup %9989 }
 0x194   :  { %7085 = vmatprep.subr.bf16.mxu0 %v9496_v45  ;;  %7249 = vmatprep.subr.bf16.mxu1 %v9498_v48  ;;  %v9559_v45 = vcombine.low %v1491_v52, %v1499_v17  ;;  %v9561_v48 = vcombine.low %v1492_v54, %v1500_v55  ;;  %v9578_v4 = vcombine.high %v1508_v37, %v1516_v39  ;;  %v1571_v55 = vld [vmem:[%s13741_s3 + $0x1980] sm:$0xff] }
 0x195   :  { %v738_v6 = vmul.f32 %v9990_v41, %v10798_v5  ;;  %v9592_v5 = vcombine.high %v1523_v43, %v1531_v23  ;;  %v9640_v35 = vcombine.high %v1571_v55, %v1579_v56  ;;  %v1588_v41 = vld [vmem:[%s13741_s3 + $0x1a08] sm:$0xff] }
 0x197   :  { %7086 = vmatpush1.bf16.msra.mxu0 %v9495_v7  ;;  %7250 = vmatpush1.bf16.msra.mxu1 %v9497_v63  ;;  %v1524_v7 = vld [vmem:[%s13741_s3 + $0x1808] sm:$0xff]  ;;  %v633_v63 = vmul.f32 0.25, %v618_v42  ;;  %v746_v40 = vmax.f32 %v738_v6, 0.0  ;;  %v1611_v6 = vld [vmem:[%s13741_s3 + $0x1ac0] sm:$0xff] }
 0x198   :  { %7087 = vmatprep.subr.bf16.mxu0 %v9512_v53  ;;  %7251 = vmatprep.subr.bf16.mxu1 %v9514_v10  ;;  %v9577_v53 = vcombine.low %v1508_v37, %v1516_v39  ;;  %v743_v10 = vmax.f32 %v735_v9, 0.0  ;;  %v9594_v11 = vcombine.high %v1524_v7, %v1532_v57  ;;  %v1587_v37 = vld [vmem:[%s13741_s3 + $0x1a00] sm:$0xff]  ;;  %v1596_v42 = vld [vmem:[%s13741_s3 + $0x1a48] sm:$0xff] }
 0x199   :  { %v11010_v28 = vpack.c.bf16 %v746_v40, %v746_v40  ;;  %v1595_v39 = vld [vmem:[%s13741_s3 + $0x1a40] sm:$0xff]  ;;  %v1628_v40 = vld [vmem:[%s13741_s3 + $0x1b48] sm:$0xff] }
 0x19a   :  { %v11005_v46 = vpack.c.bf16 %v743_v10, %v743_v10 }
 0x19b   :  { %7088 = vmatpush1.bf16.msra.mxu0 %v9511_v18  ;;  %7252 = vmatpush1.bf16.msra.mxu1 %v9513_v20  ;;  %v1548_v18 = vld [vmem:[%s13741_s3 + $0x18c8] sm:$0xff]  ;;  %v11003_v20 = vsub.f32 %v10888_v25, %v633_v63  ;;  %v1563_v25 = vld [vmem:[%s13741_s3 + $0x1940] sm:$0xff]  ;;  %v9655_v63 = vcombine.low %v1587_v37, %v1595_v39 }
 0x19c   :  { %7089 = vmatprep.subr.bf16.mxu0 %v9528_v61  ;;  %7253 = vmatprep.subr.bf16.mxu1 %v9530_v21  ;;  %v9591_v61 = vcombine.low %v1523_v43, %v1531_v23  ;;  %v9593_v21 = vcombine.low %v1524_v7, %v1532_v57  ;;  %v9610_v26 = vcombine.high %v1540_v15, %v1548_v18  ;;  %v1603_v43 = vld [vmem:[%s13741_s3 + $0x1a80] sm:$0xff]  ;;  %v1604_v23 = vld [vmem:[%s13741_s3 + $0x1a88] sm:$0xff] }
 0x19d   :  { %v649_v52 = vmul.f32 %v11003_v20, %v11003_v20  ;;  %v9624_v17 = vcombine.high %v1555_v27, %v1563_v25  ;;  %v1612_v7 = vld [vmem:[%s13741_s3 + $0x1ac8] sm:$0xff] }
 0x19e   :  { %v9674_v10 = vcombine.high %v1604_v23, %v1612_v7 }
 0x19f   :  { %7090 = vmatpush1.bf16.msra.mxu0 %v9527_v29  ;;  %7254 = vmatpush1.bf16.msra.mxu1 %v9529_v50  ;;  %v1556_v29 = vld [vmem:[%s13741_s3 + $0x1908] sm:$0xff]  ;;  %v693_v34 = vsel %vm569_vm2, %v649_v52, 0.0 }
 0x1a0   :  { %7091 = vmatprep.subr.bf16.mxu0 %v9544_v51  ;;  %7255 = vmatprep.subr.bf16.mxu1 %v9546_v19  ;;  %v1564_v50 = vld [vmem:[%s13741_s3 + $0x1948] sm:$0xff]  ;;  %v9607_v51 = vcombine.low %v1539_v38, %v1547_v12  ;;  %v9609_v19 = vcombine.low %v1540_v15, %v1548_v18  ;;  %v9671_v15 = vcombine.low %v1603_v43, %v1611_v6 }
 0x1a1   :  { %v9626_v54 = vcombine.high %v1556_v29, %v1564_v50  ;;  %v1620_v38 = vld [vmem:[%s13741_s3 + $0x1b08] sm:$0xff]  ;;  %v9673_v18 = vcombine.low %v1604_v23, %v1612_v7 }
 0x1a3   :  { %7092 = vmatpush1.bf16.msra.mxu0 %v9543_v31  ;;  %7256 = vmatpush1.bf16.msra.mxu1 %v9545_v32  ;;  %v1572_v31 = vld [vmem:[%s13741_s3 + $0x1988] sm:$0xff] }
 0x1a4   :  { %7093 = vmatprep.subr.bf16.mxu0 %v9560_v3  ;;  %7257 = vmatprep.subr.bf16.mxu1 %v9562_v33  ;;  %v1580_v32 = vld [vmem:[%s13741_s3 + $0x19c8] sm:$0xff]  ;;  %v9623_v3 = vcombine.low %v1555_v27, %v1563_v25  ;;  %v9625_v33 = vcombine.low %v1556_v29, %v1564_v50 }
 0x1a5   :  { %v9642_v36 = vcombine.high %v1572_v31, %v1580_v32  ;;  %v9641_v9 = vcombine.low %v1572_v31, %v1580_v32  ;;  %v1636_v27 = vld [vmem:[%s13741_s3 + $0x1b88] sm:$0xff] }
 0x1a6   :  { %v1644_v25 = vld [vmem:[%s13741_s3 + $0x1bc8] sm:$0xff] }
 0x1a7   :  { %7094 = vmatpush1.bf16.msra.mxu0 %v9559_v45  ;;  %7258 = vmatpush1.bf16.msra.mxu1 %v9561_v48  ;;  %v694_v45 = vrot.slane %v693_v34, 4  ;;  %v9639_v48 = vcombine.low %v1571_v55, %v1579_v56  ;;  %v9706_v52 = vcombine.high %v1636_v27, %v1644_v25  ;;  %v1652_v55 = vld [vmem:[%s13741_s3 + $0x1c08] sm:$0xff] }
 0x1a8   :  { %7095 = vmatprep.subr.bf16.mxu0 %v9576_v2  ;;  %7259 = vmatprep.subr.bf16.mxu1 %v9578_v4  ;;  %v9656_v2 = vcombine.high %v1587_v37, %v1595_v39  ;;  %v9658_v4 = vcombine.high %v1588_v41, %v1596_v42  ;;  %v1660_v56 = vld [vmem:[%s13741_s3 + $0x1c48] sm:$0xff] }
 0x1a9   :  { %v695_v57 = vadd.f32 %v694_v45, %v693_v34  ;;  %v9722_v34 = vcombine.high %v1652_v55, %v1660_v56  ;;  %v1668_v37 = vld [vmem:[%s13741_s3 + $0x1c88] sm:$0xff]  ;;  %v9721_v45 = vcombine.low %v1652_v55, %v1660_v56 }
 0x1aa   :  { %v1676_v39 = vld [vmem:[%s13741_s3 + $0x1cc8] sm:$0xff] }
 0x1ab   :  { %7096 = vmatpush1.bf16.msra.mxu0 %v9575_v8  ;;  %7260 = vmatpush1.bf16.msra.mxu1 %v9577_v53  ;;  %v9657_v8 = vcombine.low %v1588_v41, %v1596_v42  ;;  %v9672_v53 = vcombine.high %v1603_v43, %v1611_v6  ;;  %v696_v12 = vrot.slane %v695_v57, 2  ;;  %v1684_v43 = vld [vmem:[%s13741_s3 + $0x1d08] sm:$0xff] }
 0x1ac   :  { %7106 = vmatprep.subr.bf16.mxu0 %v9592_v5  ;;  %7270 = vmatprep.subr.bf16.mxu1 %v9594_v11  ;;  %v1619_v5 = vld [vmem:[%s13741_s3 + $0x1b00] sm:$0xff]  ;;  %v1692_v6 = vld [vmem:[%s13741_s3 + $0x1d48] sm:$0xff] }
 0x1ad   :  { %v1627_v11 = vld [vmem:[%s13741_s3 + $0x1b40] sm:$0xff]  ;;  %v697_v29 = vadd.f32 %v696_v12, %v695_v57  ;;  %v9737_v57 = vcombine.low %v1668_v37, %v1676_v39  ;;  %v9753_v12 = vcombine.low %v1684_v43, %v1692_v6 }
 0x1ae   :  { %7098 = vmatmul.mubr.bf16.vlgmr.msra.gmra.mrb[8].mxu0 %v11005_v46  ;;  %7262 = vmatmul.mubr.bf16.vlgmr.msra.gmra.mrb[8].mxu1 %v11005_v46  ;;  %v9687_v50 = vcombine.low %v1619_v5, %v1627_v11 }
 0x1af   :  { %7107 = vmatpush1.bf16.msra.mxu0 %v9591_v61  ;;  %7271 = vmatpush1.bf16.msra.mxu1 %v9593_v21  ;;  %v9688_v61 = vcombine.high %v1619_v5, %v1627_v11  ;;  %v9690_v21 = vcombine.high %v1620_v38, %v1628_v40  ;;  %v698_v31 = vrot.slane %v697_v29, 1  ;;  %v1700_v5 = vld [vmem:[%s13741_s3 + $0x1d88] sm:$0xff] }
 0x1b0   :  { %7108 = vmatprep.subr.bf16.mxu0 %v9608_v44  ;;  %7272 = vmatprep.subr.bf16.mxu1 %v9610_v26  ;;  %v1635_v44 = vld [vmem:[%s13741_s3 + $0x1b80] sm:$0xff]  ;;  %v1708_v11 = vld [vmem:[%s13741_s3 + $0x1dc8] sm:$0xff] }
 0x1b1   :  { %7138 = vmatprep.mubr.bf16.mxu0 %v11010_v28  ;;  %7302 = vmatprep.mubr.bf16.mxu1 %v11010_v28  ;;  %v1643_v26 = vld [vmem:[%s13741_s3 + $0x1bc0] sm:$0xff]  ;;  %v699_v41 = vadd.f32 %v698_v31, %v697_v29 }
 0x1b2   :  { %v9703_v32 = vcombine.low %v1635_v44, %v1643_v26 }
 0x1b3   :  { %7109 = vmatpush1.bf16.msra.mxu0 %v9607_v51  ;;  %7273 = vmatpush1.bf16.msra.mxu1 %v9609_v19  ;;  %v9689_v51 = vcombine.low %v1620_v38, %v1628_v40  ;;  %v9704_v19 = vcombine.high %v1635_v44, %v1643_v26  ;;  %v713_v23 = vmul.f32 0.25, %v699_v41  ;;  %v1716_v44 = vld [vmem:[%s13741_s3 + $0x1e08] sm:$0xff]  ;;  %v1763_v41 = vld [vmem:[%s13741_s3 + $0x1f80] sm:$0xff] }
 0x1b4   :  { %7110 = vmatprep.subr.bf16.mxu0 %v9624_v17  ;;  %7274 = vmatprep.subr.bf16.mxu1 %v9626_v54  ;;  %v1651_v17 = vld [vmem:[%s13741_s3 + $0x1c00] sm:$0xff]  ;;  %v1724_v26 = vld [vmem:[%s13741_s3 + $0x1e48] sm:$0xff] }
 0x1b5   :  { %v1659_v54 = vld [vmem:[%s13741_s3 + $0x1c40] sm:$0xff]  ;;  %v721_v38 = vadd.f32 1e-05, %v713_v23  ;;  %v9785_v55 = vcombine.low %v1716_v44, %v1724_v26 }
 0x1b6   :  { %v9719_v42 = vcombine.low %v1651_v17, %v1659_v54 }
 0x1b7   :  { %7111 = vmatpush1.bf16.msra.mxu0 %v9623_v3  ;;  %7275 = vmatpush1.bf16.msra.mxu1 %v9625_v33  ;;  %v9705_v3 = vcombine.low %v1636_v27, %v1644_v25  ;;  %v9720_v33 = vcombine.high %v1651_v17, %v1659_v54  ;;  %9991 = vrsqrt.f32 %v721_v38  ;;  %v9769_v25 = vcombine.low %v1700_v5, %v1708_v11  ;;  %v1740_v17 = vld [vmem:[%s13741_s3 + $0x1ec8] sm:$0xff]  ;;  %v773_v38 = vld [vmem:[%s13741_s3 + $0x90] sm:$0xff] }
 0x1b8   :  { %7112 = vmatprep.subr.bf16.mxu0 %v9640_v35  ;;  %7276 = vmatprep.subr.bf16.mxu1 %v9642_v36  ;;  %v1667_v35 = vld [vmem:[%s13741_s3 + $0x1c80] sm:$0xff] }
 0x1b9   :  { %v1675_v36 = vld [vmem:[%s13741_s3 + $0x1cc0] sm:$0xff] }
 0x1ba   :  { %v9735_v7 = vcombine.low %v1667_v35, %v1675_v36 }
 0x1bb   :  { %7113 = vmatpush1.bf16.msra.mxu0 %v9639_v48  ;;  %7277 = vmatpush1.bf16.msra.mxu1 %v9641_v9  ;;  %v9736_v48 = vcombine.high %v1667_v35, %v1675_v36  ;;  %v9738_v9 = vcombine.high %v1668_v37, %v1676_v39 }
 0x1bc   :  { %7114 = vmatprep.subr.bf16.mxu0 %v9656_v2  ;;  %7278 = vmatprep.subr.bf16.mxu1 %v9658_v4  ;;  %v1683_v2 = vld [vmem:[%s13741_s3 + $0x1d00] sm:$0xff] }
 0x1bd   :  { %v1691_v4 = vld [vmem:[%s13741_s3 + $0x1d40] sm:$0xff] }
 0x1be   :  { %v9751_v40 = vcombine.low %v1683_v2, %v1691_v4 }
 0x1bf   :  { %7115 = vmatpush1.bf16.msra.mxu0 %v9655_v63  ;;  %7279 = vmatpush1.bf16.msra.mxu1 %v9657_v8  ;;  %v9752_v63 = vcombine.high %v1683_v2, %v1691_v4  ;;  %v9754_v8 = vcombine.high %v1684_v43, %v1692_v6 }
 0x1c0   :  { %7116 = vmatprep.subr.bf16.mxu0 %v9672_v53  ;;  %7280 = vmatprep.subr.bf16.mxu1 %v9674_v10  ;;  %v1699_v53 = vld [vmem:[%s13741_s3 + $0x1d80] sm:$0xff] }
 0x1c1   :  { %v1707_v10 = vld [vmem:[%s13741_s3 + $0x1dc0] sm:$0xff] }
 0x1c2   :  { %v9767_v27 = vcombine.low %v1699_v53, %v1707_v10 }
 0x1c3   :  { %7117 = vmatpush1.bf16.msra.mxu0 %v9671_v15  ;;  %7281 = vmatpush1.bf16.msra.mxu1 %v9673_v18  ;;  %v9768_v15 = vcombine.high %v1699_v53, %v1707_v10  ;;  %v9770_v18 = vcombine.high %v1700_v5, %v1708_v11 }
 0x1c4   :  { %7118 = vmatprep.subr.bf16.mxu0 %v9688_v61  ;;  %7282 = vmatprep.subr.bf16.mxu1 %v9690_v21  ;;  %v1715_v61 = vld [vmem:[%s13741_s3 + $0x1e00] sm:$0xff] }
 0x1c5   :  { %v1723_v21 = vld [vmem:[%s13741_s3 + $0x1e40] sm:$0xff] }
 0x1c6   :  { %v9784_v29 = vcombine.high %v1715_v61, %v1723_v21  ;;  %v9783_v54 = vcombine.low %v1715_v61, %v1723_v21 }
 0x1c7   :  { %7119 = vmatpush1.bf16.msra.mxu0 %v9687_v50  ;;  %7283 = vmatpush1.bf16.msra.mxu1 %v9689_v51  ;;  %v9786_v50 = vcombine.high %v1716_v44, %v1724_v26  ;;  %v1731_v51 = vld [vmem:[%s13741_s3 + $0x1e80] sm:$0xff] }
 0x1c8   :  { %7120 = vmatprep.subr.bf16.mxu0 %v9704_v19  ;;  %7284 = vmatprep.subr.bf16.mxu1 %v9706_v52  ;;  %v1739_v19 = vld [vmem:[%s13741_s3 + $0x1ec0] sm:$0xff]  ;;  %v1732_v52 = vld [vmem:[%s13741_s3 + $0x1e88] sm:$0xff] }
 0x1c9   :  { %v9800_v56 = vcombine.high %v1731_v51, %v1739_v19  ;;  %v9802_v31 = vcombine.high %v1732_v52, %v1740_v17  ;;  %v9799_v35 = vcombine.low %v1731_v51, %v1739_v19  ;;  %v9801_v36 = vcombine.low %v1732_v52, %v1740_v17 }
 0x1cb   :  { %7121 = vmatpush1.bf16.msra.mxu0 %v9703_v32  ;;  %7285 = vmatpush1.bf16.msra.mxu1 %v9705_v3  ;;  %v1747_v32 = vld [vmem:[%s13741_s3 + $0x1f00] sm:$0xff] }
 0x1cc   :  { %7122 = vmatprep.subr.bf16.mxu0 %v9720_v33  ;;  %7286 = vmatprep.subr.bf16.mxu1 %v9722_v34  ;;  %v1755_v3 = vld [vmem:[%s13741_s3 + $0x1f40] sm:$0xff]  ;;  %v1748_v33 = vld [vmem:[%s13741_s3 + $0x1f08] sm:$0xff] }
 0x1cd   :  { %v1756_v34 = vld [vmem:[%s13741_s3 + $0x1f48] sm:$0xff]  ;;  %v9816_v37 = vcombine.high %v1747_v32, %v1755_v3  ;;  %v9815_v2 = vcombine.low %v1747_v32, %v1755_v3 }
 0x1ce   :  { %v9818_v39 = vcombine.high %v1748_v33, %v1756_v34  ;;  %v9817_v4 = vcombine.low %v1748_v33, %v1756_v34 }
 0x1cf   :  { %7123 = vmatpush1.bf16.msra.mxu0 %v9719_v42  ;;  %7287 = vmatpush1.bf16.msra.mxu1 %v9721_v45  ;;  %v9992_v42 = vpop.eup %9991  ;;  %v1771_v45 = vld [vmem:[%s13741_s3 + $0x1fc0] sm:$0xff] }
 0x1d0   :  { %7124 = vmatprep.subr.bf16.mxu0 %v9736_v48  ;;  %7288 = vmatprep.subr.bf16.mxu1 %v9738_v9  ;;  %v1764_v48 = vld [vmem:[%s13741_s3 + $0x1f88] sm:$0xff]  ;;  %v737_v43 = vmul.f32 %v9992_v42, %v11003_v20  ;;  %v9832_v6 = vcombine.high %v1763_v41, %v1771_v45  ;;  %v766_v20 = vld [vmem:[%s13741_s3 + $0x58] sm:$0xff] }
 0x1d1   :  { %v1772_v9 = vld [vmem:[%s13741_s3 + $0x1fc8] sm:$0xff] }
 0x1d2   :  { %v9834_v23 = vcombine.high %v1764_v48, %v1772_v9  ;;  %v9833_v53 = vcombine.low %v1764_v48, %v1772_v9  ;;  %v745_v10 = vmax.f32 %v737_v43, 0.0  ;;  %v837_v9 = vld [vmem:[%s13741_s3 + $0x290] sm:$0xff]  ;;  %v846_v43 = vld [vmem:[%s13741_s3 + $0x2d8] sm:$0xff] }
 0x1d3   :  { %7125 = vmatpush1.bf16.msra.mxu0 %v9735_v7  ;;  %7289 = vmatpush1.bf16.msra.mxu1 %v9737_v57  ;;  %v757_v7 = vld [vmem:[%s13741_s3 + $0x10] sm:$0xff] }
 0x1d4   :  { %7126 = vmatprep.subr.bf16.mxu0 %v9752_v63  ;;  %7290 = vmatprep.subr.bf16.mxu1 %v9754_v8  ;;  %v765_v57 = vld [vmem:[%s13741_s3 + $0x50] sm:$0xff]  ;;  %v758_v63 = vld [vmem:[%s13741_s3 + $0x18] sm:$0xff]  ;;  %v9831_v8 = vcombine.low %v1763_v41, %v1771_v45  ;;  %v11209_v61 = vpack.c.bf16 %v745_v10, %v745_v10 }
 0x1d5   :  { %v8828_v5 = vcombine.high %v757_v7, %v765_v57  ;;  %v8830_v11 = vcombine.high %v758_v63, %v766_v20  ;;  %v8829_v21 = vcombine.low %v758_v63, %v766_v20  ;;  %v853_v63 = vld [vmem:[%s13741_s3 + $0x310] sm:$0xff] }
 0x1d6   :  { %v861_v20 = vld [vmem:[%s13741_s3 + $0x350] sm:$0xff] }
 0x1d7   :  { %7127 = vmatpush1.bf16.msra.mxu0 %v9751_v40  ;;  %7291 = vmatpush1.bf16.msra.mxu1 %v9753_v12  ;;  %v781_v40 = vld [vmem:[%s13741_s3 + $0xd0] sm:$0xff]  ;;  %v774_v12 = vld [vmem:[%s13741_s3 + $0x98] sm:$0xff] }
 0x1d8   :  { %7128 = vmatprep.subr.bf16.mxu0 %v9768_v15  ;;  %7292 = vmatprep.subr.bf16.mxu1 %v9770_v18  ;;  %v782_v15 = vld [vmem:[%s13741_s3 + $0xd8] sm:$0xff]  ;;  %v8827_v18 = vcombine.low %v757_v7, %v765_v57  ;;  %v8844_v44 = vcombine.high %v773_v38, %v781_v40  ;;  %v8843_v51 = vcombine.low %v773_v38, %v781_v40  ;;  %v869_v40 = vld [vmem:[%s13741_s3 + $0x390] sm:$0xff] }
 0x1d9   :  { %v8846_v26 = vcombine.high %v774_v12, %v782_v15  ;;  %v8845_v19 = vcombine.low %v774_v12, %v782_v15  ;;  %v877_v12 = vld [vmem:[%s13741_s3 + $0x3d0] sm:$0xff]  ;;  %v870_v15 = vld [vmem:[%s13741_s3 + $0x398] sm:$0xff] }
 0x1db   :  { %7129 = vmatpush1.bf16.msra.mxu0 %v9767_v27  ;;  %7293 = vmatpush1.bf16.msra.mxu1 %v9769_v25  ;;  %v789_v27 = vld [vmem:[%s13741_s3 + $0x110] sm:$0xff] }
 0x1dc   :  { %7130 = vmatprep.subr.bf16.mxu0 %v9784_v29  ;;  %7294 = vmatprep.subr.bf16.mxu1 %v9786_v50  ;;  %v797_v25 = vld [vmem:[%s13741_s3 + $0x150] sm:$0xff]  ;;  %v790_v29 = vld [vmem:[%s13741_s3 + $0x118] sm:$0xff] }
 0x1dd   :  { %v798_v50 = vld [vmem:[%s13741_s3 + $0x158] sm:$0xff]  ;;  %v8860_v52 = vcombine.high %v789_v27, %v797_v25  ;;  %v8859_v32 = vcombine.low %v789_v27, %v797_v25  ;;  %v885_v25 = vld [vmem:[%s13741_s3 + $0x410] sm:$0xff] }
 0x1de   :  { %v8862_v17 = vcombine.high %v790_v29, %v798_v50  ;;  %v8861_v3 = vcombine.low %v790_v29, %v798_v50  ;;  %v893_v29 = vld [vmem:[%s13741_s3 + $0x450] sm:$0xff]  ;;  %v886_v50 = vld [vmem:[%s13741_s3 + $0x418] sm:$0xff] }
 0x1df   :  { %7131 = vmatpush1.bf16.msra.mxu0 %v9783_v54  ;;  %7295 = vmatpush1.bf16.msra.mxu1 %v9785_v55  ;;  %v805_v54 = vld [vmem:[%s13741_s3 + $0x190] sm:$0xff] }
 0x1e0   :  { %7132 = vmatprep.subr.bf16.mxu0 %v9800_v56  ;;  %7296 = vmatprep.subr.bf16.mxu1 %v9802_v31  ;;  %v813_v55 = vld [vmem:[%s13741_s3 + $0x1d0] sm:$0xff]  ;;  %v806_v56 = vld [vmem:[%s13741_s3 + $0x198] sm:$0xff] }
 0x1e1   :  { %v814_v31 = vld [vmem:[%s13741_s3 + $0x1d8] sm:$0xff]  ;;  %v8876_v33 = vcombine.high %v805_v54, %v813_v55  ;;  %v8875_v41 = vcombine.low %v805_v54, %v813_v55  ;;  %v901_v55 = vld [vmem:[%s13741_s3 + $0x490] sm:$0xff] }
 0x1e2   :  { %v8878_v34 = vcombine.high %v806_v56, %v814_v31  ;;  %v8877_v42 = vcombine.low %v806_v56, %v814_v31  ;;  %v909_v56 = vld [vmem:[%s13741_s3 + $0x4d0] sm:$0xff]  ;;  %v902_v31 = vld [vmem:[%s13741_s3 + $0x498] sm:$0xff] }
 0x1e3   :  { %7133 = vmatpush1.bf16.msra.mxu0 %v9799_v35  ;;  %7297 = vmatpush1.bf16.msra.mxu1 %v9801_v36  ;;  %v821_v35 = vld [vmem:[%s13741_s3 + $0x210] sm:$0xff] }
 0x1e4   :  { %7134 = vmatprep.subr.bf16.mxu0 %v9816_v37  ;;  %7298 = vmatprep.subr.bf16.mxu1 %v9818_v39  ;;  %v829_v36 = vld [vmem:[%s13741_s3 + $0x250] sm:$0xff]  ;;  %v822_v37 = vld [vmem:[%s13741_s3 + $0x218] sm:$0xff] }
 0x1e5   :  { %v830_v39 = vld [vmem:[%s13741_s3 + $0x258] sm:$0xff]  ;;  %v8892_v45 = vcombine.high %v821_v35, %v829_v36 }
 0x1e6   :  { %v8894_v48 = vcombine.high %v822_v37, %v830_v39 }
 0x1e7   :  { %7135 = vmatpush1.bf16.msra.mxu0 %v9815_v2  ;;  %7299 = vmatpush1.bf16.msra.mxu1 %v9817_v4  ;;  %v845_v2 = vld [vmem:[%s13741_s3 + $0x2d0] sm:$0xff]  ;;  %v838_v4 = vld [vmem:[%s13741_s3 + $0x298] sm:$0xff] }
 0x1e8   :  { %7136 = vmatprep.subr.bf16.mxu0 %v9832_v6  ;;  %7300 = vmatprep.subr.bf16.mxu1 %v9834_v23  ;;  %v8891_v6 = vcombine.low %v821_v35, %v829_v36  ;;  %v8893_v23 = vcombine.low %v822_v37, %v830_v39  ;;  %v8908_v7 = vcombine.high %v837_v9, %v845_v2  ;;  %v917_v36 = vld [vmem:[%s13741_s3 + $0x510] sm:$0xff]  ;;  %v918_v39 = vld [vmem:[%s13741_s3 + $0x518] sm:$0xff] }
 0x1e9   :  { %v8910_v57 = vcombine.high %v838_v4, %v846_v43  ;;  %v8907_v10 = vcombine.low %v837_v9, %v845_v2  ;;  %v925_v37 = vld [vmem:[%s13741_s3 + $0x550] sm:$0xff] }
 0x1ea   :  { %v933_v2 = vld [vmem:[%s13741_s3 + $0x590] sm:$0xff] }
 0x1eb   :  { %7137 = vmatpush1.bf16.msra.mxu0 %v9831_v8  ;;  %7301 = vmatpush1.bf16.msra.mxu1 %v9833_v53  ;;  %v854_v8 = vld [vmem:[%s13741_s3 + $0x318] sm:$0xff] }
 0x1ec   :  { %7311 = vmatprep.subr.bf16.mxu0 %v8828_v5  ;;  %7475 = vmatprep.subr.bf16.mxu1 %v8830_v11  ;;  %v862_v53 = vld [vmem:[%s13741_s3 + $0x358] sm:$0xff]  ;;  %v8909_v5 = vcombine.low %v838_v4, %v846_v43  ;;  %v8924_v11 = vcombine.high %v853_v63, %v861_v20  ;;  %v941_v4 = vld [vmem:[%s13741_s3 + $0x5d0] sm:$0xff] }
 0x1ed   :  { %v8926_v38 = vcombine.high %v854_v8, %v862_v53  ;;  %v934_v43 = vld [vmem:[%s13741_s3 + $0x598] sm:$0xff] }
 0x1ee   :  { %7139 = vmatmul.mubr.bf16.vlgmr.msra.gmra.mrb[8].mxu0 %v11209_v61  ;;  %7303 = vmatmul.mubr.bf16.vlgmr.msra.gmra.mrb[8].mxu1 %v11209_v61 }
 0x1ef   :  { %7312 = vmatpush1.bf16.msra.mxu0 %v8827_v18  ;;  %7343 = vmatprep.mubr.bf16.mxu0 %v10535_v13  ;;  %v878_v18 = vld [vmem:[%s13741_s3 + $0x3d8] sm:$0xff] }
 0x1f0   :  { %7476 = vmatpush1.bf16.msra.mxu1 %v8829_v21  ;;  %7507 = vmatprep.mubr.bf16.mxu1 %v10535_v13  ;;  %v8923_v21 = vcombine.low %v853_v63, %v861_v20  ;;  %v8942_v27 = vcombine.high %v870_v15, %v878_v18  ;;  %v949_v20 = vld [vmem:[%s13741_s3 + $0x610] sm:$0xff] }
 0x1f1   :  { %7313 = vmatprep.subr.bf16.mxu0 %v8844_v44  ;;  %7477 = vmatprep.subr.bf16.mxu1 %v8846_v26  ;;  %v8925_v44 = vcombine.low %v854_v8, %v862_v53  ;;  %v8940_v26 = vcombine.high %v869_v40, %v877_v12  ;;  %v957_v8 = vld [vmem:[%s13741_s3 + $0x650] sm:$0xff]  ;;  %v950_v53 = vld [vmem:[%s13741_s3 + $0x618] sm:$0xff] }
 0x1f3   :  { %7314 = vmatpush1.bf16.msra.mxu0 %v8843_v51  ;;  %v894_v51 = vld [vmem:[%s13741_s3 + $0x458] sm:$0xff] }
 0x1f4   :  { %7478 = vmatpush1.bf16.msra.mxu1 %v8845_v19  ;;  %7315 = vmatprep.subr.bf16.mxu0 %v8860_v52  ;;  %v8939_v19 = vcombine.low %v869_v40, %v877_v12  ;;  %v8941_v52 = vcombine.low %v870_v15, %v878_v18  ;;  %v8958_v54 = vcombine.high %v886_v50, %v894_v51  ;;  %v965_v12 = vld [vmem:[%s13741_s3 + $0x690] sm:$0xff]  ;;  %v966_v18 = vld [vmem:[%s13741_s3 + $0x698] sm:$0xff] }
 0x1f5   :  { %7479 = vmatprep.subr.bf16.mxu1 %v8862_v17  ;;  %v8956_v17 = vcombine.high %v885_v25, %v893_v29  ;;  %v973_v15 = vld [vmem:[%s13741_s3 + $0x6d0] sm:$0xff] }
 0x1f7   :  { %7316 = vmatpush1.bf16.msra.mxu0 %v8859_v32  ;;  %v910_v32 = vld [vmem:[%s13741_s3 + $0x4d8] sm:$0xff] }
 0x1f8   :  { %7480 = vmatpush1.bf16.msra.mxu1 %v8861_v3  ;;  %7317 = vmatprep.subr.bf16.mxu0 %v8876_v33  ;;  %v8955_v3 = vcombine.low %v885_v25, %v893_v29  ;;  %v8957_v33 = vcombine.low %v886_v50, %v894_v51  ;;  %v8974_v35 = vcombine.high %v902_v31, %v910_v32  ;;  %v981_v29 = vld [vmem:[%s13741_s3 + $0x710] sm:$0xff]  ;;  %v982_v51 = vld [vmem:[%s13741_s3 + $0x718] sm:$0xff] }
 0x1f9   :  { %7481 = vmatprep.subr.bf16.mxu1 %v8878_v34  ;;  %v8972_v34 = vcombine.high %v901_v55, %v909_v56  ;;  %v989_v50 = vld [vmem:[%s13741_s3 + $0x750] sm:$0xff] }
 0x1fb   :  { %7318 = vmatpush1.bf16.msra.mxu0 %v8875_v41  ;;  %v926_v41 = vld [vmem:[%s13741_s3 + $0x558] sm:$0xff] }
 0x1fc   :  { %7482 = vmatpush1.bf16.msra.mxu1 %v8877_v42  ;;  %7319 = vmatprep.subr.bf16.mxu0 %v8892_v45  ;;  %v8971_v42 = vcombine.low %v901_v55, %v909_v56  ;;  %v8973_v45 = vcombine.low %v902_v31, %v910_v32  ;;  %v8990_v9 = vcombine.high %v918_v39, %v926_v41  ;;  %v997_v56 = vld [vmem:[%s13741_s3 + $0x790] sm:$0xff]  ;;  %v998_v32 = vld [vmem:[%s13741_s3 + $0x798] sm:$0xff] }
 0x1fd   :  { %7483 = vmatprep.subr.bf16.mxu1 %v8894_v48  ;;  %v8988_v48 = vcombine.high %v917_v36, %v925_v37  ;;  %v1005_v31 = vld [vmem:[%s13741_s3 + $0x7d0] sm:$0xff] }
 0x1ff   :  { %7320 = vmatpush1.bf16.msra.mxu0 %v8891_v6  ;;  %v942_v6 = vld [vmem:[%s13741_s3 + $0x5d8] sm:$0xff] }
 0x200   :  { %7484 = vmatpush1.bf16.msra.mxu1 %v8893_v23  ;;  %7321 = vmatprep.subr.bf16.mxu0 %v8908_v7  ;;  %v8987_v23 = vcombine.low %v917_v36, %v925_v37  ;;  %v8989_v7 = vcombine.low %v918_v39, %v926_v41  ;;  %v9006_v63 = vcombine.high %v934_v43, %v942_v6  ;;  %v1013_v37 = vld [vmem:[%s13741_s3 + $0x810] sm:$0xff]  ;;  %v1014_v41 = vld [vmem:[%s13741_s3 + $0x818] sm:$0xff] }
 0x201   :  { %7485 = vmatprep.subr.bf16.mxu1 %v8910_v57  ;;  %v9004_v57 = vcombine.high %v933_v2, %v941_v4  ;;  %v1021_v39 = vld [vmem:[%s13741_s3 + $0x850] sm:$0xff] }
 0x203   :  { %7322 = vmatpush1.bf16.msra.mxu0 %v8907_v10  ;;  %v958_v10 = vld [vmem:[%s13741_s3 + $0x658] sm:$0xff] }
 0x204   :  { %7486 = vmatpush1.bf16.msra.mxu1 %v8909_v5  ;;  %7323 = vmatprep.subr.bf16.mxu0 %v8924_v11  ;;  %v9003_v5 = vcombine.low %v933_v2, %v941_v4  ;;  %v9005_v11 = vcombine.low %v934_v43, %v942_v6  ;;  %v9022_v40 = vcombine.high %v950_v53, %v958_v10  ;;  %v1029_v4 = vld [vmem:[%s13741_s3 + $0x890] sm:$0xff] }
 0x205   :  { %7487 = vmatprep.subr.bf16.mxu1 %v8926_v38  ;;  %v9020_v38 = vcombine.high %v949_v20, %v957_v8  ;;  %v1037_v43 = vld [vmem:[%s13741_s3 + $0x8d0] sm:$0xff]  ;;  %v9083_v6 = vcombine.low %v1013_v37, %v1021_v39 }
 0x207   :  { %7324 = vmatpush1.bf16.msra.mxu0 %v8923_v21  ;;  %v974_v21 = vld [vmem:[%s13741_s3 + $0x6d8] sm:$0xff] }
 0x208   :  { %7488 = vmatpush1.bf16.msra.mxu1 %v8925_v44  ;;  %7325 = vmatprep.subr.bf16.mxu0 %v8940_v26  ;;  %v9019_v44 = vcombine.low %v949_v20, %v957_v8  ;;  %v9021_v26 = vcombine.low %v950_v53, %v958_v10  ;;  %v9038_v25 = vcombine.high %v966_v18, %v974_v21  ;;  %v1045_v20 = vld [vmem:[%s13741_s3 + $0x910] sm:$0xff]  ;;  %v1046_v10 = vld [vmem:[%s13741_s3 + $0x918] sm:$0xff] }
 0x209   :  { %7489 = vmatprep.subr.bf16.mxu1 %v8942_v27  ;;  %v9036_v27 = vcombine.high %v965_v12, %v973_v15  ;;  %v1053_v8 = vld [vmem:[%s13741_s3 + $0x950] sm:$0xff] }
 0x20b   :  { %7326 = vmatpush1.bf16.msra.mxu0 %v8939_v19  ;;  %v990_v19 = vld [vmem:[%s13741_s3 + $0x758] sm:$0xff] }
 0x20c   :  { %7490 = vmatpush1.bf16.msra.mxu1 %v8941_v52  ;;  %7327 = vmatprep.subr.bf16.mxu0 %v8956_v17  ;;  %v9035_v52 = vcombine.low %v965_v12, %v973_v15  ;;  %v9037_v17 = vcombine.low %v966_v18, %v974_v21  ;;  %v9054_v55 = vcombine.high %v982_v51, %v990_v19  ;;  %v1061_v15 = vld [vmem:[%s13741_s3 + $0x990] sm:$0xff]  ;;  %v1062_v21 = vld [vmem:[%s13741_s3 + $0x998] sm:$0xff] }
 0x20d   :  { %7491 = vmatprep.subr.bf16.mxu1 %v8958_v54  ;;  %v9052_v54 = vcombine.high %v981_v29, %v989_v50  ;;  %v1069_v18 = vld [vmem:[%s13741_s3 + $0x9d0] sm:$0xff] }
 0x20f   :  { %7328 = vmatpush1.bf16.msra.mxu0 %v8955_v3  ;;  %v1006_v3 = vld [vmem:[%s13741_s3 + $0x7d8] sm:$0xff] }
 0x210   :  { %7492 = vmatpush1.bf16.msra.mxu1 %v8957_v33  ;;  %7329 = vmatprep.subr.bf16.mxu0 %v8972_v34  ;;  %v9051_v33 = vcombine.low %v981_v29, %v989_v50  ;;  %v9053_v34 = vcombine.low %v982_v51, %v990_v19  ;;  %v9070_v36 = vcombine.high %v998_v32, %v1006_v3  ;;  %v1077_v50 = vld [vmem:[%s13741_s3 + $0xa10] sm:$0xff]  ;;  %v1078_v19 = vld [vmem:[%s13741_s3 + $0xa18] sm:$0xff] }
 0x211   :  { %7493 = vmatprep.subr.bf16.mxu1 %v8974_v35  ;;  %v9068_v35 = vcombine.high %v997_v56, %v1005_v31  ;;  %v1085_v51 = vld [vmem:[%s13741_s3 + $0xa50] sm:$0xff] }
 0x213   :  { %7330 = vmatpush1.bf16.msra.mxu0 %v8971_v42  ;;  %v1022_v42 = vld [vmem:[%s13741_s3 + $0x858] sm:$0xff] }
 0x214   :  { %7494 = vmatpush1.bf16.msra.mxu1 %v8973_v45  ;;  %7331 = vmatprep.subr.bf16.mxu0 %v8988_v48  ;;  %v9067_v45 = vcombine.low %v997_v56, %v1005_v31  ;;  %v9069_v48 = vcombine.low %v998_v32, %v1006_v3  ;;  %v9086_v2 = vcombine.high %v1014_v41, %v1022_v42  ;;  %v1093_v31 = vld [vmem:[%s13741_s3 + $0xa90] sm:$0xff]  ;;  %v1094_v3 = vld [vmem:[%s13741_s3 + $0xa98] sm:$0xff] }
 0x215   :  { %7495 = vmatprep.subr.bf16.mxu1 %v8990_v9  ;;  %v9084_v9 = vcombine.high %v1013_v37, %v1021_v39  ;;  %v1101_v32 = vld [vmem:[%s13741_s3 + $0xad0] sm:$0xff] }
 0x216   :  { %v1109_v39 = vld [vmem:[%s13741_s3 + $0xb10] sm:$0xff] }
 0x217   :  { %7332 = vmatpush1.bf16.msra.mxu0 %v8987_v23  ;;  %v1030_v23 = vld [vmem:[%s13741_s3 + $0x898] sm:$0xff] }
 0x218   :  { %7496 = vmatpush1.bf16.msra.mxu1 %v8989_v7  ;;  %7333 = vmatprep.subr.bf16.mxu0 %v9004_v57  ;;  %v1038_v7 = vld [vmem:[%s13741_s3 + $0x8d8] sm:$0xff]  ;;  %v9085_v57 = vcombine.low %v1014_v41, %v1022_v42  ;;  %v1117_v41 = vld [vmem:[%s13741_s3 + $0xb50] sm:$0xff] }
 0x219   :  { %7497 = vmatprep.subr.bf16.mxu1 %v9006_v63  ;;  %v9100_v63 = vcombine.high %v1029_v4, %v1037_v43  ;;  %v9102_v53 = vcombine.high %v1030_v23, %v1038_v7  ;;  %v1110_v42 = vld [vmem:[%s13741_s3 + $0xb18] sm:$0xff] }
 0x21b   :  { %7334 = vmatpush1.bf16.msra.mxu0 %v9003_v5  ;;  %v1054_v5 = vld [vmem:[%s13741_s3 + $0x958] sm:$0xff] }
 0x21c   :  { %7498 = vmatpush1.bf16.msra.mxu1 %v9005_v11  ;;  %7335 = vmatprep.subr.bf16.mxu0 %v9020_v38  ;;  %v9099_v11 = vcombine.low %v1029_v4, %v1037_v43  ;;  %v9101_v38 = vcombine.low %v1030_v23, %v1038_v7  ;;  %v9118_v12 = vcombine.high %v1046_v10, %v1054_v5  ;;  %v1125_v43 = vld [vmem:[%s13741_s3 + $0xb90] sm:$0xff]  ;;  %v1126_v23 = vld [vmem:[%s13741_s3 + $0xb98] sm:$0xff] }
 0x21d   :  { %7499 = vmatprep.subr.bf16.mxu1 %v9022_v40  ;;  %v9116_v40 = vcombine.high %v1045_v20, %v1053_v8  ;;  %v1134_v7 = vld [vmem:[%s13741_s3 + $0xbd8] sm:$0xff] }
 0x21f   :  { %7336 = vmatpush1.bf16.msra.mxu0 %v9019_v44  ;;  %v1070_v44 = vld [vmem:[%s13741_s3 + $0x9d8] sm:$0xff] }
 0x220   :  { %7500 = vmatpush1.bf16.msra.mxu1 %v9021_v26  ;;  %7337 = vmatprep.subr.bf16.mxu0 %v9036_v27  ;;  %v9115_v26 = vcombine.low %v1045_v20, %v1053_v8  ;;  %v9117_v27 = vcombine.low %v1046_v10, %v1054_v5  ;;  %v9134_v29 = vcombine.high %v1062_v21, %v1070_v44  ;;  %v1149_v10 = vld [vmem:[%s13741_s3 + $0xc50] sm:$0xff]  ;;  %v1142_v5 = vld [vmem:[%s13741_s3 + $0xc18] sm:$0xff] }
 0x221   :  { %7501 = vmatprep.subr.bf16.mxu1 %v9038_v25  ;;  %v9132_v25 = vcombine.high %v1061_v15, %v1069_v18  ;;  %v9198_v8 = vcombine.high %v1126_v23, %v1134_v7 }
 0x223   :  { %7338 = vmatpush1.bf16.msra.mxu0 %v9035_v52  ;;  %v1086_v52 = vld [vmem:[%s13741_s3 + $0xa58] sm:$0xff] }
 0x224   :  { %7502 = vmatpush1.bf16.msra.mxu1 %v9037_v17  ;;  %7339 = vmatprep.subr.bf16.mxu0 %v9052_v54  ;;  %v9131_v17 = vcombine.low %v1061_v15, %v1069_v18  ;;  %v9133_v54 = vcombine.low %v1062_v21, %v1070_v44  ;;  %v9150_v56 = vcombine.high %v1078_v19, %v1086_v52  ;;  %v1157_v18 = vld [vmem:[%s13741_s3 + $0xc90] sm:$0xff]  ;;  %v1158_v44 = vld [vmem:[%s13741_s3 + $0xc98] sm:$0xff] }
 0x225   :  { %7503 = vmatprep.subr.bf16.mxu1 %v9054_v55  ;;  %v9148_v55 = vcombine.high %v1077_v50, %v1085_v51  ;;  %v1165_v21 = vld [vmem:[%s13741_s3 + $0xcd0] sm:$0xff] }
 0x227   :  { %7340 = vmatpush1.bf16.msra.mxu0 %v9051_v33  ;;  %v1102_v33 = vld [vmem:[%s13741_s3 + $0xad8] sm:$0xff] }
 0x228   :  { %7504 = vmatpush1.bf16.msra.mxu1 %v9053_v34  ;;  %7341 = vmatprep.subr.bf16.mxu0 %v9068_v35  ;;  %v9147_v34 = vcombine.low %v1077_v50, %v1085_v51  ;;  %v9149_v35 = vcombine.low %v1078_v19, %v1086_v52  ;;  %v9166_v37 = vcombine.high %v1094_v3, %v1102_v33  ;;  %v1173_v51 = vld [vmem:[%s13741_s3 + $0xd10] sm:$0xff]  ;;  %v1174_v52 = vld [vmem:[%s13741_s3 + $0xd18] sm:$0xff] }
 0x229   :  { %7505 = vmatprep.subr.bf16.mxu1 %v9070_v36  ;;  %v9164_v36 = vcombine.high %v1093_v31, %v1101_v32  ;;  %v1181_v19 = vld [vmem:[%s13741_s3 + $0xd50] sm:$0xff] }
 0x22b   :  { %7342 = vmatpush1.bf16.msra.mxu0 %v9067_v45  ;;  %v1118_v45 = vld [vmem:[%s13741_s3 + $0xb58] sm:$0xff] }
 0x22c   :  { %7506 = vmatpush1.bf16.msra.mxu1 %v9069_v48  ;;  %7352 = vmatprep.subr.bf16.mxu0 %v9084_v9  ;;  %v9163_v48 = vcombine.low %v1093_v31, %v1101_v32  ;;  %v9165_v9 = vcombine.low %v1094_v3, %v1102_v33  ;;  %v9182_v4 = vcombine.high %v1110_v42, %v1118_v45  ;;  %v1189_v32 = vld [vmem:[%s13741_s3 + $0xd90] sm:$0xff]  ;;  %v1190_v33 = vld [vmem:[%s13741_s3 + $0xd98] sm:$0xff] }
 0x22d   :  { %7516 = vmatprep.subr.bf16.mxu1 %v9086_v2  ;;  %v9180_v2 = vcombine.high %v1109_v39, %v1117_v41  ;;  %v1197_v3 = vld [vmem:[%s13741_s3 + $0xdd0] sm:$0xff] }
 0x22e   :  { %7344 = vmatmul.mubr.bf16.vlgmr.msra.gmra.mrb[12].mxu0 %v10537_v16 }
 0x22f   :  { %7508 = vmatmul.mubr.bf16.vlgmr.msra.gmra.mrb[12].mxu1 %v10537_v16  ;;  %7353 = vmatpush1.bf16.msra.mxu0 %v9083_v6  ;;  %v1133_v6 = vld [vmem:[%s13741_s3 + $0xbd0] sm:$0xff] }
 0x230   :  { %7384 = vmatprep.mubr.bf16.mxu0 %v10558_v24  ;;  %7517 = vmatpush1.bf16.msra.mxu1 %v9085_v57  ;;  %v9179_v57 = vcombine.low %v1109_v39, %v1117_v41  ;;  %v9196_v20 = vcombine.high %v1125_v43, %v1133_v6  ;;  %v1205_v41 = vld [vmem:[%s13741_s3 + $0xe10] sm:$0xff] }
 0x231   :  { %7548 = vmatprep.mubr.bf16.mxu1 %v10558_v24  ;;  %7354 = vmatprep.subr.bf16.mxu0 %v9100_v63  ;;  %v9181_v63 = vcombine.low %v1110_v42, %v1118_v45  ;;  %v1213_v42 = vld [vmem:[%s13741_s3 + $0xe50] sm:$0xff]  ;;  %v1206_v45 = vld [vmem:[%s13741_s3 + $0xe18] sm:$0xff] }
 0x232   :  { %7518 = vmatprep.subr.bf16.mxu1 %v9102_v53  ;;  %v1141_v53 = vld [vmem:[%s13741_s3 + $0xc10] sm:$0xff] }
 0x233   :  { %7355 = vmatpush1.bf16.msra.mxu0 %v9099_v11  ;;  %v1150_v11 = vld [vmem:[%s13741_s3 + $0xc58] sm:$0xff] }
 0x234   :  { %7519 = vmatpush1.bf16.msra.mxu1 %v9101_v38  ;;  %7356 = vmatprep.subr.bf16.mxu0 %v9116_v40  ;;  %v9195_v38 = vcombine.low %v1125_v43, %v1133_v6  ;;  %v9197_v40 = vcombine.low %v1126_v23, %v1134_v7  ;;  %v9214_v15 = vcombine.high %v1142_v5, %v1150_v11  ;;  %v1221_v6 = vld [vmem:[%s13741_s3 + $0xe90] sm:$0xff]  ;;  %v1222_v7 = vld [vmem:[%s13741_s3 + $0xe98] sm:$0xff] }
 0x235   :  { %7520 = vmatprep.subr.bf16.mxu1 %v9118_v12  ;;  %v9212_v12 = vcombine.high %v1141_v53, %v1149_v10  ;;  %v1229_v23 = vld [vmem:[%s13741_s3 + $0xed0] sm:$0xff] }
 0x237   :  { %7357 = vmatpush1.bf16.msra.mxu0 %v9115_v26  ;;  %v1166_v26 = vld [vmem:[%s13741_s3 + $0xcd8] sm:$0xff] }
 0x238   :  { %7521 = vmatpush1.bf16.msra.mxu1 %v9117_v27  ;;  %7358 = vmatprep.subr.bf16.mxu0 %v9132_v25  ;;  %v9211_v27 = vcombine.low %v1141_v53, %v1149_v10  ;;  %v9213_v25 = vcombine.low %v1142_v5, %v1150_v11  ;;  %v9230_v50 = vcombine.high %v1158_v44, %v1166_v26  ;;  %v1237_v10 = vld [vmem:[%s13741_s3 + $0xf10] sm:$0xff]  ;;  %v1238_v11 = vld [vmem:[%s13741_s3 + $0xf18] sm:$0xff] }
 0x239   :  { %7522 = vmatprep.subr.bf16.mxu1 %v9134_v29  ;;  %v9228_v29 = vcombine.high %v1157_v18, %v1165_v21  ;;  %v1245_v5 = vld [vmem:[%s13741_s3 + $0xf50] sm:$0xff] }
 0x23b   :  { %7359 = vmatpush1.bf16.msra.mxu0 %v9131_v17  ;;  %v1182_v17 = vld [vmem:[%s13741_s3 + $0xd58] sm:$0xff] }
 0x23c   :  { %7523 = vmatpush1.bf16.msra.mxu1 %v9133_v54  ;;  %7360 = vmatprep.subr.bf16.mxu0 %v9148_v55  ;;  %v9227_v54 = vcombine.low %v1157_v18, %v1165_v21  ;;  %v9229_v55 = vcombine.low %v1158_v44, %v1166_v26  ;;  %v9246_v31 = vcombine.high %v1174_v52, %v1182_v17  ;;  %v1253_v21 = vld [vmem:[%s13741_s3 + $0xf90] sm:$0xff]  ;;  %v1254_v26 = vld [vmem:[%s13741_s3 + $0xf98] sm:$0xff] }
 0x23d   :  { %7524 = vmatprep.subr.bf16.mxu1 %v9150_v56  ;;  %v9244_v56 = vcombine.high %v1173_v51, %v1181_v19  ;;  %v1261_v44 = vld [vmem:[%s13741_s3 + $0xfd0] sm:$0xff] }
 0x23f   :  { %7361 = vmatpush1.bf16.msra.mxu0 %v9147_v34  ;;  %v1198_v34 = vld [vmem:[%s13741_s3 + $0xdd8] sm:$0xff] }
 0x240   :  { %7525 = vmatpush1.bf16.msra.mxu1 %v9149_v35  ;;  %7362 = vmatprep.subr.bf16.mxu0 %v9164_v36  ;;  %v9243_v35 = vcombine.low %v1173_v51, %v1181_v19  ;;  %v9245_v36 = vcombine.low %v1174_v52, %v1182_v17  ;;  %v9262_v39 = vcombine.high %v1190_v33, %v1198_v34  ;;  %v1269_v19 = vld [vmem:[%s13741_s3 + $0x1010] sm:$0xff]  ;;  %v1270_v17 = vld [vmem:[%s13741_s3 + $0x1018] sm:$0xff] }
 0x241   :  { %7526 = vmatprep.subr.bf16.mxu1 %v9166_v37  ;;  %v9260_v37 = vcombine.high %v1189_v32, %v1197_v3  ;;  %v1277_v52 = vld [vmem:[%s13741_s3 + $0x1050] sm:$0xff] }
 0x243   :  { %7363 = vmatpush1.bf16.msra.mxu0 %v9163_v48  ;;  %v1214_v48 = vld [vmem:[%s13741_s3 + $0xe58] sm:$0xff] }
 0x244   :  { %7527 = vmatpush1.bf16.msra.mxu1 %v9165_v9  ;;  %7364 = vmatprep.subr.bf16.mxu0 %v9180_v2  ;;  %v9259_v9 = vcombine.low %v1189_v32, %v1197_v3  ;;  %v9261_v2 = vcombine.low %v1190_v33, %v1198_v34  ;;  %v9278_v43 = vcombine.high %v1206_v45, %v1214_v48  ;;  %v1285_v3 = vld [vmem:[%s13741_s3 + $0x1090] sm:$0xff] }
 0x245   :  { %7528 = vmatprep.subr.bf16.mxu1 %v9182_v4  ;;  %v9276_v4 = vcombine.high %v1205_v41, %v1213_v42  ;;  %v1293_v33 = vld [vmem:[%s13741_s3 + $0x10d0] sm:$0xff]  ;;  %v9339_v34 = vcombine.low %v1269_v19, %v1277_v52 }
 0x247   :  { %7365 = vmatpush1.bf16.msra.mxu0 %v9179_v57  ;;  %v1230_v57 = vld [vmem:[%s13741_s3 + $0xed8] sm:$0xff] }
 0x248   :  { %7529 = vmatpush1.bf16.msra.mxu1 %v9181_v63  ;;  %7366 = vmatprep.subr.bf16.mxu0 %v9196_v20  ;;  %v9275_v63 = vcombine.low %v1205_v41, %v1213_v42  ;;  %v9277_v20 = vcombine.low %v1206_v45, %v1214_v48  ;;  %v9294_v53 = vcombine.high %v1222_v7, %v1230_v57  ;;  %v1301_v41 = vld [vmem:[%s13741_s3 + $0x1110] sm:$0xff]  ;;  %v1302_v48 = vld [vmem:[%s13741_s3 + $0x1118] sm:$0xff] }
 0x249   :  { %7530 = vmatprep.subr.bf16.mxu1 %v9198_v8  ;;  %v9292_v8 = vcombine.high %v1221_v6, %v1229_v23  ;;  %v1309_v42 = vld [vmem:[%s13741_s3 + $0x1150] sm:$0xff] }
 0x24b   :  { %7367 = vmatpush1.bf16.msra.mxu0 %v9195_v38  ;;  %v1246_v38 = vld [vmem:[%s13741_s3 + $0xf58] sm:$0xff] }
 0x24c   :  { %7531 = vmatpush1.bf16.msra.mxu1 %v9197_v40  ;;  %7368 = vmatprep.subr.bf16.mxu0 %v9212_v12  ;;  %v9291_v40 = vcombine.low %v1221_v6, %v1229_v23  ;;  %v9293_v12 = vcombine.low %v1222_v7, %v1230_v57  ;;  %v9310_v18 = vcombine.high %v1238_v11, %v1246_v38  ;;  %v1317_v23 = vld [vmem:[%s13741_s3 + $0x1190] sm:$0xff]  ;;  %v1318_v57 = vld [vmem:[%s13741_s3 + $0x1198] sm:$0xff] }
 0x24d   :  { %7532 = vmatprep.subr.bf16.mxu1 %v9214_v15  ;;  %v9308_v15 = vcombine.high %v1237_v10, %v1245_v5  ;;  %v1325_v7 = vld [vmem:[%s13741_s3 + $0x11d0] sm:$0xff] }
 0x24f   :  { %7369 = vmatpush1.bf16.msra.mxu0 %v9211_v27  ;;  %v1262_v27 = vld [vmem:[%s13741_s3 + $0xfd8] sm:$0xff] }
 0x250   :  { %7533 = vmatpush1.bf16.msra.mxu1 %v9213_v25  ;;  %7370 = vmatprep.subr.bf16.mxu0 %v9228_v29  ;;  %v9307_v25 = vcombine.low %v1237_v10, %v1245_v5  ;;  %v9309_v29 = vcombine.low %v1238_v11, %v1246_v38  ;;  %v9326_v51 = vcombine.high %v1254_v26, %v1262_v27  ;;  %v1333_v5 = vld [vmem:[%s13741_s3 + $0x1210] sm:$0xff]  ;;  %v1334_v38 = vld [vmem:[%s13741_s3 + $0x1218] sm:$0xff] }
 0x251   :  { %7534 = vmatprep.subr.bf16.mxu1 %v9230_v50  ;;  %v9324_v50 = vcombine.high %v1253_v21, %v1261_v44  ;;  %v1341_v11 = vld [vmem:[%s13741_s3 + $0x1250] sm:$0xff] }
 0x253   :  { %7371 = vmatpush1.bf16.msra.mxu0 %v9227_v54  ;;  %v1278_v54 = vld [vmem:[%s13741_s3 + $0x1058] sm:$0xff] }
 0x254   :  { %7535 = vmatpush1.bf16.msra.mxu1 %v9229_v55  ;;  %7372 = vmatprep.subr.bf16.mxu0 %v9244_v56  ;;  %v9323_v55 = vcombine.low %v1253_v21, %v1261_v44  ;;  %v9325_v56 = vcombine.low %v1254_v26, %v1262_v27  ;;  %v9342_v32 = vcombine.high %v1270_v17, %v1278_v54  ;;  %v1349_v44 = vld [vmem:[%s13741_s3 + $0x1290] sm:$0xff]  ;;  %v1350_v27 = vld [vmem:[%s13741_s3 + $0x1298] sm:$0xff] }
 0x255   :  { %7536 = vmatprep.subr.bf16.mxu1 %v9246_v31  ;;  %v9340_v31 = vcombine.high %v1269_v19, %v1277_v52  ;;  %v1357_v26 = vld [vmem:[%s13741_s3 + $0x12d0] sm:$0xff] }
 0x256   :  { %v1365_v52 = vld [vmem:[%s13741_s3 + $0x1310] sm:$0xff] }
 0x257   :  { %7373 = vmatpush1.bf16.msra.mxu0 %v9243_v35  ;;  %v1286_v35 = vld [vmem:[%s13741_s3 + $0x1098] sm:$0xff] }
 0x258   :  { %7537 = vmatpush1.bf16.msra.mxu1 %v9245_v36  ;;  %7374 = vmatprep.subr.bf16.mxu0 %v9260_v37  ;;  %v1294_v36 = vld [vmem:[%s13741_s3 + $0x10d8] sm:$0xff]  ;;  %v9341_v37 = vcombine.low %v1270_v17, %v1278_v54  ;;  %v1373_v17 = vld [vmem:[%s13741_s3 + $0x1350] sm:$0xff] }
 0x259   :  { %7538 = vmatprep.subr.bf16.mxu1 %v9262_v39  ;;  %v9356_v39 = vcombine.high %v1285_v3, %v1293_v33  ;;  %v9358_v45 = vcombine.high %v1286_v35, %v1294_v36  ;;  %v1366_v54 = vld [vmem:[%s13741_s3 + $0x1318] sm:$0xff] }
 0x25b   :  { %7375 = vmatpush1.bf16.msra.mxu0 %v9259_v9  ;;  %v1310_v9 = vld [vmem:[%s13741_s3 + $0x1158] sm:$0xff] }
 0x25c   :  { %7539 = vmatpush1.bf16.msra.mxu1 %v9261_v2  ;;  %7376 = vmatprep.subr.bf16.mxu0 %v9276_v4  ;;  %v9355_v2 = vcombine.low %v1285_v3, %v1293_v33  ;;  %v9357_v4 = vcombine.low %v1286_v35, %v1294_v36  ;;  %v9374_v6 = vcombine.high %v1302_v48, %v1310_v9  ;;  %v1381_v33 = vld [vmem:[%s13741_s3 + $0x1390] sm:$0xff]  ;;  %v1382_v35 = vld [vmem:[%s13741_s3 + $0x1398] sm:$0xff] }
 0x25d   :  { %7540 = vmatprep.subr.bf16.mxu1 %v9278_v43  ;;  %v9372_v43 = vcombine.high %v1301_v41, %v1309_v42  ;;  %v1390_v36 = vld [vmem:[%s13741_s3 + $0x13d8] sm:$0xff] }
 0x25f   :  { %7377 = vmatpush1.bf16.msra.mxu0 %v9275_v63  ;;  %v1326_v63 = vld [vmem:[%s13741_s3 + $0x11d8] sm:$0xff] }
 0x260   :  { %7541 = vmatpush1.bf16.msra.mxu1 %v9277_v20  ;;  %7378 = vmatprep.subr.bf16.mxu0 %v9292_v8  ;;  %v9371_v20 = vcombine.low %v1301_v41, %v1309_v42  ;;  %v9373_v8 = vcombine.low %v1302_v48, %v1310_v9  ;;  %v9390_v10 = vcombine.high %v1318_v57, %v1326_v63  ;;  %v1405_v48 = vld [vmem:[%s13741_s3 + $0x1450] sm:$0xff]  ;;  %v1398_v9 = vld [vmem:[%s13741_s3 + $0x1418] sm:$0xff] }
 0x261   :  { %7542 = vmatprep.subr.bf16.mxu1 %v9294_v53  ;;  %v9388_v53 = vcombine.high %v1317_v23, %v1325_v7  ;;  %v9454_v42 = vcombine.high %v1382_v35, %v1390_v36 }
 0x263   :  { %7379 = vmatpush1.bf16.msra.mxu0 %v9291_v40  ;;  %v1342_v40 = vld [vmem:[%s13741_s3 + $0x1258] sm:$0xff] }
 0x264   :  { %7543 = vmatpush1.bf16.msra.mxu1 %v9293_v12  ;;  %7380 = vmatprep.subr.bf16.mxu0 %v9308_v15  ;;  %v9387_v12 = vcombine.low %v1317_v23, %v1325_v7  ;;  %v9389_v15 = vcombine.low %v1318_v57, %v1326_v63  ;;  %v9406_v21 = vcombine.high %v1334_v38, %v1342_v40  ;;  %v1413_v7 = vld [vmem:[%s13741_s3 + $0x1490] sm:$0xff]  ;;  %v1414_v63 = vld [vmem:[%s13741_s3 + $0x1498] sm:$0xff] }
 0x265   :  { %7544 = vmatprep.subr.bf16.mxu1 %v9310_v18  ;;  %v9404_v18 = vcombine.high %v1333_v5, %v1341_v11  ;;  %v1421_v57 = vld [vmem:[%s13741_s3 + $0x14d0] sm:$0xff] }
 0x267   :  { %7381 = vmatpush1.bf16.msra.mxu0 %v9307_v25  ;;  %v1358_v25 = vld [vmem:[%s13741_s3 + $0x12d8] sm:$0xff] }
 0x268   :  { %7545 = vmatpush1.bf16.msra.mxu1 %v9309_v29  ;;  %7382 = vmatprep.subr.bf16.mxu0 %v9324_v50  ;;  %v9403_v29 = vcombine.low %v1333_v5, %v1341_v11  ;;  %v9405_v50 = vcombine.low %v1334_v38, %v1342_v40  ;;  %v9422_v19 = vcombine.high %v1350_v27, %v1358_v25  ;;  %v1429_v11 = vld [vmem:[%s13741_s3 + $0x1510] sm:$0xff]  ;;  %v1430_v40 = vld [vmem:[%s13741_s3 + $0x1518] sm:$0xff] }
 0x269   :  { %7546 = vmatprep.subr.bf16.mxu1 %v9326_v51  ;;  %v9420_v51 = vcombine.high %v1349_v44, %v1357_v26  ;;  %v1437_v38 = vld [vmem:[%s13741_s3 + $0x1550] sm:$0xff] }
 0x26b   :  { %7383 = vmatpush1.bf16.msra.mxu0 %v9323_v55  ;;  %v1374_v55 = vld [vmem:[%s13741_s3 + $0x1358] sm:$0xff] }
 0x26c   :  { %7547 = vmatpush1.bf16.msra.mxu1 %v9325_v56  ;;  %7393 = vmatprep.subr.bf16.mxu0 %v9340_v31  ;;  %v9419_v56 = vcombine.low %v1349_v44, %v1357_v26  ;;  %v9421_v31 = vcombine.low %v1350_v27, %v1358_v25  ;;  %v9438_v3 = vcombine.high %v1366_v54, %v1374_v55  ;;  %v1445_v26 = vld [vmem:[%s13741_s3 + $0x1590] sm:$0xff]  ;;  %v1446_v25 = vld [vmem:[%s13741_s3 + $0x1598] sm:$0xff] }
 0x26d   :  { %7557 = vmatprep.subr.bf16.mxu1 %v9342_v32  ;;  %v9436_v32 = vcombine.high %v1365_v52, %v1373_v17  ;;  %v1453_v27 = vld [vmem:[%s13741_s3 + $0x15d0] sm:$0xff] }
 0x26e   :  { %7385 = vmatmul.mubr.bf16.vlgmr.msra.gmra.mrb[12].mxu0 %v10778_v49 }
 0x26f   :  { %7549 = vmatmul.mubr.bf16.vlgmr.msra.gmra.mrb[12].mxu1 %v10778_v49  ;;  %7394 = vmatpush1.bf16.msra.mxu0 %v9339_v34  ;;  %v1389_v34 = vld [vmem:[%s13741_s3 + $0x13d0] sm:$0xff] }
 0x270   :  { %7425 = vmatprep.mubr.bf16.mxu0 %v10786_v0  ;;  %7558 = vmatpush1.bf16.msra.mxu1 %v9341_v37  ;;  %v9435_v37 = vcombine.low %v1365_v52, %v1373_v17  ;;  %v9452_v41 = vcombine.high %v1381_v33, %v1389_v34  ;;  %v1461_v17 = vld [vmem:[%s13741_s3 + $0x1610] sm:$0xff] }
 0x271   :  { %7589 = vmatprep.mubr.bf16.mxu1 %v10786_v0  ;;  %7395 = vmatprep.subr.bf16.mxu0 %v9356_v39  ;;  %v9437_v39 = vcombine.low %v1366_v54, %v1374_v55  ;;  %v1469_v54 = vld [vmem:[%s13741_s3 + $0x1650] sm:$0xff]  ;;  %v1462_v55 = vld [vmem:[%s13741_s3 + $0x1618] sm:$0xff] }
 0x272   :  { %7559 = vmatprep.subr.bf16.mxu1 %v9358_v45  ;;  %v1397_v45 = vld [vmem:[%s13741_s3 + $0x1410] sm:$0xff] }
 0x273   :  { %7396 = vmatpush1.bf16.msra.mxu0 %v9355_v2  ;;  %v1406_v2 = vld [vmem:[%s13741_s3 + $0x1458] sm:$0xff] }
 0x274   :  { %7560 = vmatpush1.bf16.msra.mxu1 %v9357_v4  ;;  %7397 = vmatprep.subr.bf16.mxu0 %v9372_v43  ;;  %v9451_v4 = vcombine.low %v1381_v33, %v1389_v34  ;;  %v9453_v43 = vcombine.low %v1382_v35, %v1390_v36  ;;  %v9470_v23 = vcombine.high %v1398_v9, %v1406_v2  ;;  %v1477_v34 = vld [vmem:[%s13741_s3 + $0x1690] sm:$0xff]  ;;  %v1478_v36 = vld [vmem:[%s13741_s3 + $0x1698] sm:$0xff] }
 0x275   :  { %7561 = vmatprep.subr.bf16.mxu1 %v9374_v6  ;;  %v9468_v6 = vcombine.high %v1397_v45, %v1405_v48  ;;  %v1485_v35 = vld [vmem:[%s13741_s3 + $0x16d0] sm:$0xff] }
 0x277   :  { %7398 = vmatpush1.bf16.msra.mxu0 %v9371_v20  ;;  %v1422_v20 = vld [vmem:[%s13741_s3 + $0x14d8] sm:$0xff] }
 0x278   :  { %7562 = vmatpush1.bf16.msra.mxu1 %v9373_v8  ;;  %7399 = vmatprep.subr.bf16.mxu0 %v9388_v53  ;;  %v9467_v8 = vcombine.low %v1397_v45, %v1405_v48  ;;  %v9469_v53 = vcombine.low %v1398_v9, %v1406_v2  ;;  %v9486_v5 = vcombine.high %v1414_v63, %v1422_v20  ;;  %v1493_v48 = vld [vmem:[%s13741_s3 + $0x1710] sm:$0xff]  ;;  %v1494_v2 = vld [vmem:[%s13741_s3 + $0x1718] sm:$0xff] }
 0x279   :  { %7563 = vmatprep.subr.bf16.mxu1 %v9390_v10  ;;  %v9484_v10 = vcombine.high %v1413_v7, %v1421_v57  ;;  %v1501_v9 = vld [vmem:[%s13741_s3 + $0x1750] sm:$0xff] }
 0x27b   :  { %7400 = vmatpush1.bf16.msra.mxu0 %v9387_v12  ;;  %v1438_v12 = vld [vmem:[%s13741_s3 + $0x1558] sm:$0xff] }
 0x27c   :  { %7564 = vmatpush1.bf16.msra.mxu1 %v9389_v15  ;;  %7401 = vmatprep.subr.bf16.mxu0 %v9404_v18  ;;  %v9483_v15 = vcombine.low %v1413_v7, %v1421_v57  ;;  %v9485_v18 = vcombine.low %v1414_v63, %v1422_v20  ;;  %v9502_v44 = vcombine.high %v1430_v40, %v1438_v12  ;;  %v1509_v57 = vld [vmem:[%s13741_s3 + $0x1790] sm:$0xff]  ;;  %v1510_v20 = vld [vmem:[%s13741_s3 + $0x1798] sm:$0xff] }
 0x27d   :  { %7565 = vmatprep.subr.bf16.mxu1 %v9406_v21  ;;  %v9500_v21 = vcombine.high %v1429_v11, %v1437_v38  ;;  %v1517_v63 = vld [vmem:[%s13741_s3 + $0x17d0] sm:$0xff] }
 0x27f   :  { %7402 = vmatpush1.bf16.msra.mxu0 %v9403_v29  ;;  %v1454_v29 = vld [vmem:[%s13741_s3 + $0x15d8] sm:$0xff] }
 0x280   :  { %7566 = vmatpush1.bf16.msra.mxu1 %v9405_v50  ;;  %7403 = vmatprep.subr.bf16.mxu0 %v9420_v51  ;;  %v9499_v50 = vcombine.low %v1429_v11, %v1437_v38  ;;  %v9501_v51 = vcombine.low %v1430_v40, %v1438_v12  ;;  %v9518_v52 = vcombine.high %v1446_v25, %v1454_v29  ;;  %v1525_v38 = vld [vmem:[%s13741_s3 + $0x1810] sm:$0xff]  ;;  %v1526_v12 = vld [vmem:[%s13741_s3 + $0x1818] sm:$0xff] }
 0x281   :  { %7567 = vmatprep.subr.bf16.mxu1 %v9422_v19  ;;  %v9516_v19 = vcombine.high %v1445_v26, %v1453_v27  ;;  %v1533_v40 = vld [vmem:[%s13741_s3 + $0x1850] sm:$0xff] }
 0x283   :  { %7404 = vmatpush1.bf16.msra.mxu0 %v9419_v56  ;;  %v1470_v56 = vld [vmem:[%s13741_s3 + $0x1658] sm:$0xff] }
 0x284   :  { %7568 = vmatpush1.bf16.msra.mxu1 %v9421_v31  ;;  %7405 = vmatprep.subr.bf16.mxu0 %v9436_v32  ;;  %v9515_v31 = vcombine.low %v1445_v26, %v1453_v27  ;;  %v9517_v32 = vcombine.low %v1446_v25, %v1454_v29  ;;  %v9534_v33 = vcombine.high %v1462_v55, %v1470_v56  ;;  %v1541_v27 = vld [vmem:[%s13741_s3 + $0x1890] sm:$0xff] }
 0x285   :  { %7569 = vmatprep.subr.bf16.mxu1 %v9438_v3  ;;  %v9532_v3 = vcombine.high %v1461_v17, %v1469_v54  ;;  %v1549_v25 = vld [vmem:[%s13741_s3 + $0x18d0] sm:$0xff]  ;;  %v9595_v29 = vcombine.low %v1525_v38, %v1533_v40 }
 0x287   :  { %7406 = vmatpush1.bf16.msra.mxu0 %v9435_v37  ;;  %v1486_v37 = vld [vmem:[%s13741_s3 + $0x16d8] sm:$0xff] }
 0x288   :  { %7570 = vmatpush1.bf16.msra.mxu1 %v9437_v39  ;;  %7407 = vmatprep.subr.bf16.mxu0 %v9452_v41  ;;  %v9531_v39 = vcombine.low %v1461_v17, %v1469_v54  ;;  %v9533_v41 = vcombine.low %v1462_v55, %v1470_v56  ;;  %v9550_v45 = vcombine.high %v1478_v36, %v1486_v37  ;;  %v1557_v17 = vld [vmem:[%s13741_s3 + $0x1910] sm:$0xff]  ;;  %v1558_v56 = vld [vmem:[%s13741_s3 + $0x1918] sm:$0xff] }
 0x289   :  { %7571 = vmatprep.subr.bf16.mxu1 %v9454_v42  ;;  %v9548_v42 = vcombine.high %v1477_v34, %v1485_v35  ;;  %v1565_v54 = vld [vmem:[%s13741_s3 + $0x1950] sm:$0xff] }
 0x28b   :  { %7408 = vmatpush1.bf16.msra.mxu0 %v9451_v4  ;;  %v1502_v4 = vld [vmem:[%s13741_s3 + $0x1758] sm:$0xff] }
 0x28c   :  { %7572 = vmatpush1.bf16.msra.mxu1 %v9453_v43  ;;  %7409 = vmatprep.subr.bf16.mxu0 %v9468_v6  ;;  %v9547_v43 = vcombine.low %v1477_v34, %v1485_v35  ;;  %v9549_v6 = vcombine.low %v1478_v36, %v1486_v37  ;;  %v9566_v7 = vcombine.high %v1494_v2, %v1502_v4  ;;  %v1573_v35 = vld [vmem:[%s13741_s3 + $0x1990] sm:$0xff]  ;;  %v1574_v37 = vld [vmem:[%s13741_s3 + $0x1998] sm:$0xff] }
 0x28d   :  { %7573 = vmatprep.subr.bf16.mxu1 %v9470_v23  ;;  %v9564_v23 = vcombine.high %v1493_v48, %v1501_v9  ;;  %v1581_v36 = vld [vmem:[%s13741_s3 + $0x19d0] sm:$0xff] }
 0x28f   :  { %7410 = vmatpush1.bf16.msra.mxu0 %v9467_v8  ;;  %v1518_v8 = vld [vmem:[%s13741_s3 + $0x17d8] sm:$0xff] }
 0x290   :  { %7574 = vmatpush1.bf16.msra.mxu1 %v9469_v53  ;;  %7411 = vmatprep.subr.bf16.mxu0 %v9484_v10  ;;  %v9563_v53 = vcombine.low %v1493_v48, %v1501_v9  ;;  %v9565_v10 = vcombine.low %v1494_v2, %v1502_v4  ;;  %v9582_v11 = vcombine.high %v1510_v20, %v1518_v8  ;;  %v1589_v9 = vld [vmem:[%s13741_s3 + $0x1a10] sm:$0xff]  ;;  %v1590_v4 = vld [vmem:[%s13741_s3 + $0x1a18] sm:$0xff] }
 0x291   :  { %7575 = vmatprep.subr.bf16.mxu1 %v9486_v5  ;;  %v9580_v5 = vcombine.high %v1509_v57, %v1517_v63  ;;  %v1597_v2 = vld [vmem:[%s13741_s3 + $0x1a50] sm:$0xff] }
 0x293   :  { %7412 = vmatpush1.bf16.msra.mxu0 %v9483_v15  ;;  %v1534_v15 = vld [vmem:[%s13741_s3 + $0x1858] sm:$0xff] }
 0x294   :  { %7576 = vmatpush1.bf16.msra.mxu1 %v9485_v18  ;;  %7413 = vmatprep.subr.bf16.mxu0 %v9500_v21  ;;  %v9579_v18 = vcombine.low %v1509_v57, %v1517_v63  ;;  %v9581_v21 = vcombine.low %v1510_v20, %v1518_v8  ;;  %v9598_v26 = vcombine.high %v1526_v12, %v1534_v15  ;;  %v1605_v63 = vld [vmem:[%s13741_s3 + $0x1a90] sm:$0xff]  ;;  %v1606_v8 = vld [vmem:[%s13741_s3 + $0x1a98] sm:$0xff] }
 0x295   :  { %7577 = vmatprep.subr.bf16.mxu1 %v9502_v44  ;;  %v9596_v44 = vcombine.high %v1525_v38, %v1533_v40  ;;  %v1613_v20 = vld [vmem:[%s13741_s3 + $0x1ad0] sm:$0xff] }
 0x296   :  { %v9676_v38 = vcombine.high %v1605_v63, %v1613_v20 }
 0x297   :  { %7414 = vmatpush1.bf16.msra.mxu0 %v9499_v50  ;;  %v1542_v50 = vld [vmem:[%s13741_s3 + $0x1898] sm:$0xff] }
 0x298   :  { %7578 = vmatpush1.bf16.msra.mxu1 %v9501_v51  ;;  %7415 = vmatprep.subr.bf16.mxu0 %v9516_v19  ;;  %v1550_v51 = vld [vmem:[%s13741_s3 + $0x18d8] sm:$0xff]  ;;  %v9597_v19 = vcombine.low %v1526_v12, %v1534_v15  ;;  %v1621_v12 = vld [vmem:[%s13741_s3 + $0x1b10] sm:$0xff] }
 0x299   :  { %7579 = vmatprep.subr.bf16.mxu1 %v9518_v52  ;;  %v9612_v52 = vcombine.high %v1541_v27, %v1549_v25  ;;  %v9614_v55 = vcombine.high %v1542_v50, %v1550_v51  ;;  %v1629_v15 = vld [vmem:[%s13741_s3 + $0x1b50] sm:$0xff] }
 0x29b   :  { %7416 = vmatpush1.bf16.msra.mxu0 %v9515_v31  ;;  %v1566_v31 = vld [vmem:[%s13741_s3 + $0x1958] sm:$0xff] }
 0x29c   :  { %7580 = vmatpush1.bf16.msra.mxu1 %v9517_v32  ;;  %7417 = vmatprep.subr.bf16.mxu0 %v9532_v3  ;;  %v9611_v32 = vcombine.low %v1541_v27, %v1549_v25  ;;  %v9613_v3 = vcombine.low %v1542_v50, %v1550_v51  ;;  %v9630_v34 = vcombine.high %v1558_v56, %v1566_v31 }
 0x29d   :  { %7581 = vmatprep.subr.bf16.mxu1 %v9534_v33  ;;  %v9628_v33 = vcombine.high %v1557_v17, %v1565_v54  ;;  %v9692_v51 = vcombine.high %v1621_v12, %v1629_v15 }
 0x29f   :  { %7418 = vmatpush1.bf16.msra.mxu0 %v9531_v39  ;;  %v1582_v39 = vld [vmem:[%s13741_s3 + $0x19d8] sm:$0xff] }
 0x2a0   :  { %7582 = vmatpush1.bf16.msra.mxu1 %v9533_v41  ;;  %7419 = vmatprep.subr.bf16.mxu0 %v9548_v42  ;;  %v9627_v41 = vcombine.low %v1557_v17, %v1565_v54  ;;  %v9629_v42 = vcombine.low %v1558_v56, %v1566_v31  ;;  %v9646_v48 = vcombine.high %v1574_v37, %v1582_v39  ;;  %v1638_v56 = vld [vmem:[%s13741_s3 + $0x1b98] sm:$0xff] }
 0x2a1   :  { %7583 = vmatprep.subr.bf16.mxu1 %v9550_v45  ;;  %v9644_v45 = vcombine.high %v1573_v35, %v1581_v36  ;;  %v1646_v31 = vld [vmem:[%s13741_s3 + $0x1bd8] sm:$0xff] }
 0x2a3   :  { %7420 = vmatpush1.bf16.msra.mxu0 %v9547_v43  ;;  %v1598_v43 = vld [vmem:[%s13741_s3 + $0x1a58] sm:$0xff] }
 0x2a4   :  { %7584 = vmatpush1.bf16.msra.mxu1 %v9549_v6  ;;  %7421 = vmatprep.subr.bf16.mxu0 %v9564_v23  ;;  %v9643_v6 = vcombine.low %v1573_v35, %v1581_v36  ;;  %v9645_v23 = vcombine.low %v1574_v37, %v1582_v39  ;;  %v9662_v57 = vcombine.high %v1590_v4, %v1598_v43 }
 0x2a5   :  { %7585 = vmatprep.subr.bf16.mxu1 %v9566_v7  ;;  %v9660_v7 = vcombine.high %v1589_v9, %v1597_v2 }
 0x2a7   :  { %7422 = vmatpush1.bf16.msra.mxu0 %v9563_v53  ;;  %v1614_v53 = vld [vmem:[%s13741_s3 + $0x1ad8] sm:$0xff] }
 0x2a8   :  { %7586 = vmatpush1.bf16.msra.mxu1 %v9565_v10  ;;  %7423 = vmatprep.subr.bf16.mxu0 %v9580_v5  ;;  %v9659_v10 = vcombine.low %v1589_v9, %v1597_v2  ;;  %v1779_v5 = vld [vmem:[%s13743_s4] sm:$0xff]  ;;  %v9678_v40 = vcombine.high %v1606_v8, %v1614_v53  ;;  %v9677_v50 = vcombine.low %v1606_v8, %v1614_v53 }
 0x2a9   :  { %7587 = vmatprep.subr.bf16.mxu1 %v9582_v11  ;;  %v9661_v11 = vcombine.low %v1590_v4, %v1598_v43  ;;  %v1790_v27 = vrot.slane %v1779_v5, %v10470_v62  ;;  %v1798_v25 = vrot.slane %v1779_v5, %v10475_v1  ;;  %v9710_v43 = vcombine.high %v1638_v56, %v1646_v31 }
 0x2ab   :  { %7424 = vmatpush1.bf16.msra.mxu0 %v9579_v18  ;;  %v1786_v18 = vrot.slane %v1779_v5, %v10462_v60 }
 0x2ac   :  { %7588 = vmatpush1.bf16.msra.mxu1 %v9581_v21  ;;  %7434 = vmatprep.subr.bf16.mxu0 %v9596_v44  ;;  %v1794_v21 = vrot.slane %v1779_v5, %v10485_v30  ;;  %v1622_v44 = vld [vmem:[%s13741_s3 + $0x1b18] sm:$0xff] }
 0x2ad   :  { %7598 = vmatprep.subr.bf16.mxu1 %v9598_v26  ;;  %v1630_v26 = vld [vmem:[%s13741_s3 + $0x1b58] sm:$0xff] }
 0x2ae   :  { %7426 = vmatmul.mubr.bf16.vlgmr.msra.gmra.mrb[12].mxu0 %v11005_v46  ;;  %v9694_v54 = vcombine.high %v1622_v44, %v1630_v26  ;;  %v1662_v5 = vld [vmem:[%s13741_s3 + $0x1c58] sm:$0xff] }
 0x2af   :  { %7590 = vmatmul.mubr.bf16.vlgmr.msra.gmra.mrb[12].mxu1 %v11005_v46  ;;  %7435 = vmatpush1.bf16.msra.mxu0 %v9595_v29  ;;  %v9675_v29 = vcombine.low %v1605_v63, %v1613_v20  ;;  %v1653_v63 = vld [vmem:[%s13741_s3 + $0x1c10] sm:$0xff] }
 0x2b0   :  { %7466 = vmatprep.mubr.bf16.mxu0 %v11010_v28  ;;  %7599 = vmatpush1.bf16.msra.mxu1 %v9597_v19  ;;  %v1637_v19 = vld [vmem:[%s13741_s3 + $0x1b90] sm:$0xff] }
 0x2b1   :  { %7630 = vmatprep.mubr.bf16.mxu1 %v11010_v28  ;;  %7436 = vmatprep.subr.bf16.mxu0 %v9612_v52  ;;  %v1661_v20 = vld [vmem:[%s13741_s3 + $0x1c50] sm:$0xff] }
 0x2b2   :  { %7600 = vmatprep.subr.bf16.mxu1 %v9614_v55  ;;  %v1645_v55 = vld [vmem:[%s13741_s3 + $0x1bd0] sm:$0xff] }
 0x2b3   :  { %7437 = vmatpush1.bf16.msra.mxu0 %v9611_v32  ;;  %v9708_v4 = vcombine.high %v1637_v19, %v1645_v55 }
 0x2b4   :  { %7601 = vmatpush1.bf16.msra.mxu1 %v9613_v3  ;;  %7438 = vmatprep.subr.bf16.mxu0 %v9628_v33 }
 0x2b5   :  { %7602 = vmatprep.subr.bf16.mxu1 %v9630_v34 }
 0x2b7   :  { %7439 = vmatpush1.bf16.msra.mxu0 %v9627_v41  ;;  %v9691_v41 = vcombine.low %v1621_v12, %v1629_v15  ;;  %v9709_v12 = vcombine.low %v1638_v56, %v1646_v31 }
 0x2b8   :  { %7603 = vmatpush1.bf16.msra.mxu1 %v9629_v42  ;;  %7440 = vmatprep.subr.bf16.mxu0 %v9644_v45  ;;  %v9693_v42 = vcombine.low %v1622_v44, %v1630_v26 }
 0x2b9   :  { %7604 = vmatprep.subr.bf16.mxu1 %v9646_v48 }
 0x2bb   :  { %7441 = vmatpush1.bf16.msra.mxu0 %v9643_v6 }
 0x2bc   :  { %7605 = vmatpush1.bf16.msra.mxu1 %v9645_v23  ;;  %7442 = vmatprep.subr.bf16.mxu0 %v9660_v7 }
 0x2bd   :  { %7606 = vmatprep.subr.bf16.mxu1 %v9662_v57 }
 0x2bf   :  { %7443 = vmatpush1.bf16.msra.mxu0 %v9659_v10  ;;  %v1654_v10 = vld [vmem:[%s13741_s3 + $0x1c18] sm:$0xff] }
 0x2c0   :  { %7607 = vmatpush1.bf16.msra.mxu1 %v9661_v11  ;;  %7444 = vmatprep.subr.bf16.mxu0 %v9676_v38  ;;  %v9725_v56 = vcombine.low %v1654_v10, %v1662_v5 }
 0x2c1   :  { %v7140_v52 = vpop.f32.mrb[8].mxu0  ;;  %v7304_v17 = vpop.f32.mrb[8].mxu1  ;;  %7608 = vmatprep.subr.bf16.mxu1 %v9678_v40  ;;  %v9707_v40 = vcombine.low %v1637_v19, %v1645_v55  ;;  %v1670_v19 = vld [vmem:[%s13741_s3 + $0x1c98] sm:$0xff]  ;;  %v9723_v55 = vcombine.low %v1653_v63, %v1661_v20 }
 0x2c2   :  { %v11882_v32 = vadd.f32 %v7140_v52, %v1786_v18  ;;  %v11884_v3 = vadd.f32 %v7304_v17, %v1794_v21  ;;  %v7142_v33 = vpop.f32.mrb[9].mxu0  ;;  %v7306_v34 = vpop.f32.mrb[9].mxu1  ;;  %v9724_v21 = vcombine.high %v1653_v63, %v1661_v20  ;;  %v1678_v52 = vld [vmem:[%s13741_s3 + $0x1cd8] sm:$0xff] }
 0x2c3   :  { %v11886_v35 = vadd.f32 %v7142_v33, %v1790_v27  ;;  %v11888_v36 = vadd.f32 %v7306_v34, %v1798_v25  ;;  %v7144_v37 = vpop.f32.mrb[10].mxu0  ;;  %v7308_v39 = vpop.f32.mrb[10].mxu1  ;;  %7445 = vmatpush1.bf16.msra.mxu0 %v9675_v29  ;;  %v9726_v27 = vcombine.high %v1654_v10, %v1662_v5  ;;  %v1669_v25 = vld [vmem:[%s13741_s3 + $0x1c90] sm:$0xff] }
 0x2c4   :  { %v8295_v45 = vsel %vm569_vm2, %v11882_v32, 0.0  ;;  %v8309_v48 = vsel %vm569_vm2, %v11884_v3, 0.0  ;;  %7609 = vmatpush1.bf16.msra.mxu1 %v9677_v50  ;;  %v7145_v9 = vpop.f32.mrb[11].mxu0  ;;  %v7309_v2 = vpop.f32.mrb[11].mxu1  ;;  %7446 = vmatprep.subr.bf16.mxu0 %v9692_v51  ;;  %v1677_v29 = vld [vmem:[%s13741_s3 + $0x1cd0] sm:$0xff] }
 0x2c5   :  { %v8296_v6 = vrot.slane %v8295_v45, 4  ;;  %v8310_v23 = vrot.slane %v8309_v48, 4  ;;  %v8302_v7 = vsel %vm569_vm2, %v11886_v35, 0.0  ;;  %v8316_v57 = vsel %vm569_vm2, %v11888_v36, 0.0  ;;  %7610 = vmatprep.subr.bf16.mxu1 %v9694_v54  ;;  %v1686_v2 = vld [vmem:[%s13741_s3 + $0x1d18] sm:$0xff]  ;;  %v1701_v5 = vld [vmem:[%s13741_s3 + $0x1d90] sm:$0xff] }
 0x2c6   :  { %v8303_v8 = vrot.slane %v8302_v7, 4  ;;  %v8317_v53 = vrot.slane %v8316_v57, 4  ;;  %v9740_v34 = vcombine.high %v1669_v25, %v1677_v29 }
 0x2c7   :  { %v8297_v11 = vadd.f32 %v8296_v6, %v8295_v45  ;;  %v8311_v38 = vadd.f32 %v8310_v23, %v8309_v48  ;;  %7447 = vmatpush1.bf16.msra.mxu0 %v9691_v41  ;;  %v9742_v41 = vcombine.high %v1670_v19, %v1678_v52  ;;  %v1693_v45 = vld [vmem:[%s13741_s3 + $0x1d50] sm:$0xff]  ;;  %v9739_v23 = vcombine.low %v1669_v25, %v1677_v29 }
 0x2c8   :  { %v8304_v15 = vadd.f32 %v8303_v8, %v8302_v7  ;;  %v8318_v18 = vadd.f32 %v8317_v53, %v8316_v57  ;;  %7611 = vmatpush1.bf16.msra.mxu1 %v9693_v42  ;;  %7448 = vmatprep.subr.bf16.mxu0 %v9708_v4  ;;  %v1685_v42 = vld [vmem:[%s13741_s3 + $0x1d10] sm:$0xff]  ;;  %v1694_v4 = vld [vmem:[%s13741_s3 + $0x1d58] sm:$0xff]  ;;  %v9741_v7 = vcombine.low %v1670_v19, %v1678_v52 }
 0x2c9   :  { %v8298_v44 = vrot.slane %v8297_v11, 2  ;;  %v8312_v26 = vrot.slane %v8311_v38, 2  ;;  %7612 = vmatprep.subr.bf16.mxu1 %v9710_v43  ;;  %v9756_v20 = vcombine.high %v1685_v42, %v1693_v45  ;;  %v9758_v10 = vcombine.high %v1686_v2, %v1694_v4 }
 0x2ca   :  { %v8305_v50 = vrot.slane %v8304_v15, 2  ;;  %v8319_v51 = vrot.slane %v8318_v18, 2 }
 0x2cb   :  { %v8299_v17 = vadd.f32 %v8298_v44, %v8297_v11  ;;  %v8313_v54 = vadd.f32 %v8312_v26, %v8311_v38  ;;  %7449 = vmatpush1.bf16.msra.mxu0 %v9707_v40  ;;  %v1709_v11 = vld [vmem:[%s13741_s3 + $0x1dd0] sm:$0xff]  ;;  %v9755_v44 = vcombine.low %v1685_v42, %v1693_v45  ;;  %v9757_v26 = vcombine.low %v1686_v2, %v1694_v4 }
 0x2cc   :  { %v8306_v31 = vadd.f32 %v8305_v50, %v8304_v15  ;;  %v8320_v33 = vadd.f32 %v8319_v51, %v8318_v18  ;;  %7613 = vmatpush1.bf16.msra.mxu1 %v9709_v12  ;;  %7450 = vmatprep.subr.bf16.mxu0 %v9724_v21  ;;  %v1702_v12 = vld [vmem:[%s13741_s3 + $0x1d98] sm:$0xff]  ;;  %v9772_v29 = vcombine.high %v1701_v5, %v1709_v11  ;;  %v1741_v2 = vld [vmem:[%s13741_s3 + $0x1ed0] sm:$0xff] }
 0x2cd   :  { %v8300_v37 = vrot.slane %v8299_v17, 1  ;;  %v8314_v39 = vrot.slane %v8313_v54, 1  ;;  %7614 = vmatprep.subr.bf16.mxu1 %v9726_v27  ;;  %v1710_v15 = vld [vmem:[%s13741_s3 + $0x1dd8] sm:$0xff]  ;;  %v9771_v52 = vcombine.low %v1701_v5, %v1709_v11 }
 0x2ce   :  { %v8307_v48 = vrot.slane %v8306_v31, 1  ;;  %v8321_v9 = vrot.slane %v8320_v33, 1 }
 0x2cf   :  { %v8301_v43 = vadd.f32 %v8300_v37, %v8299_v17  ;;  %v8315_v6 = vadd.f32 %v8314_v39, %v8313_v54  ;;  %7451 = vmatpush1.bf16.msra.mxu0 %v9723_v55  ;;  %v1718_v17 = vld [vmem:[%s13741_s3 + $0x1e18] sm:$0xff] }
 0x2d0   :  { %v8308_v57 = vadd.f32 %v8307_v48, %v8306_v31  ;;  %v8322_v63 = vadd.f32 %v8321_v9, %v8320_v33  ;;  %7615 = vmatpush1.bf16.msra.mxu1 %v9725_v56  ;;  %7452 = vmatprep.subr.bf16.mxu0 %v9740_v34  ;;  %v1726_v54 = vld [vmem:[%s13741_s3 + $0x1e58] sm:$0xff]  ;;  %v9773_v31 = vcombine.low %v1702_v12, %v1710_v15  ;;  %v1733_v9 = vld [vmem:[%s13741_s3 + $0x1e90] sm:$0xff] }
 0x2d1   :  { %v8407_v8 = vmul.f32 0.25, %v8301_v43  ;;  %v8409_v53 = vmul.f32 0.25, %v8315_v6  ;;  %7616 = vmatprep.subr.bf16.mxu1 %v9742_v41  ;;  %v9790_v48 = vcombine.high %v1718_v17, %v1726_v54  ;;  %v1734_v6 = vld [vmem:[%s13741_s3 + $0x1e98] sm:$0xff] }
 0x2d2   :  { %v8408_v38 = vmul.f32 0.25, %v8308_v57  ;;  %v8410_v40 = vmul.f32 0.25, %v8322_v63 }
 0x2d3   :  { %v11947_v18 = vsub.f32 %v11882_v32, %v8407_v8  ;;  %v11950_v21 = vsub.f32 %v11884_v3, %v8409_v53  ;;  %7453 = vmatpush1.bf16.msra.mxu0 %v9739_v23  ;;  %v1717_v32 = vld [vmem:[%s13741_s3 + $0x1e10] sm:$0xff]  ;;  %v1742_v23 = vld [vmem:[%s13741_s3 + $0x1ed8] sm:$0xff]  ;;  %v9789_v53 = vcombine.low %v1718_v17, %v1726_v54 }
 0x2d4   :  { %v11953_v27 = vsub.f32 %v11886_v35, %v8408_v38  ;;  %v11956_v25 = vsub.f32 %v11888_v36, %v8410_v40  ;;  %7617 = vmatpush1.bf16.msra.mxu1 %v9741_v7  ;;  %7454 = vmatprep.subr.bf16.mxu0 %v9756_v20  ;;  %v1725_v3 = vld [vmem:[%s13741_s3 + $0x1e50] sm:$0xff]  ;;  %v9774_v36 = vcombine.high %v1702_v12, %v1710_v15 }
 0x2d5   :  { %v8439_v50 = vmul.f32 %v11947_v18, %v11947_v18  ;;  %v8441_v35 = vmul.f32 %v11950_v21, %v11950_v21  ;;  %7618 = vmatprep.subr.bf16.mxu1 %v9758_v10  ;;  %v9788_v33 = vcombine.high %v1717_v32, %v1725_v3  ;;  %v9787_v63 = vcombine.low %v1717_v32, %v1725_v3  ;;  %v1749_v40 = vld [vmem:[%s13741_s3 + $0x1f10] sm:$0xff] }
 0x2d6   :  { %v8440_v51 = vmul.f32 %v11953_v27, %v11953_v27  ;;  %v8442_v19 = vmul.f32 %v11956_v25, %v11956_v25  ;;  %v9804_v10 = vcombine.high %v1733_v9, %v1741_v2  ;;  %v9806_v38 = vcombine.high %v1734_v6, %v1742_v23  ;;  %v1757_v12 = vld [vmem:[%s13741_s3 + $0x1f50] sm:$0xff] }
 0x2d7   :  { %v8455_v55 = vsel %vm569_vm2, %v8439_v50, 0.0  ;;  %v8469_v56 = vsel %vm569_vm2, %v8441_v35, 0.0  ;;  %7455 = vmatpush1.bf16.msra.mxu0 %v9755_v44  ;;  %v9803_v50 = vcombine.low %v1733_v9, %v1741_v2 }
 0x2d8   :  { %v8456_v34 = vrot.slane %v8455_v55, 4  ;;  %v8470_v37 = vrot.slane %v8469_v56, 4  ;;  %v8462_v39 = vsel %vm569_vm2, %v8440_v51, 0.0  ;;  %v8476_v41 = vsel %vm569_vm2, %v8442_v19, 0.0  ;;  %7619 = vmatpush1.bf16.msra.mxu1 %v9757_v26  ;;  %7456 = vmatprep.subr.bf16.mxu0 %v9772_v29  ;;  %v1750_v26 = vld [vmem:[%s13741_s3 + $0x1f18] sm:$0xff] }
 0x2d9   :  { %v8463_v42 = vrot.slane %v8462_v39, 4  ;;  %v8477_v45 = vrot.slane %v8476_v41, 4  ;;  %7620 = vmatprep.subr.bf16.mxu1 %v9774_v36  ;;  %v1758_v29 = vld [vmem:[%s13741_s3 + $0x1f58] sm:$0xff]  ;;  %v9805_v51 = vcombine.low %v1734_v6, %v1742_v23  ;;  %v9820_v19 = vcombine.high %v1749_v40, %v1757_v12  ;;  %v759_v23 = vld [vmem:[%s13741_s3 + $0x20] sm:$0xff] }
 0x2da   :  { %v8457_v4 = vadd.f32 %v8456_v34, %v8455_v55  ;;  %v8471_v43 = vadd.f32 %v8470_v37, %v8469_v56  ;;  %v9822_v54 = vcombine.high %v1750_v26, %v1758_v29  ;;  %v1765_v55 = vld [vmem:[%s13741_s3 + $0x1f90] sm:$0xff]  ;;  %v1766_v34 = vld [vmem:[%s13741_s3 + $0x1f98] sm:$0xff]  ;;  %v9821_v9 = vcombine.low %v1750_v26, %v1758_v29  ;;  %v776_v26 = vld [vmem:[%s13741_s3 + $0xa8] sm:$0xff] }
 0x2db   :  { %v8464_v7 = vadd.f32 %v8463_v42, %v8462_v39  ;;  %v8478_v57 = vadd.f32 %v8477_v45, %v8476_v41  ;;  %7457 = vmatpush1.bf16.msra.mxu0 %v9771_v52  ;;  %v1773_v56 = vld [vmem:[%s13741_s3 + $0x1fd0] sm:$0xff]  ;;  %v1774_v37 = vld [vmem:[%s13741_s3 + $0x1fd8] sm:$0xff]  ;;  %v9819_v42 = vcombine.low %v1749_v40, %v1757_v12  ;;  %v775_v12 = vld [vmem:[%s13741_s3 + $0xa0] sm:$0xff] }
 0x2dc   :  { %v8458_v20 = vrot.slane %v8457_v4, 2  ;;  %v8472_v8 = vrot.slane %v8471_v43, 2  ;;  %7621 = vmatpush1.bf16.msra.mxu1 %v9773_v31  ;;  %7458 = vmatprep.subr.bf16.mxu0 %v9788_v33  ;;  %v9836_v2 = vcombine.high %v1765_v55, %v1773_v56  ;;  %v9838_v6 = vcombine.high %v1766_v34, %v1774_v37  ;;  %v784_v29 = vld [vmem:[%s13741_s3 + $0xe8] sm:$0xff] }
 0x2dd   :  { %v8465_v5 = vrot.slane %v8464_v7, 2  ;;  %v8479_v11 = vrot.slane %v8478_v57, 2  ;;  %7622 = vmatprep.subr.bf16.mxu1 %v9790_v48 }
 0x2de   :  { %v8459_v15 = vadd.f32 %v8458_v20, %v8457_v4  ;;  %v8473_v44 = vadd.f32 %v8472_v8, %v8471_v43  ;;  %v760_v20 = vld [vmem:[%s13741_s3 + $0x28] sm:$0xff] }
 0x2df   :  { %v8466_v32 = vadd.f32 %v8465_v5, %v8464_v7  ;;  %v8480_v3 = vadd.f32 %v8479_v11, %v8478_v57  ;;  %7459 = vmatpush1.bf16.msra.mxu0 %v9787_v63  ;;  %v767_v7 = vld [vmem:[%s13741_s3 + $0x60] sm:$0xff]  ;;  %v768_v8 = vld [vmem:[%s13741_s3 + $0x68] sm:$0xff]  ;;  %v9835_v5 = vcombine.low %v1765_v55, %v1773_v56  ;;  %v9837_v11 = vcombine.low %v1766_v34, %v1774_v37 }
 0x2e0   :  { %v8460_v35 = vrot.slane %v8459_v15, 1  ;;  %v8474_v36 = vrot.slane %v8473_v44, 1  ;;  %7623 = vmatpush1.bf16.msra.mxu1 %v9789_v53  ;;  %7460 = vmatprep.subr.bf16.mxu0 %v9804_v10  ;;  %v8834_v40 = vcombine.high %v760_v20, %v768_v8  ;;  %v8849_v55 = vcombine.low %v776_v26, %v784_v29  ;;  %v815_v34 = vld [vmem:[%s13741_s3 + $0x1e0] sm:$0xff] }
 0x2e1   :  { %v8467_v52 = vrot.slane %v8466_v32, 1  ;;  %v8481_v17 = vrot.slane %v8480_v3, 1  ;;  %7624 = vmatprep.subr.bf16.mxu1 %v9806_v38  ;;  %v8832_v38 = vcombine.high %v759_v23, %v767_v7 }
 0x2e2   :  { %v8461_v31 = vadd.f32 %v8460_v35, %v8459_v15  ;;  %v8475_v33 = vadd.f32 %v8474_v36, %v8473_v44  ;;  %v783_v15 = vld [vmem:[%s13741_s3 + $0xe0] sm:$0xff]  ;;  %v8831_v44 = vcombine.low %v759_v23, %v767_v7  ;;  %v8850_v36 = vcombine.high %v776_v26, %v784_v29  ;;  %v840_v29 = vld [vmem:[%s13741_s3 + $0x2a8] sm:$0xff] }
 0x2e3   :  { %v8468_v39 = vadd.f32 %v8467_v52, %v8466_v32  ;;  %v8482_v41 = vadd.f32 %v8481_v17, %v8480_v3  ;;  %7461 = vmatpush1.bf16.msra.mxu0 %v9803_v50  ;;  %v8833_v32 = vcombine.low %v760_v20, %v768_v8  ;;  %v8848_v3 = vcombine.high %v775_v12, %v783_v15  ;;  %v791_v50 = vld [vmem:[%s13741_s3 + $0x120] sm:$0xff] }
 0x2e4   :  { %v8567_v45 = vmul.f32 0.25, %v8461_v31  ;;  %v8569_v48 = vmul.f32 0.25, %v8475_v33  ;;  %7625 = vmatpush1.bf16.msra.mxu1 %v9805_v51  ;;  %7462 = vmatprep.subr.bf16.mxu0 %v9820_v19  ;;  %v799_v35 = vld [vmem:[%s13741_s3 + $0x160] sm:$0xff]  ;;  %v792_v51 = vld [vmem:[%s13741_s3 + $0x128] sm:$0xff]  ;;  %v10027_v52 = vmov 1983009808  }
 0x2e5   :  { %v8568_v4 = vmul.f32 0.25, %v8468_v39  ;;  %v8570_v43 = vmul.f32 0.25, %v8482_v41  ;;  %7626 = vmatprep.subr.bf16.mxu1 %v9822_v54  ;;  %v800_v19 = vld [vmem:[%s13741_s3 + $0x168] sm:$0xff]  ;;  %v8682_v17 = vunpack.c.l.s4 %v10027_v52  ;;  %v8847_v54 = vcombine.low %v775_v12, %v783_v15  ;;  %v807_v33 = vld [vmem:[%s13741_s3 + $0x1a0] sm:$0xff] }
 0x2e6   :  { %v8583_v57 = vadd.f32 1e-05, %v8567_v45  ;;  %v8585_v63 = vadd.f32 1e-05, %v8569_v48  ;;  %v8864_v56 = vcombine.high %v791_v50, %v799_v35  ;;  %v8866_v31 = vcombine.high %v792_v51, %v800_v19  ;;  %v808_v39 = vld [vmem:[%s13741_s3 + $0x1a8] sm:$0xff]  ;;  %v831_v20 = vld [vmem:[%s13741_s3 + $0x260] sm:$0xff] }
 0x2e7   :  { %v8584_v53 = vadd.f32 1e-05, %v8568_v4  ;;  %v8586_v10 = vadd.f32 1e-05, %v8570_v43  ;;  %7463 = vmatpush1.bf16.msra.mxu0 %v9819_v42  ;;  %v816_v41 = vld [vmem:[%s13741_s3 + $0x1e8] sm:$0xff]  ;;  %v8683_v48 = vunpack.c.0.s8 %v8682_v17  ;;  %v8865_v43 = vcombine.low %v792_v51, %v800_v19  ;;  %v847_v26 = vld [vmem:[%s13741_s3 + $0x2e0] sm:$0xff] }
 0x2e8   :  { %9993 = vrsqrt.f32 %v8583_v57  ;;  %7627 = vmatpush1.bf16.msra.mxu1 %v9821_v9  ;;  %7464 = vmatprep.subr.bf16.mxu0 %v9836_v2  ;;  %v8863_v9 = vcombine.low %v791_v50, %v799_v35  ;;  %v855_v52 = vld [vmem:[%s13741_s3 + $0x320] sm:$0xff] }
 0x2e9   :  { %9995 = vrsqrt.f32 %v8585_v63  ;;  %7628 = vmatprep.subr.bf16.mxu1 %v9838_v6  ;;  %v8880_v6 = vcombine.high %v807_v33, %v815_v34  ;;  %v8882_v63 = vcombine.high %v808_v39, %v816_v41  ;;  %v863_v17 = vld [vmem:[%s13741_s3 + $0x360] sm:$0xff] }
 0x2ea   :  { %9997 = vrsqrt.f32 %v8584_v53  ;;  %v824_v53 = vld [vmem:[%s13741_s3 + $0x228] sm:$0xff] }
 0x2eb   :  { %9999 = vrsqrt.f32 %v8586_v10  ;;  %7465 = vmatpush1.bf16.msra.mxu0 %v9835_v5  ;;  %v12087_v5 = vsub.s32 %v8683_v48, %v10459_v59  ;;  %v8927_v48 = vcombine.low %v855_v52, %v863_v17 }
 0x2ec   :  { %7629 = vmatpush1.bf16.msra.mxu1 %v9837_v11  ;;  %7639 = vmatprep.subr.bf16.mxu0 %v8832_v38  ;;  %v8879_v11 = vcombine.low %v807_v33, %v815_v34  ;;  %v8928_v34 = vcombine.high %v855_v52, %v863_v17 }
 0x2ed   :  { %7803 = vmatprep.subr.bf16.mxu1 %v8834_v40  ;;  %v8881_v40 = vcombine.low %v808_v39, %v816_v41  ;;  %v871_v39 = vld [vmem:[%s13741_s3 + $0x3a0] sm:$0xff] }
 0x2ee   :  { %7467 = vmatmul.mubr.bf16.vlgmr.msra.gmra.mrb[12].mxu0 %v11209_v61  ;;  %v879_v41 = vld [vmem:[%s13741_s3 + $0x3e0] sm:$0xff] }
 0x2ef   :  { %7631 = vmatmul.mubr.bf16.vlgmr.msra.gmra.mrb[12].mxu1 %v11209_v61  ;;  %7640 = vmatpush1.bf16.msra.mxu0 %v8831_v44  ;;  %v839_v44 = vld [vmem:[%s13741_s3 + $0x2a0] sm:$0xff] }
 0x2f0   :  { %7671 = vmatprep.mubr.bf16.mxu0 %v10535_v13  ;;  %7804 = vmatpush1.bf16.msra.mxu1 %v8833_v32  ;;  %v848_v32 = vld [vmem:[%s13741_s3 + $0x2e8] sm:$0xff]  ;;  %v8912_v51 = vcombine.high %v839_v44, %v847_v26 }
 0x2f1   :  { %7835 = vmatprep.mubr.bf16.mxu1 %v10535_v13  ;;  %7641 = vmatprep.subr.bf16.mxu0 %v8848_v3  ;;  %v8914_v19 = vcombine.high %v840_v29, %v848_v32  ;;  %v8913_v33 = vcombine.low %v840_v29, %v848_v32 }
 0x2f2   :  { %v9994_v37 = vpop.eup %9993  ;;  %7805 = vmatprep.subr.bf16.mxu1 %v8850_v36 }
 0x2f3   :  { %v9996_v42 = vpop.eup %9995  ;;  %v8615_v45 = vmul.f32 %v9994_v37, %v11947_v18  ;;  %7642 = vmatpush1.bf16.msra.mxu0 %v8847_v54  ;;  %v823_v18 = vld [vmem:[%s13741_s3 + $0x220] sm:$0xff] }
 0x2f4   :  { %v9998_v2 = vpop.eup %9997  ;;  %v8617_v4 = vmul.f32 %v9996_v42, %v11950_v21  ;;  %7806 = vmatpush1.bf16.msra.mxu1 %v8849_v55  ;;  %7643 = vmatprep.subr.bf16.mxu0 %v8864_v56  ;;  %v8896_v12 = vcombine.high %v823_v18, %v831_v20  ;;  %v8895_v50 = vcombine.low %v823_v18, %v831_v20  ;;  %v856_v55 = vld [vmem:[%s13741_s3 + $0x328] sm:$0xff] }
 0x2f5   :  { %v10000_v23 = vpop.eup %9999  ;;  %v8631_v7 = vmax.f32 %v8615_v45, 0.0  ;;  %v8616_v57 = vmul.f32 %v9998_v2, %v11953_v27  ;;  %7807 = vmatprep.subr.bf16.mxu1 %v8866_v31  ;;  %v832_v27 = vld [vmem:[%s13741_s3 + $0x268] sm:$0xff]  ;;  %v8911_v31 = vcombine.low %v839_v44, %v847_v26  ;;  %v8944_v2 = vcombine.high %v871_v39, %v879_v41 }
 0x2f6   :  { %v8633_v8 = vmax.f32 %v8617_v4, 0.0  ;;  %v8618_v21 = vmul.f32 %v10000_v23, %v11956_v25  ;;  %v8898_v15 = vcombine.high %v824_v53, %v832_v27  ;;  %v8897_v36 = vcombine.low %v824_v53, %v832_v27  ;;  %v864_v56 = vld [vmem:[%s13741_s3 + $0x368] sm:$0xff] }
 0x2f7   :  { %v8632_v10 = vmax.f32 %v8616_v57, 0.0  ;;  %7644 = vmatpush1.bf16.msra.mxu0 %v8863_v9  ;;  %v8930_v37 = vcombine.high %v856_v55, %v864_v56  ;;  %v872_v42 = vld [vmem:[%s13741_s3 + $0x3a8] sm:$0xff]  ;;  %v8929_v9 = vcombine.low %v856_v55, %v864_v56  ;;  %v8943_v57 = vcombine.low %v871_v39, %v879_v41  ;;  %v959_v55 = vld [vmem:[%s13741_s3 + $0x660] sm:$0xff] }
 0x2f8   :  { %v8634_v38 = vmax.f32 %v8618_v21, 0.0  ;;  %7808 = vmatpush1.bf16.msra.mxu1 %v8865_v43  ;;  %7645 = vmatprep.subr.bf16.mxu0 %v8880_v6  ;;  %v880_v45 = vld [vmem:[%s13741_s3 + $0x3e8] sm:$0xff]  ;;  %v887_v43 = vld [vmem:[%s13741_s3 + $0x420] sm:$0xff] }
 0x2f9   :  { %v9847_v25 = vpack.c.bf16 %v8632_v10, %v8631_v7  ;;  %7809 = vmatprep.subr.bf16.mxu1 %v8882_v63  ;;  %v8946_v4 = vcombine.high %v872_v42, %v880_v45  ;;  %v895_v6 = vld [vmem:[%s13741_s3 + $0x460] sm:$0xff]  ;;  %v888_v23 = vld [vmem:[%s13741_s3 + $0x428] sm:$0xff]  ;;  %v8945_v63 = vcombine.low %v872_v42, %v880_v45 }
 0x2fa   :  { %v9848_v59 = vpack.c.bf16 %v8634_v38, %v8633_v8  ;;  %v896_v7 = vld [vmem:[%s13741_s3 + $0x468] sm:$0xff]  ;;  %v8960_v18 = vcombine.high %v887_v43, %v895_v6  ;;  %v903_v8 = vld [vmem:[%s13741_s3 + $0x4a0] sm:$0xff]  ;;  %v8959_v10 = vcombine.low %v887_v43, %v895_v6 }
 0x2fb   :  { %v8687_v3 = vrot.slane %v9847_v25, %v12087_v5  ;;  %7646 = vmatpush1.bf16.msra.mxu0 %v8879_v11  ;;  %v8962_v20 = vcombine.high %v888_v23, %v896_v7  ;;  %v911_v21 = vld [vmem:[%s13741_s3 + $0x4e0] sm:$0xff]  ;;  %v904_v53 = vld [vmem:[%s13741_s3 + $0x4a8] sm:$0xff]  ;;  %v8961_v11 = vcombine.low %v888_v23, %v896_v7 }
 0x2fc   :  { %v8694_v35 = vrot.slane %v9848_v59, %v12087_v5  ;;  %7810 = vmatpush1.bf16.msra.mxu1 %v8881_v40  ;;  %7647 = vmatprep.subr.bf16.mxu0 %v8896_v12  ;;  %v912_v27 = vld [vmem:[%s13741_s3 + $0x4e8] sm:$0xff]  ;;  %v8976_v38 = vcombine.high %v903_v8, %v911_v21  ;;  %v919_v12 = vld [vmem:[%s13741_s3 + $0x520] sm:$0xff]  ;;  %v8975_v26 = vcombine.low %v903_v8, %v911_v21 }
 0x2fd   :  { %7811 = vmatprep.subr.bf16.mxu1 %v8898_v15  ;;  %v8978_v40 = vcombine.high %v904_v53, %v912_v27  ;;  %v927_v25 = vld [vmem:[%s13741_s3 + $0x560] sm:$0xff]  ;;  %v920_v15 = vld [vmem:[%s13741_s3 + $0x528] sm:$0xff]  ;;  %v8977_v59 = vcombine.low %v904_v53, %v912_v27 }
 0x2fe   :  { %v8695_v54 = vcombine.low %v8687_v3, %v8694_v35  ;;  %v928_v44 = vld [vmem:[%s13741_s3 + $0x568] sm:$0xff]  ;;  %v8992_v29 = vcombine.high %v919_v12, %v927_v25  ;;  %v935_v3 = vld [vmem:[%s13741_s3 + $0x5a0] sm:$0xff] }
 0x2ff   :  { %7648 = vmatpush1.bf16.msra.mxu0 %v8895_v50  ;;  %v8994_v32 = vcombine.high %v920_v15, %v928_v44  ;;  %v943_v50 = vld [vmem:[%s13741_s3 + $0x5e0] sm:$0xff]  ;;  %v936_v35 = vld [vmem:[%s13741_s3 + $0x5a8] sm:$0xff] }
 0x300   :  { %8751 = vst [vmem:[%s13744_s5] sm:$0xff] %v8695_v54  ;;  %7812 = vmatpush1.bf16.msra.mxu1 %v8897_v36  ;;  %7649 = vmatprep.subr.bf16.mxu0 %v8912_v51  ;;  %v944_v36 = vld [vmem:[%s13741_s3 + $0x5e8] sm:$0xff]  ;;  %v8991_v51 = vcombine.low %v919_v12, %v927_v25  ;;  %v9008_v52 = vcombine.high %v935_v3, %v943_v50  ;;  %v951_v54 = vld [vmem:[%s13741_s3 + $0x620] sm:$0xff] }
 0x301   :  { %7813 = vmatprep.subr.bf16.mxu1 %v8914_v19  ;;  %v8993_v19 = vcombine.low %v920_v15, %v928_v44  ;;  %v9010_v17 = vcombine.high %v936_v35, %v944_v36  ;;  %v952_v56 = vld [vmem:[%s13741_s3 + $0x628] sm:$0xff]  ;;  %v967_v41 = vld [vmem:[%s13741_s3 + $0x6a0] sm:$0xff] }
 0x302   :  { %v975_v42 = vld [vmem:[%s13741_s3 + $0x6e0] sm:$0xff]  ;;  %v968_v45 = vld [vmem:[%s13741_s3 + $0x6a8] sm:$0xff] }
 0x303   :  { %7650 = vmatpush1.bf16.msra.mxu0 %v8911_v31  ;;  %v960_v31 = vld [vmem:[%s13741_s3 + $0x668] sm:$0xff]  ;;  %v983_v6 = vld [vmem:[%s13741_s3 + $0x720] sm:$0xff] }
 0x304   :  { %7814 = vmatpush1.bf16.msra.mxu1 %v8913_v33  ;;  %7651 = vmatprep.subr.bf16.mxu0 %v8928_v34  ;;  %v9007_v33 = vcombine.low %v935_v3, %v943_v50  ;;  %v9009_v34 = vcombine.low %v936_v35, %v944_v36  ;;  %v9026_v39 = vcombine.high %v952_v56, %v960_v31  ;;  %v991_v23 = vld [vmem:[%s13741_s3 + $0x760] sm:$0xff]  ;;  %v984_v7 = vld [vmem:[%s13741_s3 + $0x728] sm:$0xff] }
 0x305   :  { %7815 = vmatprep.subr.bf16.mxu1 %v8930_v37  ;;  %v9024_v37 = vcombine.high %v951_v54, %v959_v55  ;;  %v999_v21 = vld [vmem:[%s13741_s3 + $0x7a0] sm:$0xff]  ;;  %v1000_v27 = vld [vmem:[%s13741_s3 + $0x7a8] sm:$0xff] }
 0x306   :  { %v1007_v53 = vld [vmem:[%s13741_s3 + $0x7e0] sm:$0xff]  ;;  %v1016_v44 = vld [vmem:[%s13741_s3 + $0x828] sm:$0xff] }
 0x307   :  { %7652 = vmatpush1.bf16.msra.mxu0 %v8927_v48  ;;  %v976_v48 = vld [vmem:[%s13741_s3 + $0x6e8] sm:$0xff]  ;;  %v1015_v25 = vld [vmem:[%s13741_s3 + $0x820] sm:$0xff] }
 0x308   :  { %7816 = vmatpush1.bf16.msra.mxu1 %v8929_v9  ;;  %7653 = vmatprep.subr.bf16.mxu0 %v8944_v2  ;;  %v9023_v9 = vcombine.low %v951_v54, %v959_v55  ;;  %v9025_v2 = vcombine.low %v952_v56, %v960_v31  ;;  %v9042_v43 = vcombine.high %v968_v45, %v976_v48  ;;  %v1023_v15 = vld [vmem:[%s13741_s3 + $0x860] sm:$0xff]  ;;  %v1048_v31 = vld [vmem:[%s13741_s3 + $0x928] sm:$0xff] }
 0x309   :  { %7817 = vmatprep.subr.bf16.mxu1 %v8946_v4  ;;  %v9040_v4 = vcombine.high %v967_v41, %v975_v42  ;;  %v1031_v50 = vld [vmem:[%s13741_s3 + $0x8a0] sm:$0xff]  ;;  %v9087_v36 = vcombine.low %v1015_v25, %v1023_v15 }
 0x30a   :  { %v1039_v35 = vld [vmem:[%s13741_s3 + $0x8e0] sm:$0xff] }
 0x30b   :  { %7654 = vmatpush1.bf16.msra.mxu0 %v8943_v57  ;;  %v992_v57 = vld [vmem:[%s13741_s3 + $0x768] sm:$0xff]  ;;  %v1047_v54 = vld [vmem:[%s13741_s3 + $0x920] sm:$0xff] }
 0x30c   :  { %7818 = vmatpush1.bf16.msra.mxu1 %v8945_v63  ;;  %7655 = vmatprep.subr.bf16.mxu0 %v8960_v18  ;;  %v9039_v63 = vcombine.low %v967_v41, %v975_v42  ;;  %v9041_v18 = vcombine.low %v968_v45, %v976_v48  ;;  %v9058_v8 = vcombine.high %v984_v7, %v992_v57  ;;  %v1055_v55 = vld [vmem:[%s13741_s3 + $0x960] sm:$0xff]  ;;  %v1064_v48 = vld [vmem:[%s13741_s3 + $0x9a8] sm:$0xff] }
 0x30d   :  { %7819 = vmatprep.subr.bf16.mxu1 %v8962_v20  ;;  %v9056_v20 = vcombine.high %v983_v6, %v991_v23  ;;  %v1063_v42 = vld [vmem:[%s13741_s3 + $0x9a0] sm:$0xff] }
 0x30e   :  { %v1071_v45 = vld [vmem:[%s13741_s3 + $0x9e0] sm:$0xff] }
 0x30f   :  { %7656 = vmatpush1.bf16.msra.mxu0 %v8959_v10  ;;  %v1008_v10 = vld [vmem:[%s13741_s3 + $0x7e8] sm:$0xff] }
 0x310   :  { %7820 = vmatpush1.bf16.msra.mxu1 %v8961_v11  ;;  %7657 = vmatprep.subr.bf16.mxu0 %v8976_v38  ;;  %v9055_v11 = vcombine.low %v983_v6, %v991_v23  ;;  %v9057_v38 = vcombine.low %v984_v7, %v992_v57  ;;  %v9074_v12 = vcombine.high %v1000_v27, %v1008_v10  ;;  %v1079_v23 = vld [vmem:[%s13741_s3 + $0xa20] sm:$0xff]  ;;  %v1080_v57 = vld [vmem:[%s13741_s3 + $0xa28] sm:$0xff] }
 0x311   :  { %7821 = vmatprep.subr.bf16.mxu1 %v8978_v40  ;;  %v9072_v40 = vcombine.high %v999_v21, %v1007_v53  ;;  %v1087_v7 = vld [vmem:[%s13741_s3 + $0xa60] sm:$0xff] }
 0x313   :  { %7658 = vmatpush1.bf16.msra.mxu0 %v8975_v26  ;;  %v1024_v26 = vld [vmem:[%s13741_s3 + $0x868] sm:$0xff] }
 0x314   :  { %7822 = vmatpush1.bf16.msra.mxu1 %v8977_v59  ;;  %7659 = vmatprep.subr.bf16.mxu0 %v8992_v29  ;;  %v9071_v59 = vcombine.low %v999_v21, %v1007_v53  ;;  %v9073_v29 = vcombine.low %v1000_v27, %v1008_v10  ;;  %v9090_v3 = vcombine.high %v1016_v44, %v1024_v26  ;;  %v1095_v53 = vld [vmem:[%s13741_s3 + $0xaa0] sm:$0xff]  ;;  %v1096_v10 = vld [vmem:[%s13741_s3 + $0xaa8] sm:$0xff] }
 0x315   :  { %7823 = vmatprep.subr.bf16.mxu1 %v8994_v32  ;;  %v9088_v32 = vcombine.high %v1015_v25, %v1023_v15  ;;  %v1103_v27 = vld [vmem:[%s13741_s3 + $0xae0] sm:$0xff] }
 0x316   :  { %v1111_v15 = vld [vmem:[%s13741_s3 + $0xb20] sm:$0xff] }
 0x317   :  { %7660 = vmatpush1.bf16.msra.mxu0 %v8991_v51  ;;  %v1032_v51 = vld [vmem:[%s13741_s3 + $0x8a8] sm:$0xff] }
 0x318   :  { %7824 = vmatpush1.bf16.msra.mxu1 %v8993_v19  ;;  %7661 = vmatprep.subr.bf16.mxu0 %v9008_v52  ;;  %v1040_v19 = vld [vmem:[%s13741_s3 + $0x8e8] sm:$0xff]  ;;  %v9089_v52 = vcombine.low %v1016_v44, %v1024_v26  ;;  %v1119_v44 = vld [vmem:[%s13741_s3 + $0xb60] sm:$0xff] }
 0x319   :  { %7825 = vmatprep.subr.bf16.mxu1 %v9010_v17  ;;  %v9104_v17 = vcombine.high %v1031_v50, %v1039_v35  ;;  %v9106_v56 = vcombine.high %v1032_v51, %v1040_v19  ;;  %v1112_v26 = vld [vmem:[%s13741_s3 + $0xb28] sm:$0xff] }
 0x31b   :  { %7662 = vmatpush1.bf16.msra.mxu0 %v9007_v33  ;;  %v1056_v33 = vld [vmem:[%s13741_s3 + $0x968] sm:$0xff] }
 0x31c   :  { %7826 = vmatpush1.bf16.msra.mxu1 %v9009_v34  ;;  %7663 = vmatprep.subr.bf16.mxu0 %v9024_v37  ;;  %v9103_v34 = vcombine.low %v1031_v50, %v1039_v35  ;;  %v9105_v37 = vcombine.low %v1032_v51, %v1040_v19  ;;  %v9122_v41 = vcombine.high %v1048_v31, %v1056_v33  ;;  %v1127_v35 = vld [vmem:[%s13741_s3 + $0xba0] sm:$0xff]  ;;  %v1128_v51 = vld [vmem:[%s13741_s3 + $0xba8] sm:$0xff] }
 0x31d   :  { %7827 = vmatprep.subr.bf16.mxu1 %v9026_v39  ;;  %v9120_v39 = vcombine.high %v1047_v54, %v1055_v55  ;;  %v1136_v19 = vld [vmem:[%s13741_s3 + $0xbe8] sm:$0xff] }
 0x31f   :  { %7664 = vmatpush1.bf16.msra.mxu0 %v9023_v9  ;;  %v1072_v9 = vld [vmem:[%s13741_s3 + $0x9e8] sm:$0xff] }
 0x320   :  { %7828 = vmatpush1.bf16.msra.mxu1 %v9025_v2  ;;  %7665 = vmatprep.subr.bf16.mxu0 %v9040_v4  ;;  %v9119_v2 = vcombine.low %v1047_v54, %v1055_v55  ;;  %v9121_v4 = vcombine.low %v1048_v31, %v1056_v33  ;;  %v9138_v6 = vcombine.high %v1064_v48, %v1072_v9  ;;  %v1151_v31 = vld [vmem:[%s13741_s3 + $0xc60] sm:$0xff]  ;;  %v1144_v33 = vld [vmem:[%s13741_s3 + $0xc28] sm:$0xff] }
 0x321   :  { %7829 = vmatprep.subr.bf16.mxu1 %v9042_v43  ;;  %v9136_v43 = vcombine.high %v1063_v42, %v1071_v45  ;;  %v9202_v55 = vcombine.high %v1128_v51, %v1136_v19 }
 0x323   :  { %7666 = vmatpush1.bf16.msra.mxu0 %v9039_v63  ;;  %v1088_v63 = vld [vmem:[%s13741_s3 + $0xa68] sm:$0xff] }
 0x324   :  { %7830 = vmatpush1.bf16.msra.mxu1 %v9041_v18  ;;  %7667 = vmatprep.subr.bf16.mxu0 %v9056_v20  ;;  %v9135_v18 = vcombine.low %v1063_v42, %v1071_v45  ;;  %v9137_v20 = vcombine.low %v1064_v48, %v1072_v9  ;;  %v9154_v21 = vcombine.high %v1080_v57, %v1088_v63  ;;  %v1159_v45 = vld [vmem:[%s13741_s3 + $0xca0] sm:$0xff]  ;;  %v1160_v9 = vld [vmem:[%s13741_s3 + $0xca8] sm:$0xff] }
 0x325   :  { %7831 = vmatprep.subr.bf16.mxu1 %v9058_v8  ;;  %v9152_v8 = vcombine.high %v1079_v23, %v1087_v7  ;;  %v1167_v48 = vld [vmem:[%s13741_s3 + $0xce0] sm:$0xff] }
 0x327   :  { %7668 = vmatpush1.bf16.msra.mxu0 %v9055_v11  ;;  %v1104_v11 = vld [vmem:[%s13741_s3 + $0xae8] sm:$0xff] }
 0x328   :  { %7832 = vmatpush1.bf16.msra.mxu1 %v9057_v38  ;;  %7669 = vmatprep.subr.bf16.mxu0 %v9072_v40  ;;  %v9151_v38 = vcombine.low %v1079_v23, %v1087_v7  ;;  %v9153_v40 = vcombine.low %v1080_v57, %v1088_v63  ;;  %v9170_v25 = vcombine.high %v1096_v10, %v1104_v11  ;;  %v1175_v7 = vld [vmem:[%s13741_s3 + $0xd20] sm:$0xff]  ;;  %v1176_v63 = vld [vmem:[%s13741_s3 + $0xd28] sm:$0xff] }
 0x329   :  { %7833 = vmatprep.subr.bf16.mxu1 %v9074_v12  ;;  %v9168_v12 = vcombine.high %v1095_v53, %v1103_v27  ;;  %v1183_v57 = vld [vmem:[%s13741_s3 + $0xd60] sm:$0xff] }
 0x32b   :  { %7670 = vmatpush1.bf16.msra.mxu0 %v9071_v59  ;;  %v1120_v59 = vld [vmem:[%s13741_s3 + $0xb68] sm:$0xff] }
 0x32c   :  { %7834 = vmatpush1.bf16.msra.mxu1 %v9073_v29  ;;  %7680 = vmatprep.subr.bf16.mxu0 %v9088_v32  ;;  %v9167_v29 = vcombine.low %v1095_v53, %v1103_v27  ;;  %v9169_v32 = vcombine.low %v1096_v10, %v1104_v11  ;;  %v9186_v50 = vcombine.high %v1112_v26, %v1120_v59  ;;  %v1191_v27 = vld [vmem:[%s13741_s3 + $0xda0] sm:$0xff]  ;;  %v1192_v11 = vld [vmem:[%s13741_s3 + $0xda8] sm:$0xff] }
 0x32d   :  { %7844 = vmatprep.subr.bf16.mxu1 %v9090_v3  ;;  %v9184_v3 = vcombine.high %v1111_v15, %v1119_v44  ;;  %v1199_v10 = vld [vmem:[%s13741_s3 + $0xde0] sm:$0xff] }
 0x32e   :  { %7672 = vmatmul.mubr.bf16.vlgmr.msra.gmra.mrb[16].mxu0 %v10537_v16 }
 0x32f   :  { %7836 = vmatmul.mubr.bf16.vlgmr.msra.gmra.mrb[16].mxu1 %v10537_v16  ;;  %7681 = vmatpush1.bf16.msra.mxu0 %v9087_v36  ;;  %v1135_v36 = vld [vmem:[%s13741_s3 + $0xbe0] sm:$0xff] }
 0x330   :  { %7712 = vmatprep.mubr.bf16.mxu0 %v10558_v24  ;;  %7845 = vmatpush1.bf16.msra.mxu1 %v9089_v52  ;;  %v9183_v52 = vcombine.low %v1111_v15, %v1119_v44  ;;  %v9200_v54 = vcombine.high %v1127_v35, %v1135_v36  ;;  %v1207_v44 = vld [vmem:[%s13741_s3 + $0xe20] sm:$0xff] }
 0x331   :  { %7876 = vmatprep.mubr.bf16.mxu1 %v10558_v24  ;;  %7682 = vmatprep.subr.bf16.mxu0 %v9104_v17  ;;  %v9185_v17 = vcombine.low %v1112_v26, %v1120_v59  ;;  %v1215_v26 = vld [vmem:[%s13741_s3 + $0xe60] sm:$0xff]  ;;  %v1208_v59 = vld [vmem:[%s13741_s3 + $0xe28] sm:$0xff] }
 0x332   :  { %7846 = vmatprep.subr.bf16.mxu1 %v9106_v56  ;;  %v1143_v56 = vld [vmem:[%s13741_s3 + $0xc20] sm:$0xff] }
 0x333   :  { %7683 = vmatpush1.bf16.msra.mxu0 %v9103_v34  ;;  %v1152_v34 = vld [vmem:[%s13741_s3 + $0xc68] sm:$0xff] }
 0x334   :  { %7847 = vmatpush1.bf16.msra.mxu1 %v9105_v37  ;;  %7684 = vmatprep.subr.bf16.mxu0 %v9120_v39  ;;  %v9199_v37 = vcombine.low %v1127_v35, %v1135_v36  ;;  %v9201_v39 = vcombine.low %v1128_v51, %v1136_v19  ;;  %v9218_v42 = vcombine.high %v1144_v33, %v1152_v34  ;;  %v1223_v36 = vld [vmem:[%s13741_s3 + $0xea0] sm:$0xff]  ;;  %v1224_v19 = vld [vmem:[%s13741_s3 + $0xea8] sm:$0xff] }
 0x335   :  { %7848 = vmatprep.subr.bf16.mxu1 %v9122_v41  ;;  %v9216_v41 = vcombine.high %v1143_v56, %v1151_v31  ;;  %v1231_v51 = vld [vmem:[%s13741_s3 + $0xee0] sm:$0xff] }
 0x337   :  { %7685 = vmatpush1.bf16.msra.mxu0 %v9119_v2  ;;  %v1168_v2 = vld [vmem:[%s13741_s3 + $0xce8] sm:$0xff] }
 0x338   :  { %7849 = vmatpush1.bf16.msra.mxu1 %v9121_v4  ;;  %7686 = vmatprep.subr.bf16.mxu0 %v9136_v43  ;;  %v9215_v4 = vcombine.low %v1143_v56, %v1151_v31  ;;  %v9217_v43 = vcombine.low %v1144_v33, %v1152_v34  ;;  %v9234_v23 = vcombine.high %v1160_v9, %v1168_v2  ;;  %v1239_v31 = vld [vmem:[%s13741_s3 + $0xf20] sm:$0xff]  ;;  %v1240_v34 = vld [vmem:[%s13741_s3 + $0xf28] sm:$0xff] }
 0x339   :  { %7850 = vmatprep.subr.bf16.mxu1 %v9138_v6  ;;  %v9232_v6 = vcombine.high %v1159_v45, %v1167_v48  ;;  %v1247_v33 = vld [vmem:[%s13741_s3 + $0xf60] sm:$0xff] }
 0x33b   :  { %7687 = vmatpush1.bf16.msra.mxu0 %v9135_v18  ;;  %v1184_v18 = vld [vmem:[%s13741_s3 + $0xd68] sm:$0xff] }
 0x33c   :  { %7851 = vmatpush1.bf16.msra.mxu1 %v9137_v20  ;;  %7688 = vmatprep.subr.bf16.mxu0 %v9152_v8  ;;  %v9231_v20 = vcombine.low %v1159_v45, %v1167_v48  ;;  %v9233_v8 = vcombine.low %v1160_v9, %v1168_v2  ;;  %v9250_v53 = vcombine.high %v1176_v63, %v1184_v18  ;;  %v1255_v48 = vld [vmem:[%s13741_s3 + $0xfa0] sm:$0xff]  ;;  %v1256_v2 = vld [vmem:[%s13741_s3 + $0xfa8] sm:$0xff] }
 0x33d   :  { %7852 = vmatprep.subr.bf16.mxu1 %v9154_v21  ;;  %v9248_v21 = vcombine.high %v1175_v7, %v1183_v57  ;;  %v1263_v9 = vld [vmem:[%s13741_s3 + $0xfe0] sm:$0xff] }
 0x33f   :  { %7689 = vmatpush1.bf16.msra.mxu0 %v9151_v38  ;;  %v1200_v38 = vld [vmem:[%s13741_s3 + $0xde8] sm:$0xff] }
 0x340   :  { %7853 = vmatpush1.bf16.msra.mxu1 %v9153_v40  ;;  %7690 = vmatprep.subr.bf16.mxu0 %v9168_v12  ;;  %v9247_v40 = vcombine.low %v1175_v7, %v1183_v57  ;;  %v9249_v12 = vcombine.low %v1176_v63, %v1184_v18  ;;  %v9266_v15 = vcombine.high %v1192_v11, %v1200_v38  ;;  %v1271_v57 = vld [vmem:[%s13741_s3 + $0x1020] sm:$0xff]  ;;  %v1272_v18 = vld [vmem:[%s13741_s3 + $0x1028] sm:$0xff] }
 0x341   :  { %7854 = vmatprep.subr.bf16.mxu1 %v9170_v25  ;;  %v9264_v25 = vcombine.high %v1191_v27, %v1199_v10  ;;  %v1279_v63 = vld [vmem:[%s13741_s3 + $0x1060] sm:$0xff] }
 0x343   :  { %7691 = vmatpush1.bf16.msra.mxu0 %v9167_v29  ;;  %v1216_v29 = vld [vmem:[%s13741_s3 + $0xe68] sm:$0xff] }
 0x344   :  { %7855 = vmatpush1.bf16.msra.mxu1 %v9169_v32  ;;  %7692 = vmatprep.subr.bf16.mxu0 %v9184_v3  ;;  %v9263_v32 = vcombine.low %v1191_v27, %v1199_v10  ;;  %v9265_v3 = vcombine.low %v1192_v11, %v1200_v38  ;;  %v9282_v35 = vcombine.high %v1208_v59, %v1216_v29  ;;  %v1287_v10 = vld [vmem:[%s13741_s3 + $0x10a0] sm:$0xff] }
 0x345   :  { %7856 = vmatprep.subr.bf16.mxu1 %v9186_v50  ;;  %v9280_v50 = vcombine.high %v1207_v44, %v1215_v26  ;;  %v1295_v11 = vld [vmem:[%s13741_s3 + $0x10e0] sm:$0xff]  ;;  %v9343_v38 = vcombine.low %v1271_v57, %v1279_v63 }
 0x347   :  { %7693 = vmatpush1.bf16.msra.mxu0 %v9183_v52  ;;  %v1232_v52 = vld [vmem:[%s13741_s3 + $0xee8] sm:$0xff] }
 0x348   :  { %7857 = vmatpush1.bf16.msra.mxu1 %v9185_v17  ;;  %7694 = vmatprep.subr.bf16.mxu0 %v9200_v54  ;;  %v9279_v17 = vcombine.low %v1207_v44, %v1215_v26  ;;  %v9281_v54 = vcombine.low %v1208_v59, %v1216_v29  ;;  %v9298_v56 = vcombine.high %v1224_v19, %v1232_v52  ;;  %v1303_v44 = vld [vmem:[%s13741_s3 + $0x1120] sm:$0xff]  ;;  %v1304_v29 = vld [vmem:[%s13741_s3 + $0x1128] sm:$0xff] }
 0x349   :  { %7858 = vmatprep.subr.bf16.mxu1 %v9202_v55  ;;  %v9296_v55 = vcombine.high %v1223_v36, %v1231_v51  ;;  %v1311_v26 = vld [vmem:[%s13741_s3 + $0x1160] sm:$0xff] }
 0x34b   :  { %7695 = vmatpush1.bf16.msra.mxu0 %v9199_v37  ;;  %v1248_v37 = vld [vmem:[%s13741_s3 + $0xf68] sm:$0xff] }
 0x34c   :  { %7859 = vmatpush1.bf16.msra.mxu1 %v9201_v39  ;;  %7696 = vmatprep.subr.bf16.mxu0 %v9216_v41  ;;  %v9295_v39 = vcombine.low %v1223_v36, %v1231_v51  ;;  %v9297_v41 = vcombine.low %v1224_v19, %v1232_v52  ;;  %v9314_v45 = vcombine.high %v1240_v34, %v1248_v37  ;;  %v1319_v51 = vld [vmem:[%s13741_s3 + $0x11a0] sm:$0xff]  ;;  %v1320_v52 = vld [vmem:[%s13741_s3 + $0x11a8] sm:$0xff] }
 0x34d   :  { %7860 = vmatprep.subr.bf16.mxu1 %v9218_v42  ;;  %v9312_v42 = vcombine.high %v1239_v31, %v1247_v33  ;;  %v1327_v19 = vld [vmem:[%s13741_s3 + $0x11e0] sm:$0xff] }
 0x34f   :  { %7697 = vmatpush1.bf16.msra.mxu0 %v9215_v4  ;;  %v1264_v4 = vld [vmem:[%s13741_s3 + $0xfe8] sm:$0xff] }
 0x350   :  { %7861 = vmatpush1.bf16.msra.mxu1 %v9217_v43  ;;  %7698 = vmatprep.subr.bf16.mxu0 %v9232_v6  ;;  %v9311_v43 = vcombine.low %v1239_v31, %v1247_v33  ;;  %v9313_v6 = vcombine.low %v1240_v34, %v1248_v37  ;;  %v9330_v7 = vcombine.high %v1256_v2, %v1264_v4  ;;  %v1335_v33 = vld [vmem:[%s13741_s3 + $0x1220] sm:$0xff]  ;;  %v1336_v37 = vld [vmem:[%s13741_s3 + $0x1228] sm:$0xff] }
 0x351   :  { %7862 = vmatprep.subr.bf16.mxu1 %v9234_v23  ;;  %v9328_v23 = vcombine.high %v1255_v48, %v1263_v9  ;;  %v1343_v34 = vld [vmem:[%s13741_s3 + $0x1260] sm:$0xff] }
 0x353   :  { %7699 = vmatpush1.bf16.msra.mxu0 %v9231_v20  ;;  %v1280_v20 = vld [vmem:[%s13741_s3 + $0x1068] sm:$0xff] }
 0x354   :  { %7863 = vmatpush1.bf16.msra.mxu1 %v9233_v8  ;;  %7700 = vmatprep.subr.bf16.mxu0 %v9248_v21  ;;  %v9327_v8 = vcombine.low %v1255_v48, %v1263_v9  ;;  %v9329_v21 = vcombine.low %v1256_v2, %v1264_v4  ;;  %v9346_v27 = vcombine.high %v1272_v18, %v1280_v20  ;;  %v1351_v9 = vld [vmem:[%s13741_s3 + $0x12a0] sm:$0xff]  ;;  %v1352_v4 = vld [vmem:[%s13741_s3 + $0x12a8] sm:$0xff] }
 0x355   :  { %7864 = vmatprep.subr.bf16.mxu1 %v9250_v53  ;;  %v9344_v53 = vcombine.high %v1271_v57, %v1279_v63  ;;  %v1359_v2 = vld [vmem:[%s13741_s3 + $0x12e0] sm:$0xff] }
 0x356   :  { %v1367_v63 = vld [vmem:[%s13741_s3 + $0x1320] sm:$0xff] }
 0x357   :  { %7701 = vmatpush1.bf16.msra.mxu0 %v9247_v40  ;;  %v1288_v40 = vld [vmem:[%s13741_s3 + $0x10a8] sm:$0xff] }
 0x358   :  { %7865 = vmatpush1.bf16.msra.mxu1 %v9249_v12  ;;  %7702 = vmatprep.subr.bf16.mxu0 %v9264_v25  ;;  %v1296_v12 = vld [vmem:[%s13741_s3 + $0x10e8] sm:$0xff]  ;;  %v9345_v25 = vcombine.low %v1272_v18, %v1280_v20  ;;  %v1375_v18 = vld [vmem:[%s13741_s3 + $0x1360] sm:$0xff] }
 0x359   :  { %7866 = vmatprep.subr.bf16.mxu1 %v9266_v15  ;;  %v9360_v15 = vcombine.high %v1287_v10, %v1295_v11  ;;  %v9362_v59 = vcombine.high %v1288_v40, %v1296_v12  ;;  %v1368_v20 = vld [vmem:[%s13741_s3 + $0x1328] sm:$0xff] }
 0x35b   :  { %7703 = vmatpush1.bf16.msra.mxu0 %v9263_v32  ;;  %v1312_v32 = vld [vmem:[%s13741_s3 + $0x1168] sm:$0xff] }
 0x35c   :  { %7867 = vmatpush1.bf16.msra.mxu1 %v9265_v3  ;;  %7704 = vmatprep.subr.bf16.mxu0 %v9280_v50  ;;  %v9359_v3 = vcombine.low %v1287_v10, %v1295_v11  ;;  %v9361_v50 = vcombine.low %v1288_v40, %v1296_v12  ;;  %v9378_v36 = vcombine.high %v1304_v29, %v1312_v32  ;;  %v1383_v11 = vld [vmem:[%s13741_s3 + $0x13a0] sm:$0xff]  ;;  %v1384_v40 = vld [vmem:[%s13741_s3 + $0x13a8] sm:$0xff] }
 0x35d   :  { %7868 = vmatprep.subr.bf16.mxu1 %v9282_v35  ;;  %v9376_v35 = vcombine.high %v1303_v44, %v1311_v26  ;;  %v1392_v12 = vld [vmem:[%s13741_s3 + $0x13e8] sm:$0xff] }
 0x35f   :  { %7705 = vmatpush1.bf16.msra.mxu0 %v9279_v17  ;;  %v1328_v17 = vld [vmem:[%s13741_s3 + $0x11e8] sm:$0xff] }
 0x360   :  { %7869 = vmatpush1.bf16.msra.mxu1 %v9281_v54  ;;  %7706 = vmatprep.subr.bf16.mxu0 %v9296_v55  ;;  %v9375_v54 = vcombine.low %v1303_v44, %v1311_v26  ;;  %v9377_v55 = vcombine.low %v1304_v29, %v1312_v32  ;;  %v9394_v31 = vcombine.high %v1320_v52, %v1328_v17  ;;  %v1407_v29 = vld [vmem:[%s13741_s3 + $0x1460] sm:$0xff]  ;;  %v1400_v32 = vld [vmem:[%s13741_s3 + $0x1428] sm:$0xff] }
 0x361   :  { %7870 = vmatprep.subr.bf16.mxu1 %v9298_v56  ;;  %v9392_v56 = vcombine.high %v1319_v51, %v1327_v19  ;;  %v9458_v26 = vcombine.high %v1384_v40, %v1392_v12 }
 0x363   :  { %7707 = vmatpush1.bf16.msra.mxu0 %v9295_v39  ;;  %v1344_v39 = vld [vmem:[%s13741_s3 + $0x1268] sm:$0xff] }
 0x364   :  { %7871 = vmatpush1.bf16.msra.mxu1 %v9297_v41  ;;  %7708 = vmatprep.subr.bf16.mxu0 %v9312_v42  ;;  %v9391_v41 = vcombine.low %v1319_v51, %v1327_v19  ;;  %v9393_v42 = vcombine.low %v1320_v52, %v1328_v17  ;;  %v9410_v48 = vcombine.high %v1336_v37, %v1344_v39  ;;  %v1415_v19 = vld [vmem:[%s13741_s3 + $0x14a0] sm:$0xff]  ;;  %v1416_v17 = vld [vmem:[%s13741_s3 + $0x14a8] sm:$0xff] }
 0x365   :  { %7872 = vmatprep.subr.bf16.mxu1 %v9314_v45  ;;  %v9408_v45 = vcombine.high %v1335_v33, %v1343_v34  ;;  %v1423_v52 = vld [vmem:[%s13741_s3 + $0x14e0] sm:$0xff] }
 0x367   :  { %7709 = vmatpush1.bf16.msra.mxu0 %v9311_v43  ;;  %v1360_v43 = vld [vmem:[%s13741_s3 + $0x12e8] sm:$0xff] }
 0x368   :  { %7873 = vmatpush1.bf16.msra.mxu1 %v9313_v6  ;;  %7710 = vmatprep.subr.bf16.mxu0 %v9328_v23  ;;  %v9407_v6 = vcombine.low %v1335_v33, %v1343_v34  ;;  %v9409_v23 = vcombine.low %v1336_v37, %v1344_v39  ;;  %v9426_v57 = vcombine.high %v1352_v4, %v1360_v43  ;;  %v1431_v34 = vld [vmem:[%s13741_s3 + $0x1520] sm:$0xff]  ;;  %v1432_v39 = vld [vmem:[%s13741_s3 + $0x1528] sm:$0xff] }
 0x369   :  { %7874 = vmatprep.subr.bf16.mxu1 %v9330_v7  ;;  %v9424_v7 = vcombine.high %v1351_v9, %v1359_v2  ;;  %v1439_v37 = vld [vmem:[%s13741_s3 + $0x1560] sm:$0xff] }
 0x36b   :  { %7711 = vmatpush1.bf16.msra.mxu0 %v9327_v8  ;;  %v1376_v8 = vld [vmem:[%s13741_s3 + $0x1368] sm:$0xff] }
 0x36c   :  { %7875 = vmatpush1.bf16.msra.mxu1 %v9329_v21  ;;  %7721 = vmatprep.subr.bf16.mxu0 %v9344_v53  ;;  %v9423_v21 = vcombine.low %v1351_v9, %v1359_v2  ;;  %v9425_v53 = vcombine.low %v1352_v4, %v1360_v43  ;;  %v9442_v10 = vcombine.high %v1368_v20, %v1376_v8  ;;  %v1447_v2 = vld [vmem:[%s13741_s3 + $0x15a0] sm:$0xff]  ;;  %v1448_v43 = vld [vmem:[%s13741_s3 + $0x15a8] sm:$0xff] }
 0x36d   :  { %7885 = vmatprep.subr.bf16.mxu1 %v9346_v27  ;;  %v9440_v27 = vcombine.high %v1367_v63, %v1375_v18  ;;  %v1455_v4 = vld [vmem:[%s13741_s3 + $0x15e0] sm:$0xff] }
 0x36e   :  { %7713 = vmatmul.mubr.bf16.vlgmr.msra.gmra.mrb[16].mxu0 %v10778_v49 }
 0x36f   :  { %7877 = vmatmul.mubr.bf16.vlgmr.msra.gmra.mrb[16].mxu1 %v10778_v49  ;;  %7722 = vmatpush1.bf16.msra.mxu0 %v9343_v38  ;;  %v1391_v38 = vld [vmem:[%s13741_s3 + $0x13e0] sm:$0xff] }
 0x370   :  { %7753 = vmatprep.mubr.bf16.mxu0 %v10786_v0  ;;  %7886 = vmatpush1.bf16.msra.mxu1 %v9345_v25  ;;  %v9439_v25 = vcombine.low %v1367_v63, %v1375_v18  ;;  %v9456_v44 = vcombine.high %v1383_v11, %v1391_v38  ;;  %v1463_v18 = vld [vmem:[%s13741_s3 + $0x1620] sm:$0xff] }
 0x371   :  { %7917 = vmatprep.mubr.bf16.mxu1 %v10786_v0  ;;  %7723 = vmatprep.subr.bf16.mxu0 %v9360_v15  ;;  %v9441_v15 = vcombine.low %v1368_v20, %v1376_v8  ;;  %v1471_v20 = vld [vmem:[%s13741_s3 + $0x1660] sm:$0xff]  ;;  %v1464_v8 = vld [vmem:[%s13741_s3 + $0x1628] sm:$0xff] }
 0x372   :  { %7887 = vmatprep.subr.bf16.mxu1 %v9362_v59  ;;  %v1399_v59 = vld [vmem:[%s13741_s3 + $0x1420] sm:$0xff] }
 0x373   :  { %7724 = vmatpush1.bf16.msra.mxu0 %v9359_v3  ;;  %v1408_v3 = vld [vmem:[%s13741_s3 + $0x1468] sm:$0xff] }
 0x374   :  { %7888 = vmatpush1.bf16.msra.mxu1 %v9361_v50  ;;  %7725 = vmatprep.subr.bf16.mxu0 %v9376_v35  ;;  %v9455_v50 = vcombine.low %v1383_v11, %v1391_v38  ;;  %v9457_v35 = vcombine.low %v1384_v40, %v1392_v12  ;;  %v9474_v51 = vcombine.high %v1400_v32, %v1408_v3  ;;  %v1479_v38 = vld [vmem:[%s13741_s3 + $0x16a0] sm:$0xff]  ;;  %v1480_v12 = vld [vmem:[%s13741_s3 + $0x16a8] sm:$0xff] }
 0x375   :  { %7889 = vmatprep.subr.bf16.mxu1 %v9378_v36  ;;  %v9472_v36 = vcombine.high %v1399_v59, %v1407_v29  ;;  %v1487_v40 = vld [vmem:[%s13741_s3 + $0x16e0] sm:$0xff] }
 0x377   :  { %7726 = vmatpush1.bf16.msra.mxu0 %v9375_v54  ;;  %v1424_v54 = vld [vmem:[%s13741_s3 + $0x14e8] sm:$0xff] }
 0x378   :  { %7890 = vmatpush1.bf16.msra.mxu1 %v9377_v55  ;;  %7727 = vmatprep.subr.bf16.mxu0 %v9392_v56  ;;  %v9471_v55 = vcombine.low %v1399_v59, %v1407_v29  ;;  %v9473_v56 = vcombine.low %v1400_v32, %v1408_v3  ;;  %v9490_v33 = vcombine.high %v1416_v17, %v1424_v54  ;;  %v1495_v29 = vld [vmem:[%s13741_s3 + $0x1720] sm:$0xff]  ;;  %v1496_v3 = vld [vmem:[%s13741_s3 + $0x1728] sm:$0xff] }
 0x379   :  { %7891 = vmatprep.subr.bf16.mxu1 %v9394_v31  ;;  %v9488_v31 = vcombine.high %v1415_v19, %v1423_v52  ;;  %v1503_v32 = vld [vmem:[%s13741_s3 + $0x1760] sm:$0xff] }
 0x37b   :  { %7728 = vmatpush1.bf16.msra.mxu0 %v9391_v41  ;;  %v1440_v41 = vld [vmem:[%s13741_s3 + $0x1568] sm:$0xff] }
 0x37c   :  { %7892 = vmatpush1.bf16.msra.mxu1 %v9393_v42  ;;  %7729 = vmatprep.subr.bf16.mxu0 %v9408_v45  ;;  %v9487_v42 = vcombine.low %v1415_v19, %v1423_v52  ;;  %v9489_v45 = vcombine.low %v1416_v17, %v1424_v54  ;;  %v9506_v9 = vcombine.high %v1432_v39, %v1440_v41  ;;  %v1511_v52 = vld [vmem:[%s13741_s3 + $0x17a0] sm:$0xff]  ;;  %v1512_v54 = vld [vmem:[%s13741_s3 + $0x17a8] sm:$0xff] }
 0x37d   :  { %7893 = vmatprep.subr.bf16.mxu1 %v9410_v48  ;;  %v9504_v48 = vcombine.high %v1431_v34, %v1439_v37  ;;  %v1519_v17 = vld [vmem:[%s13741_s3 + $0x17e0] sm:$0xff] }
 0x37f   :  { %7730 = vmatpush1.bf16.msra.mxu0 %v9407_v6  ;;  %v1456_v6 = vld [vmem:[%s13741_s3 + $0x15e8] sm:$0xff] }
 0x380   :  { %7894 = vmatpush1.bf16.msra.mxu1 %v9409_v23  ;;  %7731 = vmatprep.subr.bf16.mxu0 %v9424_v7  ;;  %v9503_v23 = vcombine.low %v1431_v34, %v1439_v37  ;;  %v9505_v7 = vcombine.low %v1432_v39, %v1440_v41  ;;  %v9522_v63 = vcombine.high %v1448_v43, %v1456_v6  ;;  %v1527_v37 = vld [vmem:[%s13741_s3 + $0x1820] sm:$0xff]  ;;  %v1528_v41 = vld [vmem:[%s13741_s3 + $0x1828] sm:$0xff] }
 0x381   :  { %7895 = vmatprep.subr.bf16.mxu1 %v9426_v57  ;;  %v9520_v57 = vcombine.high %v1447_v2, %v1455_v4  ;;  %v1535_v39 = vld [vmem:[%s13741_s3 + $0x1860] sm:$0xff] }
 0x383   :  { %7732 = vmatpush1.bf16.msra.mxu0 %v9423_v21  ;;  %v1472_v21 = vld [vmem:[%s13741_s3 + $0x1668] sm:$0xff] }
 0x384   :  { %7896 = vmatpush1.bf16.msra.mxu1 %v9425_v53  ;;  %7733 = vmatprep.subr.bf16.mxu0 %v9440_v27  ;;  %v9519_v53 = vcombine.low %v1447_v2, %v1455_v4  ;;  %v9521_v27 = vcombine.low %v1448_v43, %v1456_v6  ;;  %v9538_v11 = vcombine.high %v1464_v8, %v1472_v21  ;;  %v1543_v4 = vld [vmem:[%s13741_s3 + $0x18a0] sm:$0xff] }
 0x385   :  { %7897 = vmatprep.subr.bf16.mxu1 %v9442_v10  ;;  %v9536_v10 = vcombine.high %v1463_v18, %v1471_v20  ;;  %v1551_v43 = vld [vmem:[%s13741_s3 + $0x18e0] sm:$0xff]  ;;  %v9599_v6 = vcombine.low %v1527_v37, %v1535_v39 }
 0x387   :  { %7734 = vmatpush1.bf16.msra.mxu0 %v9439_v25  ;;  %v1488_v25 = vld [vmem:[%s13741_s3 + $0x16e8] sm:$0xff] }
 0x388   :  { %7898 = vmatpush1.bf16.msra.mxu1 %v9441_v15  ;;  %7735 = vmatprep.subr.bf16.mxu0 %v9456_v44  ;;  %v9535_v15 = vcombine.low %v1463_v18, %v1471_v20  ;;  %v9537_v44 = vcombine.low %v1464_v8, %v1472_v21  ;;  %v9554_v59 = vcombine.high %v1480_v12, %v1488_v25  ;;  %v1559_v18 = vld [vmem:[%s13741_s3 + $0x1920] sm:$0xff]  ;;  %v1560_v21 = vld [vmem:[%s13741_s3 + $0x1928] sm:$0xff] }
 0x389   :  { %7899 = vmatprep.subr.bf16.mxu1 %v9458_v26  ;;  %v9552_v26 = vcombine.high %v1479_v38, %v1487_v40  ;;  %v1567_v20 = vld [vmem:[%s13741_s3 + $0x1960] sm:$0xff] }
 0x38b   :  { %7736 = vmatpush1.bf16.msra.mxu0 %v9455_v50  ;;  %v1504_v50 = vld [vmem:[%s13741_s3 + $0x1768] sm:$0xff] }
 0x38c   :  { %7900 = vmatpush1.bf16.msra.mxu1 %v9457_v35  ;;  %7737 = vmatprep.subr.bf16.mxu0 %v9472_v36  ;;  %v9551_v35 = vcombine.low %v1479_v38, %v1487_v40  ;;  %v9553_v36 = vcombine.low %v1480_v12, %v1488_v25  ;;  %v9570_v19 = vcombine.high %v1496_v3, %v1504_v50  ;;  %v1575_v40 = vld [vmem:[%s13741_s3 + $0x19a0] sm:$0xff]  ;;  %v1576_v25 = vld [vmem:[%s13741_s3 + $0x19a8] sm:$0xff] }
 0x38d   :  { %7901 = vmatprep.subr.bf16.mxu1 %v9474_v51  ;;  %v9568_v51 = vcombine.high %v1495_v29, %v1503_v32  ;;  %v1583_v12 = vld [vmem:[%s13741_s3 + $0x19e0] sm:$0xff] }
 0x38f   :  { %7738 = vmatpush1.bf16.msra.mxu0 %v9471_v55  ;;  %v1520_v55 = vld [vmem:[%s13741_s3 + $0x17e8] sm:$0xff] }
 0x390   :  { %7902 = vmatpush1.bf16.msra.mxu1 %v9473_v56  ;;  %7739 = vmatprep.subr.bf16.mxu0 %v9488_v31  ;;  %v9567_v56 = vcombine.low %v1495_v29, %v1503_v32  ;;  %v9569_v31 = vcombine.low %v1496_v3, %v1504_v50  ;;  %v9586_v34 = vcombine.high %v1512_v54, %v1520_v55  ;;  %v1591_v32 = vld [vmem:[%s13741_s3 + $0x1a20] sm:$0xff]  ;;  %v1592_v50 = vld [vmem:[%s13741_s3 + $0x1a28] sm:$0xff] }
 0x391   :  { %7903 = vmatprep.subr.bf16.mxu1 %v9490_v33  ;;  %v9584_v33 = vcombine.high %v1511_v52, %v1519_v17  ;;  %v1599_v3 = vld [vmem:[%s13741_s3 + $0x1a60] sm:$0xff] }
 0x393   :  { %7740 = vmatpush1.bf16.msra.mxu0 %v9487_v42  ;;  %v1536_v42 = vld [vmem:[%s13741_s3 + $0x1868] sm:$0xff] }
 0x394   :  { %7904 = vmatpush1.bf16.msra.mxu1 %v9489_v45  ;;  %7741 = vmatprep.subr.bf16.mxu0 %v9504_v48  ;;  %v9583_v45 = vcombine.low %v1511_v52, %v1519_v17  ;;  %v9585_v48 = vcombine.low %v1512_v54, %v1520_v55  ;;  %v9602_v2 = vcombine.high %v1528_v41, %v1536_v42  ;;  %v1607_v17 = vld [vmem:[%s13741_s3 + $0x1aa0] sm:$0xff]  ;;  %v1608_v55 = vld [vmem:[%s13741_s3 + $0x1aa8] sm:$0xff] }
 0x395   :  { %7905 = vmatprep.subr.bf16.mxu1 %v9506_v9  ;;  %v9600_v9 = vcombine.high %v1527_v37, %v1535_v39  ;;  %v1615_v54 = vld [vmem:[%s13741_s3 + $0x1ae0] sm:$0xff] }
 0x396   :  { %v1623_v39 = vld [vmem:[%s13741_s3 + $0x1b20] sm:$0xff] }
 0x397   :  { %7742 = vmatpush1.bf16.msra.mxu0 %v9503_v23  ;;  %v1544_v23 = vld [vmem:[%s13741_s3 + $0x18a8] sm:$0xff] }
 0x398   :  { %7906 = vmatpush1.bf16.msra.mxu1 %v9505_v7  ;;  %7743 = vmatprep.subr.bf16.mxu0 %v9520_v57  ;;  %v1552_v7 = vld [vmem:[%s13741_s3 + $0x18e8] sm:$0xff]  ;;  %v9601_v57 = vcombine.low %v1528_v41, %v1536_v42  ;;  %v1631_v41 = vld [vmem:[%s13741_s3 + $0x1b60] sm:$0xff] }
 0x399   :  { %7907 = vmatprep.subr.bf16.mxu1 %v9522_v63  ;;  %v9616_v63 = vcombine.high %v1543_v4, %v1551_v43  ;;  %v9618_v8 = vcombine.high %v1544_v23, %v1552_v7  ;;  %v10025_v42 = vld [vmem:[%s13743_s4] sm:$0xff] }
 0x39b   :  { %7744 = vmatpush1.bf16.msra.mxu0 %v9519_v53  ;;  %v1568_v53 = vld [vmem:[%s13741_s3 + $0x1968] sm:$0xff] }
 0x39c   :  { %7908 = vmatpush1.bf16.msra.mxu1 %v9521_v27  ;;  %7745 = vmatprep.subr.bf16.mxu0 %v9536_v10  ;;  %v9615_v27 = vcombine.low %v1543_v4, %v1551_v43  ;;  %v9617_v10 = vcombine.low %v1544_v23, %v1552_v7  ;;  %v9634_v38 = vcombine.high %v1560_v21, %v1568_v53 }
 0x39d   :  { %7909 = vmatprep.subr.bf16.mxu1 %v9538_v11  ;;  %v9632_v11 = vcombine.high %v1559_v18, %v1567_v20  ;;  %v1806_v4 = vrot.slane %v10025_v42, %v10503_v47  ;;  %v9679_v43 = vcombine.low %v1607_v17, %v1615_v54  ;;  %v9696_v7 = vcombine.high %v1623_v39, %v1631_v41 }
 0x39f   :  { %7746 = vmatpush1.bf16.msra.mxu0 %v9535_v15  ;;  %v1584_v15 = vld [vmem:[%s13741_s3 + $0x19e8] sm:$0xff] }
 0x3a0   :  { %7910 = vmatpush1.bf16.msra.mxu1 %v9537_v44  ;;  %7747 = vmatprep.subr.bf16.mxu0 %v9552_v26  ;;  %v9631_v44 = vcombine.low %v1559_v18, %v1567_v20  ;;  %v9633_v26 = vcombine.low %v1560_v21, %v1568_v53  ;;  %v9650_v29 = vcombine.high %v1576_v25, %v1584_v15  ;;  %v1639_v18 = vld [vmem:[%s13741_s3 + $0x1ba0] sm:$0xff] }
 0x3a1   :  { %7911 = vmatprep.subr.bf16.mxu1 %v9554_v59  ;;  %v9648_v59 = vcombine.high %v1575_v40, %v1583_v12  ;;  %v1647_v20 = vld [vmem:[%s13741_s3 + $0x1be0] sm:$0xff] }
 0x3a3   :  { %7748 = vmatpush1.bf16.msra.mxu0 %v9551_v35  ;;  %v1600_v35 = vld [vmem:[%s13741_s3 + $0x1a68] sm:$0xff] }
 0x3a4   :  { %7912 = vmatpush1.bf16.msra.mxu1 %v9553_v36  ;;  %7749 = vmatprep.subr.bf16.mxu0 %v9568_v51  ;;  %v9647_v36 = vcombine.low %v1575_v40, %v1583_v12  ;;  %v9649_v51 = vcombine.low %v1576_v25, %v1584_v15  ;;  %v9666_v52 = vcombine.high %v1592_v50, %v1600_v35 }
 0x3a5   :  { %7913 = vmatprep.subr.bf16.mxu1 %v9570_v19  ;;  %v9664_v19 = vcombine.high %v1591_v32, %v1599_v3  ;;  %v9695_v25 = vcombine.low %v1623_v39, %v1631_v41 }
 0x3a7   :  { %7750 = vmatpush1.bf16.msra.mxu0 %v9567_v56  ;;  %v1616_v56 = vld [vmem:[%s13741_s3 + $0x1ae8] sm:$0xff] }
 0x3a8   :  { %7914 = vmatpush1.bf16.msra.mxu1 %v9569_v31  ;;  %7751 = vmatprep.subr.bf16.mxu0 %v9584_v33  ;;  %v9663_v31 = vcombine.low %v1591_v32, %v1599_v3  ;;  %v9665_v33 = vcombine.low %v1592_v50, %v1600_v35  ;;  %v9682_v37 = vcombine.high %v1608_v55, %v1616_v56 }
 0x3a9   :  { %7915 = vmatprep.subr.bf16.mxu1 %v9586_v34  ;;  %v9680_v34 = vcombine.high %v1607_v17, %v1615_v54  ;;  %v9681_v23 = vcombine.low %v1608_v55, %v1616_v56  ;;  %v9712_v32 = vcombine.high %v1639_v18, %v1647_v20  ;;  %v1656_v56 = vld [vmem:[%s13741_s3 + $0x1c28] sm:$0xff] }
 0x3ab   :  { %7752 = vmatpush1.bf16.msra.mxu0 %v9583_v45  ;;  %v1802_v45 = vrot.slane %v10025_v42, %v10628_v22 }
 0x3ac   :  { %7916 = vmatpush1.bf16.msra.mxu1 %v9585_v48  ;;  %7762 = vmatprep.subr.bf16.mxu0 %v9600_v9  ;;  %v1624_v48 = vld [vmem:[%s13741_s3 + $0x1b28] sm:$0xff] }
 0x3ad   :  { %7926 = vmatprep.subr.bf16.mxu1 %v9602_v2  ;;  %v1632_v9 = vld [vmem:[%s13741_s3 + $0x1b68] sm:$0xff]  ;;  %v1810_v2 = vrot.slane %v10025_v42, %v10859_v58 }
 0x3ae   :  { %7754 = vmatmul.mubr.bf16.vlgmr.msra.gmra.mrb[16].mxu0 %v11005_v46 }
 0x3af   :  { %7918 = vmatmul.mubr.bf16.vlgmr.msra.gmra.mrb[16].mxu1 %v11005_v46  ;;  %7763 = vmatpush1.bf16.msra.mxu0 %v9599_v6  ;;  %v1814_v6 = vrot.slane %v10025_v42, %v10640_v14 }
 0x3b0   :  { %7794 = vmatprep.mubr.bf16.mxu0 %v11010_v28  ;;  %7927 = vmatpush1.bf16.msra.mxu1 %v9601_v57 }
 0x3b1   :  { %7958 = vmatprep.mubr.bf16.mxu1 %v11010_v28  ;;  %7764 = vmatprep.subr.bf16.mxu0 %v9616_v63  ;;  %v9698_v63 = vcombine.high %v1624_v48, %v1632_v9 }
 0x3b2   :  { %7928 = vmatprep.subr.bf16.mxu1 %v9618_v8 }
 0x3b3   :  { %7765 = vmatpush1.bf16.msra.mxu0 %v9615_v27  ;;  %v1640_v27 = vld [vmem:[%s13741_s3 + $0x1ba8] sm:$0xff] }
 0x3b4   :  { %7929 = vmatpush1.bf16.msra.mxu1 %v9617_v10  ;;  %7766 = vmatprep.subr.bf16.mxu0 %v9632_v11  ;;  %v1648_v10 = vld [vmem:[%s13741_s3 + $0x1be8] sm:$0xff] }
 0x3b5   :  { %7930 = vmatprep.subr.bf16.mxu1 %v9634_v38  ;;  %v9713_v39 = vcombine.low %v1640_v27, %v1648_v10 }
 0x3b7   :  { %7767 = vmatpush1.bf16.msra.mxu0 %v9631_v44 }
 0x3b8   :  { %7931 = vmatpush1.bf16.msra.mxu1 %v9633_v26  ;;  %7768 = vmatprep.subr.bf16.mxu0 %v9648_v59 }
 0x3b9   :  { %7932 = vmatprep.subr.bf16.mxu1 %v9650_v29  ;;  %v9697_v29 = vcombine.low %v1624_v48, %v1632_v9 }
 0x3bb   :  { %7769 = vmatpush1.bf16.msra.mxu0 %v9647_v36 }
 0x3bc   :  { %7933 = vmatpush1.bf16.msra.mxu1 %v9649_v51  ;;  %7770 = vmatprep.subr.bf16.mxu0 %v9664_v19  ;;  %v9714_v51 = vcombine.high %v1640_v27, %v1648_v10  ;;  %v1655_v19 = vld [vmem:[%s13741_s3 + $0x1c20] sm:$0xff] }
 0x3bd   :  { %7934 = vmatprep.subr.bf16.mxu1 %v9666_v52  ;;  %v1663_v52 = vld [vmem:[%s13741_s3 + $0x1c60] sm:$0xff] }
 0x3bf   :  { %7771 = vmatpush1.bf16.msra.mxu0 %v9663_v31  ;;  %v1664_v31 = vld [vmem:[%s13741_s3 + $0x1c68] sm:$0xff] }
 0x3c0   :  { %7935 = vmatpush1.bf16.msra.mxu1 %v9665_v33  ;;  %7772 = vmatprep.subr.bf16.mxu0 %v9680_v34 }
 0x3c1   :  { %v7468_v57 = vpop.f32.mrb[12].mxu0  ;;  %7936 = vmatprep.subr.bf16.mxu1 %v9682_v37  ;;  %v9711_v37 = vcombine.low %v1639_v18, %v1647_v20  ;;  %v9727_v20 = vcombine.low %v1655_v19, %v1663_v52 }
 0x3c2   :  { %v12719_v8 = vadd.f32 %v7468_v57, %v1802_v45  ;;  %v7632_v21 = vpop.f32.mrb[12].mxu1  ;;  %v7470_v53 = vpop.f32.mrb[13].mxu0  ;;  %v9728_v45 = vcombine.high %v1655_v19, %v1663_v52  ;;  %v1680_v57 = vld [vmem:[%s13741_s3 + $0x1ce8] sm:$0xff] }
 0x3c3   :  { %v12727_v11 = vadd.f32 %v7632_v21, %v1810_v2  ;;  %v12729_v38 = vadd.f32 %v7470_v53, %v1806_v4  ;;  %v7634_v40 = vpop.f32.mrb[13].mxu1  ;;  %v7472_v12 = vpop.f32.mrb[14].mxu0  ;;  %7773 = vmatpush1.bf16.msra.mxu0 %v9679_v43  ;;  %v9730_v2 = vcombine.high %v1656_v56, %v1664_v31  ;;  %v1671_v4 = vld [vmem:[%s13741_s3 + $0x1ca0] sm:$0xff]  ;;  %v9729_v21 = vcombine.low %v1656_v56, %v1664_v31 }
 0x3c4   :  { %v8323_v15 = vsel %vm569_vm2, %v12719_v8, 0.0  ;;  %v12733_v44 = vadd.f32 %v7634_v40, %v1814_v6  ;;  %v7636_v26 = vpop.f32.mrb[14].mxu1  ;;  %7937 = vmatpush1.bf16.msra.mxu1 %v9681_v23  ;;  %v7473_v59 = vpop.f32.mrb[15].mxu0  ;;  %7774 = vmatprep.subr.bf16.mxu0 %v9696_v7  ;;  %v1679_v43 = vld [vmem:[%s13741_s3 + $0x1ce0] sm:$0xff]  ;;  %v1672_v7 = vld [vmem:[%s13741_s3 + $0x1ca8] sm:$0xff] }
 0x3c5   :  { %v8324_v3 = vrot.slane %v8323_v15, 4  ;;  %v8337_v50 = vsel %vm569_vm2, %v12727_v11, 0.0  ;;  %v8330_v35 = vsel %vm569_vm2, %v12729_v38, 0.0  ;;  %v7637_v36 = vpop.f32.mrb[15].mxu1  ;;  %7938 = vmatprep.subr.bf16.mxu1 %v9698_v63  ;;  %v9744_v10 = vcombine.high %v1671_v4, %v1679_v43  ;;  %v1695_v26 = vld [vmem:[%s13741_s3 + $0x1d60] sm:$0xff] }
 0x3c6   :  { %v8338_v17 = vrot.slane %v8337_v50, 4  ;;  %v8331_v54 = vrot.slane %v8330_v35, 4  ;;  %v8344_v55 = vsel %vm569_vm2, %v12733_v44, 0.0  ;;  %v9743_v36 = vcombine.low %v1671_v4, %v1679_v43  ;;  %v1703_v31 = vld [vmem:[%s13741_s3 + $0x1da0] sm:$0xff] }
 0x3c7   :  { %v8325_v33 = vadd.f32 %v8324_v3, %v8323_v15  ;;  %v8345_v34 = vrot.slane %v8344_v55, 4  ;;  %7775 = vmatpush1.bf16.msra.mxu0 %v9695_v25  ;;  %v9746_v25 = vcombine.high %v1672_v7, %v1680_v57  ;;  %v1687_v15 = vld [vmem:[%s13741_s3 + $0x1d20] sm:$0xff]  ;;  %v1696_v3 = vld [vmem:[%s13741_s3 + $0x1d68] sm:$0xff] }
 0x3c8   :  { %v8339_v41 = vadd.f32 %v8338_v17, %v8337_v50  ;;  %v8332_v42 = vadd.f32 %v8331_v54, %v8330_v35  ;;  %7939 = vmatpush1.bf16.msra.mxu1 %v9697_v29  ;;  %7776 = vmatprep.subr.bf16.mxu0 %v9712_v32  ;;  %v1688_v32 = vld [vmem:[%s13741_s3 + $0x1d28] sm:$0xff]  ;;  %v9760_v17 = vcombine.high %v1687_v15, %v1695_v26 }
 0x3c9   :  { %v8326_v48 = vrot.slane %v8325_v33, 2  ;;  %v8346_v9 = vadd.f32 %v8345_v34, %v8344_v55  ;;  %7940 = vmatprep.subr.bf16.mxu1 %v9714_v51  ;;  %v9745_v51 = vcombine.low %v1672_v7, %v1680_v57  ;;  %v9762_v56 = vcombine.high %v1688_v32, %v1696_v3  ;;  %v1719_v7 = vld [vmem:[%s13741_s3 + $0x1e20] sm:$0xff] }
 0x3ca   :  { %v8340_v6 = vrot.slane %v8339_v41, 2  ;;  %v8333_v23 = vrot.slane %v8332_v42, 2 }
 0x3cb   :  { %v8327_v63 = vadd.f32 %v8326_v48, %v8325_v33  ;;  %v8347_v18 = vrot.slane %v8346_v9, 2  ;;  %7777 = vmatpush1.bf16.msra.mxu0 %v9711_v37  ;;  %v1711_v33 = vld [vmem:[%s13741_s3 + $0x1de0] sm:$0xff]  ;;  %v9759_v48 = vcombine.low %v1687_v15, %v1695_v26 }
 0x3cc   :  { %v8341_v53 = vadd.f32 %v8340_v6, %v8339_v41  ;;  %v8334_v27 = vadd.f32 %v8333_v23, %v8332_v42  ;;  %7941 = vmatpush1.bf16.msra.mxu1 %v9713_v39  ;;  %7778 = vmatprep.subr.bf16.mxu0 %v9728_v45  ;;  %v1704_v39 = vld [vmem:[%s13741_s3 + $0x1da8] sm:$0xff]  ;;  %v9776_v43 = vcombine.high %v1703_v31, %v1711_v33 }
 0x3cd   :  { %v8328_v40 = vrot.slane %v8327_v63, 1  ;;  %v8348_v12 = vadd.f32 %v8347_v18, %v8346_v9  ;;  %7942 = vmatprep.subr.bf16.mxu1 %v9730_v2  ;;  %v1712_v41 = vld [vmem:[%s13741_s3 + $0x1de8] sm:$0xff]  ;;  %v9761_v9 = vcombine.low %v1688_v32, %v1696_v3  ;;  %v1743_v32 = vld [vmem:[%s13741_s3 + $0x1ee0] sm:$0xff] }
 0x3ce   :  { %v8342_v59 = vrot.slane %v8341_v53, 1  ;;  %v8335_v29 = vrot.slane %v8334_v27, 1 }
 0x3cf   :  { %v8329_v50 = vadd.f32 %v8328_v40, %v8327_v63  ;;  %v8349_v35 = vrot.slane %v8348_v12, 1  ;;  %7779 = vmatpush1.bf16.msra.mxu0 %v9727_v20  ;;  %v1728_v63 = vld [vmem:[%s13741_s3 + $0x1e68] sm:$0xff] }
 0x3d0   :  { %v8343_v19 = vadd.f32 %v8342_v59, %v8341_v53  ;;  %v8336_v52 = vadd.f32 %v8335_v29, %v8334_v27  ;;  %7943 = vmatpush1.bf16.msra.mxu1 %v9729_v21  ;;  %7780 = vmatprep.subr.bf16.mxu0 %v9744_v10  ;;  %v9775_v21 = vcombine.low %v1703_v31, %v1711_v33  ;;  %v1735_v29 = vld [vmem:[%s13741_s3 + $0x1ea0] sm:$0xff] }
 0x3d1   :  { %v8411_v54 = vmul.f32 0.25, %v8329_v50  ;;  %v8350_v55 = vadd.f32 %v8349_v35, %v8348_v12  ;;  %7944 = vmatprep.subr.bf16.mxu1 %v9746_v25  ;;  %v9777_v53 = vcombine.low %v1704_v39, %v1712_v41  ;;  %v1736_v35 = vld [vmem:[%s13741_s3 + $0x1ea8] sm:$0xff] }
 0x3d2   :  { %v8413_v34 = vmul.f32 0.25, %v8343_v19  ;;  %v8412_v37 = vmul.f32 0.25, %v8336_v52 }
 0x3d3   :  { %v12790_v42 = vsub.f32 %v12719_v8, %v8411_v54  ;;  %v8414_v45 = vmul.f32 0.25, %v8350_v55  ;;  %7781 = vmatpush1.bf16.msra.mxu0 %v9743_v36  ;;  %v9778_v8 = vcombine.high %v1704_v39, %v1712_v41  ;;  %v1744_v36 = vld [vmem:[%s13741_s3 + $0x1ee8] sm:$0xff]  ;;  %v1759_v39 = vld [vmem:[%s13741_s3 + $0x1f60] sm:$0xff] }
 0x3d4   :  { %v12793_v2 = vsub.f32 %v12727_v11, %v8413_v34  ;;  %v12796_v4 = vsub.f32 %v12729_v38, %v8412_v37  ;;  %7945 = vmatpush1.bf16.msra.mxu1 %v9745_v51  ;;  %7782 = vmatprep.subr.bf16.mxu0 %v9760_v17  ;;  %v1727_v11 = vld [vmem:[%s13741_s3 + $0x1e60] sm:$0xff]  ;;  %v9810_v34 = vcombine.high %v1736_v35, %v1744_v36 }
 0x3d5   :  { %v8443_v6 = vmul.f32 %v12790_v42, %v12790_v42  ;;  %v12801_v23 = vsub.f32 %v12733_v44, %v8414_v45  ;;  %7946 = vmatprep.subr.bf16.mxu1 %v9762_v56  ;;  %v1720_v44 = vld [vmem:[%s13741_s3 + $0x1e28] sm:$0xff]  ;;  %v9792_v12 = vcombine.high %v1719_v7, %v1727_v11  ;;  %v9791_v52 = vcombine.low %v1719_v7, %v1727_v11  ;;  %v1751_v37 = vld [vmem:[%s13741_s3 + $0x1f20] sm:$0xff] }
 0x3d6   :  { %v8445_v38 = vmul.f32 %v12793_v2, %v12793_v2  ;;  %v8444_v57 = vmul.f32 %v12796_v4, %v12796_v4  ;;  %v9794_v59 = vcombine.high %v1720_v44, %v1728_v63  ;;  %v9793_v55 = vcombine.low %v1720_v44, %v1728_v63 }
 0x3d7   :  { %v8483_v18 = vsel %vm569_vm2, %v8443_v6, 0.0  ;;  %v8446_v20 = vmul.f32 %v12801_v23, %v12801_v23  ;;  %7783 = vmatpush1.bf16.msra.mxu0 %v9759_v48  ;;  %v9808_v56 = vcombine.high %v1735_v29, %v1743_v32  ;;  %v1752_v48 = vld [vmem:[%s13741_s3 + $0x1f28] sm:$0xff] }
 0x3d8   :  { %v8484_v27 = vrot.slane %v8483_v18, 4  ;;  %v8497_v10 = vsel %vm569_vm2, %v8445_v38, 0.0  ;;  %v8490_v40 = vsel %vm569_vm2, %v8444_v57, 0.0  ;;  %7947 = vmatpush1.bf16.msra.mxu1 %v9761_v9  ;;  %7784 = vmatprep.subr.bf16.mxu0 %v9776_v43  ;;  %v1760_v9 = vld [vmem:[%s13741_s3 + $0x1f68] sm:$0xff]  ;;  %v9809_v38 = vcombine.low %v1736_v35, %v1744_v36  ;;  %v761_v36 = vld [vmem:[%s13741_s3 + $0x30] sm:$0xff] }
 0x3d9   :  { %v8498_v25 = vrot.slane %v8497_v10, 4  ;;  %v8491_v15 = vrot.slane %v8490_v40, 4  ;;  %v8504_v26 = vsel %vm569_vm2, %v8446_v20, 0.0  ;;  %7948 = vmatprep.subr.bf16.mxu1 %v9778_v8  ;;  %v9807_v8 = vcombine.low %v1735_v29, %v1743_v32  ;;  %v1767_v20 = vld [vmem:[%s13741_s3 + $0x1fa0] sm:$0xff] }
 0x3da   :  { %v8485_v3 = vadd.f32 %v8484_v27, %v8483_v18  ;;  %v8505_v50 = vrot.slane %v8504_v26, 4  ;;  %v9824_v57 = vcombine.high %v1751_v37, %v1759_v39  ;;  %v9826_v18 = vcombine.high %v1752_v48, %v1760_v9 }
 0x3db   :  { %v8499_v51 = vadd.f32 %v8498_v25, %v8497_v10  ;;  %v8492_v19 = vadd.f32 %v8491_v15, %v8490_v40  ;;  %7785 = vmatpush1.bf16.msra.mxu0 %v9775_v21  ;;  %v1775_v21 = vld [vmem:[%s13741_s3 + $0x1fe0] sm:$0xff]  ;;  %v1768_v10 = vld [vmem:[%s13741_s3 + $0x1fa8] sm:$0xff]  ;;  %v9823_v15 = vcombine.low %v1751_v37, %v1759_v39  ;;  %v9825_v29 = vcombine.low %v1752_v48, %v1760_v9  ;;  %v778_v9 = vld [vmem:[%s13741_s3 + $0xb8] sm:$0xff] }
 0x3dc   :  { %v8486_v17 = vrot.slane %v8485_v3, 2  ;;  %v8506_v54 = vadd.f32 %v8505_v50, %v8504_v26  ;;  %7949 = vmatpush1.bf16.msra.mxu1 %v9777_v53  ;;  %7786 = vmatprep.subr.bf16.mxu0 %v9792_v12  ;;  %v1776_v40 = vld [vmem:[%s13741_s3 + $0x1fe8] sm:$0xff]  ;;  %v9840_v32 = vcombine.high %v1767_v20, %v1775_v21 }
 0x3dd   :  { %v8500_v31 = vrot.slane %v8499_v51, 2  ;;  %v8493_v33 = vrot.slane %v8492_v19, 2  ;;  %7950 = vmatprep.subr.bf16.mxu1 %v9794_v59  ;;  %v9842_v35 = vcombine.high %v1768_v10, %v1776_v40 }
 0x3de   :  { %v8487_v41 = vadd.f32 %v8486_v17, %v8485_v3  ;;  %v8507_v45 = vrot.slane %v8506_v54, 2  ;;  %v762_v17 = vld [vmem:[%s13741_s3 + $0x38] sm:$0xff] }
 0x3df   :  { %v8501_v43 = vadd.f32 %v8500_v31, %v8499_v51  ;;  %v8494_v6 = vadd.f32 %v8493_v33, %v8492_v19  ;;  %7787 = vmatpush1.bf16.msra.mxu0 %v9791_v52  ;;  %v769_v51 = vld [vmem:[%s13741_s3 + $0x70] sm:$0xff]  ;;  %v9839_v31 = vcombine.low %v1767_v20, %v1775_v21 }
 0x3e0   :  { %v8488_v7 = vrot.slane %v8487_v41, 1  ;;  %v8508_v11 = vadd.f32 %v8507_v45, %v8506_v54  ;;  %7951 = vmatpush1.bf16.msra.mxu1 %v9793_v55  ;;  %7788 = vmatprep.subr.bf16.mxu0 %v9808_v56  ;;  %v770_v54 = vld [vmem:[%s13741_s3 + $0x78] sm:$0xff]  ;;  %v8836_v37 = vcombine.high %v761_v36, %v769_v51  ;;  %v785_v45 = vld [vmem:[%s13741_s3 + $0xf0] sm:$0xff]  ;;  %v8835_v48 = vcombine.low %v761_v36, %v769_v51 }
 0x3e1   :  { %v8502_v44 = vrot.slane %v8501_v43, 1  ;;  %v8495_v63 = vrot.slane %v8494_v6, 1  ;;  %7952 = vmatprep.subr.bf16.mxu1 %v9810_v34  ;;  %v9841_v34 = vcombine.low %v1768_v10, %v1776_v40  ;;  %v8838_v39 = vcombine.high %v762_v17, %v770_v54  ;;  %v810_v40 = vld [vmem:[%s13741_s3 + $0x1b8] sm:$0xff]  ;;  %v825_v51 = vld [vmem:[%s13741_s3 + $0x230] sm:$0xff] }
 0x3e2   :  { %v8489_v53 = vadd.f32 %v8488_v7, %v8487_v41  ;;  %v8509_v27 = vrot.slane %v8508_v11, 1  ;;  %v777_v41 = vld [vmem:[%s13741_s3 + $0xb0] sm:$0xff] }
 0x3e3   :  { %v8503_v12 = vadd.f32 %v8502_v44, %v8501_v43  ;;  %v8496_v25 = vadd.f32 %v8495_v63, %v8494_v6  ;;  %7789 = vmatpush1.bf16.msra.mxu0 %v9807_v8  ;;  %v786_v43 = vld [vmem:[%s13741_s3 + $0xf8] sm:$0xff]  ;;  %v8837_v6 = vcombine.low %v762_v17, %v770_v54  ;;  %v8852_v8 = vcombine.high %v777_v41, %v785_v45  ;;  %v793_v7 = vld [vmem:[%s13741_s3 + $0x130] sm:$0xff] }
 0x3e4   :  { %v8571_v26 = vmul.f32 0.25, %v8489_v53  ;;  %v8510_v59 = vadd.f32 %v8509_v27, %v8508_v11  ;;  %7953 = vmatpush1.bf16.msra.mxu1 %v9809_v38  ;;  %7790 = vmatprep.subr.bf16.mxu0 %v9824_v57  ;;  %v801_v11 = vld [vmem:[%s13741_s3 + $0x170] sm:$0xff]  ;;  %v8854_v38 = vcombine.high %v778_v9, %v786_v43  ;;  %v794_v57 = vld [vmem:[%s13741_s3 + $0x138] sm:$0xff]  ;;  %v8851_v63 = vcombine.low %v777_v41, %v785_v45 }
 0x3e5   :  { %v8573_v3 = vmul.f32 0.25, %v8503_v12  ;;  %v8572_v50 = vmul.f32 0.25, %v8496_v25  ;;  %7954 = vmatprep.subr.bf16.mxu1 %v9826_v18  ;;  %v802_v44 = vld [vmem:[%s13741_s3 + $0x178] sm:$0xff]  ;;  %v8853_v18 = vcombine.low %v778_v9, %v786_v43  ;;  %v8868_v20 = vcombine.high %v793_v7, %v801_v11  ;;  %v809_v53 = vld [vmem:[%s13741_s3 + $0x1b0] sm:$0xff] }
 0x3e6   :  { %v8587_v19 = vadd.f32 1e-05, %v8571_v26  ;;  %v8574_v52 = vmul.f32 0.25, %v8510_v59  ;;  %v8870_v21 = vcombine.high %v794_v57, %v802_v44  ;;  %v817_v27 = vld [vmem:[%s13741_s3 + $0x1f0] sm:$0xff]  ;;  %v842_v41 = vld [vmem:[%s13741_s3 + $0x2b8] sm:$0xff] }
 0x3e7   :  { %v8589_v55 = vadd.f32 1e-05, %v8573_v3  ;;  %v8588_v56 = vadd.f32 1e-05, %v8572_v50  ;;  %7791 = vmatpush1.bf16.msra.mxu0 %v9823_v15  ;;  %v8867_v15 = vcombine.low %v793_v7, %v801_v11  ;;  %v8883_v54 = vcombine.low %v809_v53, %v817_v27  ;;  %v850_v45 = vld [vmem:[%s13741_s3 + $0x2f8] sm:$0xff]  ;;  %v857_v11 = vld [vmem:[%s13741_s3 + $0x330] sm:$0xff] }
 0x3e8   :  { %10001 = vrsqrt.f32 %v8587_v19  ;;  %v8590_v33 = vadd.f32 1e-05, %v8574_v52  ;;  %7955 = vmatpush1.bf16.msra.mxu1 %v9825_v29  ;;  %7792 = vmatprep.subr.bf16.mxu0 %v9840_v32  ;;  %v8869_v29 = vcombine.low %v794_v57, %v802_v44  ;;  %v8884_v32 = vcombine.high %v809_v53, %v817_v27  ;;  %v826_v52 = vld [vmem:[%s13741_s3 + $0x238] sm:$0xff]  ;;  %v873_v27 = vld [vmem:[%s13741_s3 + $0x3b0] sm:$0xff] }
 0x3e9   :  { %10003 = vrsqrt.f32 %v8589_v55  ;;  %7956 = vmatprep.subr.bf16.mxu1 %v9842_v35  ;;  %v8918_v7 = vcombine.high %v842_v41, %v850_v45  ;;  %v858_v44 = vld [vmem:[%s13741_s3 + $0x338] sm:$0xff] }
 0x3ea   :  { %10005 = vrsqrt.f32 %v8588_v56 }
 0x3eb   :  { %10007 = vrsqrt.f32 %v8590_v33  ;;  %7793 = vmatpush1.bf16.msra.mxu0 %v9839_v31 }
 0x3ec   :  { %7957 = vmatpush1.bf16.msra.mxu1 %v9841_v34  ;;  %7967 = vmatprep.subr.bf16.mxu0 %v8836_v37  ;;  %v849_v37 = vld [vmem:[%s13741_s3 + $0x2f0] sm:$0xff] }
 0x3ed   :  { %8131 = vmatprep.subr.bf16.mxu1 %v8838_v39 }
 0x3ee   :  { %7795 = vmatmul.mubr.bf16.vlgmr.msra.gmra.mrb[16].mxu0 %v11209_v61 }
 0x3ef   :  { %7959 = vmatmul.mubr.bf16.vlgmr.msra.gmra.mrb[16].mxu1 %v11209_v61  ;;  %7968 = vmatpush1.bf16.msra.mxu0 %v8835_v48 }
 0x3f0   :  { %7999 = vmatprep.mubr.bf16.mxu0 %v10535_v13  ;;  %8132 = vmatpush1.bf16.msra.mxu1 %v8837_v6 }
 0x3f1   :  { %8163 = vmatprep.mubr.bf16.mxu1 %v10535_v13  ;;  %7969 = vmatprep.subr.bf16.mxu0 %v8852_v8  ;;  %v818_v13 = vld [vmem:[%s13741_s3 + $0x1f8] sm:$0xff] }
 0x3f2   :  { %v10002_v10 = vpop.eup %10001  ;;  %8133 = vmatprep.subr.bf16.mxu1 %v8854_v38  ;;  %v8886_v36 = vcombine.high %v810_v40, %v818_v13  ;;  %v8885_v56 = vcombine.low %v810_v40, %v818_v13  ;;  %v865_v38 = vld [vmem:[%s13741_s3 + $0x370] sm:$0xff]  ;;  %v874_v40 = vld [vmem:[%s13741_s3 + $0x3b8] sm:$0xff] }
 0x3f3   :  { %v10004_v12 = vpop.eup %10003  ;;  %v8619_v25 = vmul.f32 %v10002_v10, %v12790_v42  ;;  %7970 = vmatpush1.bf16.msra.mxu0 %v8851_v63  ;;  %v833_v42 = vld [vmem:[%s13741_s3 + $0x270] sm:$0xff]  ;;  %v866_v63 = vld [vmem:[%s13741_s3 + $0x378] sm:$0xff] }
 0x3f4   :  { %v10006_v26 = vpop.eup %10005  ;;  %v8621_v59 = vmul.f32 %v10004_v12, %v12793_v2  ;;  %8134 = vmatpush1.bf16.msra.mxu1 %v8853_v18  ;;  %7971 = vmatprep.subr.bf16.mxu0 %v8868_v20  ;;  %v8900_v31 = vcombine.high %v825_v51, %v833_v42  ;;  %v8899_v9 = vcombine.low %v825_v51, %v833_v42  ;;  %v881_v10 = vld [vmem:[%s13741_s3 + $0x3f0] sm:$0xff]  ;;  %v882_v13 = vld [vmem:[%s13741_s3 + $0x3f8] sm:$0xff] }
 0x3f5   :  { %v10008_v3 = vpop.eup %10007  ;;  %v8635_v50 = vmax.f32 %v8619_v25, 0.0  ;;  %v8620_v35 = vmul.f32 %v10006_v26, %v12796_v4  ;;  %8135 = vmatprep.subr.bf16.mxu1 %v8870_v21  ;;  %v834_v4 = vld [vmem:[%s13741_s3 + $0x278] sm:$0xff]  ;;  %v8917_v20 = vcombine.low %v842_v41, %v850_v45  ;;  %v8932_v21 = vcombine.high %v857_v11, %v865_v38  ;;  %v905_v42 = vld [vmem:[%s13741_s3 + $0x4b0] sm:$0xff] }
 0x3f6   :  { %v8637_v19 = vmax.f32 %v8621_v59, 0.0  ;;  %v8622_v2 = vmul.f32 %v10008_v3, %v12801_v23  ;;  %v8902_v34 = vcombine.high %v826_v52, %v834_v4  ;;  %v841_v23 = vld [vmem:[%s13741_s3 + $0x2b0] sm:$0xff]  ;;  %v8901_v6 = vcombine.low %v826_v52, %v834_v4  ;;  %v898_v3 = vld [vmem:[%s13741_s3 + $0x478] sm:$0xff] }
 0x3f7   :  { %v8636_v17 = vmax.f32 %v8620_v35, 0.0  ;;  %7972 = vmatpush1.bf16.msra.mxu0 %v8867_v15  ;;  %v8916_v8 = vcombine.high %v841_v23, %v849_v37  ;;  %v8915_v18 = vcombine.low %v841_v23, %v849_v37  ;;  %v8934_v53 = vcombine.high %v858_v44, %v866_v63  ;;  %v889_v59 = vld [vmem:[%s13741_s3 + $0x430] sm:$0xff]  ;;  %v914_v52 = vld [vmem:[%s13741_s3 + $0x4f8] sm:$0xff] }
 0x3f8   :  { %v8638_v55 = vmax.f32 %v8622_v2, 0.0  ;;  %8136 = vmatpush1.bf16.msra.mxu1 %v8869_v29  ;;  %7973 = vmatprep.subr.bf16.mxu0 %v8884_v32  ;;  %v8931_v12 = vcombine.low %v857_v11, %v865_v38  ;;  %v8933_v25 = vcombine.low %v858_v44, %v866_v63  ;;  %v8948_v15 = vcombine.high %v873_v27, %v881_v10  ;;  %v897_v29 = vld [vmem:[%s13741_s3 + $0x470] sm:$0xff]  ;;  %v890_v32 = vld [vmem:[%s13741_s3 + $0x438] sm:$0xff] }
 0x3f9   :  { %v9849_v33 = vpack.c.bf16 %v8636_v17, %v8635_v50  ;;  %8137 = vmatprep.subr.bf16.mxu1 %v8886_v36  ;;  %v8950_v26 = vcombine.high %v874_v40, %v882_v13  ;;  %v8947_v50 = vcombine.low %v873_v27, %v881_v10  ;;  %v8949_v35 = vcombine.low %v874_v40, %v882_v13  ;;  %v906_v2 = vld [vmem:[%s13741_s3 + $0x4b8] sm:$0xff]  ;;  %v937_v45 = vld [vmem:[%s13741_s3 + $0x5b0] sm:$0xff] }
 0x3fa   :  { %v9850_v39 = vpack.c.bf16 %v8638_v55, %v8637_v19  ;;  %v8964_v36 = vcombine.high %v889_v59, %v897_v29  ;;  %v8966_v51 = vcombine.high %v890_v32, %v898_v3  ;;  %v913_v19 = vld [vmem:[%s13741_s3 + $0x4f0] sm:$0xff]  ;;  %v8963_v4 = vcombine.low %v889_v59, %v897_v29  ;;  %v954_v44 = vld [vmem:[%s13741_s3 + $0x638] sm:$0xff] }
 0x3fb   :  { %v8704_v48 = vrot.slane %v9849_v33, %v12087_v5  ;;  %7974 = vmatpush1.bf16.msra.mxu0 %v8883_v54  ;;  %v8965_v17 = vcombine.low %v890_v32, %v898_v3  ;;  %v8980_v54 = vcombine.high %v905_v42, %v913_v19  ;;  %v8982_v55 = vcombine.high %v906_v2, %v914_v52  ;;  %v922_v33 = vld [vmem:[%s13741_s3 + $0x538] sm:$0xff]  ;;  %v953_v38 = vld [vmem:[%s13741_s3 + $0x630] sm:$0xff] }
 0x3fc   :  { %v8711_v43 = vrot.slane %v9850_v39, %v12087_v5  ;;  %8138 = vmatpush1.bf16.msra.mxu1 %v8885_v56  ;;  %7975 = vmatprep.subr.bf16.mxu0 %v8900_v31  ;;  %v921_v56 = vld [vmem:[%s13741_s3 + $0x530] sm:$0xff]  ;;  %v8979_v23 = vcombine.low %v905_v42, %v913_v19  ;;  %v8981_v37 = vcombine.low %v906_v2, %v914_v52  ;;  %v962_v63 = vld [vmem:[%s13741_s3 + $0x678] sm:$0xff] }
 0x3fd   :  { %8139 = vmatprep.subr.bf16.mxu1 %v8902_v34  ;;  %v929_v31 = vld [vmem:[%s13741_s3 + $0x570] sm:$0xff]  ;;  %v930_v34 = vld [vmem:[%s13741_s3 + $0x578] sm:$0xff] }
 0x3fe   :  { %v8712_v57 = vcombine.low %v8704_v48, %v8711_v43  ;;  %v8996_v39 = vcombine.high %v921_v56, %v929_v31  ;;  %v8998_v41 = vcombine.high %v922_v33, %v930_v34  ;;  %v945_v48 = vld [vmem:[%s13741_s3 + $0x5f0] sm:$0xff]  ;;  %v946_v43 = vld [vmem:[%s13741_s3 + $0x5f8] sm:$0xff] }
 0x3ff   :  { %7976 = vmatpush1.bf16.msra.mxu0 %v8899_v9  ;;  %v938_v9 = vld [vmem:[%s13741_s3 + $0x5b8] sm:$0xff]  ;;  %v969_v27 = vld [vmem:[%s13741_s3 + $0x6b0] sm:$0xff] }
 0x400   :  { %8752 = vst [vmem:[%s13744_s5 + $0x8] sm:$0xff] %v8712_v57  ;;  %8140 = vmatpush1.bf16.msra.mxu1 %v8901_v6  ;;  %7977 = vmatprep.subr.bf16.mxu0 %v8916_v8  ;;  %v8995_v6 = vcombine.low %v921_v56, %v929_v31  ;;  %v8997_v8 = vcombine.low %v922_v33, %v930_v34  ;;  %v961_v57 = vld [vmem:[%s13741_s3 + $0x670] sm:$0xff]  ;;  %v970_v40 = vld [vmem:[%s13741_s3 + $0x6b8] sm:$0xff] }
 0x401   :  { %8141 = vmatprep.subr.bf16.mxu1 %v8918_v7  ;;  %v9012_v7 = vcombine.high %v937_v45, %v945_v48  ;;  %v9014_v11 = vcombine.high %v938_v9, %v946_v43  ;;  %v977_v10 = vld [vmem:[%s13741_s3 + $0x6f0] sm:$0xff]  ;;  %v978_v13 = vld [vmem:[%s13741_s3 + $0x6f8] sm:$0xff] }
 0x402   :  { %v985_v59 = vld [vmem:[%s13741_s3 + $0x730] sm:$0xff]  ;;  %v986_v32 = vld [vmem:[%s13741_s3 + $0x738] sm:$0xff] }
 0x403   :  { %7978 = vmatpush1.bf16.msra.mxu0 %v8915_v18  ;;  %v9011_v18 = vcombine.low %v937_v45, %v945_v48  ;;  %v993_v29 = vld [vmem:[%s13741_s3 + $0x770] sm:$0xff]  ;;  %v994_v3 = vld [vmem:[%s13741_s3 + $0x778] sm:$0xff] }
 0x404   :  { %8142 = vmatpush1.bf16.msra.mxu1 %v8917_v20  ;;  %7979 = vmatprep.subr.bf16.mxu0 %v8932_v21  ;;  %v9013_v20 = vcombine.low %v938_v9, %v946_v43  ;;  %v9028_v21 = vcombine.high %v953_v38, %v961_v57  ;;  %v1001_v42 = vld [vmem:[%s13741_s3 + $0x7b0] sm:$0xff]  ;;  %v1002_v2 = vld [vmem:[%s13741_s3 + $0x7b8] sm:$0xff] }
 0x405   :  { %8143 = vmatprep.subr.bf16.mxu1 %v8934_v53  ;;  %v9030_v53 = vcombine.high %v954_v44, %v962_v63  ;;  %v1009_v19 = vld [vmem:[%s13741_s3 + $0x7f0] sm:$0xff]  ;;  %v1010_v52 = vld [vmem:[%s13741_s3 + $0x7f8] sm:$0xff] }
 0x406   :  { %v1017_v56 = vld [vmem:[%s13741_s3 + $0x830] sm:$0xff]  ;;  %v1018_v33 = vld [vmem:[%s13741_s3 + $0x838] sm:$0xff] }
 0x407   :  { %7980 = vmatpush1.bf16.msra.mxu0 %v8931_v12  ;;  %v9027_v12 = vcombine.low %v953_v38, %v961_v57  ;;  %v1025_v31 = vld [vmem:[%s13741_s3 + $0x870] sm:$0xff]  ;;  %v1026_v34 = vld [vmem:[%s13741_s3 + $0x878] sm:$0xff] }
 0x408   :  { %8144 = vmatpush1.bf16.msra.mxu1 %v8933_v25  ;;  %7981 = vmatprep.subr.bf16.mxu0 %v8948_v15  ;;  %v9029_v25 = vcombine.low %v954_v44, %v962_v63  ;;  %v9044_v15 = vcombine.high %v969_v27, %v977_v10  ;;  %v1033_v45 = vld [vmem:[%s13741_s3 + $0x8b0] sm:$0xff]  ;;  %v9091_v9 = vcombine.low %v1017_v56, %v1025_v31  ;;  %v1034_v43 = vld [vmem:[%s13741_s3 + $0x8b8] sm:$0xff] }
 0x409   :  { %8145 = vmatprep.subr.bf16.mxu1 %v8950_v26  ;;  %v9046_v26 = vcombine.high %v970_v40, %v978_v13  ;;  %v1041_v48 = vld [vmem:[%s13741_s3 + $0x8f0] sm:$0xff]  ;;  %v1050_v44 = vld [vmem:[%s13741_s3 + $0x938] sm:$0xff] }
 0x40a   :  { %v1057_v38 = vld [vmem:[%s13741_s3 + $0x970] sm:$0xff]  ;;  %v1058_v63 = vld [vmem:[%s13741_s3 + $0x978] sm:$0xff] }
 0x40b   :  { %7982 = vmatpush1.bf16.msra.mxu0 %v8947_v50  ;;  %v9043_v50 = vcombine.low %v969_v27, %v977_v10  ;;  %v1065_v27 = vld [vmem:[%s13741_s3 + $0x9b0] sm:$0xff] }
 0x40c   :  { %8146 = vmatpush1.bf16.msra.mxu1 %v8949_v35  ;;  %7983 = vmatprep.subr.bf16.mxu0 %v8964_v36  ;;  %v9045_v35 = vcombine.low %v970_v40, %v978_v13  ;;  %v9060_v36 = vcombine.high %v985_v59, %v993_v29  ;;  %v1073_v10 = vld [vmem:[%s13741_s3 + $0x9f0] sm:$0xff]  ;;  %v1074_v40 = vld [vmem:[%s13741_s3 + $0x9f8] sm:$0xff]  ;;  %v9125_v13 = vcombine.low %v1050_v44, %v1058_v63 }
 0x40d   :  { %8147 = vmatprep.subr.bf16.mxu1 %v8966_v51  ;;  %v9062_v51 = vcombine.high %v986_v32, %v994_v3 }
 0x40f   :  { %7984 = vmatpush1.bf16.msra.mxu0 %v8963_v4  ;;  %v9059_v4 = vcombine.low %v985_v59, %v993_v29  ;;  %v1082_v59 = vld [vmem:[%s13741_s3 + $0xa38] sm:$0xff] }
 0x410   :  { %8148 = vmatpush1.bf16.msra.mxu1 %v8965_v17  ;;  %7985 = vmatprep.subr.bf16.mxu0 %v8980_v54  ;;  %v9061_v17 = vcombine.low %v986_v32, %v994_v3  ;;  %v9076_v54 = vcombine.high %v1001_v42, %v1009_v19  ;;  %v1090_v29 = vld [vmem:[%s13741_s3 + $0xa78] sm:$0xff]  ;;  %v9139_v32 = vcombine.low %v1065_v27, %v1073_v10 }
 0x411   :  { %8149 = vmatprep.subr.bf16.mxu1 %v8982_v55  ;;  %v9078_v55 = vcombine.high %v1002_v2, %v1010_v52 }
 0x413   :  { %7986 = vmatpush1.bf16.msra.mxu0 %v8979_v23  ;;  %v9075_v23 = vcombine.low %v1001_v42, %v1009_v19  ;;  %v1098_v42 = vld [vmem:[%s13741_s3 + $0xab8] sm:$0xff] }
 0x414   :  { %8150 = vmatpush1.bf16.msra.mxu1 %v8981_v37  ;;  %7987 = vmatprep.subr.bf16.mxu0 %v8996_v39  ;;  %v9077_v37 = vcombine.low %v1002_v2, %v1010_v52  ;;  %v9092_v39 = vcombine.high %v1017_v56, %v1025_v31  ;;  %v1106_v19 = vld [vmem:[%s13741_s3 + $0xaf8] sm:$0xff]  ;;  %v9157_v52 = vcombine.low %v1082_v59, %v1090_v29 }
 0x415   :  { %8151 = vmatprep.subr.bf16.mxu1 %v8998_v41  ;;  %v9094_v41 = vcombine.high %v1018_v33, %v1026_v34  ;;  %v1114_v56 = vld [vmem:[%s13741_s3 + $0xb38] sm:$0xff] }
 0x416   :  { %v1122_v31 = vld [vmem:[%s13741_s3 + $0xb78] sm:$0xff] }
 0x417   :  { %7988 = vmatpush1.bf16.msra.mxu0 %v8995_v6  ;;  %v1042_v6 = vld [vmem:[%s13741_s3 + $0x8f8] sm:$0xff] }
 0x418   :  { %8152 = vmatpush1.bf16.msra.mxu1 %v8997_v8  ;;  %7989 = vmatprep.subr.bf16.mxu0 %v9012_v7  ;;  %v9093_v8 = vcombine.low %v1018_v33, %v1026_v34  ;;  %v9108_v7 = vcombine.high %v1033_v45, %v1041_v48  ;;  %v9110_v57 = vcombine.high %v1034_v43, %v1042_v6 }
 0x419   :  { %8153 = vmatprep.subr.bf16.mxu1 %v9014_v11  ;;  %v1049_v11 = vld [vmem:[%s13741_s3 + $0x930] sm:$0xff]  ;;  %v9173_v34 = vcombine.low %v1098_v42, %v1106_v19 }
 0x41b   :  { %7990 = vmatpush1.bf16.msra.mxu0 %v9011_v18  ;;  %v9107_v18 = vcombine.low %v1033_v45, %v1041_v48  ;;  %v1130_v45 = vld [vmem:[%s13741_s3 + $0xbb8] sm:$0xff] }
 0x41c   :  { %8154 = vmatpush1.bf16.msra.mxu1 %v9013_v20  ;;  %7991 = vmatprep.subr.bf16.mxu0 %v9028_v21  ;;  %v9109_v20 = vcombine.low %v1034_v43, %v1042_v6  ;;  %v9124_v21 = vcombine.high %v1049_v11, %v1057_v38  ;;  %v1138_v48 = vld [vmem:[%s13741_s3 + $0xbf8] sm:$0xff]  ;;  %v9189_v43 = vcombine.low %v1114_v56, %v1122_v31 }
 0x41d   :  { %8155 = vmatprep.subr.bf16.mxu1 %v9030_v53  ;;  %v9126_v53 = vcombine.high %v1050_v44, %v1058_v63  ;;  %v9205_v63 = vcombine.low %v1130_v45, %v1138_v48 }
 0x41f   :  { %7992 = vmatpush1.bf16.msra.mxu0 %v9027_v12  ;;  %v9140_v12 = vcombine.high %v1065_v27, %v1073_v10  ;;  %v1162_v27 = vld [vmem:[%s13741_s3 + $0xcb8] sm:$0xff] }
 0x420   :  { %8156 = vmatpush1.bf16.msra.mxu1 %v9029_v25  ;;  %7993 = vmatprep.subr.bf16.mxu0 %v9044_v15  ;;  %v1081_v15 = vld [vmem:[%s13741_s3 + $0xa30] sm:$0xff]  ;;  %v1170_v10 = vld [vmem:[%s13741_s3 + $0xcf8] sm:$0xff] }
 0x421   :  { %8157 = vmatprep.subr.bf16.mxu1 %v9046_v26  ;;  %v1089_v26 = vld [vmem:[%s13741_s3 + $0xa70] sm:$0xff] }
 0x422   :  { %v9155_v2 = vcombine.low %v1081_v15, %v1089_v26 }
 0x423   :  { %7994 = vmatpush1.bf16.msra.mxu0 %v9043_v50  ;;  %v9156_v50 = vcombine.high %v1081_v15, %v1089_v26  ;;  %v1178_v15 = vld [vmem:[%s13741_s3 + $0xd38] sm:$0xff] }
 0x424   :  { %8158 = vmatpush1.bf16.msra.mxu1 %v9045_v35  ;;  %7995 = vmatprep.subr.bf16.mxu0 %v9060_v36  ;;  %v9158_v35 = vcombine.high %v1082_v59, %v1090_v29  ;;  %v1097_v36 = vld [vmem:[%s13741_s3 + $0xab0] sm:$0xff]  ;;  %v1186_v26 = vld [vmem:[%s13741_s3 + $0xd78] sm:$0xff]  ;;  %v9237_v29 = vcombine.low %v1162_v27, %v1170_v10 }
 0x425   :  { %8159 = vmatprep.subr.bf16.mxu1 %v9062_v51  ;;  %v1105_v51 = vld [vmem:[%s13741_s3 + $0xaf0] sm:$0xff] }
 0x426   :  { %v9171_v33 = vcombine.low %v1097_v36, %v1105_v51 }
 0x427   :  { %7996 = vmatpush1.bf16.msra.mxu0 %v9059_v4  ;;  %v9172_v4 = vcombine.high %v1097_v36, %v1105_v51  ;;  %v1194_v36 = vld [vmem:[%s13741_s3 + $0xdb8] sm:$0xff] }
 0x428   :  { %8160 = vmatpush1.bf16.msra.mxu1 %v9061_v17  ;;  %7997 = vmatprep.subr.bf16.mxu0 %v9076_v54  ;;  %v9174_v17 = vcombine.high %v1098_v42, %v1106_v19  ;;  %v1113_v54 = vld [vmem:[%s13741_s3 + $0xb30] sm:$0xff]  ;;  %v1202_v51 = vld [vmem:[%s13741_s3 + $0xdf8] sm:$0xff]  ;;  %v9253_v19 = vcombine.low %v1178_v15, %v1186_v26 }
 0x429   :  { %8161 = vmatprep.subr.bf16.mxu1 %v9078_v55  ;;  %v1121_v55 = vld [vmem:[%s13741_s3 + $0xb70] sm:$0xff] }
 0x42b   :  { %7998 = vmatpush1.bf16.msra.mxu0 %v9075_v23  ;;  %v9188_v23 = vcombine.high %v1113_v54, %v1121_v55 }
 0x42c   :  { %8162 = vmatpush1.bf16.msra.mxu1 %v9077_v37  ;;  %8008 = vmatprep.subr.bf16.mxu0 %v9092_v39  ;;  %v9190_v37 = vcombine.high %v1114_v56, %v1122_v31  ;;  %v1129_v39 = vld [vmem:[%s13741_s3 + $0xbb0] sm:$0xff]  ;;  %v9269_v31 = vcombine.low %v1194_v36, %v1202_v51 }
 0x42d   :  { %8172 = vmatprep.subr.bf16.mxu1 %v9094_v41  ;;  %v1137_v41 = vld [vmem:[%s13741_s3 + $0xbf0] sm:$0xff] }
 0x42e   :  { %8000 = vmatmul.mubr.bf16.vlgmr.msra.gmra.mrb[20].mxu0 %v10537_v16  ;;  %v9204_v6 = vcombine.high %v1129_v39, %v1137_v41  ;;  %v9203_v44 = vcombine.low %v1129_v39, %v1137_v41  ;;  %v1226_v39 = vld [vmem:[%s13741_s3 + $0xeb8] sm:$0xff] }
 0x42f   :  { %8164 = vmatmul.mubr.bf16.vlgmr.msra.gmra.mrb[20].mxu1 %v10537_v16  ;;  %8009 = vmatpush1.bf16.msra.mxu0 %v9091_v9  ;;  %v1066_v16 = vld [vmem:[%s13741_s3 + $0x9b8] sm:$0xff]  ;;  %v9187_v9 = vcombine.low %v1113_v54, %v1121_v55 }
 0x430   :  { %8040 = vmatprep.mubr.bf16.mxu0 %v10558_v24  ;;  %8173 = vmatpush1.bf16.msra.mxu1 %v9093_v8  ;;  %v9142_v25 = vcombine.high %v1066_v16, %v1074_v40  ;;  %v9141_v3 = vcombine.low %v1066_v16, %v1074_v40  ;;  %v9206_v8 = vcombine.high %v1130_v45, %v1138_v48  ;;  %v1210_v54 = vld [vmem:[%s13741_s3 + $0xe38] sm:$0xff] }
 0x431   :  { %8204 = vmatprep.mubr.bf16.mxu1 %v10558_v24  ;;  %8010 = vmatprep.subr.bf16.mxu0 %v9108_v7  ;;  %v9123_v24 = vcombine.low %v1049_v11, %v1057_v38  ;;  %v1145_v7 = vld [vmem:[%s13741_s3 + $0xc30] sm:$0xff]  ;;  %v1146_v38 = vld [vmem:[%s13741_s3 + $0xc38] sm:$0xff] }
 0x432   :  { %8174 = vmatprep.subr.bf16.mxu1 %v9110_v57  ;;  %v1153_v11 = vld [vmem:[%s13741_s3 + $0xc70] sm:$0xff]  ;;  %v1154_v57 = vld [vmem:[%s13741_s3 + $0xc78] sm:$0xff] }
 0x433   :  { %8011 = vmatpush1.bf16.msra.mxu0 %v9107_v18  ;;  %v9220_v18 = vcombine.high %v1145_v7, %v1153_v11  ;;  %v9219_v16 = vcombine.low %v1145_v7, %v1153_v11  ;;  %v9221_v40 = vcombine.low %v1146_v38, %v1154_v57  ;;  %v1218_v55 = vld [vmem:[%s13741_s3 + $0xe78] sm:$0xff] }
 0x434   :  { %8175 = vmatpush1.bf16.msra.mxu1 %v9109_v20  ;;  %8012 = vmatprep.subr.bf16.mxu0 %v9124_v21  ;;  %v9222_v20 = vcombine.high %v1146_v38, %v1154_v57  ;;  %v1161_v21 = vld [vmem:[%s13741_s3 + $0xcb0] sm:$0xff]  ;;  %v1234_v41 = vld [vmem:[%s13741_s3 + $0xef8] sm:$0xff]  ;;  %v9285_v48 = vcombine.low %v1210_v54, %v1218_v55 }
 0x435   :  { %8176 = vmatprep.subr.bf16.mxu1 %v9126_v53  ;;  %v1169_v53 = vld [vmem:[%s13741_s3 + $0xcf0] sm:$0xff]  ;;  %v1242_v7 = vld [vmem:[%s13741_s3 + $0xf38] sm:$0xff]  ;;  %v9301_v57 = vcombine.low %v1226_v39, %v1234_v41 }
 0x436   :  { %v9235_v59 = vcombine.low %v1161_v21, %v1169_v53  ;;  %v1250_v11 = vld [vmem:[%s13741_s3 + $0xf78] sm:$0xff] }
 0x437   :  { %8013 = vmatpush1.bf16.msra.mxu0 %v9123_v24  ;;  %v9236_v24 = vcombine.high %v1161_v21, %v1169_v53  ;;  %v1258_v21 = vld [vmem:[%s13741_s3 + $0xfb8] sm:$0xff] }
 0x438   :  { %8177 = vmatpush1.bf16.msra.mxu1 %v9125_v13  ;;  %8014 = vmatprep.subr.bf16.mxu0 %v9140_v12  ;;  %v9238_v13 = vcombine.high %v1162_v27, %v1170_v10  ;;  %v1177_v12 = vld [vmem:[%s13741_s3 + $0xd30] sm:$0xff]  ;;  %v1266_v53 = vld [vmem:[%s13741_s3 + $0xff8] sm:$0xff]  ;;  %v9317_v10 = vcombine.low %v1242_v7, %v1250_v11 }
 0x439   :  { %8178 = vmatprep.subr.bf16.mxu1 %v9142_v25  ;;  %v1185_v25 = vld [vmem:[%s13741_s3 + $0xd70] sm:$0xff] }
 0x43a   :  { %v9251_v42 = vcombine.low %v1177_v12, %v1185_v25 }
 0x43b   :  { %8015 = vmatpush1.bf16.msra.mxu0 %v9139_v32  ;;  %v9252_v32 = vcombine.high %v1177_v12, %v1185_v25  ;;  %v1274_v12 = vld [vmem:[%s13741_s3 + $0x1038] sm:$0xff] }
 0x43c   :  { %8179 = vmatpush1.bf16.msra.mxu1 %v9141_v3  ;;  %8016 = vmatprep.subr.bf16.mxu0 %v9156_v50  ;;  %v9254_v3 = vcombine.high %v1178_v15, %v1186_v26  ;;  %v1193_v50 = vld [vmem:[%s13741_s3 + $0xdb0] sm:$0xff]  ;;  %v1282_v25 = vld [vmem:[%s13741_s3 + $0x1078] sm:$0xff]  ;;  %v9333_v26 = vcombine.low %v1258_v21, %v1266_v53 }
 0x43d   :  { %8180 = vmatprep.subr.bf16.mxu1 %v9158_v35  ;;  %v1201_v35 = vld [vmem:[%s13741_s3 + $0xdf0] sm:$0xff] }
 0x43e   :  { %v9267_v56 = vcombine.low %v1193_v50, %v1201_v35 }
 0x43f   :  { %8017 = vmatpush1.bf16.msra.mxu0 %v9155_v2  ;;  %v9268_v2 = vcombine.high %v1193_v50, %v1201_v35  ;;  %v1290_v35 = vld [vmem:[%s13741_s3 + $0x10b8] sm:$0xff] }
 0x440   :  { %8181 = vmatpush1.bf16.msra.mxu1 %v9157_v52  ;;  %8018 = vmatprep.subr.bf16.mxu0 %v9172_v4  ;;  %v9270_v52 = vcombine.high %v1194_v36, %v1202_v51  ;;  %v1209_v4 = vld [vmem:[%s13741_s3 + $0xe30] sm:$0xff]  ;;  %v1298_v36 = vld [vmem:[%s13741_s3 + $0x10f8] sm:$0xff]  ;;  %v9349_v51 = vcombine.low %v1274_v12, %v1282_v25 }
 0x441   :  { %8182 = vmatprep.subr.bf16.mxu1 %v9174_v17  ;;  %v1217_v17 = vld [vmem:[%s13741_s3 + $0xe70] sm:$0xff] }
 0x442   :  { %v9283_v45 = vcombine.low %v1209_v4, %v1217_v17 }
 0x443   :  { %8019 = vmatpush1.bf16.msra.mxu0 %v9171_v33  ;;  %v9284_v33 = vcombine.high %v1209_v4, %v1217_v17  ;;  %v1306_v4 = vld [vmem:[%s13741_s3 + $0x1138] sm:$0xff] }
 0x444   :  { %8183 = vmatpush1.bf16.msra.mxu1 %v9173_v34  ;;  %8020 = vmatprep.subr.bf16.mxu0 %v9188_v23  ;;  %v9286_v34 = vcombine.high %v1210_v54, %v1218_v55  ;;  %v1225_v23 = vld [vmem:[%s13741_s3 + $0xeb0] sm:$0xff]  ;;  %v1314_v17 = vld [vmem:[%s13741_s3 + $0x1178] sm:$0xff]  ;;  %v9365_v55 = vcombine.low %v1290_v35, %v1298_v36 }
 0x445   :  { %8184 = vmatprep.subr.bf16.mxu1 %v9190_v37  ;;  %v1233_v37 = vld [vmem:[%s13741_s3 + $0xef0] sm:$0xff] }
 0x446   :  { %v9299_v38 = vcombine.low %v1225_v23, %v1233_v37 }
 0x447   :  { %8021 = vmatpush1.bf16.msra.mxu0 %v9187_v9  ;;  %v9300_v9 = vcombine.high %v1225_v23, %v1233_v37  ;;  %v1330_v23 = vld [vmem:[%s13741_s3 + $0x11f8] sm:$0xff]  ;;  %v9381_v37 = vcombine.low %v1306_v4, %v1314_v17 }
 0x448   :  { %8185 = vmatpush1.bf16.msra.mxu1 %v9189_v43  ;;  %8022 = vmatprep.subr.bf16.mxu0 %v9204_v6  ;;  %v9302_v43 = vcombine.high %v1226_v39, %v1234_v41  ;;  %v1241_v6 = vld [vmem:[%s13741_s3 + $0xf30] sm:$0xff] }
 0x449   :  { %8186 = vmatprep.subr.bf16.mxu1 %v9206_v8  ;;  %v1249_v8 = vld [vmem:[%s13741_s3 + $0xf70] sm:$0xff] }
 0x44a   :  { %v9315_v27 = vcombine.low %v1241_v6, %v1249_v8 }
 0x44b   :  { %8023 = vmatpush1.bf16.msra.mxu0 %v9203_v44  ;;  %v9316_v44 = vcombine.high %v1241_v6, %v1249_v8 }
 0x44c   :  { %8187 = vmatpush1.bf16.msra.mxu1 %v9205_v63  ;;  %8024 = vmatprep.subr.bf16.mxu0 %v9220_v18  ;;  %v9318_v63 = vcombine.high %v1242_v7, %v1250_v11  ;;  %v1257_v18 = vld [vmem:[%s13741_s3 + $0xfb0] sm:$0xff] }
 0x44d   :  { %8188 = vmatprep.subr.bf16.mxu1 %v9222_v20  ;;  %v1265_v20 = vld [vmem:[%s13741_s3 + $0xff0] sm:$0xff] }
 0x44e   :  { %v9331_v15 = vcombine.low %v1257_v18, %v1265_v20 }
 0x44f   :  { %8025 = vmatpush1.bf16.msra.mxu0 %v9219_v16  ;;  %v9332_v16 = vcombine.high %v1257_v18, %v1265_v20 }
 0x450   :  { %8189 = vmatpush1.bf16.msra.mxu1 %v9221_v40  ;;  %8026 = vmatprep.subr.bf16.mxu0 %v9236_v24  ;;  %v9334_v40 = vcombine.high %v1258_v21, %v1266_v53  ;;  %v1273_v24 = vld [vmem:[%s13741_s3 + $0x1030] sm:$0xff] }
 0x451   :  { %8190 = vmatprep.subr.bf16.mxu1 %v9238_v13  ;;  %v1281_v13 = vld [vmem:[%s13741_s3 + $0x1070] sm:$0xff] }
 0x452   :  { %v9347_v50 = vcombine.low %v1273_v24, %v1281_v13 }
 0x453   :  { %8027 = vmatpush1.bf16.msra.mxu0 %v9235_v59  ;;  %v9348_v59 = vcombine.high %v1273_v24, %v1281_v13 }
 0x454   :  { %8191 = vmatpush1.bf16.msra.mxu1 %v9237_v29  ;;  %8028 = vmatprep.subr.bf16.mxu0 %v9252_v32  ;;  %v9350_v29 = vcombine.high %v1274_v12, %v1282_v25  ;;  %v1289_v32 = vld [vmem:[%s13741_s3 + $0x10b0] sm:$0xff] }
 0x455   :  { %8192 = vmatprep.subr.bf16.mxu1 %v9254_v3  ;;  %v1297_v3 = vld [vmem:[%s13741_s3 + $0x10f0] sm:$0xff] }
 0x456   :  { %v9363_v54 = vcombine.low %v1289_v32, %v1297_v3 }
 0x457   :  { %8029 = vmatpush1.bf16.msra.mxu0 %v9251_v42  ;;  %v9364_v42 = vcombine.high %v1289_v32, %v1297_v3 }
 0x458   :  { %8193 = vmatpush1.bf16.msra.mxu1 %v9253_v19  ;;  %8030 = vmatprep.subr.bf16.mxu0 %v9268_v2  ;;  %v1305_v19 = vld [vmem:[%s13741_s3 + $0x1130] sm:$0xff] }
 0x459   :  { %8194 = vmatprep.subr.bf16.mxu1 %v9270_v52  ;;  %v1313_v2 = vld [vmem:[%s13741_s3 + $0x1170] sm:$0xff]  ;;  %v9366_v52 = vcombine.high %v1290_v35, %v1298_v36 }
 0x45a   :  { %v1401_v36 = vld [vmem:[%s13741_s3 + $0x1430] sm:$0xff] }
 0x45b   :  { %8031 = vmatpush1.bf16.msra.mxu0 %v9267_v56  ;;  %v9380_v56 = vcombine.high %v1305_v19, %v1313_v2 }
 0x45c   :  { %8195 = vmatpush1.bf16.msra.mxu1 %v9269_v31  ;;  %8032 = vmatprep.subr.bf16.mxu0 %v9284_v33  ;;  %v9382_v31 = vcombine.high %v1306_v4, %v1314_v17  ;;  %v1321_v33 = vld [vmem:[%s13741_s3 + $0x11b0] sm:$0xff] }
 0x45d   :  { %8196 = vmatprep.subr.bf16.mxu1 %v9286_v34  ;;  %v1329_v34 = vld [vmem:[%s13741_s3 + $0x11f0] sm:$0xff] }
 0x45e   :  { %v9396_v39 = vcombine.high %v1321_v33, %v1329_v34  ;;  %v9395_v6 = vcombine.low %v1321_v33, %v1329_v34 }
 0x45f   :  { %8033 = vmatpush1.bf16.msra.mxu0 %v9283_v45  ;;  %v1337_v45 = vld [vmem:[%s13741_s3 + $0x1230] sm:$0xff] }
 0x460   :  { %8197 = vmatpush1.bf16.msra.mxu1 %v9285_v48  ;;  %8034 = vmatprep.subr.bf16.mxu0 %v9300_v9  ;;  %v1345_v48 = vld [vmem:[%s13741_s3 + $0x1270] sm:$0xff]  ;;  %v1338_v9 = vld [vmem:[%s13741_s3 + $0x1238] sm:$0xff] }
 0x461   :  { %8198 = vmatprep.subr.bf16.mxu1 %v9302_v43  ;;  %v1346_v43 = vld [vmem:[%s13741_s3 + $0x1278] sm:$0xff]  ;;  %v9412_v7 = vcombine.high %v1337_v45, %v1345_v48  ;;  %v9411_v18 = vcombine.low %v1337_v45, %v1345_v48 }
 0x462   :  { %v9414_v11 = vcombine.high %v1338_v9, %v1346_v43  ;;  %v9413_v20 = vcombine.low %v1338_v9, %v1346_v43 }
 0x463   :  { %8035 = vmatpush1.bf16.msra.mxu0 %v9299_v38  ;;  %v1353_v38 = vld [vmem:[%s13741_s3 + $0x12b0] sm:$0xff] }
 0x464   :  { %8199 = vmatpush1.bf16.msra.mxu1 %v9301_v57  ;;  %8036 = vmatprep.subr.bf16.mxu0 %v9316_v44  ;;  %v1361_v57 = vld [vmem:[%s13741_s3 + $0x12f0] sm:$0xff]  ;;  %v1354_v44 = vld [vmem:[%s13741_s3 + $0x12b8] sm:$0xff] }
 0x465   :  { %8200 = vmatprep.subr.bf16.mxu1 %v9318_v63  ;;  %v1362_v63 = vld [vmem:[%s13741_s3 + $0x12f8] sm:$0xff]  ;;  %v9428_v21 = vcombine.high %v1353_v38, %v1361_v57  ;;  %v9427_v24 = vcombine.low %v1353_v38, %v1361_v57 }
 0x466   :  { %v9430_v53 = vcombine.high %v1354_v44, %v1362_v63  ;;  %v9429_v13 = vcombine.low %v1354_v44, %v1362_v63 }
 0x467   :  { %8037 = vmatpush1.bf16.msra.mxu0 %v9315_v27  ;;  %v1369_v27 = vld [vmem:[%s13741_s3 + $0x1330] sm:$0xff] }
 0x468   :  { %8201 = vmatpush1.bf16.msra.mxu1 %v9317_v10  ;;  %8038 = vmatprep.subr.bf16.mxu0 %v9332_v16  ;;  %v1377_v10 = vld [vmem:[%s13741_s3 + $0x1370] sm:$0xff]  ;;  %v1370_v16 = vld [vmem:[%s13741_s3 + $0x1338] sm:$0xff] }
 0x469   :  { %8202 = vmatprep.subr.bf16.mxu1 %v9334_v40  ;;  %v1378_v40 = vld [vmem:[%s13741_s3 + $0x1378] sm:$0xff]  ;;  %v9444_v12 = vcombine.high %v1369_v27, %v1377_v10  ;;  %v9443_v32 = vcombine.low %v1369_v27, %v1377_v10 }
 0x46a   :  { %v9446_v25 = vcombine.high %v1370_v16, %v1378_v40  ;;  %v9445_v3 = vcombine.low %v1370_v16, %v1378_v40 }
 0x46b   :  { %8039 = vmatpush1.bf16.msra.mxu0 %v9331_v15  ;;  %v1385_v15 = vld [vmem:[%s13741_s3 + $0x13b0] sm:$0xff] }
 0x46c   :  { %8203 = vmatpush1.bf16.msra.mxu1 %v9333_v26  ;;  %8049 = vmatprep.subr.bf16.mxu0 %v9348_v59  ;;  %v1393_v26 = vld [vmem:[%s13741_s3 + $0x13f0] sm:$0xff]  ;;  %v1386_v59 = vld [vmem:[%s13741_s3 + $0x13b8] sm:$0xff] }
 0x46d   :  { %8213 = vmatprep.subr.bf16.mxu1 %v9350_v29  ;;  %v1394_v29 = vld [vmem:[%s13741_s3 + $0x13f8] sm:$0xff] }
 0x46e   :  { %8041 = vmatmul.mubr.bf16.vlgmr.msra.gmra.mrb[20].mxu0 %v10778_v49  ;;  %v9462_v35 = vcombine.high %v1386_v59, %v1394_v29 }
 0x46f   :  { %8205 = vmatmul.mubr.bf16.vlgmr.msra.gmra.mrb[20].mxu1 %v10778_v49  ;;  %8050 = vmatpush1.bf16.msra.mxu0 %v9347_v50  ;;  %v1322_v49 = vld [vmem:[%s13741_s3 + $0x11b8] sm:$0xff]  ;;  %v9460_v50 = vcombine.high %v1385_v15, %v1393_v26 }
 0x470   :  { %8081 = vmatprep.mubr.bf16.mxu0 %v10786_v0  ;;  %8214 = vmatpush1.bf16.msra.mxu1 %v9349_v51  ;;  %v9398_v41 = vcombine.high %v1322_v49, %v1330_v23  ;;  %v9397_v8 = vcombine.low %v1322_v49, %v1330_v23  ;;  %v1409_v51 = vld [vmem:[%s13741_s3 + $0x1470] sm:$0xff] }
 0x471   :  { %8245 = vmatprep.mubr.bf16.mxu1 %v10786_v0  ;;  %8051 = vmatprep.subr.bf16.mxu0 %v9364_v42  ;;  %v9379_v0 = vcombine.low %v1305_v19, %v1313_v2  ;;  %v1402_v42 = vld [vmem:[%s13741_s3 + $0x1438] sm:$0xff]  ;;  %v9459_v2 = vcombine.low %v1385_v15, %v1393_v26  ;;  %v9476_v4 = vcombine.high %v1401_v36, %v1409_v51 }
 0x472   :  { %8215 = vmatprep.subr.bf16.mxu1 %v9366_v52  ;;  %v1410_v19 = vld [vmem:[%s13741_s3 + $0x1478] sm:$0xff]  ;;  %v9461_v52 = vcombine.low %v1386_v59, %v1394_v29  ;;  %v9475_v33 = vcombine.low %v1401_v36, %v1409_v51 }
 0x473   :  { %8052 = vmatpush1.bf16.msra.mxu0 %v9363_v54  ;;  %v9478_v17 = vcombine.high %v1402_v42, %v1410_v19  ;;  %v1417_v54 = vld [vmem:[%s13741_s3 + $0x14b0] sm:$0xff]  ;;  %v9477_v34 = vcombine.low %v1402_v42, %v1410_v19 }
 0x474   :  { %8216 = vmatpush1.bf16.msra.mxu1 %v9365_v55  ;;  %8053 = vmatprep.subr.bf16.mxu0 %v9380_v56  ;;  %v1425_v55 = vld [vmem:[%s13741_s3 + $0x14f0] sm:$0xff]  ;;  %v1418_v56 = vld [vmem:[%s13741_s3 + $0x14b8] sm:$0xff] }
 0x475   :  { %8217 = vmatprep.subr.bf16.mxu1 %v9382_v31  ;;  %v1426_v31 = vld [vmem:[%s13741_s3 + $0x14f8] sm:$0xff]  ;;  %v9492_v49 = vcombine.high %v1417_v54, %v1425_v55  ;;  %v9491_v45 = vcombine.low %v1417_v54, %v1425_v55 }
 0x476   :  { %v9494_v23 = vcombine.high %v1418_v56, %v1426_v31  ;;  %v9493_v48 = vcombine.low %v1418_v56, %v1426_v31 }
 0x477   :  { %8054 = vmatpush1.bf16.msra.mxu0 %v9379_v0  ;;  %v1433_v0 = vld [vmem:[%s13741_s3 + $0x1530] sm:$0xff] }
 0x478   :  { %8218 = vmatpush1.bf16.msra.mxu1 %v9381_v37  ;;  %8055 = vmatprep.subr.bf16.mxu0 %v9396_v39  ;;  %v1441_v37 = vld [vmem:[%s13741_s3 + $0x1570] sm:$0xff]  ;;  %v1434_v39 = vld [vmem:[%s13741_s3 + $0x1538] sm:$0xff] }
 0x479   :  { %8219 = vmatprep.subr.bf16.mxu1 %v9398_v41  ;;  %v1442_v41 = vld [vmem:[%s13741_s3 + $0x1578] sm:$0xff]  ;;  %v9508_v9 = vcombine.high %v1433_v0, %v1441_v37  ;;  %v9507_v38 = vcombine.low %v1433_v0, %v1441_v37 }
 0x47a   :  { %v9510_v43 = vcombine.high %v1434_v39, %v1442_v41  ;;  %v9509_v57 = vcombine.low %v1434_v39, %v1442_v41 }
 0x47b   :  { %8056 = vmatpush1.bf16.msra.mxu0 %v9395_v6  ;;  %v1449_v6 = vld [vmem:[%s13741_s3 + $0x15b0] sm:$0xff] }
 0x47c   :  { %8220 = vmatpush1.bf16.msra.mxu1 %v9397_v8  ;;  %8057 = vmatprep.subr.bf16.mxu0 %v9412_v7  ;;  %v1457_v8 = vld [vmem:[%s13741_s3 + $0x15f0] sm:$0xff]  ;;  %v1450_v7 = vld [vmem:[%s13741_s3 + $0x15b8] sm:$0xff] }
 0x47d   :  { %8221 = vmatprep.subr.bf16.mxu1 %v9414_v11  ;;  %v1458_v11 = vld [vmem:[%s13741_s3 + $0x15f8] sm:$0xff]  ;;  %v9524_v44 = vcombine.high %v1449_v6, %v1457_v8  ;;  %v9523_v27 = vcombine.low %v1449_v6, %v1457_v8 }
 0x47e   :  { %v9526_v63 = vcombine.high %v1450_v7, %v1458_v11  ;;  %v9525_v10 = vcombine.low %v1450_v7, %v1458_v11  ;;  %v1554_v6 = vld [vmem:[%s13741_s3 + $0x18f8] sm:$0xff]  ;;  %v1561_v11 = vld [vmem:[%s13741_s3 + $0x1930] sm:$0xff] }
 0x47f   :  { %8058 = vmatpush1.bf16.msra.mxu0 %v9411_v18  ;;  %v1465_v18 = vld [vmem:[%s13741_s3 + $0x1630] sm:$0xff] }
 0x480   :  { %8222 = vmatpush1.bf16.msra.mxu1 %v9413_v20  ;;  %8059 = vmatprep.subr.bf16.mxu0 %v9428_v21  ;;  %v1473_v20 = vld [vmem:[%s13741_s3 + $0x1670] sm:$0xff]  ;;  %v1466_v21 = vld [vmem:[%s13741_s3 + $0x1638] sm:$0xff] }
 0x481   :  { %8223 = vmatprep.subr.bf16.mxu1 %v9430_v53  ;;  %v1474_v53 = vld [vmem:[%s13741_s3 + $0x1678] sm:$0xff]  ;;  %v9540_v16 = vcombine.high %v1465_v18, %v1473_v20  ;;  %v9539_v15 = vcombine.low %v1465_v18, %v1473_v20 }
 0x482   :  { %v9542_v40 = vcombine.high %v1466_v21, %v1474_v53  ;;  %v9541_v26 = vcombine.low %v1466_v21, %v1474_v53 }
 0x483   :  { %8060 = vmatpush1.bf16.msra.mxu0 %v9427_v24  ;;  %v1481_v24 = vld [vmem:[%s13741_s3 + $0x16b0] sm:$0xff] }
 0x484   :  { %8224 = vmatpush1.bf16.msra.mxu1 %v9429_v13  ;;  %8061 = vmatprep.subr.bf16.mxu0 %v9444_v12  ;;  %v1489_v13 = vld [vmem:[%s13741_s3 + $0x16f0] sm:$0xff]  ;;  %v1482_v12 = vld [vmem:[%s13741_s3 + $0x16b8] sm:$0xff] }
 0x485   :  { %8225 = vmatprep.subr.bf16.mxu1 %v9446_v25  ;;  %v1490_v25 = vld [vmem:[%s13741_s3 + $0x16f8] sm:$0xff]  ;;  %v9556_v59 = vcombine.high %v1481_v24, %v1489_v13  ;;  %v9555_v36 = vcombine.low %v1481_v24, %v1489_v13 }
 0x486   :  { %v9558_v29 = vcombine.high %v1482_v12, %v1490_v25  ;;  %v9557_v51 = vcombine.low %v1482_v12, %v1490_v25  ;;  %v1593_v12 = vld [vmem:[%s13741_s3 + $0x1a30] sm:$0xff] }
 0x487   :  { %8062 = vmatpush1.bf16.msra.mxu0 %v9443_v32  ;;  %v1497_v32 = vld [vmem:[%s13741_s3 + $0x1730] sm:$0xff] }
 0x488   :  { %8226 = vmatpush1.bf16.msra.mxu1 %v9445_v3  ;;  %8063 = vmatprep.subr.bf16.mxu0 %v9460_v50  ;;  %v1505_v3 = vld [vmem:[%s13741_s3 + $0x1770] sm:$0xff]  ;;  %v1498_v50 = vld [vmem:[%s13741_s3 + $0x1738] sm:$0xff] }
 0x489   :  { %8227 = vmatprep.subr.bf16.mxu1 %v9462_v35  ;;  %v1506_v35 = vld [vmem:[%s13741_s3 + $0x1778] sm:$0xff]  ;;  %v9572_v42 = vcombine.high %v1497_v32, %v1505_v3  ;;  %v9571_v54 = vcombine.low %v1497_v32, %v1505_v3  ;;  %v1601_v25 = vld [vmem:[%s13741_s3 + $0x1a70] sm:$0xff] }
 0x48a   :  { %v9574_v19 = vcombine.high %v1498_v50, %v1506_v35  ;;  %v9573_v55 = vcombine.low %v1498_v50, %v1506_v35  ;;  %v9668_v32 = vcombine.high %v1593_v12, %v1601_v25  ;;  %v1609_v50 = vld [vmem:[%s13741_s3 + $0x1ab0] sm:$0xff] }
 0x48b   :  { %8064 = vmatpush1.bf16.msra.mxu0 %v9459_v2  ;;  %v1513_v2 = vld [vmem:[%s13741_s3 + $0x17b0] sm:$0xff] }
 0x48c   :  { %8228 = vmatpush1.bf16.msra.mxu1 %v9461_v52  ;;  %8065 = vmatprep.subr.bf16.mxu0 %v9476_v4  ;;  %v1521_v52 = vld [vmem:[%s13741_s3 + $0x17f0] sm:$0xff]  ;;  %v1514_v4 = vld [vmem:[%s13741_s3 + $0x17b8] sm:$0xff] }
 0x48d   :  { %8229 = vmatprep.subr.bf16.mxu1 %v9478_v17  ;;  %v1522_v17 = vld [vmem:[%s13741_s3 + $0x17f8] sm:$0xff]  ;;  %v9588_v56 = vcombine.high %v1513_v2, %v1521_v52  ;;  %v9587_v0 = vcombine.low %v1513_v2, %v1521_v52  ;;  %v1617_v35 = vld [vmem:[%s13741_s3 + $0x1af0] sm:$0xff] }
 0x48e   :  { %v9590_v31 = vcombine.high %v1514_v4, %v1522_v17  ;;  %v9589_v37 = vcombine.low %v1514_v4, %v1522_v17  ;;  %v9684_v52 = vcombine.high %v1609_v50, %v1617_v35  ;;  %v1625_v17 = vld [vmem:[%s13741_s3 + $0x1b30] sm:$0xff] }
 0x48f   :  { %8066 = vmatpush1.bf16.msra.mxu0 %v9475_v33  ;;  %v1529_v33 = vld [vmem:[%s13741_s3 + $0x1830] sm:$0xff] }
 0x490   :  { %8230 = vmatpush1.bf16.msra.mxu1 %v9477_v34  ;;  %8067 = vmatprep.subr.bf16.mxu0 %v9492_v49  ;;  %v1537_v34 = vld [vmem:[%s13741_s3 + $0x1870] sm:$0xff]  ;;  %v1530_v49 = vld [vmem:[%s13741_s3 + $0x1838] sm:$0xff] }
 0x491   :  { %8231 = vmatprep.subr.bf16.mxu1 %v9494_v23  ;;  %v1538_v23 = vld [vmem:[%s13741_s3 + $0x1878] sm:$0xff]  ;;  %v9604_v39 = vcombine.high %v1529_v33, %v1537_v34 }
 0x492   :  { %v9606_v41 = vcombine.high %v1530_v49, %v1538_v23  ;;  %v9605_v8 = vcombine.low %v1530_v49, %v1538_v23  ;;  %v9683_v49 = vcombine.low %v1609_v50, %v1617_v35 }
 0x493   :  { %8068 = vmatpush1.bf16.msra.mxu0 %v9491_v45  ;;  %v1545_v45 = vld [vmem:[%s13741_s3 + $0x18b0] sm:$0xff] }
 0x494   :  { %8232 = vmatpush1.bf16.msra.mxu1 %v9493_v48  ;;  %8069 = vmatprep.subr.bf16.mxu0 %v9508_v9  ;;  %v1553_v48 = vld [vmem:[%s13741_s3 + $0x18f0] sm:$0xff]  ;;  %v9603_v9 = vcombine.low %v1529_v33, %v1537_v34 }
 0x495   :  { %8233 = vmatprep.subr.bf16.mxu1 %v9510_v43  ;;  %v1546_v43 = vld [vmem:[%s13741_s3 + $0x18b8] sm:$0xff]  ;;  %v9620_v7 = vcombine.high %v1545_v45, %v1553_v48  ;;  %v9619_v18 = vcombine.low %v1545_v45, %v1553_v48 }
 0x496   :  { %v9621_v20 = vcombine.low %v1546_v43, %v1554_v6 }
 0x497   :  { %8070 = vmatpush1.bf16.msra.mxu0 %v9507_v38  ;;  %v1569_v38 = vld [vmem:[%s13741_s3 + $0x1970] sm:$0xff] }
 0x498   :  { %8234 = vmatpush1.bf16.msra.mxu1 %v9509_v57  ;;  %8071 = vmatprep.subr.bf16.mxu0 %v9524_v44  ;;  %v9622_v57 = vcombine.high %v1546_v43, %v1554_v6  ;;  %v1562_v44 = vld [vmem:[%s13741_s3 + $0x1938] sm:$0xff]  ;;  %v9636_v21 = vcombine.high %v1561_v11, %v1569_v38 }
 0x499   :  { %8235 = vmatprep.subr.bf16.mxu1 %v9526_v63  ;;  %v1570_v63 = vld [vmem:[%s13741_s3 + $0x1978] sm:$0xff] }
 0x49a   :  { %v9638_v53 = vcombine.high %v1562_v44, %v1570_v63 }
 0x49b   :  { %8072 = vmatpush1.bf16.msra.mxu0 %v9523_v27  ;;  %v1577_v27 = vld [vmem:[%s13741_s3 + $0x19b0] sm:$0xff] }
 0x49c   :  { %8236 = vmatpush1.bf16.msra.mxu1 %v9525_v10  ;;  %8073 = vmatprep.subr.bf16.mxu0 %v9540_v16  ;;  %v1585_v10 = vld [vmem:[%s13741_s3 + $0x19f0] sm:$0xff]  ;;  %v1586_v16 = vld [vmem:[%s13741_s3 + $0x19f8] sm:$0xff] }
 0x49d   :  { %8237 = vmatprep.subr.bf16.mxu1 %v9542_v40  ;;  %v9637_v40 = vcombine.low %v1562_v44, %v1570_v63  ;;  %v9652_v24 = vcombine.high %v1577_v27, %v1585_v10 }
 0x49f   :  { %8074 = vmatpush1.bf16.msra.mxu0 %v9539_v15  ;;  %v1594_v15 = vld [vmem:[%s13741_s3 + $0x1a38] sm:$0xff] }
 0x4a0   :  { %8238 = vmatpush1.bf16.msra.mxu1 %v9541_v26  ;;  %8075 = vmatprep.subr.bf16.mxu0 %v9556_v59  ;;  %v1602_v26 = vld [vmem:[%s13741_s3 + $0x1a78] sm:$0xff]  ;;  %v9651_v59 = vcombine.low %v1577_v27, %v1585_v10 }
 0x4a1   :  { %8239 = vmatprep.subr.bf16.mxu1 %v9558_v29  ;;  %v9670_v3 = vcombine.high %v1594_v15, %v1602_v26  ;;  %v9669_v2 = vcombine.low %v1594_v15, %v1602_v26 }
 0x4a3   :  { %8076 = vmatpush1.bf16.msra.mxu0 %v9555_v36  ;;  %v1610_v36 = vld [vmem:[%s13741_s3 + $0x1ab8] sm:$0xff] }
 0x4a4   :  { %8240 = vmatpush1.bf16.msra.mxu1 %v9557_v51  ;;  %8077 = vmatprep.subr.bf16.mxu0 %v9572_v42  ;;  %v1618_v51 = vld [vmem:[%s13741_s3 + $0x1af8] sm:$0xff]  ;;  %v9667_v42 = vcombine.low %v1593_v12, %v1601_v25 }
 0x4a5   :  { %8241 = vmatprep.subr.bf16.mxu1 %v9574_v19  ;;  %v13537_v19 = vld [vmem:[%s13743_s4 + $0x8] sm:$0xff]  ;;  %v9686_v4 = vcombine.high %v1610_v36, %v1618_v51  ;;  %v9685_v23 = vcombine.low %v1610_v36, %v1618_v51  ;;  %v1658_v12 = vld [vmem:[%s13741_s3 + $0x1c38] sm:$0xff] }
 0x4a6   :  { %v1826_v33 = vrot.slane %v13537_v19, %v10485_v30  ;;  %v1822_v34 = vrot.slane %v13537_v19, %v10470_v62  ;;  %v1649_v30 = vld [vmem:[%s13741_s3 + $0x1bf0] sm:$0xff]  ;;  %v1666_v25 = vld [vmem:[%s13741_s3 + $0x1c78] sm:$0xff] }
 0x4a7   :  { %8078 = vmatpush1.bf16.msra.mxu0 %v9571_v54  ;;  %v1633_v54 = vld [vmem:[%s13741_s3 + $0x1b70] sm:$0xff]  ;;  %v9734_v51 = vcombine.high %v1658_v12, %v1666_v25 }
 0x4a8   :  { %8242 = vmatpush1.bf16.msra.mxu1 %v9573_v55  ;;  %8079 = vmatprep.subr.bf16.mxu0 %v9588_v56  ;;  %v1818_v55 = vrot.slane %v13537_v19, %v10462_v60  ;;  %v1626_v56 = vld [vmem:[%s13741_s3 + $0x1b38] sm:$0xff]  ;;  %v1830_v60 = vrot.slane %v13537_v19, %v10475_v1 }
 0x4a9   :  { %8243 = vmatprep.subr.bf16.mxu1 %v9590_v31  ;;  %v1634_v31 = vld [vmem:[%s13741_s3 + $0x1b78] sm:$0xff] }
 0x4aa   :  { %v1642_v1 = vld [vmem:[%s13741_s3 + $0x1bb8] sm:$0xff] }
 0x4ab   :  { %8080 = vmatpush1.bf16.msra.mxu0 %v9587_v0  ;;  %v9700_v0 = vcombine.high %v1625_v17, %v1633_v54 }
 0x4ac   :  { %8244 = vmatpush1.bf16.msra.mxu1 %v9589_v37  ;;  %8090 = vmatprep.subr.bf16.mxu0 %v9604_v39  ;;  %v9702_v39 = vcombine.high %v1626_v56, %v1634_v31 }
 0x4ad   :  { %8254 = vmatprep.subr.bf16.mxu1 %v9606_v41  ;;  %v1641_v41 = vld [vmem:[%s13741_s3 + $0x1bb0] sm:$0xff] }
 0x4ae   :  { %8082 = vmatmul.mubr.bf16.vlgmr.msra.gmra.mrb[20].mxu0 %v11005_v46 }
 0x4af   :  { %8246 = vmatmul.mubr.bf16.vlgmr.msra.gmra.mrb[20].mxu1 %v11005_v46  ;;  %8091 = vmatpush1.bf16.msra.mxu0 %v9603_v9  ;;  %v1578_v46 = vld [vmem:[%s13741_s3 + $0x19b8] sm:$0xff] }
 0x4b0   :  { %8122 = vmatprep.mubr.bf16.mxu0 %v11010_v28  ;;  %8255 = vmatpush1.bf16.msra.mxu1 %v9605_v8  ;;  %v9654_v13 = vcombine.high %v1578_v46, %v1586_v16  ;;  %v9653_v29 = vcombine.low %v1578_v46, %v1586_v16  ;;  %v1650_v9 = vld [vmem:[%s13741_s3 + $0x1bf8] sm:$0xff]  ;;  %v1657_v16 = vld [vmem:[%s13741_s3 + $0x1c30] sm:$0xff] }
 0x4b1   :  { %8286 = vmatprep.mubr.bf16.mxu1 %v11010_v28  ;;  %8092 = vmatprep.subr.bf16.mxu0 %v9620_v7  ;;  %v9635_v28 = vcombine.low %v1561_v11, %v1569_v38  ;;  %v9699_v11 = vcombine.low %v1625_v17, %v1633_v54  ;;  %v9718_v46 = vcombine.high %v1642_v1, %v1650_v9  ;;  %v1674_v17 = vld [vmem:[%s13741_s3 + $0x1cb8] sm:$0xff] }
 0x4b2   :  { %8256 = vmatprep.subr.bf16.mxu1 %v9622_v57  ;;  %v1682_v54 = vld [vmem:[%s13741_s3 + $0x1cf8] sm:$0xff] }
 0x4b3   :  { %8093 = vmatpush1.bf16.msra.mxu0 %v9619_v18  ;;  %v9701_v18 = vcombine.low %v1626_v56, %v1634_v31 }
 0x4b4   :  { %8257 = vmatpush1.bf16.msra.mxu1 %v9621_v20  ;;  %8094 = vmatprep.subr.bf16.mxu0 %v9636_v21  ;;  %v9716_v20 = vcombine.high %v1641_v41, %v1649_v30 }
 0x4b5   :  { %8258 = vmatprep.subr.bf16.mxu1 %v9638_v53 }
 0x4b7   :  { %8095 = vmatpush1.bf16.msra.mxu0 %v9635_v28  ;;  %v1665_v28 = vld [vmem:[%s13741_s3 + $0x1c70] sm:$0xff] }
 0x4b8   :  { %8259 = vmatpush1.bf16.msra.mxu1 %v9637_v40  ;;  %8096 = vmatprep.subr.bf16.mxu0 %v9652_v24  ;;  %v9732_v50 = vcombine.high %v1657_v16, %v1665_v28  ;;  %v9731_v31 = vcombine.low %v1657_v16, %v1665_v28  ;;  %v1706_v16 = vld [vmem:[%s13741_s3 + $0x1db8] sm:$0xff] }
 0x4b9   :  { %8260 = vmatprep.subr.bf16.mxu1 %v9654_v13  ;;  %v1714_v28 = vld [vmem:[%s13741_s3 + $0x1df8] sm:$0xff] }
 0x4bb   :  { %8097 = vmatpush1.bf16.msra.mxu0 %v9651_v59  ;;  %v9715_v59 = vcombine.low %v1641_v41, %v1649_v30  ;;  %v1697_v41 = vld [vmem:[%s13741_s3 + $0x1d70] sm:$0xff] }
 0x4bc   :  { %8261 = vmatpush1.bf16.msra.mxu1 %v9653_v29  ;;  %8098 = vmatprep.subr.bf16.mxu0 %v9668_v32  ;;  %v9717_v29 = vcombine.low %v1642_v1, %v1650_v9  ;;  %v1698_v1 = vld [vmem:[%s13741_s3 + $0x1d78] sm:$0xff] }
 0x4bd   :  { %8262 = vmatprep.subr.bf16.mxu1 %v9670_v3 }
 0x4bf   :  { %8099 = vmatpush1.bf16.msra.mxu0 %v9667_v42  ;;  %v1673_v42 = vld [vmem:[%s13741_s3 + $0x1cb0] sm:$0xff] }
 0x4c0   :  { %8263 = vmatpush1.bf16.msra.mxu1 %v9669_v2  ;;  %8100 = vmatprep.subr.bf16.mxu0 %v9684_v52  ;;  %v1681_v2 = vld [vmem:[%s13741_s3 + $0x1cf0] sm:$0xff] }
 0x4c1   :  { %v7796_v37 = vpop.f32.mrb[16].mxu0  ;;  %8264 = vmatprep.subr.bf16.mxu1 %v9686_v4 }
 0x4c2   :  { %v13565_v62 = vadd.f32 %v7796_v37, %v1818_v55  ;;  %v7960_v45 = vpop.f32.mrb[16].mxu1  ;;  %v7798_v48 = vpop.f32.mrb[17].mxu0  ;;  %v9750_v37 = vcombine.high %v1674_v17, %v1682_v54 }
 0x4c3   :  { %v13573_v43 = vadd.f32 %v7960_v45, %v1826_v33  ;;  %v13575_v6 = vadd.f32 %v7798_v48, %v1822_v34  ;;  %v7962_v8 = vpop.f32.mrb[17].mxu1  ;;  %v7800_v7 = vpop.f32.mrb[18].mxu0  ;;  %8101 = vmatpush1.bf16.msra.mxu0 %v9683_v49  ;;  %v9733_v33 = vcombine.low %v1658_v12, %v1666_v25  ;;  %v1690_v48 = vld [vmem:[%s13741_s3 + $0x1d38] sm:$0xff] }
 0x4c4   :  { %v8351_v38 = vsel %vm569_vm2, %v13565_v62, 0.0  ;;  %v13579_v57 = vadd.f32 %v7962_v8, %v1830_v60  ;;  %v7964_v44 = vpop.f32.mrb[18].mxu1  ;;  %8265 = vmatpush1.bf16.msra.mxu1 %v9685_v23  ;;  %v7801_v63 = vpop.f32.mrb[19].mxu0  ;;  %8102 = vmatprep.subr.bf16.mxu0 %v9700_v0  ;;  %v9748_v60 = vcombine.high %v1673_v42, %v1681_v2  ;;  %v9747_v7 = vcombine.low %v1673_v42, %v1681_v2 }
 0x4c5   :  { %v8352_v21 = vrot.slane %v8351_v38, 4  ;;  %v8365_v53 = vsel %vm569_vm2, %v13573_v43, 0.0  ;;  %v8358_v27 = vsel %vm569_vm2, %v13575_v6, 0.0  ;;  %v7965_v10 = vpop.f32.mrb[19].mxu1  ;;  %8266 = vmatprep.subr.bf16.mxu1 %v9702_v39  ;;  %v1689_v39 = vld [vmem:[%s13741_s3 + $0x1d30] sm:$0xff]  ;;  %v9765_v12 = vcombine.low %v1690_v48, %v1698_v1 }
 0x4c6   :  { %v8366_v40 = vrot.slane %v8365_v53, 4  ;;  %v8359_v24 = vrot.slane %v8358_v27, 4  ;;  %v8372_v13 = vsel %vm569_vm2, %v13579_v57, 0.0  ;;  %v9764_v63 = vcombine.high %v1689_v39, %v1697_v41 }
 0x4c7   :  { %v8353_v15 = vadd.f32 %v8352_v21, %v8351_v38  ;;  %v8373_v26 = vrot.slane %v8372_v13, 4  ;;  %8103 = vmatpush1.bf16.msra.mxu0 %v9699_v11  ;;  %v9749_v11 = vcombine.low %v1674_v17, %v1682_v54  ;;  %v9766_v21 = vcombine.high %v1690_v48, %v1698_v1 }
 0x4c8   :  { %v8367_v32 = vadd.f32 %v8366_v40, %v8365_v53  ;;  %v8360_v3 = vadd.f32 %v8359_v24, %v8358_v27  ;;  %8267 = vmatpush1.bf16.msra.mxu1 %v9701_v18  ;;  %8104 = vmatprep.subr.bf16.mxu0 %v9716_v20  ;;  %v1705_v53 = vld [vmem:[%s13741_s3 + $0x1db0] sm:$0xff]  ;;  %v9781_v42 = vcombine.low %v1706_v16, %v1714_v28 }
 0x4c9   :  { %v8354_v35 = vrot.slane %v8353_v15, 2  ;;  %v8374_v36 = vadd.f32 %v8373_v26, %v8372_v13  ;;  %8268 = vmatprep.subr.bf16.mxu1 %v9718_v46  ;;  %v1713_v27 = vld [vmem:[%s13741_s3 + $0x1df0] sm:$0xff]  ;;  %v9763_v13 = vcombine.low %v1689_v39, %v1697_v41 }
 0x4ca   :  { %v8368_v52 = vrot.slane %v8367_v32, 2  ;;  %v8361_v4 = vrot.slane %v8360_v3, 2  ;;  %v9780_v26 = vcombine.high %v1705_v53, %v1713_v27 }
 0x4cb   :  { %v8355_v55 = vadd.f32 %v8354_v35, %v8353_v15  ;;  %v8375_v56 = vrot.slane %v8374_v36, 2  ;;  %8105 = vmatpush1.bf16.msra.mxu0 %v9715_v59 }
 0x4cc   :  { %v8369_v34 = vadd.f32 %v8368_v52, %v8367_v32  ;;  %v8362_v49 = vadd.f32 %v8361_v4, %v8360_v3  ;;  %8269 = vmatpush1.bf16.msra.mxu1 %v9717_v29  ;;  %8106 = vmatprep.subr.bf16.mxu0 %v9732_v50  ;;  %v1721_v32 = vld [vmem:[%s13741_s3 + $0x1e30] sm:$0xff]  ;;  %v1730_v50 = vld [vmem:[%s13741_s3 + $0x1e78] sm:$0xff] }
 0x4cd   :  { %v8356_v23 = vrot.slane %v8355_v55, 1  ;;  %v8376_v0 = vadd.f32 %v8375_v56, %v8374_v36  ;;  %8270 = vmatprep.subr.bf16.mxu1 %v9734_v51  ;;  %v9779_v51 = vcombine.low %v1705_v53, %v1713_v27 }
 0x4ce   :  { %v8370_v30 = vrot.slane %v8369_v34, 1  ;;  %v8363_v45 = vrot.slane %v8362_v49, 1 }
 0x4cf   :  { %v8357_v9 = vadd.f32 %v8356_v23, %v8355_v55  ;;  %v8377_v8 = vrot.slane %v8376_v0, 1  ;;  %8107 = vmatpush1.bf16.msra.mxu0 %v9731_v31  ;;  %v1738_v23 = vld [vmem:[%s13741_s3 + $0x1eb8] sm:$0xff] }
 0x4d0   :  { %v8371_v38 = vadd.f32 %v8370_v30, %v8369_v34  ;;  %v8364_v44 = vadd.f32 %v8363_v45, %v8362_v49  ;;  %8271 = vmatpush1.bf16.msra.mxu1 %v9733_v33  ;;  %8108 = vmatprep.subr.bf16.mxu0 %v9748_v60  ;;  %v1737_v33 = vld [vmem:[%s13741_s3 + $0x1eb0] sm:$0xff] }
 0x4d1   :  { %v8415_v18 = vmul.f32 0.25, %v8357_v9  ;;  %v8378_v20 = vadd.f32 %v8377_v8, %v8376_v0  ;;  %8272 = vmatprep.subr.bf16.mxu1 %v9750_v37  ;;  %v1745_v34 = vld [vmem:[%s13741_s3 + $0x1ef0] sm:$0xff]  ;;  %v1746_v0 = vld [vmem:[%s13741_s3 + $0x1ef8] sm:$0xff] }
 0x4d2   :  { %v8417_v10 = vmul.f32 0.25, %v8371_v38  ;;  %v8416_v46 = vmul.f32 0.25, %v8364_v44  ;;  %v9812_v1 = vcombine.high %v1737_v33, %v1745_v34  ;;  %v1761_v38 = vld [vmem:[%s13741_s3 + $0x1f70] sm:$0xff]  ;;  %v9811_v27 = vcombine.low %v1737_v33, %v1745_v34 }
 0x4d3   :  { %v13636_v40 = vsub.f32 %v13565_v62, %v8415_v18  ;;  %v8418_v24 = vmul.f32 0.25, %v8378_v20  ;;  %8109 = vmatpush1.bf16.msra.mxu0 %v9747_v7  ;;  %v9782_v62 = vcombine.high %v1706_v16, %v1714_v28  ;;  %v9814_v7 = vcombine.high %v1738_v23, %v1746_v0  ;;  %v1754_v18 = vld [vmem:[%s13741_s3 + $0x1f38] sm:$0xff] }
 0x4d4   :  { %v13639_v25 = vsub.f32 %v13573_v43, %v8417_v10  ;;  %v13642_v15 = vsub.f32 %v13575_v6, %v8416_v46  ;;  %8273 = vmatpush1.bf16.msra.mxu1 %v9749_v11  ;;  %8110 = vmatprep.subr.bf16.mxu0 %v9764_v63  ;;  %v1729_v43 = vld [vmem:[%s13741_s3 + $0x1e70] sm:$0xff]  ;;  %v1762_v20 = vld [vmem:[%s13741_s3 + $0x1f78] sm:$0xff]  ;;  %v9813_v16 = vcombine.low %v1738_v23, %v1746_v0 }
 0x4d5   :  { %v8447_v59 = vmul.f32 %v13636_v40, %v13636_v40  ;;  %v13647_v29 = vsub.f32 %v13579_v57, %v8418_v24  ;;  %8274 = vmatprep.subr.bf16.mxu1 %v9766_v21  ;;  %v1722_v57 = vld [vmem:[%s13741_s3 + $0x1e38] sm:$0xff]  ;;  %v9796_v17 = vcombine.high %v1721_v32, %v1729_v43  ;;  %v9795_v41 = vcombine.low %v1721_v32, %v1729_v43  ;;  %v1753_v11 = vld [vmem:[%s13741_s3 + $0x1f30] sm:$0xff] }
 0x4d6   :  { %v8449_v6 = vmul.f32 %v13639_v25, %v13639_v25  ;;  %v8448_v3 = vmul.f32 %v13642_v15, %v13642_v15  ;;  %v9798_v31 = vcombine.high %v1722_v57, %v1730_v50  ;;  %v9797_v48 = vcombine.low %v1722_v57, %v1730_v50  ;;  %v1770_v43 = vld [vmem:[%s13741_s3 + $0x1fb8] sm:$0xff] }
 0x4d7   :  { %v8511_v35 = vsel %vm569_vm2, %v8447_v59, 0.0  ;;  %v8450_v36 = vmul.f32 %v13647_v29, %v13647_v29  ;;  %8111 = vmatpush1.bf16.msra.mxu0 %v9763_v13  ;;  %v9828_v28 = vcombine.high %v1753_v11, %v1761_v38  ;;  %v1777_v59 = vld [vmem:[%s13741_s3 + $0x1ff0] sm:$0xff]  ;;  %v9827_v50 = vcombine.low %v1753_v11, %v1761_v38 }
 0x4d8   :  { %v8512_v2 = vrot.slane %v8511_v35, 4  ;;  %v8525_v52 = vsel %vm569_vm2, %v8449_v6, 0.0  ;;  %v8518_v4 = vsel %vm569_vm2, %v8448_v3, 0.0  ;;  %8275 = vmatpush1.bf16.msra.mxu1 %v9765_v12  ;;  %8112 = vmatprep.subr.bf16.mxu0 %v9780_v26  ;;  %v9830_v12 = vcombine.high %v1754_v18, %v1762_v20  ;;  %v1769_v26 = vld [vmem:[%s13741_s3 + $0x1fb0] sm:$0xff]  ;;  %v1778_v6 = vld [vmem:[%s13741_s3 + $0x1ff8] sm:$0xff] }
 0x4d9   :  { %v8526_v54 = vrot.slane %v8525_v52, 4  ;;  %v8519_v55 = vrot.slane %v8518_v4, 4  ;;  %v8532_v56 = vsel %vm569_vm2, %v8450_v36, 0.0  ;;  %8276 = vmatprep.subr.bf16.mxu1 %v9782_v62  ;;  %v9845_v34 = vcombine.low %v1770_v43, %v1778_v6 }
 0x4da   :  { %v8513_v49 = vadd.f32 %v8512_v2, %v8511_v35  ;;  %v8533_v60 = vrot.slane %v8532_v56, 4 }
 0x4db   :  { %v8527_v37 = vadd.f32 %v8526_v54, %v8525_v52  ;;  %v8520_v39 = vadd.f32 %v8519_v55, %v8518_v4  ;;  %8113 = vmatpush1.bf16.msra.mxu0 %v9779_v51  ;;  %v9829_v51 = vcombine.low %v1754_v18, %v1762_v20  ;;  %v9846_v4 = vcombine.high %v1770_v43, %v1778_v6 }
 0x4dc   :  { %v8514_v30 = vrot.slane %v8513_v49, 2  ;;  %v8534_v45 = vadd.f32 %v8533_v60, %v8532_v56  ;;  %8277 = vmatpush1.bf16.msra.mxu1 %v9781_v42  ;;  %8114 = vmatprep.subr.bf16.mxu0 %v9796_v17  ;;  %v9844_v42 = vcombine.high %v1769_v26, %v1777_v59 }
 0x4dd   :  { %v8528_v9 = vrot.slane %v8527_v37, 2  ;;  %v8521_v8 = vrot.slane %v8520_v39, 2  ;;  %8278 = vmatprep.subr.bf16.mxu1 %v9798_v31  ;;  %v9843_v31 = vcombine.low %v1769_v26, %v1777_v59 }
 0x4de   :  { %v8515_v44 = vadd.f32 %v8514_v30, %v8513_v49  ;;  %v8535_v63 = vrot.slane %v8534_v45, 2 }
 0x4df   :  { %v8529_v21 = vadd.f32 %v8528_v9, %v8527_v37  ;;  %v8522_v53 = vadd.f32 %v8521_v8, %v8520_v39  ;;  %8115 = vmatpush1.bf16.msra.mxu0 %v9795_v41 }
 0x4e0   :  { %v8516_v10 = vrot.slane %v8515_v44, 1  ;;  %v8536_v46 = vadd.f32 %v8535_v63, %v8534_v45  ;;  %8279 = vmatpush1.bf16.msra.mxu1 %v9797_v48  ;;  %8116 = vmatprep.subr.bf16.mxu0 %v9812_v1 }
 0x4e1   :  { %v8530_v24 = vrot.slane %v8529_v21, 1  ;;  %v8523_v13 = vrot.slane %v8522_v53, 1  ;;  %8280 = vmatprep.subr.bf16.mxu1 %v9814_v7 }
 0x4e2   :  { %v8517_v62 = vadd.f32 %v8516_v10, %v8515_v44  ;;  %v8537_v32 = vrot.slane %v8536_v46, 1 }
 0x4e3   :  { %v8531_v3 = vadd.f32 %v8530_v24, %v8529_v21  ;;  %v8524_v57 = vadd.f32 %v8523_v13, %v8522_v53  ;;  %8117 = vmatpush1.bf16.msra.mxu0 %v9811_v27 }
 0x4e4   :  { %v8575_v35 = vmul.f32 0.25, %v8517_v62  ;;  %v8538_v36 = vadd.f32 %v8537_v32, %v8536_v46  ;;  %8281 = vmatpush1.bf16.msra.mxu1 %v9813_v16  ;;  %8118 = vmatprep.subr.bf16.mxu0 %v9828_v28 }
 0x4e5   :  { %v8577_v2 = vmul.f32 0.25, %v8531_v3  ;;  %v8576_v52 = vmul.f32 0.25, %v8524_v57  ;;  %8282 = vmatprep.subr.bf16.mxu1 %v9830_v12 }
 0x4e6   :  { %v8591_v17 = vadd.f32 1e-05, %v8575_v35  ;;  %v8578_v54 = vmul.f32 0.25, %v8538_v36 }
 0x4e7   :  { %v8593_v55 = vadd.f32 1e-05, %v8577_v2  ;;  %v8592_v56 = vadd.f32 1e-05, %v8576_v52  ;;  %8119 = vmatpush1.bf16.msra.mxu0 %v9827_v50 }
 0x4e8   :  { %10009 = vrsqrt.f32 %v8591_v17  ;;  %v8594_v33 = vadd.f32 1e-05, %v8578_v54  ;;  %8283 = vmatpush1.bf16.msra.mxu1 %v9829_v51  ;;  %8120 = vmatprep.subr.bf16.mxu0 %v9844_v42 }
 0x4e9   :  { %10011 = vrsqrt.f32 %v8593_v55  ;;  %8284 = vmatprep.subr.bf16.mxu1 %v9846_v4 }
 0x4ea   :  { %10013 = vrsqrt.f32 %v8592_v56 }
 0x4eb   :  { %10015 = vrsqrt.f32 %v8594_v33  ;;  %8121 = vmatpush1.bf16.msra.mxu0 %v9843_v31 }
 0x4ec   :  { %8285 = vmatpush1.bf16.msra.mxu1 %v9845_v34 }
 0x4ee   :  { %8123 = vmatmul.mubr.bf16.vlgmr.msra.gmra.mrb[20].mxu0 %v11209_v61 }
 0x4ef   :  { %8287 = vmatmul.mubr.bf16.vlgmr.msra.gmra.mrb[20].mxu1 %v11209_v61 }
 0x4f2   :  { %v10010_v49 = vpop.eup %10009 }
 0x4f3   :  { %v10012_v60 = vpop.eup %10011  ;;  %v8623_v23 = vmul.f32 %v10010_v49, %v13636_v40  ;;  %v1834_v40 = vrot.slane %v13537_v19, %v10628_v22 }
 0x4f4   :  { %v10014_v0 = vpop.eup %10013  ;;  %v8625_v37 = vmul.f32 %v10012_v60, %v13639_v25  ;;  %v1842_v25 = vrot.slane %v13537_v19, %v10859_v58 }
 0x4f5   :  { %v10016_v39 = vpop.eup %10015  ;;  %v8639_v41 = vmax.f32 %v8623_v23, 0.0  ;;  %v8624_v30 = vmul.f32 %v10014_v0, %v13642_v15  ;;  %v1838_v15 = vrot.slane %v13537_v19, %v10503_v47 }
 0x4f6   :  { %v8641_v45 = vmax.f32 %v8625_v37, 0.0  ;;  %v8626_v48 = vmul.f32 %v10016_v39, %v13647_v29  ;;  %v1846_v29 = vrot.slane %v13537_v19, %v10640_v14 }
 0x4f7   :  { %v8640_v1 = vmax.f32 %v8624_v30, 0.0 }
 0x4f8   :  { %v8642_v9 = vmax.f32 %v8626_v48, 0.0 }
 0x4f9   :  { %v9851_v8 = vpack.c.bf16 %v8640_v1, %v8639_v41 }
 0x4fa   :  { %v9852_v7 = vpack.c.bf16 %v8642_v9, %v8641_v45 }
 0x4fb   :  { %v8721_v61 = vrot.slane %v9851_v8, %v12087_v5 }
 0x4fc   :  { %v8728_v11 = vrot.slane %v9852_v7, %v12087_v5 }
 0x4fe   :  { %v8729_v38 = vcombine.low %v8721_v61, %v8728_v11 }
 0x500   :  { %8753 = vst [vmem:[%s13744_s5 + $0x10] sm:$0xff] %v8729_v38 }
 0x5c1   :  { %v8124_v44 = vpop.f32.mrb[20].mxu0 }
 0x5c2   :  { %v9867_v63 = vadd.f32 %v8124_v44, %v1834_v40  ;;  %v8288_v18 = vpop.f32.mrb[20].mxu1  ;;  %v8126_v20 = vpop.f32.mrb[21].mxu0 }
 0x5c3   :  { %v9869_v21 = vadd.f32 %v8288_v18, %v1842_v25  ;;  %v9868_v53 = vadd.f32 %v8126_v20, %v1838_v15  ;;  %v8290_v27 = vpop.f32.mrb[21].mxu1  ;;  %v8128_v10 = vpop.f32.mrb[22].mxu0 }
 0x5c4   :  { %v8379_v46 = vsel %vm569_vm2, %v9867_v63, 0.0  ;;  %v9870_v22 = vadd.f32 %v8290_v27, %v1846_v29  ;;  %v8292_v16 = vpop.f32.mrb[22].mxu1  ;;  %v8129_v28 = vpop.f32.mrb[23].mxu0 }
 0x5c5   :  { %v8380_v58 = vrot.slane %v8379_v46, 4  ;;  %v8393_v24 = vsel %vm569_vm2, %v9869_v21, 0.0  ;;  %v8386_v47 = vsel %vm569_vm2, %v9868_v53, 0.0  ;;  %v8293_v13 = vpop.f32.mrb[23].mxu1 }
 0x5c6   :  { %v8394_v14 = vrot.slane %v8393_v24, 4  ;;  %v8387_v19 = vrot.slane %v8386_v47, 4  ;;  %v8400_v12 = vsel %vm569_vm2, %v9870_v22, 0.0 }
 0x5c7   :  { %v8381_v26 = vadd.f32 %v8380_v58, %v8379_v46  ;;  %v8401_v59 = vrot.slane %v8400_v12, 4 }
 0x5c8   :  { %v8395_v62 = vadd.f32 %v8394_v14, %v8393_v24  ;;  %v8388_v32 = vadd.f32 %v8387_v19, %v8386_v47 }
 0x5c9   :  { %v8382_v43 = vrot.slane %v8381_v26, 2  ;;  %v8402_v6 = vadd.f32 %v8401_v59, %v8400_v12 }
 0x5ca   :  { %v8396_v3 = vrot.slane %v8395_v62, 2  ;;  %v8389_v57 = vrot.slane %v8388_v32, 2 }
 0x5cb   :  { %v8383_v50 = vadd.f32 %v8382_v43, %v8381_v26  ;;  %v8403_v35 = vrot.slane %v8402_v6, 2 }
 0x5cc   :  { %v8397_v36 = vadd.f32 %v8396_v3, %v8395_v62  ;;  %v8390_v51 = vadd.f32 %v8389_v57, %v8388_v32 }
 0x5cd   :  { %v8384_v42 = vrot.slane %v8383_v50, 1  ;;  %v8404_v2 = vadd.f32 %v8403_v35, %v8402_v6 }
 0x5ce   :  { %v8398_v52 = vrot.slane %v8397_v36, 1  ;;  %v8391_v4 = vrot.slane %v8390_v51, 1 }
 0x5cf   :  { %v8385_v17 = vadd.f32 %v8384_v42, %v8383_v50  ;;  %v8405_v54 = vrot.slane %v8404_v2, 1 }
 0x5d0   :  { %v8399_v55 = vadd.f32 %v8398_v52, %v8397_v36  ;;  %v8392_v56 = vadd.f32 %v8391_v4, %v8390_v51 }
 0x5d1   :  { %v8419_v31 = vmul.f32 0.25, %v8385_v17  ;;  %v8406_v33 = vadd.f32 %v8405_v54, %v8404_v2 }
 0x5d2   :  { %v8421_v34 = vmul.f32 0.25, %v8399_v55  ;;  %v8420_v49 = vmul.f32 0.25, %v8392_v56 }
 0x5d3   :  { %v8435_v60 = vsub.f32 %v9867_v63, %v8419_v31  ;;  %v8422_v23 = vmul.f32 0.25, %v8406_v33 }
 0x5d4   :  { %v8437_v0 = vsub.f32 %v9869_v21, %v8421_v34  ;;  %v8436_v37 = vsub.f32 %v9868_v53, %v8420_v49 }
 0x5d5   :  { %v8451_v39 = vmul.f32 %v8435_v60, %v8435_v60  ;;  %v8438_v41 = vsub.f32 %v9870_v22, %v8422_v23 }
 0x5d6   :  { %v8453_v30 = vmul.f32 %v8437_v0, %v8437_v0  ;;  %v8452_v45 = vmul.f32 %v8436_v37, %v8436_v37 }
 0x5d7   :  { %v8539_v48 = vsel %vm569_vm2, %v8451_v39, 0.0  ;;  %v8454_v1 = vmul.f32 %v8438_v41, %v8438_v41 }
 0x5d8   :  { %v8540_v9 = vrot.slane %v8539_v48, 4  ;;  %v8553_v8 = vsel %vm569_vm2, %v8453_v30, 0.0  ;;  %v8546_v7 = vsel %vm569_vm2, %v8452_v45, 0.0 }
 0x5d9   :  { %v8554_v61 = vrot.slane %v8553_v8, 4  ;;  %v8547_v11 = vrot.slane %v8546_v7, 4  ;;  %v8560_v38 = vsel %vm569_vm2, %v8454_v1, 0.0 }
 0x5da   :  { %v8541_v40 = vadd.f32 %v8540_v9, %v8539_v48  ;;  %v8561_v25 = vrot.slane %v8560_v38, 4 }
 0x5db   :  { %v8555_v15 = vadd.f32 %v8554_v61, %v8553_v8  ;;  %v8548_v29 = vadd.f32 %v8547_v11, %v8546_v7 }
 0x5dc   :  { %v8542_v44 = vrot.slane %v8541_v40, 2  ;;  %v8562_v63 = vadd.f32 %v8561_v25, %v8560_v38 }
 0x5dd   :  { %v8556_v18 = vrot.slane %v8555_v15, 2  ;;  %v8549_v20 = vrot.slane %v8548_v29, 2 }
 0x5de   :  { %v8543_v21 = vadd.f32 %v8542_v44, %v8541_v40  ;;  %v8563_v53 = vrot.slane %v8562_v63, 2 }
 0x5df   :  { %v8557_v27 = vadd.f32 %v8556_v18, %v8555_v15  ;;  %v8550_v10 = vadd.f32 %v8549_v20, %v8548_v29 }
 0x5e0   :  { %v8544_v46 = vrot.slane %v8543_v21, 1  ;;  %v8564_v22 = vadd.f32 %v8563_v53, %v8562_v63 }
 0x5e1   :  { %v8558_v16 = vrot.slane %v8557_v27, 1  ;;  %v8551_v28 = vrot.slane %v8550_v10, 1 }
 0x5e2   :  { %v8545_v58 = vadd.f32 %v8544_v46, %v8543_v21  ;;  %v8565_v24 = vrot.slane %v8564_v22, 1 }
 0x5e3   :  { %v8559_v47 = vadd.f32 %v8558_v16, %v8557_v27  ;;  %v8552_v13 = vadd.f32 %v8551_v28, %v8550_v10 }
 0x5e4   :  { %v8579_v14 = vmul.f32 0.25, %v8545_v58  ;;  %v8566_v19 = vadd.f32 %v8565_v24, %v8564_v22 }
 0x5e5   :  { %v8581_v12 = vmul.f32 0.25, %v8559_v47  ;;  %v8580_v26 = vmul.f32 0.25, %v8552_v13 }
 0x5e6   :  { %v8595_v59 = vadd.f32 1e-05, %v8579_v14  ;;  %v8582_v62 = vmul.f32 0.25, %v8566_v19 }
 0x5e7   :  { %v8597_v32 = vadd.f32 1e-05, %v8581_v12  ;;  %v8596_v43 = vadd.f32 1e-05, %v8580_v26 }
 0x5e8   :  { %10017 = vrsqrt.f32 %v8595_v59  ;;  %v8598_v6 = vadd.f32 1e-05, %v8582_v62 }
 0x5e9   :  { %10019 = vrsqrt.f32 %v8597_v32 }
 0x5ea   :  { %10021 = vrsqrt.f32 %v8596_v43 }
 0x5eb   :  { %10023 = vrsqrt.f32 %v8598_v6 }
 0x5f2   :  { %v10018_v3 = vpop.eup %10017 }
 0x5f3   :  { %v10020_v57 = vpop.eup %10019  ;;  %v8627_v50 = vmul.f32 %v10018_v3, %v8435_v60 }
 0x5f4   :  { %v10022_v35 = vpop.eup %10021  ;;  %v8629_v36 = vmul.f32 %v10020_v57, %v8437_v0 }
 0x5f5   :  { %v10024_v51 = vpop.eup %10023  ;;  %v8643_v42 = vmax.f32 %v8627_v50, 0.0  ;;  %v8628_v2 = vmul.f32 %v10022_v35, %v8436_v37 }
 0x5f6   :  { %v8645_v52 = vmax.f32 %v8629_v36, 0.0  ;;  %v8630_v4 = vmul.f32 %v10024_v51, %v8438_v41 }
 0x5f7   :  { %v8644_v17 = vmax.f32 %v8628_v2, 0.0 }
 0x5f8   :  { %v8646_v54 = vmax.f32 %v8630_v4, 0.0 }
 0x5f9   :  { %v9853_v55 = vpack.c.bf16 %v8644_v17, %v8643_v42 }
 0x5fa   :  { %v9854_v56 = vpack.c.bf16 %v8646_v54, %v8645_v52 }
 0x5fb   :  { %v8738_v31 = vrot.slane %v9853_v55, %v12087_v5 }
 0x5fc   :  { %v8745_v33 = vrot.slane %v9854_v56, %v12087_v5 }
 0x5fe   :  { %v8746_v34 = vcombine.low %v8738_v31, %v8745_v33 }
 0x600   :  { %8754 = vst [vmem:[%s13744_s5 + $0x18] sm:$0xff] %v8746_v34 }

// kernel: generator_forward.4
= control target key start
LH: loop header
LB: loop body
LE: loop exit
PB: predicated region body
PF: predicated region fallthrough
CT: control target
= control target key end

     0   :  { %s4843_s1 = inlined_call_operand.vmem [shape: bf16[2048,256], index: 1, kind: input, shape index: {}]   ;;  %s4844_s0 = inlined_call_operand.vmem [shape: bf16[64,2048], index: 0, kind: input, shape index: {}]   ;;  %s4845_s2 = inlined_call_operand.vmem [shape: f32[64,1], index: 2, kind: input, shape index: {}]   ;;  %s4846_s3 = inlined_call_operand.vmem [shape: bf16[64,256], index: 3, kind: output, shape index: {}]  }
   0x1   :  { %v3238_v0 = vld [vmem:[%s4843_s1 + $0x4] ss:$8 sps:$4 sm:$0xff]   ;;  %v3242_v2 = vld [vmem:[%s4843_s1] ss:$8 sps:$4 sm:$0xff]   ;;  %v3244_v4 = vld [vmem:[%s4843_s1 + $0x14] ss:$8 sps:$4 sm:$0xff]  }
   0x2   :  { %v3240_v1 = vld [vmem:[%s4843_s1 + $0x404] ss:$8 sps:$4 sm:$0xff]   ;;  %1982 = vmatprep.subr.bf16.mxu1 %v3238_v0  ;;  %v3243_v3 = vld [vmem:[%s4843_s1 + $0x400] ss:$8 sps:$4 sm:$0xff]   ;;  %v3246_v5 = vld [vmem:[%s4843_s1 + $0x414] ss:$8 sps:$4 sm:$0xff]  }
   0x3   :  { %2274 = vmatprep.subr.bf16.mxu0 %v3240_v1  ;;  %1983 = vmatpush1.bf16.msra.mxu1 %v3242_v2  ;;  %v3248_v6 = vld [vmem:[%s4843_s1 + $0x10] ss:$8 sps:$4 sm:$0xff]   ;;  %v3250_v8 = vld [vmem:[%s4843_s1 + $0x24] ss:$8 sps:$4 sm:$0xff]   ;;  %v3254_v10 = vld [vmem:[%s4843_s1 + $0x20] ss:$8 sps:$4 sm:$0xff]  }
   0x4   :  { %2275 = vmatpush1.bf16.msra.mxu0 %v3243_v3  ;;  %1984 = vmatprep.subr.bf16.mxu1 %v3244_v4  ;;  %v3249_v7 = vld [vmem:[%s4843_s1 + $0x410] ss:$8 sps:$4 sm:$0xff]   ;;  %v3252_v9 = vld [vmem:[%s4843_s1 + $0x424] ss:$8 sps:$4 sm:$0xff]   ;;  %v3255_v11 = vld [vmem:[%s4843_s1 + $0x420] ss:$8 sps:$4 sm:$0xff]  }
   0x5   :  { %2276 = vmatprep.subr.bf16.mxu0 %v3246_v5  ;;  %v3256_v12 = vld [vmem:[%s4843_s1 + $0x34] ss:$8 sps:$4 sm:$0xff]   ;;  %v3260_v14 = vld [vmem:[%s4843_s1 + $0x30] ss:$8 sps:$4 sm:$0xff]   ;;  %v3262_v16 = vld [vmem:[%s4843_s1 + $0x44] ss:$8 sps:$4 sm:$0xff]  }
   0x6   :  { %v3258_v13 = vld [vmem:[%s4843_s1 + $0x434] ss:$8 sps:$4 sm:$0xff]   ;;  %v3261_v15 = vld [vmem:[%s4843_s1 + $0x430] ss:$8 sps:$4 sm:$0xff]   ;;  %v3264_v17 = vld [vmem:[%s4843_s1 + $0x444] ss:$8 sps:$4 sm:$0xff]  }
   0x7   :  { %1985 = vmatpush1.bf16.msra.mxu1 %v3248_v6  ;;  %v3266_v18 = vld [vmem:[%s4843_s1 + $0x40] ss:$8 sps:$4 sm:$0xff]   ;;  %v3268_v20 = vld [vmem:[%s4843_s1 + $0x54] ss:$8 sps:$4 sm:$0xff]   ;;  %v3272_v22 = vld [vmem:[%s4843_s1 + $0x50] ss:$8 sps:$4 sm:$0xff]  }
   0x8   :  { %2277 = vmatpush1.bf16.msra.mxu0 %v3249_v7  ;;  %1986 = vmatprep.subr.bf16.mxu1 %v3250_v8  ;;  %v3267_v19 = vld [vmem:[%s4843_s1 + $0x440] ss:$8 sps:$4 sm:$0xff]   ;;  %v3270_v21 = vld [vmem:[%s4843_s1 + $0x454] ss:$8 sps:$4 sm:$0xff]   ;;  %v3273_v23 = vld [vmem:[%s4843_s1 + $0x450] ss:$8 sps:$4 sm:$0xff]  }
   0x9   :  { %2278 = vmatprep.subr.bf16.mxu0 %v3252_v9  ;;  %v3274_v24 = vld [vmem:[%s4843_s1 + $0x64] ss:$8 sps:$4 sm:$0xff]   ;;  %v3278_v26 = vld [vmem:[%s4843_s1 + $0x60] ss:$8 sps:$4 sm:$0xff]   ;;  %v3280_v28 = vld [vmem:[%s4843_s1 + $0x74] ss:$8 sps:$4 sm:$0xff]  }
   0xa   :  { %v3276_v25 = vld [vmem:[%s4843_s1 + $0x464] ss:$8 sps:$4 sm:$0xff]   ;;  %v3279_v27 = vld [vmem:[%s4843_s1 + $0x460] ss:$8 sps:$4 sm:$0xff]   ;;  %v3282_v29 = vld [vmem:[%s4843_s1 + $0x474] ss:$8 sps:$4 sm:$0xff]  }
   0xb   :  { %1987 = vmatpush1.bf16.msra.mxu1 %v3254_v10  ;;  %v3284_v30 = vld [vmem:[%s4843_s1 + $0x70] ss:$8 sps:$4 sm:$0xff]   ;;  %v3286_v32 = vld [vmem:[%s4843_s1 + $0x84] ss:$8 sps:$4 sm:$0xff]   ;;  %v3290_v34 = vld [vmem:[%s4843_s1 + $0x80] ss:$8 sps:$4 sm:$0xff]  }
   0xc   :  { %2279 = vmatpush1.bf16.msra.mxu0 %v3255_v11  ;;  %1988 = vmatprep.subr.bf16.mxu1 %v3256_v12  ;;  %v3285_v31 = vld [vmem:[%s4843_s1 + $0x470] ss:$8 sps:$4 sm:$0xff]   ;;  %v3288_v33 = vld [vmem:[%s4843_s1 + $0x484] ss:$8 sps:$4 sm:$0xff]   ;;  %v3291_v35 = vld [vmem:[%s4843_s1 + $0x480] ss:$8 sps:$4 sm:$0xff]  }
   0xd   :  { %2280 = vmatprep.subr.bf16.mxu0 %v3258_v13  ;;  %v3292_v36 = vld [vmem:[%s4843_s1 + $0x94] ss:$8 sps:$4 sm:$0xff]   ;;  %v3296_v38 = vld [vmem:[%s4843_s1 + $0x90] ss:$8 sps:$4 sm:$0xff]   ;;  %v3298_v40 = vld [vmem:[%s4843_s1 + $0xa4] ss:$8 sps:$4 sm:$0xff]  }
   0xe   :  { %v3294_v37 = vld [vmem:[%s4843_s1 + $0x494] ss:$8 sps:$4 sm:$0xff]   ;;  %v3297_v39 = vld [vmem:[%s4843_s1 + $0x490] ss:$8 sps:$4 sm:$0xff]   ;;  %v3300_v41 = vld [vmem:[%s4843_s1 + $0x4a4] ss:$8 sps:$4 sm:$0xff]  }
   0xf   :  { %1989 = vmatpush1.bf16.msra.mxu1 %v3260_v14  ;;  %v3302_v42 = vld [vmem:[%s4843_s1 + $0xa0] ss:$8 sps:$4 sm:$0xff]   ;;  %v3304_v44 = vld [vmem:[%s4843_s1 + $0xb4] ss:$8 sps:$4 sm:$0xff]   ;;  %v3308_v46 = vld [vmem:[%s4843_s1 + $0xb0] ss:$8 sps:$4 sm:$0xff]  }
  0x10   :  { %2281 = vmatpush1.bf16.msra.mxu0 %v3261_v15  ;;  %1990 = vmatprep.subr.bf16.mxu1 %v3262_v16  ;;  %v3303_v43 = vld [vmem:[%s4843_s1 + $0x4a0] ss:$8 sps:$4 sm:$0xff]   ;;  %v3306_v45 = vld [vmem:[%s4843_s1 + $0x4b4] ss:$8 sps:$4 sm:$0xff]   ;;  %v3309_v47 = vld [vmem:[%s4843_s1 + $0x4b0] ss:$8 sps:$4 sm:$0xff]  }
  0x11   :  { %2282 = vmatprep.subr.bf16.mxu0 %v3264_v17  ;;  %v14_v48 = vld [vmem:[%s4844_s0] sm:$0xff]  ;;  %v3316_v58 = vld [vmem:[%s4843_s1 + $0xd4] ss:$8 sps:$4 sm:$0xff]   ;;  %v3320_v60 = vld [vmem:[%s4843_s1 + $0xd0] ss:$8 sps:$4 sm:$0xff]  }
  0x12   :  { %v22_v49 = vld [vmem:[%s4844_s0 + $0x40] sm:$0xff]  ;;  %v3318_v59 = vld [vmem:[%s4843_s1 + $0x4d4] ss:$8 sps:$4 sm:$0xff]   ;;  %v3321_v61 = vld [vmem:[%s4843_s1 + $0x4d0] ss:$8 sps:$4 sm:$0xff]  }
  0x13   :  { %1991 = vmatpush1.bf16.msra.mxu1 %v3266_v18  ;;  %v3310_v50 = vld [vmem:[%s4843_s1 + $0xc4] ss:$8 sps:$4 sm:$0xff]   ;;  %v2772_v52 = vcombine.high %v14_v48, %v22_v49  ;;  %v3314_v56 = vld [vmem:[%s4843_s1 + $0xc0] ss:$8 sps:$4 sm:$0xff]   ;;  %v3328_v2 = vld [vmem:[%s4843_s1 + $0xf4] ss:$8 sps:$4 sm:$0xff]   ;;  %v2771_v8 = vcombine.low %v14_v48, %v22_v49 }
  0x14   :  { %2283 = vmatpush1.bf16.msra.mxu0 %v3267_v19  ;;  %1992 = vmatprep.subr.bf16.mxu1 %v3268_v20  ;;  %v3312_v51 = vld [vmem:[%s4843_s1 + $0x4c4] ss:$8 sps:$4 sm:$0xff]   ;;  %v3315_v57 = vld [vmem:[%s4843_s1 + $0x4c0] ss:$8 sps:$4 sm:$0xff]   ;;  %v3330_v3 = vld [vmem:[%s4843_s1 + $0x4f4] ss:$8 sps:$4 sm:$0xff]  }
  0x15   :  { %2284 = vmatprep.subr.bf16.mxu0 %v3270_v21  ;;  %v18_v53 = vld [vmem:[%s4844_s0 + $0x20] sm:$0xff]  ;;  %2014 = vmatprep.mubr.bf16.mxu1 %v2772_v52  ;;  %v3332_v4 = vld [vmem:[%s4843_s1 + $0xf0] ss:$8 sps:$4 sm:$0xff]   ;;  %v3342_v12 = vld [vmem:[%s4843_s1 + $0x114] ss:$8 sps:$4 sm:$0xff]  }
  0x16   :  { %v26_v54 = vld [vmem:[%s4844_s0 + $0x60] sm:$0xff]  ;;  %v3333_v5 = vld [vmem:[%s4843_s1 + $0x4f0] ss:$8 sps:$4 sm:$0xff]   ;;  %v3345_v13 = vld [vmem:[%s4843_s1 + $0x514] ss:$8 sps:$4 sm:$0xff]  }
  0x17   :  { %1993 = vmatpush1.bf16.msra.mxu1 %v3272_v22  ;;  %v2780_v55 = vcombine.high %v18_v53, %v26_v54  ;;  %v3322_v62 = vld [vmem:[%s4843_s1 + $0xe4] ss:$8 sps:$4 sm:$0xff]   ;;  %v3326_v0 = vld [vmem:[%s4843_s1 + $0xe0] ss:$8 sps:$4 sm:$0xff]   ;;  %v2779_v10 = vcombine.low %v18_v53, %v26_v54  ;;  %v3340_v14 = vld [vmem:[%s4843_s1 + $0x110] ss:$8 sps:$4 sm:$0xff]  }
  0x18   :  { %2285 = vmatpush1.bf16.msra.mxu0 %v3273_v23  ;;  %1994 = vmatprep.subr.bf16.mxu1 %v3274_v24  ;;  %v3324_v63 = vld [vmem:[%s4843_s1 + $0x4e4] ss:$8 sps:$4 sm:$0xff]   ;;  %v3327_v1 = vld [vmem:[%s4843_s1 + $0x4e0] ss:$8 sps:$4 sm:$0xff]   ;;  %v3343_v15 = vld [vmem:[%s4843_s1 + $0x510] ss:$8 sps:$4 sm:$0xff]  }
  0x19   :  { %2286 = vmatprep.subr.bf16.mxu0 %v3276_v25  ;;  %2306 = vmatprep.mubr.bf16.mxu0 %v2780_v55  ;;  %v3336_v6 = vld [vmem:[%s4843_s1 + $0x104] ss:$8 sps:$4 sm:$0xff]   ;;  %v3334_v9 = vld [vmem:[%s4843_s1 + $0x100] ss:$8 sps:$4 sm:$0xff]   ;;  %v3354_v22 = vld [vmem:[%s4843_s1 + $0x134] ss:$8 sps:$4 sm:$0xff]  }
  0x1a   :  { %v3339_v7 = vld [vmem:[%s4843_s1 + $0x504] ss:$8 sps:$4 sm:$0xff]   ;;  %v3337_v11 = vld [vmem:[%s4843_s1 + $0x500] ss:$8 sps:$4 sm:$0xff]   ;;  %v3357_v23 = vld [vmem:[%s4843_s1 + $0x534] ss:$8 sps:$4 sm:$0xff]  }
  0x1b   :  { %1995 = vmatpush1.bf16.msra.mxu1 %v3278_v26  ;;  %v3348_v16 = vld [vmem:[%s4843_s1 + $0x124] ss:$8 sps:$4 sm:$0xff]   ;;  %v3346_v18 = vld [vmem:[%s4843_s1 + $0x120] ss:$8 sps:$4 sm:$0xff]  }
  0x1c   :  { %2287 = vmatpush1.bf16.msra.mxu0 %v3279_v27  ;;  %1996 = vmatprep.subr.bf16.mxu1 %v3280_v28  ;;  %v3351_v17 = vld [vmem:[%s4843_s1 + $0x524] ss:$8 sps:$4 sm:$0xff]   ;;  %v3349_v19 = vld [vmem:[%s4843_s1 + $0x520] ss:$8 sps:$4 sm:$0xff]  }
  0x1d   :  { %2288 = vmatprep.subr.bf16.mxu0 %v3282_v29  ;;  %v30_v20 = vld [vmem:[%s4844_s0 + $0x80] sm:$0xff]  ;;  %v3352_v29 = vld [vmem:[%s4843_s1 + $0x130] ss:$8 sps:$4 sm:$0xff]  }
  0x1e   :  { %v38_v21 = vld [vmem:[%s4844_s0 + $0xc0] sm:$0xff] }
  0x1f   :  { %1997 = vmatpush1.bf16.msra.mxu1 %v3284_v30  ;;  %v2788_v24 = vcombine.high %v30_v20, %v38_v21  ;;  %v34_v25 = vld [vmem:[%s4844_s0 + $0xa0] sm:$0xff]  ;;  %v2787_v26 = vcombine.low %v30_v20, %v38_v21  ;;  %v3355_v30 = vld [vmem:[%s4843_s1 + $0x530] ss:$8 sps:$4 sm:$0xff]  }
  0x20   :  { %2289 = vmatpush1.bf16.msra.mxu0 %v3285_v31  ;;  %1998 = vmatprep.subr.bf16.mxu1 %v3286_v32  ;;  %v42_v27 = vld [vmem:[%s4844_s0 + $0xe0] sm:$0xff]  ;;  %v3400_v20 = vld [vmem:[%s4843_s1 + $0x1b0] ss:$8 sps:$4 sm:$0xff]  }
  0x21   :  { %2290 = vmatprep.subr.bf16.mxu0 %v3288_v33  ;;  %v2796_v28 = vcombine.high %v34_v25, %v42_v27  ;;  %v2795_v31 = vcombine.low %v34_v25, %v42_v27  ;;  %v3360_v32 = vld [vmem:[%s4843_s1 + $0x144] ss:$8 sps:$4 sm:$0xff]   ;;  %v3370_v55 = vld [vmem:[%s4843_s1 + $0x160] ss:$8 sps:$4 sm:$0xff]   ;;  %v3403_v21 = vld [vmem:[%s4843_s1 + $0x5b0] ss:$8 sps:$4 sm:$0xff]  }
  0x22   :  { %v3363_v33 = vld [vmem:[%s4843_s1 + $0x544] ss:$8 sps:$4 sm:$0xff]   ;;  %v3409_v25 = vld [vmem:[%s4843_s1 + $0x5c0] ss:$8 sps:$4 sm:$0xff]   ;;  %v3417_v27 = vld [vmem:[%s4843_s1 + $0x5d4] ss:$8 sps:$4 sm:$0xff]  }
  0x23   :  { %1999 = vmatpush1.bf16.msra.mxu1 %v3290_v34  ;;  %v46_v34 = vld [vmem:[%s4844_s0 + $0x100] sm:$0xff] }
  0x24   :  { %2291 = vmatpush1.bf16.msra.mxu0 %v3291_v35  ;;  %2000 = vmatprep.subr.bf16.mxu1 %v3292_v36  ;;  %v54_v35 = vld [vmem:[%s4844_s0 + $0x140] sm:$0xff] }
  0x25   :  { %2292 = vmatprep.subr.bf16.mxu0 %v3294_v37  ;;  %v3358_v36 = vld [vmem:[%s4843_s1 + $0x140] ss:$8 sps:$4 sm:$0xff]   ;;  %v2804_v37 = vcombine.high %v46_v34, %v54_v35 }
  0x26   :  { %v62_v48 = vld [vmem:[%s4844_s0 + $0x180] sm:$0xff] }
  0x27   :  { %2001 = vmatpush1.bf16.msra.mxu1 %v3296_v38  ;;  %v3361_v38 = vld [vmem:[%s4843_s1 + $0x540] ss:$8 sps:$4 sm:$0xff]  }
  0x28   :  { %2293 = vmatpush1.bf16.msra.mxu0 %v3297_v39  ;;  %2002 = vmatprep.subr.bf16.mxu1 %v3298_v40  ;;  %v50_v39 = vld [vmem:[%s4844_s0 + $0x120] sm:$0xff] }
  0x29   :  { %2294 = vmatprep.subr.bf16.mxu0 %v3300_v41  ;;  %v58_v40 = vld [vmem:[%s4844_s0 + $0x160] sm:$0xff]  ;;  %v2803_v41 = vcombine.low %v46_v34, %v54_v35  ;;  %v3426_v34 = vld [vmem:[%s4843_s1 + $0x1f4] ss:$8 sps:$4 sm:$0xff]  }
  0x2a   :  { %v70_v49 = vld [vmem:[%s4844_s0 + $0x1c0] sm:$0xff]  ;;  %v3429_v35 = vld [vmem:[%s4843_s1 + $0x5f4] ss:$8 sps:$4 sm:$0xff]  }
  0x2b   :  { %2003 = vmatpush1.bf16.msra.mxu1 %v3302_v42  ;;  %v3366_v42 = vld [vmem:[%s4843_s1 + $0x154] ss:$8 sps:$4 sm:$0xff]   ;;  %v2820_v52 = vcombine.high %v62_v48, %v70_v49  ;;  %v66_v53 = vld [vmem:[%s4844_s0 + $0x1a0] sm:$0xff] }
  0x2c   :  { %2295 = vmatpush1.bf16.msra.mxu0 %v3303_v43  ;;  %2004 = vmatprep.subr.bf16.mxu1 %v3304_v44  ;;  %v2812_v43 = vcombine.high %v50_v39, %v58_v40  ;;  %v3369_v44 = vld [vmem:[%s4843_s1 + $0x554] ss:$8 sps:$4 sm:$0xff]   ;;  %v74_v54 = vld [vmem:[%s4844_s0 + $0x1e0] sm:$0xff] }
  0x2d   :  { %2296 = vmatprep.subr.bf16.mxu0 %v3306_v45  ;;  %v3364_v45 = vld [vmem:[%s4843_s1 + $0x150] ss:$8 sps:$4 sm:$0xff]  }
  0x2f   :  { %2005 = vmatpush1.bf16.msra.mxu1 %v3308_v46  ;;  %v3367_v46 = vld [vmem:[%s4843_s1 + $0x550] ss:$8 sps:$4 sm:$0xff]  }
  0x30   :  { %2297 = vmatpush1.bf16.msra.mxu0 %v3309_v47  ;;  %2006 = vmatprep.subr.bf16.mxu1 %v3310_v50  ;;  %v2811_v47 = vcombine.low %v50_v39, %v58_v40  ;;  %v3372_v50 = vld [vmem:[%s4843_s1 + $0x164] ss:$8 sps:$4 sm:$0xff]   ;;  %v3430_v40 = vld [vmem:[%s4843_s1 + $0x200] ss:$8 sps:$4 sm:$0xff]  }
  0x31   :  { %2298 = vmatprep.subr.bf16.mxu0 %v3312_v51  ;;  %v3375_v51 = vld [vmem:[%s4843_s1 + $0x564] ss:$8 sps:$4 sm:$0xff]  }
  0x32   :  { %v3435_v39 = vld [vmem:[%s4843_s1 + $0x604] ss:$8 sps:$4 sm:$0xff]  }
  0x33   :  { %2007 = vmatpush1.bf16.msra.mxu1 %v3314_v56  ;;  %v3373_v56 = vld [vmem:[%s4843_s1 + $0x560] ss:$8 sps:$4 sm:$0xff]  }
  0x34   :  { %2299 = vmatpush1.bf16.msra.mxu0 %v3315_v57  ;;  %2008 = vmatprep.subr.bf16.mxu1 %v3316_v58  ;;  %v2828_v57 = vcombine.high %v66_v53, %v74_v54  ;;  %v2819_v58 = vcombine.low %v62_v48, %v70_v49  ;;  %v3438_v48 = vld [vmem:[%s4843_s1 + $0x214] ss:$8 sps:$4 sm:$0xff]  }
  0x35   :  { %2300 = vmatprep.subr.bf16.mxu0 %v3318_v59  ;;  %v3378_v59 = vld [vmem:[%s4843_s1 + $0x174] ss:$8 sps:$4 sm:$0xff]  }
  0x36   :  { %v3441_v49 = vld [vmem:[%s4843_s1 + $0x614] ss:$8 sps:$4 sm:$0xff]  }
  0x37   :  { %2009 = vmatpush1.bf16.msra.mxu1 %v3320_v60  ;;  %v3381_v60 = vld [vmem:[%s4843_s1 + $0x574] ss:$8 sps:$4 sm:$0xff]  }
  0x38   :  { %2301 = vmatpush1.bf16.msra.mxu0 %v3321_v61  ;;  %2010 = vmatprep.subr.bf16.mxu1 %v3322_v62  ;;  %v3376_v61 = vld [vmem:[%s4843_s1 + $0x170] ss:$8 sps:$4 sm:$0xff]  }
  0x39   :  { %2302 = vmatprep.subr.bf16.mxu0 %v3324_v63  ;;  %v3379_v62 = vld [vmem:[%s4843_s1 + $0x570] ss:$8 sps:$4 sm:$0xff]   ;;  %v3998_v63 = vld [vmem:[%s4844_s0 + $0x8] sm:$0xff] }
  0x3b   :  { %2011 = vmatpush1.bf16.msra.mxu1 %v3326_v0  ;;  %v2827_v0 = vcombine.low %v66_v53, %v74_v54  ;;  %v3439_v53 = vld [vmem:[%s4843_s1 + $0x610] ss:$8 sps:$4 sm:$0xff]   ;;  %v3444_v54 = vld [vmem:[%s4843_s1 + $0x224] ss:$8 sps:$4 sm:$0xff]  }
  0x3c   :  { %2303 = vmatpush1.bf16.msra.mxu0 %v3327_v1  ;;  %2012 = vmatprep.subr.bf16.mxu1 %v3328_v2  ;;  %v4003_v1 = vld [vmem:[%s4844_s0 + $0x48] sm:$0xff] }
  0x3d   :  { %2304 = vmatprep.subr.bf16.mxu0 %v3330_v3  ;;  %v3384_v2 = vld [vmem:[%s4843_s1 + $0x184] ss:$8 sps:$4 sm:$0xff]  }
  0x3e   :  { %v3387_v3 = vld [vmem:[%s4843_s1 + $0x584] ss:$8 sps:$4 sm:$0xff]  }
  0x3f   :  { %2013 = vmatpush1.bf16.msra.mxu1 %v3332_v4  ;;  %v2774_v4 = vcombine.high %v3998_v63, %v4003_v1 }
  0x40   :  { %2305 = vmatpush1.bf16.msra.mxu0 %v3333_v5  ;;  %2055 = vmatprep.subr.bf16.mxu1 %v3336_v6  ;;  %v4016_v5 = vld [vmem:[%s4844_s0 + $0x28] sm:$0xff] }
  0x41   :  { %2347 = vmatprep.subr.bf16.mxu0 %v3339_v7  ;;  %v4021_v6 = vld [vmem:[%s4844_s0 + $0x68] sm:$0xff] }
  0x42   :  { %2015 = vmatmul.mubr.bf16.vlgmr.msra.gmra.mrb[0].mxu1 %v2771_v8  ;;  %v2782_v7 = vcombine.high %v4016_v5, %v4021_v6  ;;  %v3382_v8 = vld [vmem:[%s4843_s1 + $0x180] ss:$8 sps:$4 sm:$0xff]  }
  0x43   :  { %2307 = vmatmul.mubr.bf16.vlgmr.msra.gmra.mrb[0].mxu0 %v2779_v10  ;;  %2056 = vmatpush1.bf16.msra.mxu1 %v3334_v9  ;;  %v3385_v9 = vld [vmem:[%s4843_s1 + $0x580] ss:$8 sps:$4 sm:$0xff]   ;;  %v3390_v10 = vld [vmem:[%s4843_s1 + $0x194] ss:$8 sps:$4 sm:$0xff]  }
  0x44   :  { %2348 = vmatpush1.bf16.msra.mxu0 %v3337_v11  ;;  %2057 = vmatprep.subr.bf16.mxu1 %v3342_v12  ;;  %v3393_v11 = vld [vmem:[%s4843_s1 + $0x594] ss:$8 sps:$4 sm:$0xff]   ;;  %v3388_v12 = vld [vmem:[%s4843_s1 + $0x190] ss:$8 sps:$4 sm:$0xff]  }
  0x45   :  { %2349 = vmatprep.subr.bf16.mxu0 %v3345_v13  ;;  %2024 = vmatprep.mubr.bf16.mxu1 %v2788_v24  ;;  %v3391_v13 = vld [vmem:[%s4843_s1 + $0x590] ss:$8 sps:$4 sm:$0xff]   ;;  %v3406_v24 = vld [vmem:[%s4843_s1 + $0x1c0] ss:$8 sps:$4 sm:$0xff]  }
  0x46   :  { %2316 = vmatprep.mubr.bf16.mxu0 %v2796_v28  ;;  %v3412_v28 = vld [vmem:[%s4843_s1 + $0x1d0] ss:$8 sps:$4 sm:$0xff]  }
  0x47   :  { %2058 = vmatpush1.bf16.msra.mxu1 %v3340_v14  ;;  %v3396_v14 = vld [vmem:[%s4843_s1 + $0x1a4] ss:$8 sps:$4 sm:$0xff]  }
  0x48   :  { %2350 = vmatpush1.bf16.msra.mxu0 %v3343_v15  ;;  %2059 = vmatprep.subr.bf16.mxu1 %v3348_v16  ;;  %v3399_v15 = vld [vmem:[%s4843_s1 + $0x5a4] ss:$8 sps:$4 sm:$0xff]   ;;  %v3394_v16 = vld [vmem:[%s4843_s1 + $0x1a0] ss:$8 sps:$4 sm:$0xff]  }
  0x49   :  { %2351 = vmatprep.subr.bf16.mxu0 %v3351_v17  ;;  %v3397_v17 = vld [vmem:[%s4843_s1 + $0x5a0] ss:$8 sps:$4 sm:$0xff]  }
  0x4a   :  { %2025 = vmatmul.mubr.bf16.gmra.mrb[4].mxu1 %v2787_v26  ;;  %v3414_v26 = vld [vmem:[%s4843_s1 + $0x1d4] ss:$8 sps:$4 sm:$0xff]  }
  0x4b   :  { %2060 = vmatpush1.bf16.msra.mxu1 %v3346_v18  ;;  %2317 = vmatmul.mubr.bf16.gmra.mrb[4].mxu0 %v2795_v31  ;;  %v3402_v18 = vld [vmem:[%s4843_s1 + $0x1b4] ss:$8 sps:$4 sm:$0xff]   ;;  %v3423_v31 = vld [vmem:[%s4843_s1 + $0x5e4] ss:$8 sps:$4 sm:$0xff]  }
  0x4c   :  { %2352 = vmatpush1.bf16.msra.mxu0 %v3349_v19  ;;  %2061 = vmatprep.subr.bf16.mxu1 %v3354_v22  ;;  %v3405_v19 = vld [vmem:[%s4843_s1 + $0x5b4] ss:$8 sps:$4 sm:$0xff]   ;;  %v3408_v22 = vld [vmem:[%s4843_s1 + $0x1c4] ss:$8 sps:$4 sm:$0xff]  }
  0x4d   :  { %2353 = vmatprep.subr.bf16.mxu0 %v3357_v23  ;;  %2034 = vmatprep.mubr.bf16.mxu1 %v2804_v37  ;;  %v3411_v23 = vld [vmem:[%s4843_s1 + $0x5c4] ss:$8 sps:$4 sm:$0xff]   ;;  %v3427_v37 = vld [vmem:[%s4843_s1 + $0x5f0] ss:$8 sps:$4 sm:$0xff]  }
  0x4e   :  { %2326 = vmatprep.mubr.bf16.mxu0 %v2812_v43  ;;  %v2773_v43 = vcombine.low %v3998_v63, %v4003_v1  ;;  %v59_v63 = vld [vmem:[%s4844_s0 + $0x168] sm:$0xff]  ;;  %v3453_v1 = vld [vmem:[%s4843_s1 + $0x634] ss:$8 sps:$4 sm:$0xff]  }
  0x4f   :  { %2062 = vmatpush1.bf16.msra.mxu1 %v3352_v29  ;;  %v3415_v29 = vld [vmem:[%s4843_s1 + $0x5d0] ss:$8 sps:$4 sm:$0xff]  }
  0x50   :  { %2354 = vmatpush1.bf16.msra.mxu0 %v3355_v30  ;;  %2063 = vmatprep.subr.bf16.mxu1 %v3360_v32  ;;  %v3420_v30 = vld [vmem:[%s4843_s1 + $0x1e4] ss:$8 sps:$4 sm:$0xff]   ;;  %v3418_v32 = vld [vmem:[%s4843_s1 + $0x1e0] ss:$8 sps:$4 sm:$0xff]  }
  0x51   :  { %2355 = vmatprep.subr.bf16.mxu0 %v3363_v33  ;;  %v3421_v33 = vld [vmem:[%s4843_s1 + $0x5e0] ss:$8 sps:$4 sm:$0xff]  }
  0x52   :  { %2035 = vmatmul.mubr.bf16.gmra.mrb[8].mxu1 %v2803_v41  ;;  %v3433_v41 = vld [vmem:[%s4843_s1 + $0x600] ss:$8 sps:$4 sm:$0xff]  }
  0x53   :  { %2064 = vmatpush1.bf16.msra.mxu1 %v3358_v36  ;;  %2327 = vmatmul.mubr.bf16.gmra.mrb[8].mxu0 %v2811_v47  ;;  %v3424_v36 = vld [vmem:[%s4843_s1 + $0x1f0] ss:$8 sps:$4 sm:$0xff]   ;;  %v43_v47 = vld [vmem:[%s4844_s0 + $0xe8] sm:$0xff] }
  0x54   :  { %2356 = vmatpush1.bf16.msra.mxu0 %v3361_v38  ;;  %2065 = vmatprep.subr.bf16.mxu1 %v3366_v42  ;;  %v3432_v38 = vld [vmem:[%s4843_s1 + $0x204] ss:$8 sps:$4 sm:$0xff]  }
  0x55   :  { %2357 = vmatprep.subr.bf16.mxu0 %v3369_v44  ;;  %2044 = vmatprep.mubr.bf16.mxu1 %v2820_v52  ;;  %v31_v42 = vld [vmem:[%s4844_s0 + $0x88] sm:$0xff]  ;;  %v2781_v44 = vcombine.low %v4016_v5, %v4021_v6  ;;  %v3436_v52 = vld [vmem:[%s4843_s1 + $0x210] ss:$8 sps:$4 sm:$0xff]  }
  0x56   :  { %2336 = vmatprep.mubr.bf16.mxu0 %v2828_v57  ;;  %v3445_v57 = vld [vmem:[%s4843_s1 + $0x620] ss:$8 sps:$4 sm:$0xff]   ;;  %v3451_v5 = vld [vmem:[%s4843_s1 + $0x630] ss:$8 sps:$4 sm:$0xff]   ;;  %v3456_v6 = vld [vmem:[%s4843_s1 + $0x244] ss:$8 sps:$4 sm:$0xff]  }
  0x57   :  { %2066 = vmatpush1.bf16.msra.mxu1 %v3364_v45  ;;  %v39_v45 = vld [vmem:[%s4844_s0 + $0xc8] sm:$0xff] }
  0x58   :  { %2358 = vmatpush1.bf16.msra.mxu0 %v3367_v46  ;;  %2067 = vmatprep.subr.bf16.mxu1 %v3372_v50  ;;  %v35_v46 = vld [vmem:[%s4844_s0 + $0xa8] sm:$0xff]  ;;  %v2790_v50 = vcombine.high %v31_v42, %v39_v45 }
  0x59   :  { %2359 = vmatprep.subr.bf16.mxu0 %v3375_v51  ;;  %v2798_v51 = vcombine.high %v35_v46, %v43_v47 }
  0x5a   :  { %2045 = vmatmul.mubr.bf16.gmra.mrb[12].mxu1 %v2819_v58  ;;  %v47_v58 = vld [vmem:[%s4844_s0 + $0x108] sm:$0xff] }
  0x5b   :  { %2068 = vmatpush1.bf16.msra.mxu1 %v3370_v55  ;;  %2087 = vmatprep.mubr.bf16.mxu1 %v2774_v4  ;;  %v3447_v55 = vld [vmem:[%s4843_s1 + $0x624] ss:$8 sps:$4 sm:$0xff]   ;;  %v3448_v4 = vld [vmem:[%s4843_s1 + $0x230] ss:$8 sps:$4 sm:$0xff]  }
  0x5c   :  { %2360 = vmatpush1.bf16.msra.mxu0 %v3373_v56  ;;  %2069 = vmatprep.subr.bf16.mxu1 %v3378_v59  ;;  %v3442_v56 = vld [vmem:[%s4843_s1 + $0x220] ss:$8 sps:$4 sm:$0xff]  }
  0x5d   :  { %2361 = vmatprep.subr.bf16.mxu0 %v3381_v60  ;;  %2337 = vmatmul.mubr.bf16.gmra.mrb[12].mxu0 %v2827_v0  ;;  %v55_v59 = vld [vmem:[%s4844_s0 + $0x148] sm:$0xff]  ;;  %v2789_v60 = vcombine.low %v31_v42, %v39_v45  ;;  %v3450_v0 = vld [vmem:[%s4843_s1 + $0x234] ss:$8 sps:$4 sm:$0xff]   ;;  %v3638_v42 = vmov 0   ;;  %v3484_v45 = vld [vmem:[%s4843_s1 + $0x290] ss:$8 sps:$4 sm:$0xff]  }
  0x5e   :  { %2379 = vmatprep.mubr.bf16.mxu0 %v2782_v7  ;;  %v3459_v7 = vld [vmem:[%s4843_s1 + $0x644] ss:$8 sps:$4 sm:$0xff]   ;;  %3236 = vset.pattern.permute.xlu0 %v3638_v42 }
  0x5f   :  { %2070 = vmatpush1.bf16.msra.mxu1 %v3376_v61  ;;  %v2797_v61 = vcombine.low %v35_v46, %v43_v47  ;;  %3237 = vset.pattern.permute.xlu1 %v3638_v42  ;;  %v3487_v46 = vld [vmem:[%s4843_s1 + $0x690] ss:$8 sps:$4 sm:$0xff]   ;;  %v3492_v47 = vld [vmem:[%s4843_s1 + $0x2a4] ss:$8 sps:$4 sm:$0xff]  }
  0x60   :  { %2362 = vmatpush1.bf16.msra.mxu0 %v3379_v62  ;;  %2071 = vmatprep.subr.bf16.mxu1 %v3384_v2  ;;  %v51_v62 = vld [vmem:[%s4844_s0 + $0x128] sm:$0xff]  ;;  %v2806_v2 = vcombine.high %v47_v58, %v55_v59  ;;  %v3547_v42 = vld [vmem:[%s4843_s1 + $0x730] ss:$8 sps:$4 sm:$0xff]  }
  0x61   :  { %2363 = vmatprep.subr.bf16.mxu0 %v3387_v3  ;;  %v2814_v3 = vcombine.high %v51_v62, %v59_v63 }
  0x63   :  { %2072 = vmatpush1.bf16.msra.mxu1 %v3382_v8  ;;  %v3454_v8 = vld [vmem:[%s4843_s1 + $0x240] ss:$8 sps:$4 sm:$0xff]  }
  0x64   :  { %2364 = vmatpush1.bf16.msra.mxu0 %v3385_v9  ;;  %2073 = vmatprep.subr.bf16.mxu1 %v3390_v10  ;;  %v3457_v9 = vld [vmem:[%s4843_s1 + $0x640] ss:$8 sps:$4 sm:$0xff]  }
  0x65   :  { %2365 = vmatprep.subr.bf16.mxu0 %v3393_v11  ;;  %v63_v10 = vld [vmem:[%s4844_s0 + $0x188] sm:$0xff] }
  0x66   :  { %v71_v11 = vld [vmem:[%s4844_s0 + $0x1c8] sm:$0xff] }
  0x67   :  { %2074 = vmatpush1.bf16.msra.mxu1 %v3388_v12  ;;  %v2805_v12 = vcombine.low %v47_v58, %v55_v59  ;;  %v3505_v58 = vld [vmem:[%s4843_s1 + $0x6c0] ss:$8 sps:$4 sm:$0xff]   ;;  %v3510_v59 = vld [vmem:[%s4843_s1 + $0x2d4] ss:$8 sps:$4 sm:$0xff]  }
  0x68   :  { %2366 = vmatpush1.bf16.msra.mxu0 %v3391_v13  ;;  %2075 = vmatprep.subr.bf16.mxu1 %v3396_v14  ;;  %v2813_v13 = vcombine.low %v51_v62, %v59_v63  ;;  %v67_v14 = vld [vmem:[%s4844_s0 + $0x1a8] sm:$0xff]  ;;  %v3511_v62 = vld [vmem:[%s4843_s1 + $0x6d0] ss:$8 sps:$4 sm:$0xff]  }
  0x69   :  { %2367 = vmatprep.subr.bf16.mxu0 %v3399_v15  ;;  %v75_v15 = vld [vmem:[%s4844_s0 + $0x1e8] sm:$0xff] }
  0x6a   :  { %v3516_v63 = vld [vmem:[%s4843_s1 + $0x2e4] ss:$8 sps:$4 sm:$0xff]  }
  0x6b   :  { %2076 = vmatpush1.bf16.msra.mxu1 %v3394_v16  ;;  %v3462_v16 = vld [vmem:[%s4843_s1 + $0x254] ss:$8 sps:$4 sm:$0xff]  }
  0x6c   :  { %2368 = vmatpush1.bf16.msra.mxu0 %v3397_v17  ;;  %2077 = vmatprep.subr.bf16.mxu1 %v3402_v18  ;;  %v3465_v17 = vld [vmem:[%s4843_s1 + $0x654] ss:$8 sps:$4 sm:$0xff]   ;;  %v2822_v18 = vcombine.high %v63_v10, %v71_v11 }
  0x6d   :  { %2369 = vmatprep.subr.bf16.mxu0 %v3405_v19  ;;  %v2830_v19 = vcombine.high %v67_v14, %v75_v15 }
  0x6f   :  { %2078 = vmatpush1.bf16.msra.mxu1 %v3400_v20  ;;  %v3460_v20 = vld [vmem:[%s4843_s1 + $0x250] ss:$8 sps:$4 sm:$0xff]  }
  0x70   :  { %2370 = vmatpush1.bf16.msra.mxu0 %v3403_v21  ;;  %2079 = vmatprep.subr.bf16.mxu1 %v3408_v22  ;;  %v3463_v21 = vld [vmem:[%s4843_s1 + $0x650] ss:$8 sps:$4 sm:$0xff]   ;;  %v3468_v22 = vld [vmem:[%s4843_s1 + $0x264] ss:$8 sps:$4 sm:$0xff]  }
  0x71   :  { %2371 = vmatprep.subr.bf16.mxu0 %v3411_v23  ;;  %v3471_v23 = vld [vmem:[%s4843_s1 + $0x664] ss:$8 sps:$4 sm:$0xff]  }
  0x73   :  { %2080 = vmatpush1.bf16.msra.mxu1 %v3406_v24  ;;  %v3466_v24 = vld [vmem:[%s4843_s1 + $0x260] ss:$8 sps:$4 sm:$0xff]  }
  0x74   :  { %2372 = vmatpush1.bf16.msra.mxu0 %v3409_v25  ;;  %2081 = vmatprep.subr.bf16.mxu1 %v3414_v26  ;;  %v3469_v25 = vld [vmem:[%s4843_s1 + $0x660] ss:$8 sps:$4 sm:$0xff]   ;;  %v4242_v26 = vld [vmem:[%s4844_s0 + $0x10] sm:$0xff] }
  0x75   :  { %2373 = vmatprep.subr.bf16.mxu0 %v3417_v27  ;;  %v4247_v27 = vld [vmem:[%s4844_s0 + $0x50] sm:$0xff] }
  0x77   :  { %2082 = vmatpush1.bf16.msra.mxu1 %v3412_v28  ;;  %v2821_v28 = vcombine.low %v63_v10, %v71_v11  ;;  %v32_v10 = vld [vmem:[%s4844_s0 + $0x90] sm:$0xff]  ;;  %v2775_v11 = vcombine.low %v4242_v26, %v4247_v27 }
  0x78   :  { %2374 = vmatpush1.bf16.msra.mxu0 %v3415_v29  ;;  %2083 = vmatprep.subr.bf16.mxu1 %v3420_v30  ;;  %v2829_v29 = vcombine.low %v67_v14, %v75_v15  ;;  %v4252_v30 = vld [vmem:[%s4844_s0 + $0x30] sm:$0xff] }
  0x79   :  { %2375 = vmatprep.subr.bf16.mxu0 %v3423_v31  ;;  %v4257_v31 = vld [vmem:[%s4844_s0 + $0x70] sm:$0xff] }
  0x7a   :  { %v36_v14 = vld [vmem:[%s4844_s0 + $0xb0] sm:$0xff] }
  0x7b   :  { %2084 = vmatpush1.bf16.msra.mxu1 %v3418_v32  ;;  %v3474_v32 = vld [vmem:[%s4843_s1 + $0x274] ss:$8 sps:$4 sm:$0xff]  }
  0x7c   :  { %2376 = vmatpush1.bf16.msra.mxu0 %v3421_v33  ;;  %2085 = vmatprep.subr.bf16.mxu1 %v3426_v34  ;;  %v3477_v33 = vld [vmem:[%s4843_s1 + $0x674] ss:$8 sps:$4 sm:$0xff]   ;;  %v2776_v34 = vcombine.high %v4242_v26, %v4247_v27  ;;  %v3540_v27 = vld [vmem:[%s4843_s1 + $0x324] ss:$8 sps:$4 sm:$0xff]  }
  0x7d   :  { %2377 = vmatprep.subr.bf16.mxu0 %v3429_v35  ;;  %v2784_v35 = vcombine.high %v4252_v30, %v4257_v31  ;;  %v44_v15 = vld [vmem:[%s4844_s0 + $0xf0] sm:$0xff]  ;;  %v337_v26 = vld [vmem:[%s4845_s2 + $0x18] sm:$0xff] }
  0x7f   :  { %2086 = vmatpush1.bf16.msra.mxu1 %v3424_v36  ;;  %v3472_v36 = vld [vmem:[%s4843_s1 + $0x270] ss:$8 sps:$4 sm:$0xff]  }
  0x80   :  { %2378 = vmatpush1.bf16.msra.mxu0 %v3427_v37  ;;  %2128 = vmatprep.subr.bf16.mxu1 %v3432_v38  ;;  %v3475_v37 = vld [vmem:[%s4843_s1 + $0x670] ss:$8 sps:$4 sm:$0xff]   ;;  %v3480_v38 = vld [vmem:[%s4843_s1 + $0x284] ss:$8 sps:$4 sm:$0xff]  }
  0x81   :  { %2420 = vmatprep.subr.bf16.mxu0 %v3435_v39  ;;  %v3483_v39 = vld [vmem:[%s4843_s1 + $0x684] ss:$8 sps:$4 sm:$0xff]  }
  0x82   :  { %2088 = vmatmul.mubr.bf16.vlgmr.msra.gmra.mrb[0].mxu1 %v2773_v43  ;;  %v3486_v43 = vld [vmem:[%s4843_s1 + $0x294] ss:$8 sps:$4 sm:$0xff]  }
  0x83   :  { %2380 = vmatmul.mubr.bf16.vlgmr.msra.gmra.mrb[0].mxu0 %v2781_v44  ;;  %2129 = vmatpush1.bf16.msra.mxu1 %v3430_v40  ;;  %v3478_v40 = vld [vmem:[%s4843_s1 + $0x280] ss:$8 sps:$4 sm:$0xff]   ;;  %v3489_v44 = vld [vmem:[%s4843_s1 + $0x694] ss:$8 sps:$4 sm:$0xff]  }
  0x84   :  { %2421 = vmatpush1.bf16.msra.mxu0 %v3433_v41  ;;  %2130 = vmatprep.subr.bf16.mxu1 %v3438_v48  ;;  %v3481_v41 = vld [vmem:[%s4843_s1 + $0x680] ss:$8 sps:$4 sm:$0xff]   ;;  %v3495_v48 = vld [vmem:[%s4843_s1 + $0x6a4] ss:$8 sps:$4 sm:$0xff]  }
  0x85   :  { %2422 = vmatprep.subr.bf16.mxu0 %v3441_v49  ;;  %2097 = vmatprep.mubr.bf16.mxu1 %v2790_v50  ;;  %v3490_v49 = vld [vmem:[%s4843_s1 + $0x2a0] ss:$8 sps:$4 sm:$0xff]  }
  0x86   :  { %2389 = vmatprep.mubr.bf16.mxu0 %v2798_v51  ;;  %v3493_v50 = vld [vmem:[%s4843_s1 + $0x6a0] ss:$8 sps:$4 sm:$0xff]   ;;  %v3498_v51 = vld [vmem:[%s4843_s1 + $0x2b4] ss:$8 sps:$4 sm:$0xff]  }
  0x87   :  { %2131 = vmatpush1.bf16.msra.mxu1 %v3436_v52  ;;  %v3501_v52 = vld [vmem:[%s4843_s1 + $0x6b4] ss:$8 sps:$4 sm:$0xff]  }
  0x88   :  { %2423 = vmatpush1.bf16.msra.mxu0 %v3439_v53  ;;  %2132 = vmatprep.subr.bf16.mxu1 %v3444_v54  ;;  %v3496_v53 = vld [vmem:[%s4843_s1 + $0x2b0] ss:$8 sps:$4 sm:$0xff]  }
  0x89   :  { %2424 = vmatprep.subr.bf16.mxu0 %v3447_v55  ;;  %v3499_v54 = vld [vmem:[%s4843_s1 + $0x6b0] ss:$8 sps:$4 sm:$0xff]   ;;  %v3504_v55 = vld [vmem:[%s4843_s1 + $0x2c4] ss:$8 sps:$4 sm:$0xff]  }
  0x8a   :  { %2098 = vmatmul.mubr.bf16.gmra.mrb[4].mxu1 %v2789_v60  ;;  %v3513_v60 = vld [vmem:[%s4843_s1 + $0x6d4] ss:$8 sps:$4 sm:$0xff]  }
  0x8b   :  { %2390 = vmatmul.mubr.bf16.gmra.mrb[4].mxu0 %v2797_v61  ;;  %2133 = vmatpush1.bf16.msra.mxu1 %v3442_v56  ;;  %v3507_v56 = vld [vmem:[%s4843_s1 + $0x6c4] ss:$8 sps:$4 sm:$0xff]   ;;  %v3508_v61 = vld [vmem:[%s4843_s1 + $0x2d0] ss:$8 sps:$4 sm:$0xff]  }
  0x8c   :  { %2425 = vmatpush1.bf16.msra.mxu0 %v3445_v57  ;;  %2134 = vmatprep.subr.bf16.mxu1 %v3450_v0  ;;  %v3502_v57 = vld [vmem:[%s4843_s1 + $0x2c0] ss:$8 sps:$4 sm:$0xff]   ;;  %v3519_v0 = vld [vmem:[%s4843_s1 + $0x6e4] ss:$8 sps:$4 sm:$0xff]  }
  0x8d   :  { %2426 = vmatprep.subr.bf16.mxu0 %v3453_v1  ;;  %2107 = vmatprep.mubr.bf16.mxu1 %v2806_v2  ;;  %v3514_v1 = vld [vmem:[%s4843_s1 + $0x2e0] ss:$8 sps:$4 sm:$0xff]  }
  0x8e   :  { %2399 = vmatprep.mubr.bf16.mxu0 %v2814_v3  ;;  %v3517_v2 = vld [vmem:[%s4843_s1 + $0x6e0] ss:$8 sps:$4 sm:$0xff]   ;;  %v3522_v3 = vld [vmem:[%s4843_s1 + $0x2f4] ss:$8 sps:$4 sm:$0xff]  }
  0x8f   :  { %2135 = vmatpush1.bf16.msra.mxu1 %v3448_v4  ;;  %v3525_v4 = vld [vmem:[%s4843_s1 + $0x6f4] ss:$8 sps:$4 sm:$0xff]  }
  0x90   :  { %2427 = vmatpush1.bf16.msra.mxu0 %v3451_v5  ;;  %2136 = vmatprep.subr.bf16.mxu1 %v3456_v6  ;;  %v3520_v5 = vld [vmem:[%s4843_s1 + $0x2f0] ss:$8 sps:$4 sm:$0xff]  }
  0x91   :  { %2428 = vmatprep.subr.bf16.mxu0 %v3459_v7  ;;  %v3523_v6 = vld [vmem:[%s4843_s1 + $0x6f0] ss:$8 sps:$4 sm:$0xff]   ;;  %v3528_v7 = vld [vmem:[%s4843_s1 + $0x304] ss:$8 sps:$4 sm:$0xff]  }
  0x92   :  { %2108 = vmatmul.mubr.bf16.gmra.mrb[8].mxu1 %v2805_v12  ;;  %v2783_v12 = vcombine.low %v4252_v30, %v4257_v31  ;;  %v2799_v31 = vcombine.low %v36_v14, %v44_v15 }
  0x93   :  { %2400 = vmatmul.mubr.bf16.gmra.mrb[8].mxu0 %v2813_v13  ;;  %2137 = vmatpush1.bf16.msra.mxu1 %v3454_v8  ;;  %v3531_v8 = vld [vmem:[%s4843_s1 + $0x704] ss:$8 sps:$4 sm:$0xff]   ;;  %v40_v13 = vld [vmem:[%s4844_s0 + $0xd0] sm:$0xff] }
  0x94   :  { %2429 = vmatpush1.bf16.msra.mxu0 %v3457_v9  ;;  %2138 = vmatprep.subr.bf16.mxu1 %v3462_v16  ;;  %v3526_v9 = vld [vmem:[%s4843_s1 + $0x300] ss:$8 sps:$4 sm:$0xff]   ;;  %v2791_v30 = vcombine.low %v32_v10, %v40_v13 }
  0x95   :  { %2430 = vmatprep.subr.bf16.mxu0 %v3465_v17  ;;  %2117 = vmatprep.mubr.bf16.mxu1 %v2822_v18  ;;  %v3529_v16 = vld [vmem:[%s4843_s1 + $0x700] ss:$8 sps:$4 sm:$0xff]   ;;  %v336_v18 = vld [vmem:[%s4845_s2 + $0x10] sm:$0xff] }
  0x96   :  { %2409 = vmatprep.mubr.bf16.mxu0 %v2830_v19  ;;  %v334_v17 = vld [vmem:[%s4845_s2] sm:$0xff]  ;;  %v3534_v19 = vld [vmem:[%s4843_s1 + $0x314] ss:$8 sps:$4 sm:$0xff]   ;;  %354 = vperm.xlu1 %3237, %v336_v18  }
  0x97   :  { %2139 = vmatpush1.bf16.msra.mxu1 %v3460_v20  ;;  %v3537_v20 = vld [vmem:[%s4843_s1 + $0x714] ss:$8 sps:$4 sm:$0xff]   ;;  %344 = vperm.xlu0 %3236, %v334_v17   ;;  %v3574_v17 = vld [vmem:[%s4843_s1 + $0x380] ss:$8 sps:$4 sm:$0xff]  }
  0x98   :  { %2431 = vmatpush1.bf16.msra.mxu0 %v3463_v21  ;;  %2140 = vmatprep.subr.bf16.mxu1 %v3468_v22  ;;  %v2792_v21 = vcombine.high %v32_v10, %v40_v13  ;;  %v2800_v22 = vcombine.high %v36_v14, %v44_v15  ;;  %v3573_v10 = vld [vmem:[%s4843_s1 + $0x774] ss:$8 sps:$4 sm:$0xff]   ;;  %v3568_v13 = vld [vmem:[%s4843_s1 + $0x370] ss:$8 sps:$4 sm:$0xff]   ;;  %v3576_v15 = vld [vmem:[%s4843_s1 + $0x384] ss:$8 sps:$4 sm:$0xff]  }
  0x99   :  { %2432 = vmatprep.subr.bf16.mxu0 %v3471_v23  ;;  %v3532_v23 = vld [vmem:[%s4843_s1 + $0x310] ss:$8 sps:$4 sm:$0xff]   ;;  %v3577_v18 = vld [vmem:[%s4843_s1 + $0x780] ss:$8 sps:$4 sm:$0xff]  }
  0x9a   :  { %2118 = vmatmul.mubr.bf16.gmra.mrb[12].mxu1 %v2821_v28  ;;  %v3543_v28 = vld [vmem:[%s4843_s1 + $0x724] ss:$8 sps:$4 sm:$0xff]   ;;  %359 = vperm.xlu1 %3237, %v337_v26   ;;  %v3571_v14 = vld [vmem:[%s4843_s1 + $0x770] ss:$8 sps:$4 sm:$0xff]   ;;  %v3589_v26 = vld [vmem:[%s4843_s1 + $0x7a0] ss:$8 sps:$4 sm:$0xff]  }
  0x9b   :  { %2410 = vmatmul.mubr.bf16.gmra.mrb[12].mxu0 %v2829_v29  ;;  %2141 = vmatpush1.bf16.msra.mxu1 %v3466_v24  ;;  %v3535_v24 = vld [vmem:[%s4843_s1 + $0x710] ss:$8 sps:$4 sm:$0xff]  }
  0x9c   :  { %2433 = vmatpush1.bf16.msra.mxu0 %v3469_v25  ;;  %2142 = vmatprep.subr.bf16.mxu1 %v3474_v32  ;;  %v335_v25 = vld [vmem:[%s4845_s2 + $0x8] sm:$0xff]  ;;  %v48_v29 = vld [vmem:[%s4844_s0 + $0x110] sm:$0xff] }
  0x9d   :  { %2434 = vmatprep.subr.bf16.mxu0 %v3477_v33  ;;  %2160 = vmatprep.mubr.bf16.mxu1 %v2776_v34  ;;  %v56_v32 = vld [vmem:[%s4844_s0 + $0x150] sm:$0xff] }
  0x9e   :  { %2452 = vmatprep.mubr.bf16.mxu0 %v2784_v35  ;;  %v52_v33 = vld [vmem:[%s4844_s0 + $0x130] sm:$0xff]  ;;  %349 = vperm.xlu0 %3236, %v335_v25   ;;  %v3538_v35 = vld [vmem:[%s4843_s1 + $0x320] ss:$8 sps:$4 sm:$0xff]  }
  0x9f   :  { %2143 = vmatpush1.bf16.msra.mxu1 %v3472_v36  ;;  %v60_v34 = vld [vmem:[%s4844_s0 + $0x170] sm:$0xff]  ;;  %v3541_v36 = vld [vmem:[%s4843_s1 + $0x720] ss:$8 sps:$4 sm:$0xff]  }
  0xa0   :  { %2435 = vmatpush1.bf16.msra.mxu0 %v3475_v37  ;;  %2144 = vmatprep.subr.bf16.mxu1 %v3480_v38  ;;  %v3546_v37 = vld [vmem:[%s4843_s1 + $0x334] ss:$8 sps:$4 sm:$0xff]   ;;  %v3586_v25 = vld [vmem:[%s4843_s1 + $0x3a0] ss:$8 sps:$4 sm:$0xff]  }
  0xa1   :  { %2436 = vmatprep.subr.bf16.mxu0 %v3483_v39  ;;  %v3549_v38 = vld [vmem:[%s4843_s1 + $0x734] ss:$8 sps:$4 sm:$0xff]   ;;  %v2808_v39 = vcombine.high %v48_v29, %v56_v32 }
  0xa3   :  { %2145 = vmatpush1.bf16.msra.mxu1 %v3478_v40  ;;  %v2816_v40 = vcombine.high %v52_v33, %v60_v34 }
  0xa4   :  { %2437 = vmatpush1.bf16.msra.mxu0 %v3481_v41  ;;  %2146 = vmatprep.subr.bf16.mxu1 %v3486_v43  ;;  %v3544_v41 = vld [vmem:[%s4843_s1 + $0x330] ss:$8 sps:$4 sm:$0xff]   ;;  %v338_v43 = vld [vmem:[%s4845_s2 + $0x20] sm:$0xff] }
  0xa5   :  { %2438 = vmatprep.subr.bf16.mxu0 %v3489_v44  ;;  %v339_v44 = vld [vmem:[%s4845_s2 + $0x28] sm:$0xff]  ;;  %364 = vperm.xlu0 %3236, %v338_v43   ;;  %v3618_v43 = vld [vmem:[%s4843_s1 + $0x3f4] ss:$8 sps:$4 sm:$0xff]  }
  0xa6   :  { %369 = vperm.xlu1 %3237, %v339_v44   ;;  %v3621_v44 = vld [vmem:[%s4843_s1 + $0x7f4] ss:$8 sps:$4 sm:$0xff]  }
  0xa7   :  { %2147 = vmatpush1.bf16.msra.mxu1 %v3484_v45  ;;  %v3552_v45 = vld [vmem:[%s4843_s1 + $0x344] ss:$8 sps:$4 sm:$0xff]  }
  0xa8   :  { %2439 = vmatpush1.bf16.msra.mxu0 %v3487_v46  ;;  %2148 = vmatprep.subr.bf16.mxu1 %v3492_v47  ;;  %v3555_v46 = vld [vmem:[%s4843_s1 + $0x744] ss:$8 sps:$4 sm:$0xff]   ;;  %v64_v47 = vld [vmem:[%s4844_s0 + $0x190] sm:$0xff] }
  0xa9   :  { %2440 = vmatprep.subr.bf16.mxu0 %v3495_v48  ;;  %v2807_v48 = vcombine.low %v48_v29, %v56_v32  ;;  %v3592_v29 = vld [vmem:[%s4843_s1 + $0x3b0] ss:$8 sps:$4 sm:$0xff]   ;;  %v3603_v32 = vld [vmem:[%s4843_s1 + $0x7c4] ss:$8 sps:$4 sm:$0xff]  }
  0xab   :  { %2149 = vmatpush1.bf16.msra.mxu1 %v3490_v49  ;;  %v2815_v49 = vcombine.low %v52_v33, %v60_v34  ;;  %v3598_v33 = vld [vmem:[%s4843_s1 + $0x3c0] ss:$8 sps:$4 sm:$0xff]  }
  0xac   :  { %2441 = vmatpush1.bf16.msra.mxu0 %v3493_v50  ;;  %2150 = vmatprep.subr.bf16.mxu1 %v3498_v51  ;;  %v72_v50 = vld [vmem:[%s4844_s0 + $0x1d0] sm:$0xff]  ;;  %v3601_v34 = vld [vmem:[%s4843_s1 + $0x7c0] ss:$8 sps:$4 sm:$0xff]  }
  0xad   :  { %2442 = vmatprep.subr.bf16.mxu0 %v3501_v52  ;;  %v68_v51 = vld [vmem:[%s4844_s0 + $0x1b0] sm:$0xff] }
  0xae   :  { %v76_v52 = vld [vmem:[%s4844_s0 + $0x1f0] sm:$0xff] }
  0xaf   :  { %2151 = vmatpush1.bf16.msra.mxu1 %v3496_v53  ;;  %v3550_v53 = vld [vmem:[%s4843_s1 + $0x340] ss:$8 sps:$4 sm:$0xff]  }
  0xb0   :  { %2443 = vmatpush1.bf16.msra.mxu0 %v3499_v54  ;;  %2152 = vmatprep.subr.bf16.mxu1 %v3504_v55  ;;  %v3553_v54 = vld [vmem:[%s4843_s1 + $0x740] ss:$8 sps:$4 sm:$0xff]   ;;  %v3558_v55 = vld [vmem:[%s4843_s1 + $0x354] ss:$8 sps:$4 sm:$0xff]  }
  0xb1   :  { %2444 = vmatprep.subr.bf16.mxu0 %v3507_v56  ;;  %v3561_v56 = vld [vmem:[%s4843_s1 + $0x754] ss:$8 sps:$4 sm:$0xff]  }
  0xb3   :  { %2153 = vmatpush1.bf16.msra.mxu1 %v3502_v57  ;;  %v2824_v57 = vcombine.high %v64_v47, %v72_v50 }
  0xb4   :  { %2445 = vmatpush1.bf16.msra.mxu0 %v3505_v58  ;;  %2154 = vmatprep.subr.bf16.mxu1 %v3510_v59  ;;  %v2832_v58 = vcombine.high %v68_v51, %v76_v52  ;;  %v3556_v59 = vld [vmem:[%s4843_s1 + $0x350] ss:$8 sps:$4 sm:$0xff]  }
  0xb5   :  { %2446 = vmatprep.subr.bf16.mxu0 %v3513_v60  ;;  %v3559_v60 = vld [vmem:[%s4843_s1 + $0x750] ss:$8 sps:$4 sm:$0xff]  }
  0xb7   :  { %2155 = vmatpush1.bf16.msra.mxu1 %v3508_v61  ;;  %v340_v61 = vld [vmem:[%s4845_s2 + $0x30] sm:$0xff] }
  0xb8   :  { %2447 = vmatpush1.bf16.msra.mxu0 %v3511_v62  ;;  %2156 = vmatprep.subr.bf16.mxu1 %v3516_v63  ;;  %v341_v62 = vld [vmem:[%s4845_s2 + $0x38] sm:$0xff]  ;;  %v3564_v63 = vld [vmem:[%s4843_s1 + $0x364] ss:$8 sps:$4 sm:$0xff]  }
  0xb9   :  { %2448 = vmatprep.subr.bf16.mxu0 %v3519_v0  ;;  %v3567_v0 = vld [vmem:[%s4843_s1 + $0x764] ss:$8 sps:$4 sm:$0xff]   ;;  %374 = vperm.xlu0 %3236, %v340_v61  }
  0xba   :  { %379 = vperm.xlu1 %3237, %v341_v62  }
  0xbb   :  { %2157 = vmatpush1.bf16.msra.mxu1 %v3514_v1  ;;  %v4516_v1 = vld [vmem:[%s4844_s0 + $0x18] sm:$0xff] }
  0xbc   :  { %2449 = vmatpush1.bf16.msra.mxu0 %v3517_v2  ;;  %2158 = vmatprep.subr.bf16.mxu1 %v3522_v3  ;;  %v2823_v2 = vcombine.low %v64_v47, %v72_v50  ;;  %v2831_v3 = vcombine.low %v68_v51, %v76_v52  ;;  %v33_v47 = vld [vmem:[%s4844_s0 + $0x98] sm:$0xff] }
  0xbd   :  { %2450 = vmatprep.subr.bf16.mxu0 %v3525_v4  ;;  %v4521_v4 = vld [vmem:[%s4844_s0 + $0x58] sm:$0xff] }
  0xbe   :  { %v45_v50 = vld [vmem:[%s4844_s0 + $0xf8] sm:$0xff]  ;;  %v2777_v51 = vcombine.low %v4516_v1, %v4521_v4 }
  0xbf   :  { %2159 = vmatpush1.bf16.msra.mxu1 %v3520_v5  ;;  %v4526_v5 = vld [vmem:[%s4844_s0 + $0x38] sm:$0xff] }
  0xc0   :  { %2451 = vmatpush1.bf16.msra.mxu0 %v3523_v6  ;;  %2201 = vmatprep.subr.bf16.mxu1 %v3528_v7  ;;  %v4531_v6 = vld [vmem:[%s4844_s0 + $0x78] sm:$0xff]  ;;  %v3562_v7 = vld [vmem:[%s4843_s1 + $0x360] ss:$8 sps:$4 sm:$0xff]  }
  0xc1   :  { %2493 = vmatprep.subr.bf16.mxu0 %v3531_v8  ;;  %v3565_v8 = vld [vmem:[%s4843_s1 + $0x760] ss:$8 sps:$4 sm:$0xff]   ;;  %v2785_v52 = vcombine.low %v4526_v5, %v4531_v6 }
  0xc2   :  { %2161 = vmatmul.mubr.bf16.vlgmr.msra.gmra.mrb[0].mxu1 %v2775_v11  ;;  %v2778_v11 = vcombine.high %v4516_v1, %v4521_v4  ;;  %v69_v1 = vld [vmem:[%s4844_s0 + $0x1b8] sm:$0xff] }
  0xc3   :  { %2453 = vmatmul.mubr.bf16.vlgmr.msra.gmra.mrb[0].mxu0 %v2783_v12  ;;  %2202 = vmatpush1.bf16.msra.mxu1 %v3526_v9  ;;  %v3570_v9 = vld [vmem:[%s4843_s1 + $0x374] ss:$8 sps:$4 sm:$0xff]   ;;  %v2786_v12 = vcombine.high %v4526_v5, %v4531_v6 }
  0xc4   :  { %2494 = vmatpush1.bf16.msra.mxu0 %v3529_v16  ;;  %2203 = vmatprep.subr.bf16.mxu1 %v3534_v19  ;;  %v3579_v16 = vld [vmem:[%s4843_s1 + $0x784] ss:$8 sps:$4 sm:$0xff]   ;;  %v3582_v19 = vld [vmem:[%s4843_s1 + $0x394] ss:$8 sps:$4 sm:$0xff]  }
  0xc5   :  { %2495 = vmatprep.subr.bf16.mxu0 %v3537_v20  ;;  %2170 = vmatprep.mubr.bf16.mxu1 %v2792_v21  ;;  %v3585_v20 = vld [vmem:[%s4843_s1 + $0x794] ss:$8 sps:$4 sm:$0xff]   ;;  %v3580_v21 = vld [vmem:[%s4843_s1 + $0x390] ss:$8 sps:$4 sm:$0xff]  }
  0xc6   :  { %2462 = vmatprep.mubr.bf16.mxu0 %v2800_v22  ;;  %v3583_v22 = vld [vmem:[%s4843_s1 + $0x790] ss:$8 sps:$4 sm:$0xff]  }
  0xc7   :  { %2204 = vmatpush1.bf16.msra.mxu1 %v3532_v23  ;;  %v3588_v23 = vld [vmem:[%s4843_s1 + $0x3a4] ss:$8 sps:$4 sm:$0xff]  }
  0xc8   :  { %2496 = vmatpush1.bf16.msra.mxu0 %v3535_v24  ;;  %2205 = vmatprep.subr.bf16.mxu1 %v3540_v27  ;;  %v3591_v24 = vld [vmem:[%s4843_s1 + $0x7a4] ss:$8 sps:$4 sm:$0xff]   ;;  %v3594_v27 = vld [vmem:[%s4843_s1 + $0x3b4] ss:$8 sps:$4 sm:$0xff]  }
  0xc9   :  { %2497 = vmatprep.subr.bf16.mxu0 %v3543_v28  ;;  %v3597_v28 = vld [vmem:[%s4843_s1 + $0x7b4] ss:$8 sps:$4 sm:$0xff]  }
  0xca   :  { %2171 = vmatmul.mubr.bf16.gmra.mrb[4].mxu1 %v2791_v30  ;;  %v3595_v30 = vld [vmem:[%s4843_s1 + $0x7b0] ss:$8 sps:$4 sm:$0xff]  }
  0xcb   :  { %2463 = vmatmul.mubr.bf16.gmra.mrb[4].mxu0 %v2799_v31  ;;  %2206 = vmatpush1.bf16.msra.mxu1 %v3538_v35  ;;  %v3600_v31 = vld [vmem:[%s4843_s1 + $0x3c4] ss:$8 sps:$4 sm:$0xff]   ;;  %v3606_v35 = vld [vmem:[%s4843_s1 + $0x3d4] ss:$8 sps:$4 sm:$0xff]  }
  0xcc   :  { %2498 = vmatpush1.bf16.msra.mxu0 %v3541_v36  ;;  %2207 = vmatprep.subr.bf16.mxu1 %v3546_v37  ;;  %v3609_v36 = vld [vmem:[%s4843_s1 + $0x7d4] ss:$8 sps:$4 sm:$0xff]   ;;  %v3604_v37 = vld [vmem:[%s4843_s1 + $0x3d0] ss:$8 sps:$4 sm:$0xff]  }
  0xcd   :  { %2499 = vmatprep.subr.bf16.mxu0 %v3549_v38  ;;  %2180 = vmatprep.mubr.bf16.mxu1 %v2808_v39  ;;  %v3607_v38 = vld [vmem:[%s4843_s1 + $0x7d0] ss:$8 sps:$4 sm:$0xff]   ;;  %v3612_v39 = vld [vmem:[%s4843_s1 + $0x3e4] ss:$8 sps:$4 sm:$0xff]  }
  0xce   :  { %2472 = vmatprep.mubr.bf16.mxu0 %v2816_v40  ;;  %v3615_v40 = vld [vmem:[%s4843_s1 + $0x7e4] ss:$8 sps:$4 sm:$0xff]  }
  0xcf   :  { %2208 = vmatpush1.bf16.msra.mxu1 %v3544_v41  ;;  %v3610_v41 = vld [vmem:[%s4843_s1 + $0x3e0] ss:$8 sps:$4 sm:$0xff]  }
  0xd0   :  { %2500 = vmatpush1.bf16.msra.mxu0 %v3547_v42  ;;  %2209 = vmatprep.subr.bf16.mxu1 %v3552_v45  ;;  %v3613_v42 = vld [vmem:[%s4843_s1 + $0x7e0] ss:$8 sps:$4 sm:$0xff]   ;;  %v3616_v45 = vld [vmem:[%s4843_s1 + $0x3f0] ss:$8 sps:$4 sm:$0xff]  }
  0xd1   :  { %2501 = vmatprep.subr.bf16.mxu0 %v3555_v46  ;;  %v3619_v46 = vld [vmem:[%s4843_s1 + $0x7f0] ss:$8 sps:$4 sm:$0xff]  }
  0xd2   :  { %2181 = vmatmul.mubr.bf16.gmra.mrb[8].mxu1 %v2807_v48  ;;  %v41_v48 = vld [vmem:[%s4844_s0 + $0xd8] sm:$0xff] }
  0xd3   :  { %2473 = vmatmul.mubr.bf16.gmra.mrb[8].mxu0 %v2815_v49  ;;  %2210 = vmatpush1.bf16.msra.mxu1 %v3550_v53  ;;  %v37_v49 = vld [vmem:[%s4844_s0 + $0xb8] sm:$0xff]  ;;  %v2794_v53 = vcombine.high %v33_v47, %v41_v48 }
  0xd4   :  { %2502 = vmatpush1.bf16.msra.mxu0 %v3553_v54  ;;  %2211 = vmatprep.subr.bf16.mxu1 %v3558_v55  ;;  %v2802_v54 = vcombine.high %v37_v49, %v45_v50  ;;  %v49_v55 = vld [vmem:[%s4844_s0 + $0x118] sm:$0xff] }
  0xd5   :  { %2503 = vmatprep.subr.bf16.mxu0 %v3561_v56  ;;  %2190 = vmatprep.mubr.bf16.mxu1 %v2824_v57  ;;  %v57_v56 = vld [vmem:[%s4844_s0 + $0x158] sm:$0xff] }
  0xd6   :  { %2482 = vmatprep.mubr.bf16.mxu0 %v2832_v58  ;;  %v53_v57 = vld [vmem:[%s4844_s0 + $0x138] sm:$0xff]  ;;  %v2810_v61 = vcombine.high %v49_v55, %v57_v56 }
  0xd7   :  { %2212 = vmatpush1.bf16.msra.mxu1 %v3556_v59  ;;  %v61_v58 = vld [vmem:[%s4844_s0 + $0x178] sm:$0xff]  ;;  %v2793_v59 = vcombine.low %v33_v47, %v41_v48 }
  0xd8   :  { %2504 = vmatpush1.bf16.msra.mxu0 %v3559_v60  ;;  %2213 = vmatprep.subr.bf16.mxu1 %v3564_v63  ;;  %v2801_v60 = vcombine.low %v37_v49, %v45_v50  ;;  %v2818_v62 = vcombine.high %v53_v57, %v61_v58  ;;  %v65_v63 = vld [vmem:[%s4844_s0 + $0x198] sm:$0xff]  ;;  %v2817_v4 = vcombine.low %v53_v57, %v61_v58 }
  0xd9   :  { %2505 = vmatprep.subr.bf16.mxu0 %v3567_v0  ;;  %v73_v0 = vld [vmem:[%s4844_s0 + $0x1d8] sm:$0xff] }
  0xda   :  { %2191 = vmatmul.mubr.bf16.gmra.mrb[12].mxu1 %v2823_v2  ;;  %v77_v2 = vld [vmem:[%s4844_s0 + $0x1f8] sm:$0xff]  ;;  %v2826_v5 = vcombine.high %v65_v63, %v73_v0 }
  0xdb   :  { %2483 = vmatmul.mubr.bf16.gmra.mrb[12].mxu0 %v2831_v3  ;;  %2214 = vmatpush1.bf16.msra.mxu1 %v3562_v7  ;;  %v2809_v3 = vcombine.low %v49_v55, %v57_v56  ;;  %v2834_v6 = vcombine.high %v69_v1, %v77_v2  ;;  %v2825_v7 = vcombine.low %v65_v63, %v73_v0 }
  0xdc   :  { %2506 = vmatpush1.bf16.msra.mxu0 %v3565_v8  ;;  %2215 = vmatprep.subr.bf16.mxu1 %v3570_v9  ;;  %v2833_v8 = vcombine.low %v69_v1, %v77_v2 }
  0xdd   :  { %2507 = vmatprep.subr.bf16.mxu0 %v3573_v10  ;;  %2233 = vmatprep.mubr.bf16.mxu1 %v2778_v11 }
  0xde   :  { %2525 = vmatprep.mubr.bf16.mxu0 %v2786_v12 }
  0xdf   :  { %2216 = vmatpush1.bf16.msra.mxu1 %v3568_v13 }
  0xe0   :  { %2508 = vmatpush1.bf16.msra.mxu0 %v3571_v14  ;;  %2217 = vmatprep.subr.bf16.mxu1 %v3576_v15 }
  0xe1   :  { %2509 = vmatprep.subr.bf16.mxu0 %v3579_v16 }
  0xe3   :  { %2218 = vmatpush1.bf16.msra.mxu1 %v3574_v17 }
  0xe4   :  { %2510 = vmatpush1.bf16.msra.mxu0 %v3577_v18  ;;  %2219 = vmatprep.subr.bf16.mxu1 %v3582_v19 }
  0xe5   :  { %2511 = vmatprep.subr.bf16.mxu0 %v3585_v20 }
  0xe7   :  { %2220 = vmatpush1.bf16.msra.mxu1 %v3580_v21 }
  0xe8   :  { %2512 = vmatpush1.bf16.msra.mxu0 %v3583_v22  ;;  %2221 = vmatprep.subr.bf16.mxu1 %v3588_v23 }
  0xe9   :  { %2513 = vmatprep.subr.bf16.mxu0 %v3591_v24 }
  0xeb   :  { %2222 = vmatpush1.bf16.msra.mxu1 %v3586_v25 }
  0xec   :  { %2514 = vmatpush1.bf16.msra.mxu0 %v3589_v26  ;;  %2223 = vmatprep.subr.bf16.mxu1 %v3594_v27 }
  0xed   :  { %2515 = vmatprep.subr.bf16.mxu0 %v3597_v28 }
  0xef   :  { %2224 = vmatpush1.bf16.msra.mxu1 %v3592_v29 }
  0xf0   :  { %2516 = vmatpush1.bf16.msra.mxu0 %v3595_v30  ;;  %2225 = vmatprep.subr.bf16.mxu1 %v3600_v31 }
  0xf1   :  { %2517 = vmatprep.subr.bf16.mxu0 %v3603_v32 }
  0xf3   :  { %2226 = vmatpush1.bf16.msra.mxu1 %v3598_v33 }
  0xf4   :  { %2518 = vmatpush1.bf16.msra.mxu0 %v3601_v34  ;;  %2227 = vmatprep.subr.bf16.mxu1 %v3606_v35 }
  0xf5   :  { %2519 = vmatprep.subr.bf16.mxu0 %v3609_v36 }
  0xf7   :  { %2228 = vmatpush1.bf16.msra.mxu1 %v3604_v37 }
  0xf8   :  { %2520 = vmatpush1.bf16.msra.mxu0 %v3607_v38  ;;  %2229 = vmatprep.subr.bf16.mxu1 %v3612_v39 }
  0xf9   :  { %2521 = vmatprep.subr.bf16.mxu0 %v3615_v40 }
  0xfb   :  { %2230 = vmatpush1.bf16.msra.mxu1 %v3610_v41 }
  0xfc   :  { %2522 = vmatpush1.bf16.msra.mxu0 %v3613_v42  ;;  %2231 = vmatprep.subr.bf16.mxu1 %v3618_v43 }
  0xfd   :  { %2523 = vmatprep.subr.bf16.mxu0 %v3621_v44 }
  0xff   :  { %2232 = vmatpush1.bf16.msra.mxu1 %v3616_v45 }
 0x100   :  { %2524 = vmatpush1.bf16.msra.mxu0 %v3619_v46 }
 0x102   :  { %2234 = vmatmul.mubr.bf16.vlgmr.msra.gmra.mrb[0].mxu1 %v2777_v51 }
 0x103   :  { %2526 = vmatmul.mubr.bf16.vlgmr.msra.gmra.mrb[0].mxu0 %v2785_v52  ;;  %2243 = vmatprep.mubr.bf16.mxu1 %v2794_v53 }
 0x104   :  { %2535 = vmatprep.mubr.bf16.mxu0 %v2802_v54 }
 0x10a   :  { %2244 = vmatmul.mubr.bf16.gmra.mrb[4].mxu1 %v2793_v59 }
 0x10b   :  { %2536 = vmatmul.mubr.bf16.gmra.mrb[4].mxu0 %v2801_v60  ;;  %2253 = vmatprep.mubr.bf16.mxu1 %v2810_v61 }
 0x10c   :  { %2545 = vmatprep.mubr.bf16.mxu0 %v2818_v62 }
 0x112   :  { %2254 = vmatmul.mubr.bf16.gmra.mrb[8].mxu1 %v2809_v3 }
 0x113   :  { %2546 = vmatmul.mubr.bf16.gmra.mrb[8].mxu0 %v2817_v4  ;;  %2263 = vmatprep.mubr.bf16.mxu1 %v2826_v5 }
 0x114   :  { %2555 = vmatprep.mubr.bf16.mxu0 %v2834_v6 }
 0x115   :  { %v355_v11 = vpop.permute.xlu1 %354 }
 0x116   :  { %v345_v9 = vpop.permute.xlu0 %344 }
 0x119   :  { %v360_v29 = vpop.permute.xlu1 %359 }
 0x11a   :  { %2264 = vmatmul.mubr.bf16.gmra.mrb[12].mxu1 %v2825_v7 }
 0x11b   :  { %2556 = vmatmul.mubr.bf16.gmra.mrb[12].mxu0 %v2833_v8 }
 0x11d   :  { %v350_v10 = vpop.permute.xlu0 %349 }
 0x124   :  { %v365_v48 = vpop.permute.xlu0 %364 }
 0x125   :  { %v370_v49 = vpop.permute.xlu1 %369 }
 0x138   :  { %v375_v4 = vpop.permute.xlu0 %374 }
 0x139   :  { %v380_v5 = vpop.permute.xlu1 %379 }
 0x1d5   :  { %v2235_v12 = vpop.f32.mrb[0].mxu1 }
 0x1d6   :  { %v2527_v13 = vpop.f32.mrb[0].mxu0  ;;  %v3107_v14 = vadd.f32 %v2235_v12, %v345_v9  ;;  %v2237_v15 = vpop.f32.mrb[1].mxu1 }
 0x1d7   :  { %v2529_v16 = vpop.f32.mrb[1].mxu0  ;;  %v3109_v17 = vadd.f32 %v2237_v15, %v345_v9  ;;  %v2239_v18 = vpop.f32.mrb[2].mxu1 }
 0x1d8   :  { %v2531_v19 = vpop.f32.mrb[2].mxu0  ;;  %v4691_v20 = vadd.f32 %v3107_v14, %v2527_v13  ;;  %v3111_v21 = vadd.f32 %v2239_v18, %v350_v10  ;;  %v2241_v22 = vpop.f32.mrb[3].mxu1 }
 0x1d9   :  { %v2533_v23 = vpop.f32.mrb[3].mxu0  ;;  %v4693_v24 = vadd.f32 %v3109_v17, %v2529_v16  ;;  %v3113_v25 = vadd.f32 %v2241_v22, %v350_v10 }
 0x1da   :  { %v4695_v26 = vadd.f32 %v3111_v21, %v2531_v19 }
 0x1db   :  { %v4697_v27 = vadd.f32 %v3113_v25, %v2533_v23  ;;  %v2566_v28 = vadd.f32 %v4693_v24, %v4691_v20 }
 0x1dd   :  { %2567 = vadd.xlane.f32.xlu0 %v2566_v28  ;;  %v2245_v31 = vpop.f32.mrb[4].mxu1  ;;  %v2569_v32 = vadd.f32 %v4697_v27, %v4695_v26 }
 0x1de   :  { %v2537_v30 = vpop.f32.mrb[4].mxu0  ;;  %v3115_v33 = vadd.f32 %v2245_v31, %v355_v11  ;;  %v2247_v34 = vpop.f32.mrb[5].mxu1 }
 0x1df   :  { %v2539_v35 = vpop.f32.mrb[5].mxu0  ;;  %v3117_v36 = vadd.f32 %v2247_v34, %v355_v11  ;;  %2570 = vadd.xlane.f32.xlu1 %v2569_v32  ;;  %v2249_v38 = vpop.f32.mrb[6].mxu1 }
 0x1e0   :  { %v2541_v37 = vpop.f32.mrb[6].mxu0  ;;  %v4703_v39 = vadd.f32 %v3115_v33, %v2537_v30  ;;  %v3119_v40 = vadd.f32 %v2249_v38, %v360_v29  ;;  %v2251_v41 = vpop.f32.mrb[7].mxu1 }
 0x1e1   :  { %v2543_v42 = vpop.f32.mrb[7].mxu0  ;;  %v4705_v43 = vadd.f32 %v3117_v36, %v2539_v35  ;;  %v3121_v44 = vadd.f32 %v2251_v41, %v360_v29 }
 0x1e2   :  { %v4707_v45 = vadd.f32 %v3119_v40, %v2541_v37 }
 0x1e3   :  { %v4709_v46 = vadd.f32 %v3121_v44, %v2543_v42  ;;  %v2572_v47 = vadd.f32 %v4705_v43, %v4703_v39 }
 0x1e5   :  { %2573 = vadd.xlane.f32.xlu0 %v2572_v47  ;;  %v2255_v51 = vpop.f32.mrb[8].mxu1  ;;  %v2575_v58 = vadd.f32 %v4709_v46, %v4707_v45 }
 0x1e6   :  { %v2547_v50 = vpop.f32.mrb[8].mxu0  ;;  %v3123_v52 = vadd.f32 %v2255_v51, %v365_v48  ;;  %v2257_v53 = vpop.f32.mrb[9].mxu1 }
 0x1e7   :  { %v2549_v54 = vpop.f32.mrb[9].mxu0  ;;  %v3125_v55 = vadd.f32 %v2257_v53, %v365_v48  ;;  %v2259_v56 = vpop.f32.mrb[10].mxu1 }
 0x1e8   :  { %v2551_v57 = vpop.f32.mrb[10].mxu0  ;;  %v4715_v59 = vadd.f32 %v3123_v52, %v2547_v50  ;;  %v3127_v60 = vadd.f32 %v2259_v56, %v370_v49  ;;  %v2261_v61 = vpop.f32.mrb[11].mxu1 }
 0x1e9   :  { %v2553_v62 = vpop.f32.mrb[11].mxu0  ;;  %v4717_v63 = vadd.f32 %v3125_v55, %v2549_v54  ;;  %v3129_v0 = vadd.f32 %v2261_v61, %v370_v49  ;;  %2576 = vadd.xlane.f32.xlu0 %v2575_v58 }
 0x1ea   :  { %v4719_v1 = vadd.f32 %v3127_v60, %v2551_v57 }
 0x1eb   :  { %v4721_v2 = vadd.f32 %v3129_v0, %v2553_v62  ;;  %v2578_v3 = vadd.f32 %v4717_v63, %v4715_v59 }
 0x1ed   :  { %2579 = vadd.xlane.f32.xlu1 %v2578_v3  ;;  %v2265_v7 = vpop.f32.mrb[12].mxu1  ;;  %v2581_v8 = vadd.f32 %v4721_v2, %v4719_v1 }
 0x1ee   :  { %v2557_v6 = vpop.f32.mrb[12].mxu0  ;;  %v3131_v9 = vadd.f32 %v2265_v7, %v375_v4  ;;  %v2267_v10 = vpop.f32.mrb[13].mxu1 }
 0x1ef   :  { %v2559_v11 = vpop.f32.mrb[13].mxu0  ;;  %v3133_v12 = vadd.f32 %v2267_v10, %v375_v4  ;;  %2582 = vadd.xlane.f32.xlu0 %v2581_v8  ;;  %v2269_v14 = vpop.f32.mrb[14].mxu1 }
 0x1f0   :  { %v2561_v13 = vpop.f32.mrb[14].mxu0  ;;  %v3132_v15 = vadd.f32 %v3131_v9, %v2557_v6  ;;  %v3135_v16 = vadd.f32 %v2269_v14, %v380_v5  ;;  %v2271_v17 = vpop.f32.mrb[15].mxu1 }
 0x1f1   :  { %v2563_v18 = vpop.f32.mrb[15].mxu0  ;;  %v3134_v19 = vadd.f32 %v3133_v12, %v2559_v11  ;;  %v3137_v21 = vadd.f32 %v2271_v17, %v380_v5 }
 0x1f2   :  { %v3136_v22 = vadd.f32 %v3135_v16, %v2561_v13 }
 0x1f3   :  { %v3138_v23 = vadd.f32 %v3137_v21, %v2563_v18  ;;  %v2584_v25 = vadd.f32 %v3134_v19, %v3132_v15 }
 0x1f5   :  { %2585 = vadd.xlane.f32.xlu1 %v2584_v25  ;;  %v2587_v28 = vadd.f32 %v3138_v23, %v3136_v22 }
 0x1f7   :  { %2588 = vadd.xlane.f32.xlu0 %v2587_v28 }
 0x26a   :  { %v2568_v29 = vpop.xlane.xlu0 %2567 }
 0x26b   :  { %v2591_v30 = vmul.f32 0.00390625, %v2568_v29 }
 0x26c   :  { %v2571_v31 = vpop.xlane.xlu1 %2570 }
 0x26d   :  { %v4728_v32 = vsub.f32 %v4691_v20, %v2591_v30  ;;  %v4731_v33 = vsub.f32 %v4693_v24, %v2591_v30  ;;  %v2592_v34 = vmul.f32 0.00390625, %v2571_v31 }
 0x26f   :  { %v4734_v35 = vsub.f32 %v4695_v26, %v2592_v34  ;;  %v4737_v36 = vsub.f32 %v4697_v27, %v2592_v34  ;;  %v2615_v37 = vmul.f32 %v4728_v32, %v4728_v32  ;;  %v2616_v38 = vmul.f32 %v4731_v33, %v4731_v33 }
 0x271   :  { %v2631_v40 = vadd.f32 %v2616_v38, %v2615_v37  ;;  %v2617_v20 = vmul.f32 %v4734_v35, %v4734_v35  ;;  %v2618_v24 = vmul.f32 %v4737_v36, %v4737_v36 }
 0x272   :  { %v2574_v41 = vpop.xlane.xlu0 %2573 }
 0x273   :  { %v2593_v42 = vmul.f32 0.00390625, %v2574_v41  ;;  %2632 = vadd.xlane.f32.xlu1 %v2631_v40  ;;  %v2634_v26 = vadd.f32 %v2618_v24, %v2617_v20 }
 0x275   :  { %v4748_v27 = vsub.f32 %v4703_v39, %v2593_v42  ;;  %v4751_v44 = vsub.f32 %v4705_v43, %v2593_v42  ;;  %2635 = vadd.xlane.f32.xlu0 %v2634_v26 }
 0x276   :  { %v2577_v47 = vpop.xlane.xlu0 %2576 }
 0x277   :  { %v2594_v48 = vmul.f32 0.00390625, %v2577_v47  ;;  %v2619_v49 = vmul.f32 %v4748_v27, %v4748_v27  ;;  %v2620_v50 = vmul.f32 %v4751_v44, %v4751_v44 }
 0x279   :  { %v4758_v51 = vsub.f32 %v4707_v45, %v2594_v48  ;;  %v4761_v52 = vsub.f32 %v4709_v46, %v2594_v48  ;;  %v2637_v39 = vadd.f32 %v2620_v50, %v2619_v49 }
 0x27a   :  { %v2580_v53 = vpop.xlane.xlu1 %2579 }
 0x27b   :  { %v2595_v54 = vmul.f32 0.00390625, %v2580_v53  ;;  %2638 = vadd.xlane.f32.xlu1 %v2637_v39  ;;  %v2621_v43 = vmul.f32 %v4758_v51, %v4758_v51  ;;  %v2622_v55 = vmul.f32 %v4761_v52, %v4761_v52 }
 0x27c   :  { %v2583_v56 = vpop.xlane.xlu0 %2582 }
 0x27d   :  { %v4768_v57 = vsub.f32 %v4715_v59, %v2595_v54  ;;  %v4771_v45 = vsub.f32 %v4717_v63, %v2595_v54  ;;  %v2596_v58 = vmul.f32 0.00390625, %v2583_v56  ;;  %v2640_v46 = vadd.f32 %v2622_v55, %v2621_v43 }
 0x27f   :  { %v4774_v60 = vsub.f32 %v4719_v1, %v2596_v58  ;;  %v4777_v61 = vsub.f32 %v4721_v2, %v2596_v58  ;;  %2641 = vadd.xlane.f32.xlu0 %v2640_v46  ;;  %v2623_v62 = vmul.f32 %v4768_v57, %v4768_v57  ;;  %v2624_v0 = vmul.f32 %v4771_v45, %v4771_v45 }
 0x281   :  { %v2643_v59 = vadd.f32 %v2624_v0, %v2623_v62  ;;  %v2625_v63 = vmul.f32 %v4774_v60, %v4774_v60  ;;  %v2626_v3 = vmul.f32 %v4777_v61, %v4777_v61 }
 0x282   :  { %v2586_v4 = vpop.xlane.xlu1 %2585 }
 0x283   :  { %v2597_v1 = vmul.f32 0.00390625, %v2586_v4  ;;  %2644 = vadd.xlane.f32.xlu1 %v2643_v59  ;;  %v2646_v5 = vadd.f32 %v2626_v3, %v2625_v63 }
 0x284   :  { %v2589_v2 = vpop.xlane.xlu0 %2588 }
 0x285   :  { %v4787_v6 = vsub.f32 %v3132_v15, %v2597_v1  ;;  %v4789_v7 = vsub.f32 %v3134_v19, %v2597_v1  ;;  %v2598_v8 = vmul.f32 0.00390625, %v2589_v2  ;;  %2647 = vadd.xlane.f32.xlu0 %v2646_v5 }
 0x287   :  { %v4791_v9 = vsub.f32 %v3136_v22, %v2598_v8  ;;  %v4793_v10 = vsub.f32 %v3138_v23, %v2598_v8  ;;  %v2627_v11 = vmul.f32 %v4787_v6, %v4787_v6  ;;  %v2628_v12 = vmul.f32 %v4789_v7, %v4789_v7 }
 0x289   :  { %v2649_v13 = vadd.f32 %v2628_v12, %v2627_v11  ;;  %v2629_v14 = vmul.f32 %v4791_v9, %v4791_v9  ;;  %v2630_v15 = vmul.f32 %v4793_v10, %v4793_v10 }
 0x28b   :  { %2650 = vadd.xlane.f32.xlu1 %v2649_v13  ;;  %v2652_v16 = vadd.f32 %v2630_v15, %v2629_v14 }
 0x28d   :  { %2653 = vadd.xlane.f32.xlu0 %v2652_v16 }
 0x300   :  { %v2633_v17 = vpop.xlane.xlu1 %2632 }
 0x301   :  { %v2655_v18 = vmul.f32 0.00390625, %v2633_v17 }
 0x302   :  { %v2636_v19 = vpop.xlane.xlu0 %2635 }
 0x303   :  { %v2663_v21 = vadd.f32 1e-05, %v2655_v18  ;;  %v2656_v22 = vmul.f32 0.00390625, %v2636_v19 }
 0x305   :  { %3622 = vrsqrt.f32 %v2663_v21  ;;  %v2664_v23 = vadd.f32 1e-05, %v2656_v22 }
 0x307   :  { %3624 = vrsqrt.f32 %v2664_v23 }
 0x308   :  { %v2639_v25 = vpop.xlane.xlu1 %2638 }
 0x309   :  { %v2657_v28 = vmul.f32 0.00390625, %v2639_v25 }
 0x30b   :  { %v2665_v29 = vadd.f32 1e-05, %v2657_v28 }
 0x30c   :  { %v2642_v30 = vpop.xlane.xlu0 %2641 }
 0x30d   :  { %3626 = vrsqrt.f32 %v2665_v29  ;;  %v2658_v31 = vmul.f32 0.00390625, %v2642_v30 }
 0x30f   :  { %v3623_v34 = vpop.eup %3622  ;;  %v2666_v37 = vadd.f32 1e-05, %v2658_v31 }
 0x310   :  { %v2679_v38 = vmul.f32 %v3623_v34, %v4728_v32  ;;  %v2680_v40 = vmul.f32 %v3623_v34, %v4731_v33  ;;  %v2645_v20 = vpop.xlane.xlu1 %2644 }
 0x311   :  { %v3625_v24 = vpop.eup %3624  ;;  %3628 = vrsqrt.f32 %v2666_v37  ;;  %v2659_v41 = vmul.f32 0.00390625, %v2645_v20 }
 0x312   :  { %v2695_v42 = vmax.f32 %v2679_v38, 0.0  ;;  %v2696_v26 = vmax.f32 %v2680_v40, 0.0  ;;  %v2681_v47 = vmul.f32 %v3625_v24, %v4734_v35  ;;  %v2682_v48 = vmul.f32 %v3625_v24, %v4737_v36  ;;  %v2648_v49 = vpop.xlane.xlu0 %2647 }
 0x313   :  { %v2667_v50 = vadd.f32 1e-05, %v2659_v41  ;;  %v2660_v39 = vmul.f32 0.00390625, %v2648_v49 }
 0x314   :  { %v3099_v53 = vpack.c.bf16 %v2696_v26, %v2695_v42  ;;  %v2697_v54 = vmax.f32 %v2681_v47, 0.0  ;;  %v2698_v43 = vmax.f32 %v2682_v48, 0.0 }
 0x315   :  { %3630 = vrsqrt.f32 %v2667_v50  ;;  %v2668_v32 = vadd.f32 1e-05, %v2660_v39 }
 0x316   :  { %2759 = vst [vmem:[%s4846_s3] sm:$0xff] %v3099_v53  ;;  %v3100_v33 = vpack.c.bf16 %v2698_v43, %v2697_v54 }
 0x317   :  { %v3627_v55 = vpop.eup %3626  ;;  %3632 = vrsqrt.f32 %v2668_v32 }
 0x318   :  { %2760 = vst [vmem:[%s4846_s3 + $0x8] sm:$0xff] %v3100_v33  ;;  %v2683_v35 = vmul.f32 %v3627_v55, %v4748_v27  ;;  %v2684_v36 = vmul.f32 %v3627_v55, %v4751_v44  ;;  %v2651_v56 = vpop.xlane.xlu1 %2650 }
 0x319   :  { %v2661_v58 = vmul.f32 0.00390625, %v2651_v56 }
 0x31a   :  { %v2699_v46 = vmax.f32 %v2683_v35, 0.0  ;;  %v2700_v62 = vmax.f32 %v2684_v36, 0.0  ;;  %v2654_v0 = vpop.xlane.xlu0 %2653 }
 0x31b   :  { %v3629_v59 = vpop.eup %3628  ;;  %v2669_v63 = vadd.f32 1e-05, %v2661_v58  ;;  %v2662_v3 = vmul.f32 0.00390625, %v2654_v0 }
 0x31c   :  { %v3101_v4 = vpack.c.bf16 %v2700_v62, %v2699_v46  ;;  %v2685_v1 = vmul.f32 %v3629_v59, %v4758_v51  ;;  %v2686_v5 = vmul.f32 %v3629_v59, %v4761_v52 }
 0x31d   :  { %3634 = vrsqrt.f32 %v2669_v63  ;;  %v2670_v2 = vadd.f32 1e-05, %v2662_v3 }
 0x31e   :  { %2761 = vst [vmem:[%s4846_s3 + $0x10] sm:$0xff] %v3101_v4  ;;  %v2701_v27 = vmax.f32 %v2685_v1, 0.0  ;;  %v2702_v44 = vmax.f32 %v2686_v5, 0.0 }
 0x31f   :  { %v3631_v8 = vpop.eup %3630  ;;  %3636 = vrsqrt.f32 %v2670_v2 }
 0x320   :  { %v3102_v11 = vpack.c.bf16 %v2702_v44, %v2701_v27  ;;  %v2687_v12 = vmul.f32 %v3631_v8, %v4768_v57  ;;  %v2688_v13 = vmul.f32 %v3631_v8, %v4771_v45 }
 0x321   :  { %v3633_v14 = vpop.eup %3632 }
 0x322   :  { %2762 = vst [vmem:[%s4846_s3 + $0x18] sm:$0xff] %v3102_v11  ;;  %v2703_v51 = vmax.f32 %v2687_v12, 0.0  ;;  %v2704_v52 = vmax.f32 %v2688_v13, 0.0  ;;  %v2689_v15 = vmul.f32 %v3633_v14, %v4774_v60  ;;  %v2690_v16 = vmul.f32 %v3633_v14, %v4777_v61 }
 0x324   :  { %v3103_v17 = vpack.c.bf16 %v2704_v52, %v2703_v51  ;;  %v2705_v18 = vmax.f32 %v2689_v15, 0.0  ;;  %v2706_v19 = vmax.f32 %v2690_v16, 0.0 }
 0x326   :  { %2763 = vst [vmem:[%s4846_s3 + $0x20] sm:$0xff] %v3103_v17  ;;  %v3104_v57 = vpack.c.bf16 %v2706_v19, %v2705_v18 }
 0x327   :  { %v3635_v45 = vpop.eup %3634 }
 0x328   :  { %2764 = vst [vmem:[%s4846_s3 + $0x28] sm:$0xff] %v3104_v57  ;;  %v2691_v21 = vmul.f32 %v3635_v45, %v4787_v6  ;;  %v2692_v22 = vmul.f32 %v3635_v45, %v4789_v7 }
 0x329   :  { %v3637_v60 = vpop.eup %3636 }
 0x32a   :  { %v2707_v23 = vmax.f32 %v2691_v21, 0.0  ;;  %v2708_v61 = vmax.f32 %v2692_v22, 0.0  ;;  %v2693_v25 = vmul.f32 %v3637_v60, %v4791_v9  ;;  %v2694_v28 = vmul.f32 %v3637_v60, %v4793_v10 }
 0x32c   :  { %v3105_v29 = vpack.c.bf16 %v2708_v61, %v2707_v23  ;;  %v2709_v30 = vmax.f32 %v2693_v25, 0.0  ;;  %v2710_v31 = vmax.f32 %v2694_v28, 0.0 }
 0x32e   :  { %2765 = vst [vmem:[%s4846_s3 + $0x30] sm:$0xff] %v3105_v29  ;;  %v3106_v34 = vpack.c.bf16 %v2710_v31, %v2709_v30 }
 0x330   :  { %2766 = vst [vmem:[%s4846_s3 + $0x38] sm:$0xff] %v3106_v34 }

// kernel: generator_forward.5
= control target key start
LH: loop header
LB: loop body
LE: loop exit
PB: predicated region body
PF: predicated region fallthrough
CT: control target
= control target key end

     0   :  { %s4381_s0 = inlined_call_operand.vmem [shape: bf16[1,1024], index: 0, kind: input, shape index: {}]   ;;  %s4382_s1 = inlined_call_operand.vmem [shape: bf16[1024,1024], index: 1, kind: input, shape index: {}]   ;;  %s4383_s2 = inlined_call_operand.<no memory space> [shape: f32[1,1], index: 2, kind: input, shape index: {}]   ;;  %s4384_s3 = inlined_call_operand.vmem [shape: f32[1,1024], index: 3, kind: output, shape index: {}]  }
   0x1   :  { %v8_v0 = vstv %s4383_s2 }
   0x2   :  { %9 = vst [vmem:[#allocation2] sm:$0x1] %v8_v0 }
   0x3   :  { %s3496_s14 = smov 0   ;;  %s3498_s15 = smov 0  }
   0x4   :  { %s3500_s16 = smov 0  }
   0x5 LB: > { %s2730_s2 = sadd.s32 4294967295, %s3469_s16   ;;  %s3513_s17 = sadd.s32 1, %s3469_s16   ;;  %s3469_s16 = sphi %s3500_s16, %s4387_s16   ;;  %s3465_s15 = sphi %s3498_s15, %s4386_s15   ;;  %s3461_s14 = sphi %s3496_s14, %s4385_s14  }
   0x6   : > { %s40_s18 = ssub.s32 %s3469_s16, %s3513_s17  ;;  %s43_s19 = sadd.s32 1, %s3465_s15 }
   0x7   : > { %p41_p0 = scmp.eq.s32.totalorder %s40_s18, 0  ;;  %p50_p1 = scmp.ne.s32.totalorder %s3465_s15, %s3461_s14 }
   0x8   : > { %p51_p2 = scmp.eq.s32.totalorder %s3469_s16, 0  ;;  %p2733_p4 = scmp.ge.s32.totalorder %s3469_s16, 2 }
   0x9   : > { %s3522_s20 = scalar_select %p41_p0, %s3465_s15, %s43_s19  }
   0xa   : > { %p52_p3 = por %p51_p2, %p50_p1  ;;  %129 = sbr.rel (%p2733_p4) target bundleno = 149 (0x95), region = 24 }
  0x11   : > { %132 = sbr.rel (!%p52_p3) target bundleno = 149 (0x95), region = 28  ;;  %s134_s21 = sand.u32 (%p52_p3), 1, %s3465_s15  }
  0x12   : > { %s2998_s22 = sshll.u32 (%p52_p3), %s3469_s16, 4  ;;  %s2734_s23 = sshll.u32 (%p52_p3), %s134_s21, 11 }
  0x13   : > { %s3530_s26 = scalar_lea.vmem (%p52_p3), %s4382_s1, %s2998_s22  ;;  %s3535_s27 = scalar_lea.vmem (%p52_p3), [#allocation3], %s2734_s23 }
  0x14   : > { %v152_v1 = vld [vmem:[%s3530_s26] sm:$0xff] (%p52_p3)  ;;  %v154_v2 = vld [vmem:[%s3530_s26 + $0x8] sm:$0xff] (%p52_p3) }
  0x15   : > { %v156_v3 = vld [vmem:[%s3530_s26 + $0x20] sm:$0xff] (%p52_p3)  ;;  %153 = vst [vmem:[%s3535_s27] sm:$0xff] (%p52_p3), %v152_v1  ;;  %155 = vst [vmem:[%s3535_s27 + $0x8] sm:$0xff] (%p52_p3), %v154_v2  ;;  %v158_v4 = vld [vmem:[%s3530_s26 + $0x28] sm:$0xff] (%p52_p3) }
  0x16   : > { %157 = vst [vmem:[%s3535_s27 + $0x10] sm:$0xff] (%p52_p3), %v156_v3  ;;  %v160_v5 = vld [vmem:[%s3530_s26 + $0x40] sm:$0xff] (%p52_p3)  ;;  %v162_v6 = vld [vmem:[%s3530_s26 + $0x48] sm:$0xff] (%p52_p3)  ;;  %159 = vst [vmem:[%s3535_s27 + $0x18] sm:$0xff] (%p52_p3), %v158_v4 }
  0x17   : > { %161 = vst [vmem:[%s3535_s27 + $0x20] sm:$0xff] (%p52_p3), %v160_v5  ;;  %163 = vst [vmem:[%s3535_s27 + $0x28] sm:$0xff] (%p52_p3), %v162_v6  ;;  %v164_v7 = vld [vmem:[%s3530_s26 + $0x60] sm:$0xff] (%p52_p3)  ;;  %v166_v8 = vld [vmem:[%s3530_s26 + $0x68] sm:$0xff] (%p52_p3) }
  0x18   : > { %v168_v9 = vld [vmem:[%s3530_s26 + $0x80] sm:$0xff]  ;;  %165 = vst [vmem:[%s3535_s27 + $0x30] sm:$0xff] %v164_v7  ;;  %167 = vst [vmem:[%s3535_s27 + $0x38] sm:$0xff] %v166_v8  ;;  %v170_v10 = vld [vmem:[%s3530_s26 + $0x88] sm:$0xff] }
  0x19   : > { %169 = vst [vmem:[%s3535_s27 + $0x40] sm:$0xff] %v168_v9  ;;  %v172_v11 = vld [vmem:[%s3530_s26 + $0xa0] sm:$0xff]  ;;  %v174_v12 = vld [vmem:[%s3530_s26 + $0xa8] sm:$0xff]  ;;  %171 = vst [vmem:[%s3535_s27 + $0x48] sm:$0xff] %v170_v10 }
  0x1a   : > { %173 = vst [vmem:[%s3535_s27 + $0x50] sm:$0xff] %v172_v11  ;;  %175 = vst [vmem:[%s3535_s27 + $0x58] sm:$0xff] %v174_v12  ;;  %v176_v13 = vld [vmem:[%s3530_s26 + $0xc0] sm:$0xff]  ;;  %v178_v14 = vld [vmem:[%s3530_s26 + $0xc8] sm:$0xff] }
  0x1b   : > { %v180_v15 = vld [vmem:[%s3530_s26 + $0xe0] sm:$0xff]  ;;  %177 = vst [vmem:[%s3535_s27 + $0x60] sm:$0xff] %v176_v13  ;;  %179 = vst [vmem:[%s3535_s27 + $0x68] sm:$0xff] %v178_v14  ;;  %v182_v16 = vld [vmem:[%s3530_s26 + $0xe8] sm:$0xff] }
  0x1c   : > { %181 = vst [vmem:[%s3535_s27 + $0x70] sm:$0xff] %v180_v15  ;;  %v184_v17 = vld [vmem:[%s3530_s26 + $0x100] sm:$0xff]  ;;  %v186_v18 = vld [vmem:[%s3530_s26 + $0x108] sm:$0xff]  ;;  %183 = vst [vmem:[%s3535_s27 + $0x78] sm:$0xff] %v182_v16 }
  0x1d   : > { %185 = vst [vmem:[%s3535_s27 + $0x80] sm:$0xff] %v184_v17  ;;  %187 = vst [vmem:[%s3535_s27 + $0x88] sm:$0xff] %v186_v18  ;;  %v188_v19 = vld [vmem:[%s3530_s26 + $0x120] sm:$0xff]  ;;  %v190_v20 = vld [vmem:[%s3530_s26 + $0x128] sm:$0xff] }
  0x1e   : > { %v192_v21 = vld [vmem:[%s3530_s26 + $0x140] sm:$0xff]  ;;  %189 = vst [vmem:[%s3535_s27 + $0x90] sm:$0xff] %v188_v19  ;;  %191 = vst [vmem:[%s3535_s27 + $0x98] sm:$0xff] %v190_v20  ;;  %v194_v22 = vld [vmem:[%s3530_s26 + $0x148] sm:$0xff] }
  0x1f   : > { %193 = vst [vmem:[%s3535_s27 + $0xa0] sm:$0xff] %v192_v21  ;;  %v196_v23 = vld [vmem:[%s3530_s26 + $0x160] sm:$0xff]  ;;  %v198_v24 = vld [vmem:[%s3530_s26 + $0x168] sm:$0xff]  ;;  %195 = vst [vmem:[%s3535_s27 + $0xa8] sm:$0xff] %v194_v22 }
  0x20   : > { %197 = vst [vmem:[%s3535_s27 + $0xb0] sm:$0xff] %v196_v23  ;;  %199 = vst [vmem:[%s3535_s27 + $0xb8] sm:$0xff] %v198_v24  ;;  %v200_v25 = vld [vmem:[%s3530_s26 + $0x180] sm:$0xff]  ;;  %v202_v26 = vld [vmem:[%s3530_s26 + $0x188] sm:$0xff] }
  0x21   : > { %v204_v27 = vld [vmem:[%s3530_s26 + $0x1a0] sm:$0xff]  ;;  %201 = vst [vmem:[%s3535_s27 + $0xc0] sm:$0xff] %v200_v25  ;;  %203 = vst [vmem:[%s3535_s27 + $0xc8] sm:$0xff] %v202_v26  ;;  %v206_v28 = vld [vmem:[%s3530_s26 + $0x1a8] sm:$0xff] }
  0x22   : > { %205 = vst [vmem:[%s3535_s27 + $0xd0] sm:$0xff] %v204_v27  ;;  %v208_v29 = vld [vmem:[%s3530_s26 + $0x1c0] sm:$0xff]  ;;  %v210_v30 = vld [vmem:[%s3530_s26 + $0x1c8] sm:$0xff]  ;;  %207 = vst [vmem:[%s3535_s27 + $0xd8] sm:$0xff] %v206_v28 }
  0x23   : > { %209 = vst [vmem:[%s3535_s27 + $0xe0] sm:$0xff] %v208_v29  ;;  %211 = vst [vmem:[%s3535_s27 + $0xe8] sm:$0xff] %v210_v30  ;;  %v212_v31 = vld [vmem:[%s3530_s26 + $0x1e0] sm:$0xff]  ;;  %v214_v32 = vld [vmem:[%s3530_s26 + $0x1e8] sm:$0xff] }
  0x24   : > { %v216_v33 = vld [vmem:[%s3530_s26 + $0x200] sm:$0xff]  ;;  %213 = vst [vmem:[%s3535_s27 + $0xf0] sm:$0xff] %v212_v31  ;;  %215 = vst [vmem:[%s3535_s27 + $0xf8] sm:$0xff] %v214_v32  ;;  %v218_v34 = vld [vmem:[%s3530_s26 + $0x208] sm:$0xff] }
  0x25   : > { %217 = vst [vmem:[%s3535_s27 + $0x100] sm:$0xff] %v216_v33  ;;  %v220_v35 = vld [vmem:[%s3530_s26 + $0x220] sm:$0xff]  ;;  %v222_v36 = vld [vmem:[%s3530_s26 + $0x228] sm:$0xff]  ;;  %219 = vst [vmem:[%s3535_s27 + $0x108] sm:$0xff] %v218_v34 }
  0x26   : > { %221 = vst [vmem:[%s3535_s27 + $0x110] sm:$0xff] %v220_v35  ;;  %223 = vst [vmem:[%s3535_s27 + $0x118] sm:$0xff] %v222_v36  ;;  %v224_v37 = vld [vmem:[%s3530_s26 + $0x240] sm:$0xff]  ;;  %v226_v38 = vld [vmem:[%s3530_s26 + $0x248] sm:$0xff] }
  0x27   : > { %v228_v39 = vld [vmem:[%s3530_s26 + $0x260] sm:$0xff]  ;;  %225 = vst [vmem:[%s3535_s27 + $0x120] sm:$0xff] %v224_v37  ;;  %227 = vst [vmem:[%s3535_s27 + $0x128] sm:$0xff] %v226_v38  ;;  %v230_v40 = vld [vmem:[%s3530_s26 + $0x268] sm:$0xff] }
  0x28   : > { %229 = vst [vmem:[%s3535_s27 + $0x130] sm:$0xff] %v228_v39  ;;  %v232_v41 = vld [vmem:[%s3530_s26 + $0x280] sm:$0xff]  ;;  %v234_v42 = vld [vmem:[%s3530_s26 + $0x288] sm:$0xff]  ;;  %231 = vst [vmem:[%s3535_s27 + $0x138] sm:$0xff] %v230_v40 }
  0x29   : > { %233 = vst [vmem:[%s3535_s27 + $0x140] sm:$0xff] %v232_v41  ;;  %235 = vst [vmem:[%s3535_s27 + $0x148] sm:$0xff] %v234_v42  ;;  %v236_v43 = vld [vmem:[%s3530_s26 + $0x2a0] sm:$0xff]  ;;  %v238_v44 = vld [vmem:[%s3530_s26 + $0x2a8] sm:$0xff] }
  0x2a   : > { %v240_v45 = vld [vmem:[%s3530_s26 + $0x2c0] sm:$0xff]  ;;  %237 = vst [vmem:[%s3535_s27 + $0x150] sm:$0xff] %v236_v43  ;;  %239 = vst [vmem:[%s3535_s27 + $0x158] sm:$0xff] %v238_v44  ;;  %v242_v46 = vld [vmem:[%s3530_s26 + $0x2c8] sm:$0xff] }
  0x2b   : > { %241 = vst [vmem:[%s3535_s27 + $0x160] sm:$0xff] %v240_v45  ;;  %v244_v47 = vld [vmem:[%s3530_s26 + $0x2e0] sm:$0xff]  ;;  %v246_v48 = vld [vmem:[%s3530_s26 + $0x2e8] sm:$0xff]  ;;  %243 = vst [vmem:[%s3535_s27 + $0x168] sm:$0xff] %v242_v46 }
  0x2c   : > { %245 = vst [vmem:[%s3535_s27 + $0x170] sm:$0xff] %v244_v47  ;;  %247 = vst [vmem:[%s3535_s27 + $0x178] sm:$0xff] %v246_v48  ;;  %v248_v49 = vld [vmem:[%s3530_s26 + $0x300] sm:$0xff]  ;;  %v250_v50 = vld [vmem:[%s3530_s26 + $0x308] sm:$0xff] }
  0x2d   : > { %v252_v51 = vld [vmem:[%s3530_s26 + $0x320] sm:$0xff]  ;;  %249 = vst [vmem:[%s3535_s27 + $0x180] sm:$0xff] %v248_v49  ;;  %251 = vst [vmem:[%s3535_s27 + $0x188] sm:$0xff] %v250_v50  ;;  %v254_v52 = vld [vmem:[%s3530_s26 + $0x328] sm:$0xff] }
  0x2e   : > { %253 = vst [vmem:[%s3535_s27 + $0x190] sm:$0xff] %v252_v51  ;;  %v256_v53 = vld [vmem:[%s3530_s26 + $0x340] sm:$0xff]  ;;  %v258_v54 = vld [vmem:[%s3530_s26 + $0x348] sm:$0xff]  ;;  %255 = vst [vmem:[%s3535_s27 + $0x198] sm:$0xff] %v254_v52 }
  0x2f   : > { %257 = vst [vmem:[%s3535_s27 + $0x1a0] sm:$0xff] %v256_v53  ;;  %259 = vst [vmem:[%s3535_s27 + $0x1a8] sm:$0xff] %v258_v54  ;;  %v260_v55 = vld [vmem:[%s3530_s26 + $0x360] sm:$0xff]  ;;  %v262_v56 = vld [vmem:[%s3530_s26 + $0x368] sm:$0xff] }
  0x30   : > { %v264_v57 = vld [vmem:[%s3530_s26 + $0x380] sm:$0xff]  ;;  %261 = vst [vmem:[%s3535_s27 + $0x1b0] sm:$0xff] %v260_v55  ;;  %263 = vst [vmem:[%s3535_s27 + $0x1b8] sm:$0xff] %v262_v56  ;;  %v266_v58 = vld [vmem:[%s3530_s26 + $0x388] sm:$0xff] }
  0x31   : > { %265 = vst [vmem:[%s3535_s27 + $0x1c0] sm:$0xff] %v264_v57  ;;  %v268_v59 = vld [vmem:[%s3530_s26 + $0x3a0] sm:$0xff]  ;;  %v270_v60 = vld [vmem:[%s3530_s26 + $0x3a8] sm:$0xff]  ;;  %267 = vst [vmem:[%s3535_s27 + $0x1c8] sm:$0xff] %v266_v58 }
  0x32   : > { %269 = vst [vmem:[%s3535_s27 + $0x1d0] sm:$0xff] %v268_v59  ;;  %271 = vst [vmem:[%s3535_s27 + $0x1d8] sm:$0xff] %v270_v60  ;;  %v272_v61 = vld [vmem:[%s3530_s26 + $0x3c0] sm:$0xff]  ;;  %v274_v62 = vld [vmem:[%s3530_s26 + $0x3c8] sm:$0xff] }
  0x33   : > { %v276_v63 = vld [vmem:[%s3530_s26 + $0x3e0] sm:$0xff]  ;;  %273 = vst [vmem:[%s3535_s27 + $0x1e0] sm:$0xff] %v272_v61  ;;  %275 = vst [vmem:[%s3535_s27 + $0x1e8] sm:$0xff] %v274_v62  ;;  %v278_v0 = vld [vmem:[%s3530_s26 + $0x3e8] sm:$0xff] }
  0x34   : > { %277 = vst [vmem:[%s3535_s27 + $0x1f0] sm:$0xff] %v276_v63  ;;  %v280_v1 = vld [vmem:[%s3530_s26 + $0x400] sm:$0xff]  ;;  %v282_v2 = vld [vmem:[%s3530_s26 + $0x408] sm:$0xff]  ;;  %279 = vst [vmem:[%s3535_s27 + $0x1f8] sm:$0xff] %v278_v0 }
  0x35   : > { %281 = vst [vmem:[%s3535_s27 + $0x200] sm:$0xff] %v280_v1  ;;  %283 = vst [vmem:[%s3535_s27 + $0x208] sm:$0xff] %v282_v2  ;;  %v284_v3 = vld [vmem:[%s3530_s26 + $0x420] sm:$0xff]  ;;  %v286_v4 = vld [vmem:[%s3530_s26 + $0x428] sm:$0xff] }
  0x36   : > { %v288_v5 = vld [vmem:[%s3530_s26 + $0x440] sm:$0xff]  ;;  %285 = vst [vmem:[%s3535_s27 + $0x210] sm:$0xff] %v284_v3  ;;  %287 = vst [vmem:[%s3535_s27 + $0x218] sm:$0xff] %v286_v4  ;;  %v290_v6 = vld [vmem:[%s3530_s26 + $0x448] sm:$0xff] }
  0x37   : > { %289 = vst [vmem:[%s3535_s27 + $0x220] sm:$0xff] %v288_v5  ;;  %v292_v7 = vld [vmem:[%s3530_s26 + $0x460] sm:$0xff]  ;;  %v294_v8 = vld [vmem:[%s3530_s26 + $0x468] sm:$0xff]  ;;  %291 = vst [vmem:[%s3535_s27 + $0x228] sm:$0xff] %v290_v6 }
  0x38   : > { %293 = vst [vmem:[%s3535_s27 + $0x230] sm:$0xff] %v292_v7  ;;  %295 = vst [vmem:[%s3535_s27 + $0x238] sm:$0xff] %v294_v8  ;;  %v296_v9 = vld [vmem:[%s3530_s26 + $0x480] sm:$0xff]  ;;  %v298_v10 = vld [vmem:[%s3530_s26 + $0x488] sm:$0xff] }
  0x39   : > { %v300_v11 = vld [vmem:[%s3530_s26 + $0x4a0] sm:$0xff]  ;;  %297 = vst [vmem:[%s3535_s27 + $0x240] sm:$0xff] %v296_v9  ;;  %299 = vst [vmem:[%s3535_s27 + $0x248] sm:$0xff] %v298_v10  ;;  %v302_v12 = vld [vmem:[%s3530_s26 + $0x4a8] sm:$0xff] }
  0x3a   : > { %301 = vst [vmem:[%s3535_s27 + $0x250] sm:$0xff] %v300_v11  ;;  %v304_v13 = vld [vmem:[%s3530_s26 + $0x4c0] sm:$0xff]  ;;  %v306_v14 = vld [vmem:[%s3530_s26 + $0x4c8] sm:$0xff]  ;;  %303 = vst [vmem:[%s3535_s27 + $0x258] sm:$0xff] %v302_v12 }
  0x3b   : > { %305 = vst [vmem:[%s3535_s27 + $0x260] sm:$0xff] %v304_v13  ;;  %307 = vst [vmem:[%s3535_s27 + $0x268] sm:$0xff] %v306_v14  ;;  %v308_v15 = vld [vmem:[%s3530_s26 + $0x4e0] sm:$0xff]  ;;  %v310_v16 = vld [vmem:[%s3530_s26 + $0x4e8] sm:$0xff] }
  0x3c   : > { %v312_v17 = vld [vmem:[%s3530_s26 + $0x500] sm:$0xff]  ;;  %309 = vst [vmem:[%s3535_s27 + $0x270] sm:$0xff] %v308_v15  ;;  %311 = vst [vmem:[%s3535_s27 + $0x278] sm:$0xff] %v310_v16  ;;  %v314_v18 = vld [vmem:[%s3530_s26 + $0x508] sm:$0xff] }
  0x3d   : > { %313 = vst [vmem:[%s3535_s27 + $0x280] sm:$0xff] %v312_v17  ;;  %v316_v19 = vld [vmem:[%s3530_s26 + $0x520] sm:$0xff]  ;;  %v318_v20 = vld [vmem:[%s3530_s26 + $0x528] sm:$0xff]  ;;  %315 = vst [vmem:[%s3535_s27 + $0x288] sm:$0xff] %v314_v18 }
  0x3e   : > { %317 = vst [vmem:[%s3535_s27 + $0x290] sm:$0xff] %v316_v19  ;;  %319 = vst [vmem:[%s3535_s27 + $0x298] sm:$0xff] %v318_v20  ;;  %v320_v21 = vld [vmem:[%s3530_s26 + $0x540] sm:$0xff]  ;;  %v322_v22 = vld [vmem:[%s3530_s26 + $0x548] sm:$0xff] }
  0x3f   : > { %v324_v23 = vld [vmem:[%s3530_s26 + $0x560] sm:$0xff]  ;;  %321 = vst [vmem:[%s3535_s27 + $0x2a0] sm:$0xff] %v320_v21  ;;  %323 = vst [vmem:[%s3535_s27 + $0x2a8] sm:$0xff] %v322_v22  ;;  %v326_v24 = vld [vmem:[%s3530_s26 + $0x568] sm:$0xff] }
  0x40   : > { %325 = vst [vmem:[%s3535_s27 + $0x2b0] sm:$0xff] %v324_v23  ;;  %v328_v25 = vld [vmem:[%s3530_s26 + $0x580] sm:$0xff]  ;;  %v330_v26 = vld [vmem:[%s3530_s26 + $0x588] sm:$0xff]  ;;  %327 = vst [vmem:[%s3535_s27 + $0x2b8] sm:$0xff] %v326_v24 }
  0x41   : > { %329 = vst [vmem:[%s3535_s27 + $0x2c0] sm:$0xff] %v328_v25  ;;  %331 = vst [vmem:[%s3535_s27 + $0x2c8] sm:$0xff] %v330_v26  ;;  %v332_v27 = vld [vmem:[%s3530_s26 + $0x5a0] sm:$0xff]  ;;  %v334_v28 = vld [vmem:[%s3530_s26 + $0x5a8] sm:$0xff] }
  0x42   : > { %v336_v29 = vld [vmem:[%s3530_s26 + $0x5c0] sm:$0xff]  ;;  %333 = vst [vmem:[%s3535_s27 + $0x2d0] sm:$0xff] %v332_v27  ;;  %335 = vst [vmem:[%s3535_s27 + $0x2d8] sm:$0xff] %v334_v28  ;;  %v338_v30 = vld [vmem:[%s3530_s26 + $0x5c8] sm:$0xff] }
  0x43   : > { %337 = vst [vmem:[%s3535_s27 + $0x2e0] sm:$0xff] %v336_v29  ;;  %v340_v31 = vld [vmem:[%s3530_s26 + $0x5e0] sm:$0xff]  ;;  %v342_v32 = vld [vmem:[%s3530_s26 + $0x5e8] sm:$0xff]  ;;  %339 = vst [vmem:[%s3535_s27 + $0x2e8] sm:$0xff] %v338_v30 }
  0x44   : > { %341 = vst [vmem:[%s3535_s27 + $0x2f0] sm:$0xff] %v340_v31  ;;  %343 = vst [vmem:[%s3535_s27 + $0x2f8] sm:$0xff] %v342_v32  ;;  %v344_v33 = vld [vmem:[%s3530_s26 + $0x600] sm:$0xff]  ;;  %v346_v34 = vld [vmem:[%s3530_s26 + $0x608] sm:$0xff] }
  0x45   : > { %v348_v35 = vld [vmem:[%s3530_s26 + $0x620] sm:$0xff]  ;;  %345 = vst [vmem:[%s3535_s27 + $0x300] sm:$0xff] %v344_v33  ;;  %347 = vst [vmem:[%s3535_s27 + $0x308] sm:$0xff] %v346_v34  ;;  %v350_v36 = vld [vmem:[%s3530_s26 + $0x628] sm:$0xff] }
  0x46   : > { %349 = vst [vmem:[%s3535_s27 + $0x310] sm:$0xff] %v348_v35  ;;  %v352_v37 = vld [vmem:[%s3530_s26 + $0x640] sm:$0xff]  ;;  %v354_v38 = vld [vmem:[%s3530_s26 + $0x648] sm:$0xff]  ;;  %351 = vst [vmem:[%s3535_s27 + $0x318] sm:$0xff] %v350_v36 }
  0x47   : > { %353 = vst [vmem:[%s3535_s27 + $0x320] sm:$0xff] %v352_v37  ;;  %355 = vst [vmem:[%s3535_s27 + $0x328] sm:$0xff] %v354_v38  ;;  %v356_v39 = vld [vmem:[%s3530_s26 + $0x660] sm:$0xff]  ;;  %v358_v40 = vld [vmem:[%s3530_s26 + $0x668] sm:$0xff] }
  0x48   : > { %v360_v41 = vld [vmem:[%s3530_s26 + $0x680] sm:$0xff]  ;;  %357 = vst [vmem:[%s3535_s27 + $0x330] sm:$0xff] %v356_v39  ;;  %359 = vst [vmem:[%s3535_s27 + $0x338] sm:$0xff] %v358_v40  ;;  %v362_v42 = vld [vmem:[%s3530_s26 + $0x688] sm:$0xff] }
  0x49   : > { %361 = vst [vmem:[%s3535_s27 + $0x340] sm:$0xff] %v360_v41  ;;  %v364_v43 = vld [vmem:[%s3530_s26 + $0x6a0] sm:$0xff]  ;;  %v366_v44 = vld [vmem:[%s3530_s26 + $0x6a8] sm:$0xff]  ;;  %363 = vst [vmem:[%s3535_s27 + $0x348] sm:$0xff] %v362_v42 }
  0x4a   : > { %365 = vst [vmem:[%s3535_s27 + $0x350] sm:$0xff] %v364_v43  ;;  %367 = vst [vmem:[%s3535_s27 + $0x358] sm:$0xff] %v366_v44  ;;  %v368_v45 = vld [vmem:[%s3530_s26 + $0x6c0] sm:$0xff]  ;;  %v370_v46 = vld [vmem:[%s3530_s26 + $0x6c8] sm:$0xff] }
  0x4b   : > { %v372_v47 = vld [vmem:[%s3530_s26 + $0x6e0] sm:$0xff]  ;;  %369 = vst [vmem:[%s3535_s27 + $0x360] sm:$0xff] %v368_v45  ;;  %371 = vst [vmem:[%s3535_s27 + $0x368] sm:$0xff] %v370_v46  ;;  %v374_v48 = vld [vmem:[%s3530_s26 + $0x6e8] sm:$0xff] }
  0x4c   : > { %373 = vst [vmem:[%s3535_s27 + $0x370] sm:$0xff] %v372_v47  ;;  %v376_v49 = vld [vmem:[%s3530_s26 + $0x700] sm:$0xff]  ;;  %v378_v50 = vld [vmem:[%s3530_s26 + $0x708] sm:$0xff]  ;;  %375 = vst [vmem:[%s3535_s27 + $0x378] sm:$0xff] %v374_v48 }
  0x4d   : > { %377 = vst [vmem:[%s3535_s27 + $0x380] sm:$0xff] %v376_v49  ;;  %379 = vst [vmem:[%s3535_s27 + $0x388] sm:$0xff] %v378_v50  ;;  %v380_v51 = vld [vmem:[%s3530_s26 + $0x720] sm:$0xff]  ;;  %v382_v52 = vld [vmem:[%s3530_s26 + $0x728] sm:$0xff] }
  0x4e   : > { %v384_v53 = vld [vmem:[%s3530_s26 + $0x740] sm:$0xff]  ;;  %381 = vst [vmem:[%s3535_s27 + $0x390] sm:$0xff] %v380_v51  ;;  %383 = vst [vmem:[%s3535_s27 + $0x398] sm:$0xff] %v382_v52  ;;  %v386_v54 = vld [vmem:[%s3530_s26 + $0x748] sm:$0xff] }
  0x4f   : > { %385 = vst [vmem:[%s3535_s27 + $0x3a0] sm:$0xff] %v384_v53  ;;  %v388_v55 = vld [vmem:[%s3530_s26 + $0x760] sm:$0xff]  ;;  %v390_v56 = vld [vmem:[%s3530_s26 + $0x768] sm:$0xff]  ;;  %387 = vst [vmem:[%s3535_s27 + $0x3a8] sm:$0xff] %v386_v54 }
  0x50   : > { %389 = vst [vmem:[%s3535_s27 + $0x3b0] sm:$0xff] %v388_v55  ;;  %391 = vst [vmem:[%s3535_s27 + $0x3b8] sm:$0xff] %v390_v56  ;;  %v392_v57 = vld [vmem:[%s3530_s26 + $0x780] sm:$0xff]  ;;  %v394_v58 = vld [vmem:[%s3530_s26 + $0x788] sm:$0xff] }
  0x51   : > { %v396_v59 = vld [vmem:[%s3530_s26 + $0x7a0] sm:$0xff]  ;;  %393 = vst [vmem:[%s3535_s27 + $0x3c0] sm:$0xff] %v392_v57  ;;  %395 = vst [vmem:[%s3535_s27 + $0x3c8] sm:$0xff] %v394_v58  ;;  %v398_v60 = vld [vmem:[%s3530_s26 + $0x7a8] sm:$0xff] }
  0x52   : > { %397 = vst [vmem:[%s3535_s27 + $0x3d0] sm:$0xff] %v396_v59  ;;  %v400_v61 = vld [vmem:[%s3530_s26 + $0x7c0] sm:$0xff]  ;;  %v402_v62 = vld [vmem:[%s3530_s26 + $0x7c8] sm:$0xff]  ;;  %399 = vst [vmem:[%s3535_s27 + $0x3d8] sm:$0xff] %v398_v60 }
  0x53   : > { %401 = vst [vmem:[%s3535_s27 + $0x3e0] sm:$0xff] %v400_v61  ;;  %403 = vst [vmem:[%s3535_s27 + $0x3e8] sm:$0xff] %v402_v62  ;;  %v404_v63 = vld [vmem:[%s3530_s26 + $0x7e0] sm:$0xff]  ;;  %v406_v0 = vld [vmem:[%s3530_s26 + $0x7e8] sm:$0xff] }
  0x54   : > { %v408_v1 = vld [vmem:[%s3530_s26 + $0x800] sm:$0xff]  ;;  %405 = vst [vmem:[%s3535_s27 + $0x3f0] sm:$0xff] %v404_v63  ;;  %407 = vst [vmem:[%s3535_s27 + $0x3f8] sm:$0xff] %v406_v0  ;;  %v410_v2 = vld [vmem:[%s3530_s26 + $0x808] sm:$0xff] }
  0x55   : > { %409 = vst [vmem:[%s3535_s27 + $0x400] sm:$0xff] %v408_v1  ;;  %v412_v3 = vld [vmem:[%s3530_s26 + $0x820] sm:$0xff]  ;;  %v414_v4 = vld [vmem:[%s3530_s26 + $0x828] sm:$0xff]  ;;  %411 = vst [vmem:[%s3535_s27 + $0x408] sm:$0xff] %v410_v2 }
  0x56   : > { %413 = vst [vmem:[%s3535_s27 + $0x410] sm:$0xff] %v412_v3  ;;  %415 = vst [vmem:[%s3535_s27 + $0x418] sm:$0xff] %v414_v4  ;;  %v416_v5 = vld [vmem:[%s3530_s26 + $0x840] sm:$0xff]  ;;  %v418_v6 = vld [vmem:[%s3530_s26 + $0x848] sm:$0xff] }
  0x57   : > { %v420_v7 = vld [vmem:[%s3530_s26 + $0x860] sm:$0xff]  ;;  %417 = vst [vmem:[%s3535_s27 + $0x420] sm:$0xff] %v416_v5  ;;  %419 = vst [vmem:[%s3535_s27 + $0x428] sm:$0xff] %v418_v6  ;;  %v422_v8 = vld [vmem:[%s3530_s26 + $0x868] sm:$0xff] }
  0x58   : > { %421 = vst [vmem:[%s3535_s27 + $0x430] sm:$0xff] %v420_v7  ;;  %v424_v9 = vld [vmem:[%s3530_s26 + $0x880] sm:$0xff]  ;;  %v426_v10 = vld [vmem:[%s3530_s26 + $0x888] sm:$0xff]  ;;  %423 = vst [vmem:[%s3535_s27 + $0x438] sm:$0xff] %v422_v8 }
  0x59   : > { %425 = vst [vmem:[%s3535_s27 + $0x440] sm:$0xff] %v424_v9  ;;  %427 = vst [vmem:[%s3535_s27 + $0x448] sm:$0xff] %v426_v10  ;;  %v428_v11 = vld [vmem:[%s3530_s26 + $0x8a0] sm:$0xff]  ;;  %v430_v12 = vld [vmem:[%s3530_s26 + $0x8a8] sm:$0xff] }
  0x5a   : > { %v432_v13 = vld [vmem:[%s3530_s26 + $0x8c0] sm:$0xff]  ;;  %429 = vst [vmem:[%s3535_s27 + $0x450] sm:$0xff] %v428_v11  ;;  %431 = vst [vmem:[%s3535_s27 + $0x458] sm:$0xff] %v430_v12  ;;  %v434_v14 = vld [vmem:[%s3530_s26 + $0x8c8] sm:$0xff] }
  0x5b   : > { %433 = vst [vmem:[%s3535_s27 + $0x460] sm:$0xff] %v432_v13  ;;  %v436_v15 = vld [vmem:[%s3530_s26 + $0x8e0] sm:$0xff]  ;;  %v438_v16 = vld [vmem:[%s3530_s26 + $0x8e8] sm:$0xff]  ;;  %435 = vst [vmem:[%s3535_s27 + $0x468] sm:$0xff] %v434_v14 }
  0x5c   : > { %437 = vst [vmem:[%s3535_s27 + $0x470] sm:$0xff] %v436_v15  ;;  %439 = vst [vmem:[%s3535_s27 + $0x478] sm:$0xff] %v438_v16  ;;  %v440_v17 = vld [vmem:[%s3530_s26 + $0x900] sm:$0xff]  ;;  %v442_v18 = vld [vmem:[%s3530_s26 + $0x908] sm:$0xff] }
  0x5d   : > { %v444_v19 = vld [vmem:[%s3530_s26 + $0x920] sm:$0xff]  ;;  %441 = vst [vmem:[%s3535_s27 + $0x480] sm:$0xff] %v440_v17  ;;  %443 = vst [vmem:[%s3535_s27 + $0x488] sm:$0xff] %v442_v18  ;;  %v446_v20 = vld [vmem:[%s3530_s26 + $0x928] sm:$0xff] }
  0x5e   : > { %445 = vst [vmem:[%s3535_s27 + $0x490] sm:$0xff] %v444_v19  ;;  %v448_v21 = vld [vmem:[%s3530_s26 + $0x940] sm:$0xff]  ;;  %v450_v22 = vld [vmem:[%s3530_s26 + $0x948] sm:$0xff]  ;;  %447 = vst [vmem:[%s3535_s27 + $0x498] sm:$0xff] %v446_v20 }
  0x5f   : > { %449 = vst [vmem:[%s3535_s27 + $0x4a0] sm:$0xff] %v448_v21  ;;  %451 = vst [vmem:[%s3535_s27 + $0x4a8] sm:$0xff] %v450_v22  ;;  %v452_v23 = vld [vmem:[%s3530_s26 + $0x960] sm:$0xff]  ;;  %v454_v24 = vld [vmem:[%s3530_s26 + $0x968] sm:$0xff] }
  0x60   : > { %v456_v25 = vld [vmem:[%s3530_s26 + $0x980] sm:$0xff]  ;;  %453 = vst [vmem:[%s3535_s27 + $0x4b0] sm:$0xff] %v452_v23  ;;  %455 = vst [vmem:[%s3535_s27 + $0x4b8] sm:$0xff] %v454_v24  ;;  %v458_v26 = vld [vmem:[%s3530_s26 + $0x988] sm:$0xff] }
  0x61   : > { %457 = vst [vmem:[%s3535_s27 + $0x4c0] sm:$0xff] %v456_v25  ;;  %v460_v27 = vld [vmem:[%s3530_s26 + $0x9a0] sm:$0xff]  ;;  %v462_v28 = vld [vmem:[%s3530_s26 + $0x9a8] sm:$0xff]  ;;  %459 = vst [vmem:[%s3535_s27 + $0x4c8] sm:$0xff] %v458_v26 }
  0x62   : > { %461 = vst [vmem:[%s3535_s27 + $0x4d0] sm:$0xff] %v460_v27  ;;  %463 = vst [vmem:[%s3535_s27 + $0x4d8] sm:$0xff] %v462_v28  ;;  %v464_v29 = vld [vmem:[%s3530_s26 + $0x9c0] sm:$0xff]  ;;  %v466_v30 = vld [vmem:[%s3530_s26 + $0x9c8] sm:$0xff] }
  0x63   : > { %v468_v31 = vld [vmem:[%s3530_s26 + $0x9e0] sm:$0xff]  ;;  %465 = vst [vmem:[%s3535_s27 + $0x4e0] sm:$0xff] %v464_v29  ;;  %467 = vst [vmem:[%s3535_s27 + $0x4e8] sm:$0xff] %v466_v30  ;;  %v470_v32 = vld [vmem:[%s3530_s26 + $0x9e8] sm:$0xff] }
  0x64   : > { %469 = vst [vmem:[%s3535_s27 + $0x4f0] sm:$0xff] %v468_v31  ;;  %v472_v33 = vld [vmem:[%s3530_s26 + $0xa00] sm:$0xff]  ;;  %v474_v34 = vld [vmem:[%s3530_s26 + $0xa08] sm:$0xff]  ;;  %471 = vst [vmem:[%s3535_s27 + $0x4f8] sm:$0xff] %v470_v32 }
  0x65   : > { %473 = vst [vmem:[%s3535_s27 + $0x500] sm:$0xff] %v472_v33  ;;  %475 = vst [vmem:[%s3535_s27 + $0x508] sm:$0xff] %v474_v34  ;;  %v476_v35 = vld [vmem:[%s3530_s26 + $0xa20] sm:$0xff]  ;;  %v478_v36 = vld [vmem:[%s3530_s26 + $0xa28] sm:$0xff] }
  0x66   : > { %v480_v37 = vld [vmem:[%s3530_s26 + $0xa40] sm:$0xff]  ;;  %477 = vst [vmem:[%s3535_s27 + $0x510] sm:$0xff] %v476_v35  ;;  %479 = vst [vmem:[%s3535_s27 + $0x518] sm:$0xff] %v478_v36  ;;  %v482_v38 = vld [vmem:[%s3530_s26 + $0xa48] sm:$0xff] }
  0x67   : > { %481 = vst [vmem:[%s3535_s27 + $0x520] sm:$0xff] %v480_v37  ;;  %v484_v39 = vld [vmem:[%s3530_s26 + $0xa60] sm:$0xff]  ;;  %v486_v40 = vld [vmem:[%s3530_s26 + $0xa68] sm:$0xff]  ;;  %483 = vst [vmem:[%s3535_s27 + $0x528] sm:$0xff] %v482_v38 }
  0x68   : > { %485 = vst [vmem:[%s3535_s27 + $0x530] sm:$0xff] %v484_v39  ;;  %487 = vst [vmem:[%s3535_s27 + $0x538] sm:$0xff] %v486_v40  ;;  %v488_v41 = vld [vmem:[%s3530_s26 + $0xa80] sm:$0xff]  ;;  %v490_v42 = vld [vmem:[%s3530_s26 + $0xa88] sm:$0xff] }
  0x69   : > { %v492_v43 = vld [vmem:[%s3530_s26 + $0xaa0] sm:$0xff]  ;;  %489 = vst [vmem:[%s3535_s27 + $0x540] sm:$0xff] %v488_v41  ;;  %491 = vst [vmem:[%s3535_s27 + $0x548] sm:$0xff] %v490_v42  ;;  %v494_v44 = vld [vmem:[%s3530_s26 + $0xaa8] sm:$0xff] }
  0x6a   : > { %493 = vst [vmem:[%s3535_s27 + $0x550] sm:$0xff] %v492_v43  ;;  %v496_v45 = vld [vmem:[%s3530_s26 + $0xac0] sm:$0xff]  ;;  %v498_v46 = vld [vmem:[%s3530_s26 + $0xac8] sm:$0xff]  ;;  %495 = vst [vmem:[%s3535_s27 + $0x558] sm:$0xff] %v494_v44 }
  0x6b   : > { %497 = vst [vmem:[%s3535_s27 + $0x560] sm:$0xff] %v496_v45  ;;  %499 = vst [vmem:[%s3535_s27 + $0x568] sm:$0xff] %v498_v46  ;;  %v500_v47 = vld [vmem:[%s3530_s26 + $0xae0] sm:$0xff]  ;;  %v502_v48 = vld [vmem:[%s3530_s26 + $0xae8] sm:$0xff] }
  0x6c   : > { %v504_v49 = vld [vmem:[%s3530_s26 + $0xb00] sm:$0xff]  ;;  %501 = vst [vmem:[%s3535_s27 + $0x570] sm:$0xff] %v500_v47  ;;  %503 = vst [vmem:[%s3535_s27 + $0x578] sm:$0xff] %v502_v48  ;;  %v506_v50 = vld [vmem:[%s3530_s26 + $0xb08] sm:$0xff] }
  0x6d   : > { %505 = vst [vmem:[%s3535_s27 + $0x580] sm:$0xff] %v504_v49  ;;  %v508_v51 = vld [vmem:[%s3530_s26 + $0xb20] sm:$0xff]  ;;  %v510_v52 = vld [vmem:[%s3530_s26 + $0xb28] sm:$0xff]  ;;  %507 = vst [vmem:[%s3535_s27 + $0x588] sm:$0xff] %v506_v50 }
  0x6e   : > { %509 = vst [vmem:[%s3535_s27 + $0x590] sm:$0xff] %v508_v51  ;;  %511 = vst [vmem:[%s3535_s27 + $0x598] sm:$0xff] %v510_v52  ;;  %v512_v53 = vld [vmem:[%s3530_s26 + $0xb40] sm:$0xff]  ;;  %v514_v54 = vld [vmem:[%s3530_s26 + $0xb48] sm:$0xff] }
  0x6f   : > { %v516_v55 = vld [vmem:[%s3530_s26 + $0xb60] sm:$0xff]  ;;  %513 = vst [vmem:[%s3535_s27 + $0x5a0] sm:$0xff] %v512_v53  ;;  %515 = vst [vmem:[%s3535_s27 + $0x5a8] sm:$0xff] %v514_v54  ;;  %v518_v56 = vld [vmem:[%s3530_s26 + $0xb68] sm:$0xff] }
  0x70   : > { %517 = vst [vmem:[%s3535_s27 + $0x5b0] sm:$0xff] %v516_v55  ;;  %v520_v57 = vld [vmem:[%s3530_s26 + $0xb80] sm:$0xff]  ;;  %v522_v58 = vld [vmem:[%s3530_s26 + $0xb88] sm:$0xff]  ;;  %519 = vst [vmem:[%s3535_s27 + $0x5b8] sm:$0xff] %v518_v56 }
  0x71   : > { %521 = vst [vmem:[%s3535_s27 + $0x5c0] sm:$0xff] %v520_v57  ;;  %523 = vst [vmem:[%s3535_s27 + $0x5c8] sm:$0xff] %v522_v58  ;;  %v524_v59 = vld [vmem:[%s3530_s26 + $0xba0] sm:$0xff]  ;;  %v526_v60 = vld [vmem:[%s3530_s26 + $0xba8] sm:$0xff] }
  0x72   : > { %v528_v61 = vld [vmem:[%s3530_s26 + $0xbc0] sm:$0xff]  ;;  %525 = vst [vmem:[%s3535_s27 + $0x5d0] sm:$0xff] %v524_v59  ;;  %527 = vst [vmem:[%s3535_s27 + $0x5d8] sm:$0xff] %v526_v60  ;;  %v530_v62 = vld [vmem:[%s3530_s26 + $0xbc8] sm:$0xff] }
  0x73   : > { %529 = vst [vmem:[%s3535_s27 + $0x5e0] sm:$0xff] %v528_v61  ;;  %v532_v63 = vld [vmem:[%s3530_s26 + $0xbe0] sm:$0xff]  ;;  %v534_v0 = vld [vmem:[%s3530_s26 + $0xbe8] sm:$0xff]  ;;  %531 = vst [vmem:[%s3535_s27 + $0x5e8] sm:$0xff] %v530_v62 }
  0x74   : > { %533 = vst [vmem:[%s3535_s27 + $0x5f0] sm:$0xff] %v532_v63  ;;  %535 = vst [vmem:[%s3535_s27 + $0x5f8] sm:$0xff] %v534_v0  ;;  %v536_v1 = vld [vmem:[%s3530_s26 + $0xc00] sm:$0xff]  ;;  %v538_v2 = vld [vmem:[%s3530_s26 + $0xc08] sm:$0xff] }
  0x75   : > { %v540_v3 = vld [vmem:[%s3530_s26 + $0xc20] sm:$0xff]  ;;  %537 = vst [vmem:[%s3535_s27 + $0x600] sm:$0xff] %v536_v1  ;;  %539 = vst [vmem:[%s3535_s27 + $0x608] sm:$0xff] %v538_v2  ;;  %v542_v4 = vld [vmem:[%s3530_s26 + $0xc28] sm:$0xff] }
  0x76   : > { %541 = vst [vmem:[%s3535_s27 + $0x610] sm:$0xff] %v540_v3  ;;  %v544_v5 = vld [vmem:[%s3530_s26 + $0xc40] sm:$0xff]  ;;  %v546_v6 = vld [vmem:[%s3530_s26 + $0xc48] sm:$0xff]  ;;  %543 = vst [vmem:[%s3535_s27 + $0x618] sm:$0xff] %v542_v4 }
  0x77   : > { %545 = vst [vmem:[%s3535_s27 + $0x620] sm:$0xff] %v544_v5  ;;  %547 = vst [vmem:[%s3535_s27 + $0x628] sm:$0xff] %v546_v6  ;;  %v548_v7 = vld [vmem:[%s3530_s26 + $0xc60] sm:$0xff]  ;;  %v550_v8 = vld [vmem:[%s3530_s26 + $0xc68] sm:$0xff] }
  0x78   : > { %v552_v9 = vld [vmem:[%s3530_s26 + $0xc80] sm:$0xff]  ;;  %549 = vst [vmem:[%s3535_s27 + $0x630] sm:$0xff] %v548_v7  ;;  %551 = vst [vmem:[%s3535_s27 + $0x638] sm:$0xff] %v550_v8  ;;  %v554_v10 = vld [vmem:[%s3530_s26 + $0xc88] sm:$0xff] }
  0x79   : > { %553 = vst [vmem:[%s3535_s27 + $0x640] sm:$0xff] %v552_v9  ;;  %v556_v11 = vld [vmem:[%s3530_s26 + $0xca0] sm:$0xff]  ;;  %v558_v12 = vld [vmem:[%s3530_s26 + $0xca8] sm:$0xff]  ;;  %555 = vst [vmem:[%s3535_s27 + $0x648] sm:$0xff] %v554_v10 }
  0x7a   : > { %557 = vst [vmem:[%s3535_s27 + $0x650] sm:$0xff] %v556_v11  ;;  %559 = vst [vmem:[%s3535_s27 + $0x658] sm:$0xff] %v558_v12  ;;  %v560_v13 = vld [vmem:[%s3530_s26 + $0xcc0] sm:$0xff]  ;;  %v562_v14 = vld [vmem:[%s3530_s26 + $0xcc8] sm:$0xff] }
  0x7b   : > { %v564_v15 = vld [vmem:[%s3530_s26 + $0xce0] sm:$0xff]  ;;  %561 = vst [vmem:[%s3535_s27 + $0x660] sm:$0xff] %v560_v13  ;;  %563 = vst [vmem:[%s3535_s27 + $0x668] sm:$0xff] %v562_v14  ;;  %v566_v16 = vld [vmem:[%s3530_s26 + $0xce8] sm:$0xff] }
  0x7c   : > { %565 = vst [vmem:[%s3535_s27 + $0x670] sm:$0xff] %v564_v15  ;;  %v568_v17 = vld [vmem:[%s3530_s26 + $0xd00] sm:$0xff]  ;;  %v570_v18 = vld [vmem:[%s3530_s26 + $0xd08] sm:$0xff]  ;;  %567 = vst [vmem:[%s3535_s27 + $0x678] sm:$0xff] %v566_v16 }
  0x7d   : > { %569 = vst [vmem:[%s3535_s27 + $0x680] sm:$0xff] %v568_v17  ;;  %571 = vst [vmem:[%s3535_s27 + $0x688] sm:$0xff] %v570_v18  ;;  %v572_v19 = vld [vmem:[%s3530_s26 + $0xd20] sm:$0xff]  ;;  %v574_v20 = vld [vmem:[%s3530_s26 + $0xd28] sm:$0xff] }
  0x7e   : > { %v576_v21 = vld [vmem:[%s3530_s26 + $0xd40] sm:$0xff]  ;;  %573 = vst [vmem:[%s3535_s27 + $0x690] sm:$0xff] %v572_v19  ;;  %575 = vst [vmem:[%s3535_s27 + $0x698] sm:$0xff] %v574_v20  ;;  %v578_v22 = vld [vmem:[%s3530_s26 + $0xd48] sm:$0xff] }
  0x7f   : > { %577 = vst [vmem:[%s3535_s27 + $0x6a0] sm:$0xff] %v576_v21  ;;  %v580_v23 = vld [vmem:[%s3530_s26 + $0xd60] sm:$0xff]  ;;  %v582_v24 = vld [vmem:[%s3530_s26 + $0xd68] sm:$0xff]  ;;  %579 = vst [vmem:[%s3535_s27 + $0x6a8] sm:$0xff] %v578_v22 }
  0x80   : > { %581 = vst [vmem:[%s3535_s27 + $0x6b0] sm:$0xff] %v580_v23  ;;  %583 = vst [vmem:[%s3535_s27 + $0x6b8] sm:$0xff] %v582_v24  ;;  %v584_v25 = vld [vmem:[%s3530_s26 + $0xd80] sm:$0xff]  ;;  %v586_v26 = vld [vmem:[%s3530_s26 + $0xd88] sm:$0xff] }
  0x81   : > { %v588_v27 = vld [vmem:[%s3530_s26 + $0xda0] sm:$0xff]  ;;  %585 = vst [vmem:[%s3535_s27 + $0x6c0] sm:$0xff] %v584_v25  ;;  %587 = vst [vmem:[%s3535_s27 + $0x6c8] sm:$0xff] %v586_v26  ;;  %v590_v28 = vld [vmem:[%s3530_s26 + $0xda8] sm:$0xff] }
  0x82   : > { %589 = vst [vmem:[%s3535_s27 + $0x6d0] sm:$0xff] %v588_v27  ;;  %v592_v29 = vld [vmem:[%s3530_s26 + $0xdc0] sm:$0xff]  ;;  %v594_v30 = vld [vmem:[%s3530_s26 + $0xdc8] sm:$0xff]  ;;  %591 = vst [vmem:[%s3535_s27 + $0x6d8] sm:$0xff] %v590_v28 }
  0x83   : > { %593 = vst [vmem:[%s3535_s27 + $0x6e0] sm:$0xff] %v592_v29  ;;  %595 = vst [vmem:[%s3535_s27 + $0x6e8] sm:$0xff] %v594_v30  ;;  %v596_v31 = vld [vmem:[%s3530_s26 + $0xde0] sm:$0xff]  ;;  %v598_v32 = vld [vmem:[%s3530_s26 + $0xde8] sm:$0xff] }
  0x84   : > { %v600_v33 = vld [vmem:[%s3530_s26 + $0xe00] sm:$0xff]  ;;  %597 = vst [vmem:[%s3535_s27 + $0x6f0] sm:$0xff] %v596_v31  ;;  %599 = vst [vmem:[%s3535_s27 + $0x6f8] sm:$0xff] %v598_v32  ;;  %v602_v34 = vld [vmem:[%s3530_s26 + $0xe08] sm:$0xff] }
  0x85   : > { %601 = vst [vmem:[%s3535_s27 + $0x700] sm:$0xff] %v600_v33  ;;  %v604_v35 = vld [vmem:[%s3530_s26 + $0xe20] sm:$0xff]  ;;  %v606_v36 = vld [vmem:[%s3530_s26 + $0xe28] sm:$0xff]  ;;  %603 = vst [vmem:[%s3535_s27 + $0x708] sm:$0xff] %v602_v34 }
  0x86   : > { %605 = vst [vmem:[%s3535_s27 + $0x710] sm:$0xff] %v604_v35  ;;  %607 = vst [vmem:[%s3535_s27 + $0x718] sm:$0xff] %v606_v36  ;;  %v608_v37 = vld [vmem:[%s3530_s26 + $0xe40] sm:$0xff]  ;;  %v610_v38 = vld [vmem:[%s3530_s26 + $0xe48] sm:$0xff] }
  0x87   : > { %v612_v39 = vld [vmem:[%s3530_s26 + $0xe60] sm:$0xff]  ;;  %609 = vst [vmem:[%s3535_s27 + $0x720] sm:$0xff] %v608_v37  ;;  %611 = vst [vmem:[%s3535_s27 + $0x728] sm:$0xff] %v610_v38  ;;  %v614_v40 = vld [vmem:[%s3530_s26 + $0xe68] sm:$0xff] }
  0x88   : > { %613 = vst [vmem:[%s3535_s27 + $0x730] sm:$0xff] %v612_v39  ;;  %v616_v41 = vld [vmem:[%s3530_s26 + $0xe80] sm:$0xff]  ;;  %v618_v42 = vld [vmem:[%s3530_s26 + $0xe88] sm:$0xff]  ;;  %615 = vst [vmem:[%s3535_s27 + $0x738] sm:$0xff] %v614_v40 }
  0x89   : > { %617 = vst [vmem:[%s3535_s27 + $0x740] sm:$0xff] %v616_v41  ;;  %619 = vst [vmem:[%s3535_s27 + $0x748] sm:$0xff] %v618_v42  ;;  %v620_v43 = vld [vmem:[%s3530_s26 + $0xea0] sm:$0xff]  ;;  %v622_v44 = vld [vmem:[%s3530_s26 + $0xea8] sm:$0xff] }
  0x8a   : > { %v624_v45 = vld [vmem:[%s3530_s26 + $0xec0] sm:$0xff]  ;;  %621 = vst [vmem:[%s3535_s27 + $0x750] sm:$0xff] %v620_v43  ;;  %623 = vst [vmem:[%s3535_s27 + $0x758] sm:$0xff] %v622_v44  ;;  %v626_v46 = vld [vmem:[%s3530_s26 + $0xec8] sm:$0xff] }
  0x8b   : > { %625 = vst [vmem:[%s3535_s27 + $0x760] sm:$0xff] %v624_v45  ;;  %v628_v47 = vld [vmem:[%s3530_s26 + $0xee0] sm:$0xff]  ;;  %v630_v48 = vld [vmem:[%s3530_s26 + $0xee8] sm:$0xff]  ;;  %627 = vst [vmem:[%s3535_s27 + $0x768] sm:$0xff] %v626_v46 }
  0x8c   : > { %629 = vst [vmem:[%s3535_s27 + $0x770] sm:$0xff] %v628_v47  ;;  %631 = vst [vmem:[%s3535_s27 + $0x778] sm:$0xff] %v630_v48  ;;  %v632_v49 = vld [vmem:[%s3530_s26 + $0xf00] sm:$0xff]  ;;  %v634_v50 = vld [vmem:[%s3530_s26 + $0xf08] sm:$0xff] }
  0x8d   : > { %v636_v51 = vld [vmem:[%s3530_s26 + $0xf20] sm:$0xff]  ;;  %633 = vst [vmem:[%s3535_s27 + $0x780] sm:$0xff] %v632_v49  ;;  %635 = vst [vmem:[%s3535_s27 + $0x788] sm:$0xff] %v634_v50  ;;  %v638_v52 = vld [vmem:[%s3530_s26 + $0xf28] sm:$0xff] }
  0x8e   : > { %637 = vst [vmem:[%s3535_s27 + $0x790] sm:$0xff] %v636_v51  ;;  %v640_v53 = vld [vmem:[%s3530_s26 + $0xf40] sm:$0xff]  ;;  %v642_v54 = vld [vmem:[%s3530_s26 + $0xf48] sm:$0xff]  ;;  %639 = vst [vmem:[%s3535_s27 + $0x798] sm:$0xff] %v638_v52 }
  0x8f   : > { %641 = vst [vmem:[%s3535_s27 + $0x7a0] sm:$0xff] %v640_v53  ;;  %643 = vst [vmem:[%s3535_s27 + $0x7a8] sm:$0xff] %v642_v54  ;;  %v644_v55 = vld [vmem:[%s3530_s26 + $0xf60] sm:$0xff]  ;;  %v646_v56 = vld [vmem:[%s3530_s26 + $0xf68] sm:$0xff] }
  0x90   : > { %v648_v57 = vld [vmem:[%s3530_s26 + $0xf80] sm:$0xff]  ;;  %645 = vst [vmem:[%s3535_s27 + $0x7b0] sm:$0xff] %v644_v55  ;;  %647 = vst [vmem:[%s3535_s27 + $0x7b8] sm:$0xff] %v646_v56  ;;  %v650_v58 = vld [vmem:[%s3530_s26 + $0xf88] sm:$0xff] }
  0x91   : > { %649 = vst [vmem:[%s3535_s27 + $0x7c0] sm:$0xff] %v648_v57  ;;  %v652_v59 = vld [vmem:[%s3530_s26 + $0xfa0] sm:$0xff]  ;;  %v654_v60 = vld [vmem:[%s3530_s26 + $0xfa8] sm:$0xff]  ;;  %651 = vst [vmem:[%s3535_s27 + $0x7c8] sm:$0xff] %v650_v58 }
  0x92   : > { %653 = vst [vmem:[%s3535_s27 + $0x7d0] sm:$0xff] %v652_v59  ;;  %655 = vst [vmem:[%s3535_s27 + $0x7d8] sm:$0xff] %v654_v60  ;;  %v656_v61 = vld [vmem:[%s3530_s26 + $0xfc0] sm:$0xff]  ;;  %v658_v62 = vld [vmem:[%s3530_s26 + $0xfc8] sm:$0xff] }
  0x93   : > { %v660_v63 = vld [vmem:[%s3530_s26 + $0xfe0] sm:$0xff]  ;;  %657 = vst [vmem:[%s3535_s27 + $0x7e0] sm:$0xff] %v656_v61  ;;  %659 = vst [vmem:[%s3535_s27 + $0x7e8] sm:$0xff] %v658_v62  ;;  %v662_v0 = vld [vmem:[%s3530_s26 + $0xfe8] sm:$0xff] }
  0x94   : > { %661 = vst [vmem:[%s3535_s27 + $0x7f0] sm:$0xff] %v660_v63  ;;  %663 = vst [vmem:[%s3535_s27 + $0x7f8] sm:$0xff] %v662_v0 }
  0x95 PF: > { %p2737_p5 = scmp.ge.s32.totalorder %s3469_s16, 1  ;;  %p668_p6 = scmp.lt.s32.totalorder %s3469_s16, 3 }
  0x97   : > { %p669_p7 = pnand %p2737_p5, %p668_p6 }
  0x98   : > { %s675_s28 = sand.u32 (!%p669_p7), 1, %s3461_s14   ;;  %v966_v1 = vlaneseq (!%p669_p7)  ;;  %v3471_v2 = vmov (!%p669_p7), 1966171168   ;;  %v4052_v4 = vld [vmem:[%s4381_s0] sm:$0xff] (!%p669_p7)  ;;  %s2739_s6 = sshll.u32 (!%p669_p7), %s2730_s2, 2 }
  0x99   : > { %672 = sbr.rel (%p669_p7) target bundleno = 650 (0x28a), region = 51  ;;  %s2738_s29 = sshll.u32 (!%p669_p7), %s675_s28, 11  ;;  %v973_v3 = vunpack.c.l.s4 (!%p669_p7), %v3471_v2 }
  0x9a   : > { %v4055_v5 = vshrl.u32 (!%p669_p7), %v966_v1, 7  ;;  %s4057_s5 = scalar_lea.vmem (!%p669_p7), [#allocation3], %s2738_s29  ;;  %p699_p8 = scmp.lt.s32.totalorder (!%p669_p7), %s2739_s6, 7  ;;  %vm2671_vm0 = vcmp.lt.s32.totalorder (!%p669_p7), %v966_v1, 512 }
  0x9b   : > { %v3054_v6 = vld [vmem:[%s4057_s5 + $0x4] ss:$16 sps:$4 sm:$0xff] (!%p669_p7)   ;;  %v974_v7 = vunpack.c.0.s8 (!%p669_p7), %v973_v3  ;;  %v3056_v8 = vld [vmem:[%s4057_s5 + $0xc] ss:$16 sps:$4 sm:$0xff] (!%p669_p7)   ;;  %v3058_v9 = vld [vmem:[%s4057_s5] ss:$16 sps:$4 sm:$0xff] (!%p669_p7)  }
  0x9c   : > { %2308 = vmatprep.subr.bf16.mxu0 (!%p669_p7), %v3054_v6  ;;  %v3059_v10 = vld [vmem:[%s4057_s5 + $0x8] ss:$16 sps:$4 sm:$0xff] (!%p669_p7)   ;;  %2472 = vmatprep.subr.bf16.mxu1 (!%p669_p7), %v3056_v8  ;;  %v3060_v12 = vld [vmem:[%s4057_s5 + $0x24] ss:$16 sps:$4 sm:$0xff] (!%p669_p7)   ;;  %v3062_v13 = vld [vmem:[%s4057_s5 + $0x2c] ss:$16 sps:$4 sm:$0xff] (!%p669_p7)  }
  0x9d   : > { %v4064_v11 = vsub.s32 (!%p669_p7), %v974_v7, %v4055_v5  ;;  %2309 = vmatpush1.bf16.msra.mxu0 (!%p669_p7), %v3058_v9  ;;  %2473 = vmatpush1.bf16.msra.mxu1 (!%p669_p7), %v3059_v10  ;;  %v3064_v14 = vld [vmem:[%s4057_s5 + $0x20] ss:$16 sps:$4 sm:$0xff] (!%p669_p7)   ;;  %v3065_v16 = vld [vmem:[%s4057_s5 + $0x28] ss:$16 sps:$4 sm:$0xff] (!%p669_p7)   ;;  %v3066_v17 = vld [vmem:[%s4057_s5 + $0x44] ss:$16 sps:$4 sm:$0xff] (!%p669_p7)  }
  0x9e   : > { %2310 = vmatprep.subr.bf16.mxu0 (!%p669_p7), %v3060_v12  ;;  %2474 = vmatprep.subr.bf16.mxu1 (!%p669_p7), %v3062_v13  ;;  %v3068_v19 = vld [vmem:[%s4057_s5 + $0x4c] ss:$16 sps:$4 sm:$0xff] (!%p669_p7)   ;;  %v3070_v20 = vld [vmem:[%s4057_s5 + $0x40] ss:$16 sps:$4 sm:$0xff] (!%p669_p7)   ;;  %v3071_v21 = vld [vmem:[%s4057_s5 + $0x48] ss:$16 sps:$4 sm:$0xff] (!%p669_p7)  }
  0x9f   : > { %v4071_v15 = vrot.slane (!%p669_p7), %v4052_v4, %v4064_v11  ;;  %v3072_v22 = vld [vmem:[%s4057_s5 + $0x64] ss:$16 sps:$4 sm:$0xff] (!%p669_p7)   ;;  %v3074_v24 = vld [vmem:[%s4057_s5 + $0x6c] ss:$16 sps:$4 sm:$0xff] (!%p669_p7)   ;;  %v3076_v25 = vld [vmem:[%s4057_s5 + $0x60] ss:$16 sps:$4 sm:$0xff] (!%p669_p7)  }
  0xa0   : > { %v3077_v26 = vld [vmem:[%s4057_s5 + $0x68] ss:$16 sps:$4 sm:$0xff]   ;;  %v3078_v27 = vld [vmem:[%s4057_s5 + $0x84] ss:$16 sps:$4 sm:$0xff]   ;;  %v3080_v28 = vld [vmem:[%s4057_s5 + $0x8c] ss:$16 sps:$4 sm:$0xff]  }
  0xa1   : > { %v986_v18 = vcombine.high %v4071_v15, %v4071_v15  ;;  %2311 = vmatpush1.bf16.msra.mxu0 %v3064_v14  ;;  %2475 = vmatpush1.bf16.msra.mxu1 %v3065_v16  ;;  %v3082_v29 = vld [vmem:[%s4057_s5 + $0x80] ss:$16 sps:$4 sm:$0xff]   ;;  %v3083_v30 = vld [vmem:[%s4057_s5 + $0x88] ss:$16 sps:$4 sm:$0xff]   ;;  %v3084_v31 = vld [vmem:[%s4057_s5 + $0xa4] ss:$16 sps:$4 sm:$0xff]  }
  0xa2   : > { %2312 = vmatprep.subr.bf16.mxu0 %v3066_v17  ;;  %2476 = vmatprep.subr.bf16.mxu1 %v3068_v19  ;;  %v3086_v32 = vld [vmem:[%s4057_s5 + $0xac] ss:$16 sps:$4 sm:$0xff]   ;;  %v3088_v33 = vld [vmem:[%s4057_s5 + $0xa0] ss:$16 sps:$4 sm:$0xff]   ;;  %v3089_v34 = vld [vmem:[%s4057_s5 + $0xa8] ss:$16 sps:$4 sm:$0xff]  }
  0xa3   : > { %v4082_v23 = vrot.slane %v986_v18, %v4064_v11  ;;  %v3090_v35 = vld [vmem:[%s4057_s5 + $0xc4] ss:$16 sps:$4 sm:$0xff]   ;;  %v3092_v36 = vld [vmem:[%s4057_s5 + $0xcc] ss:$16 sps:$4 sm:$0xff]   ;;  %v3094_v37 = vld [vmem:[%s4057_s5 + $0xc0] ss:$16 sps:$4 sm:$0xff]  }
  0xa4   : > { %v3095_v38 = vld [vmem:[%s4057_s5 + $0xc8] ss:$16 sps:$4 sm:$0xff]   ;;  %v3096_v39 = vld [vmem:[%s4057_s5 + $0xe4] ss:$16 sps:$4 sm:$0xff]   ;;  %v3098_v40 = vld [vmem:[%s4057_s5 + $0xec] ss:$16 sps:$4 sm:$0xff]  }
  0xa5   : > { %2340 = vmatprep.mubr.bf16.mxu0 %v4082_v23  ;;  %2504 = vmatprep.mubr.bf16.mxu1 %v4082_v23  ;;  %v3100_v41 = vld [vmem:[%s4057_s5 + $0xe0] ss:$16 sps:$4 sm:$0xff]   ;;  %v3101_v42 = vld [vmem:[%s4057_s5 + $0xe8] ss:$16 sps:$4 sm:$0xff]   ;;  %v3102_v43 = vld [vmem:[%s4057_s5 + $0x104] ss:$16 sps:$4 sm:$0xff]  }
  0xa6   : > { %2313 = vmatpush1.bf16.msra.mxu0 %v3070_v20  ;;  %2477 = vmatpush1.bf16.msra.mxu1 %v3071_v21  ;;  %v3104_v44 = vld [vmem:[%s4057_s5 + $0x10c] ss:$16 sps:$4 sm:$0xff]   ;;  %v3106_v45 = vld [vmem:[%s4057_s5 + $0x100] ss:$16 sps:$4 sm:$0xff]   ;;  %v3107_v46 = vld [vmem:[%s4057_s5 + $0x108] ss:$16 sps:$4 sm:$0xff]   ;;  %v4143_v20 = vrot.slane %v4071_v15, %v4064_v11 }
  0xa7   : > { %2314 = vmatprep.subr.bf16.mxu0 %v3072_v22  ;;  %2478 = vmatprep.subr.bf16.mxu1 %v3074_v24  ;;  %v3108_v47 = vld [vmem:[%s4057_s5 + $0x124] ss:$16 sps:$4 sm:$0xff]   ;;  %v3110_v48 = vld [vmem:[%s4057_s5 + $0x12c] ss:$16 sps:$4 sm:$0xff]   ;;  %v3112_v49 = vld [vmem:[%s4057_s5 + $0x120] ss:$16 sps:$4 sm:$0xff]   ;;  %v1018_v24 = vcombine.high %v4082_v23, %v4082_v23 }
  0xa8   : > { %v3113_v50 = vld [vmem:[%s4057_s5 + $0x128] ss:$16 sps:$4 sm:$0xff]   ;;  %v3114_v51 = vld [vmem:[%s4057_s5 + $0x144] ss:$16 sps:$4 sm:$0xff]   ;;  %v3116_v52 = vld [vmem:[%s4057_s5 + $0x14c] ss:$16 sps:$4 sm:$0xff]  }
  0xa9   : > { %v3118_v53 = vld [vmem:[%s4057_s5 + $0x140] ss:$16 sps:$4 sm:$0xff]   ;;  %v3119_v54 = vld [vmem:[%s4057_s5 + $0x148] ss:$16 sps:$4 sm:$0xff]   ;;  %v3120_v55 = vld [vmem:[%s4057_s5 + $0x164] ss:$16 sps:$4 sm:$0xff]  }
  0xaa   : > { %2315 = vmatpush1.bf16.msra.mxu0 %v3076_v25  ;;  %2479 = vmatpush1.bf16.msra.mxu1 %v3077_v26  ;;  %v3122_v56 = vld [vmem:[%s4057_s5 + $0x16c] ss:$16 sps:$4 sm:$0xff]   ;;  %v3124_v57 = vld [vmem:[%s4057_s5 + $0x160] ss:$16 sps:$4 sm:$0xff]   ;;  %v3125_v58 = vld [vmem:[%s4057_s5 + $0x168] ss:$16 sps:$4 sm:$0xff]  }
  0xab   : > { %2316 = vmatprep.subr.bf16.mxu0 %v3078_v27  ;;  %2480 = vmatprep.subr.bf16.mxu1 %v3080_v28  ;;  %v3126_v59 = vld [vmem:[%s4057_s5 + $0x184] ss:$16 sps:$4 sm:$0xff]   ;;  %v3128_v60 = vld [vmem:[%s4057_s5 + $0x18c] ss:$16 sps:$4 sm:$0xff]   ;;  %v3130_v61 = vld [vmem:[%s4057_s5 + $0x180] ss:$16 sps:$4 sm:$0xff]  }
  0xac   : > { %v3131_v62 = vld [vmem:[%s4057_s5 + $0x188] ss:$16 sps:$4 sm:$0xff]   ;;  %v3132_v63 = vld [vmem:[%s4057_s5 + $0x1a4] ss:$16 sps:$4 sm:$0xff]   ;;  %v3134_v0 = vld [vmem:[%s4057_s5 + $0x1ac] ss:$16 sps:$4 sm:$0xff]  }
  0xad   : > { %v3136_v2 = vld [vmem:[%s4057_s5 + $0x1a0] ss:$16 sps:$4 sm:$0xff]   ;;  %v3137_v3 = vld [vmem:[%s4057_s5 + $0x1a8] ss:$16 sps:$4 sm:$0xff]   ;;  %v3138_v6 = vld [vmem:[%s4057_s5 + $0x1c4] ss:$16 sps:$4 sm:$0xff]  }
  0xae   : > { %2317 = vmatpush1.bf16.msra.mxu0 %v3082_v29  ;;  %2481 = vmatpush1.bf16.msra.mxu1 %v3083_v30  ;;  %v3140_v7 = vld [vmem:[%s4057_s5 + $0x1cc] ss:$16 sps:$4 sm:$0xff]   ;;  %v3142_v8 = vld [vmem:[%s4057_s5 + $0x1c0] ss:$16 sps:$4 sm:$0xff]   ;;  %v3143_v9 = vld [vmem:[%s4057_s5 + $0x1c8] ss:$16 sps:$4 sm:$0xff]  }
  0xaf   : > { %2318 = vmatprep.subr.bf16.mxu0 %v3084_v31  ;;  %2482 = vmatprep.subr.bf16.mxu1 %v3086_v32  ;;  %v3144_v10 = vld [vmem:[%s4057_s5 + $0x1e4] ss:$16 sps:$4 sm:$0xff]   ;;  %v3146_v12 = vld [vmem:[%s4057_s5 + $0x1ec] ss:$16 sps:$4 sm:$0xff]   ;;  %v3148_v13 = vld [vmem:[%s4057_s5 + $0x1e0] ss:$16 sps:$4 sm:$0xff]  }
  0xb0   : > { %v3149_v14 = vld [vmem:[%s4057_s5 + $0x1e8] ss:$16 sps:$4 sm:$0xff]   ;;  %v3152_v16 = vld [vmem:[%s4057_s5 + $0x204] ss:$16 sps:$4 sm:$0xff]   ;;  %v3155_v17 = vld [vmem:[%s4057_s5 + $0x20c] ss:$16 sps:$4 sm:$0xff]  }
  0xb1   : > { %v3150_v18 = vld [vmem:[%s4057_s5 + $0x200] ss:$16 sps:$4 sm:$0xff]   ;;  %v3153_v19 = vld [vmem:[%s4057_s5 + $0x208] ss:$16 sps:$4 sm:$0xff]   ;;  %v3158_v21 = vld [vmem:[%s4057_s5 + $0x224] ss:$16 sps:$4 sm:$0xff]  }
  0xb2   : > { %2319 = vmatpush1.bf16.msra.mxu0 %v3088_v33  ;;  %2483 = vmatpush1.bf16.msra.mxu1 %v3089_v34  ;;  %v3161_v22 = vld [vmem:[%s4057_s5 + $0x22c] ss:$16 sps:$4 sm:$0xff]   ;;  %v3156_v25 = vld [vmem:[%s4057_s5 + $0x220] ss:$16 sps:$4 sm:$0xff]   ;;  %v3159_v15 = vld [vmem:[%s4057_s5 + $0x228] ss:$16 sps:$4 sm:$0xff]  }
  0xb3   : > { %2320 = vmatprep.subr.bf16.mxu0 %v3090_v35  ;;  %2484 = vmatprep.subr.bf16.mxu1 %v3092_v36  ;;  %v3164_v26 = vld [vmem:[%s4057_s5 + $0x244] ss:$16 sps:$4 sm:$0xff]   ;;  %v3167_v27 = vld [vmem:[%s4057_s5 + $0x24c] ss:$16 sps:$4 sm:$0xff]   ;;  %v3162_v23 = vld [vmem:[%s4057_s5 + $0x240] ss:$16 sps:$4 sm:$0xff]  }
  0xb4   : > { %v3165_v28 = vld [vmem:[%s4057_s5 + $0x248] ss:$16 sps:$4 sm:$0xff]   ;;  %v3170_v29 = vld [vmem:[%s4057_s5 + $0x264] ss:$16 sps:$4 sm:$0xff]   ;;  %v3173_v30 = vld [vmem:[%s4057_s5 + $0x26c] ss:$16 sps:$4 sm:$0xff]  }
  0xb5   : > { %v3168_v31 = vld [vmem:[%s4057_s5 + $0x260] ss:$16 sps:$4 sm:$0xff]   ;;  %v3171_v32 = vld [vmem:[%s4057_s5 + $0x268] ss:$16 sps:$4 sm:$0xff]   ;;  %v3176_v33 = vld [vmem:[%s4057_s5 + $0x284] ss:$16 sps:$4 sm:$0xff]  }
  0xb6   : > { %2321 = vmatpush1.bf16.msra.mxu0 %v3094_v37  ;;  %2485 = vmatpush1.bf16.msra.mxu1 %v3095_v38  ;;  %v3179_v34 = vld [vmem:[%s4057_s5 + $0x28c] ss:$16 sps:$4 sm:$0xff]   ;;  %v3174_v35 = vld [vmem:[%s4057_s5 + $0x280] ss:$16 sps:$4 sm:$0xff]   ;;  %v3177_v36 = vld [vmem:[%s4057_s5 + $0x288] ss:$16 sps:$4 sm:$0xff]  }
  0xb7   : > { %2322 = vmatprep.subr.bf16.mxu0 %v3096_v39  ;;  %2486 = vmatprep.subr.bf16.mxu1 %v3098_v40  ;;  %v3182_v37 = vld [vmem:[%s4057_s5 + $0x2a4] ss:$16 sps:$4 sm:$0xff]   ;;  %v3185_v38 = vld [vmem:[%s4057_s5 + $0x2ac] ss:$16 sps:$4 sm:$0xff]   ;;  %v3180_v39 = vld [vmem:[%s4057_s5 + $0x2a0] ss:$16 sps:$4 sm:$0xff]  }
  0xb8   : > { %v3183_v40 = vld [vmem:[%s4057_s5 + $0x2a8] ss:$16 sps:$4 sm:$0xff]   ;;  %s4389_s6 = smov (!%p699_p8, %s2739_s6), 7 }
  0xb9   : > { %s701_s9 = scalar_lea.vmem %s4384_s3, %s4389_s6 }
  0xba   : > { %2323 = vmatpush1.bf16.msra.mxu0 %v3100_v41  ;;  %2487 = vmatpush1.bf16.msra.mxu1 %v3101_v42  ;;  %v3188_v41 = vld [vmem:[%s4057_s5 + $0x2c4] ss:$16 sps:$4 sm:$0xff]   ;;  %v3191_v42 = vld [vmem:[%s4057_s5 + $0x2cc] ss:$16 sps:$4 sm:$0xff]  }
  0xbb   : > { %2324 = vmatprep.subr.bf16.mxu0 %v3102_v43  ;;  %2488 = vmatprep.subr.bf16.mxu1 %v3104_v44  ;;  %v3186_v43 = vld [vmem:[%s4057_s5 + $0x2c0] ss:$16 sps:$4 sm:$0xff]   ;;  %v3189_v44 = vld [vmem:[%s4057_s5 + $0x2c8] ss:$16 sps:$4 sm:$0xff]  }
  0xbe   : > { %2325 = vmatpush1.bf16.msra.mxu0 %v3106_v45  ;;  %2489 = vmatpush1.bf16.msra.mxu1 %v3107_v46  ;;  %v3194_v45 = vld [vmem:[%s4057_s5 + $0x2e4] ss:$16 sps:$4 sm:$0xff]   ;;  %v3197_v46 = vld [vmem:[%s4057_s5 + $0x2ec] ss:$16 sps:$4 sm:$0xff]  }
  0xbf   : > { %2326 = vmatprep.subr.bf16.mxu0 %v3108_v47  ;;  %2490 = vmatprep.subr.bf16.mxu1 %v3110_v48  ;;  %v3192_v47 = vld [vmem:[%s4057_s5 + $0x2e0] ss:$16 sps:$4 sm:$0xff]   ;;  %v3195_v48 = vld [vmem:[%s4057_s5 + $0x2e8] ss:$16 sps:$4 sm:$0xff]  }
  0xc2   : > { %2327 = vmatpush1.bf16.msra.mxu0 %v3112_v49  ;;  %2491 = vmatpush1.bf16.msra.mxu1 %v3113_v50  ;;  %v3200_v49 = vld [vmem:[%s4057_s5 + $0x304] ss:$16 sps:$4 sm:$0xff]   ;;  %v3203_v50 = vld [vmem:[%s4057_s5 + $0x30c] ss:$16 sps:$4 sm:$0xff]  }
  0xc3   : > { %2328 = vmatprep.subr.bf16.mxu0 %v3114_v51  ;;  %2492 = vmatprep.subr.bf16.mxu1 %v3116_v52  ;;  %v3198_v51 = vld [vmem:[%s4057_s5 + $0x300] ss:$16 sps:$4 sm:$0xff]   ;;  %v3201_v52 = vld [vmem:[%s4057_s5 + $0x308] ss:$16 sps:$4 sm:$0xff]  }
  0xc6   : > { %2329 = vmatpush1.bf16.msra.mxu0 %v3118_v53  ;;  %2493 = vmatpush1.bf16.msra.mxu1 %v3119_v54  ;;  %v3206_v53 = vld [vmem:[%s4057_s5 + $0x324] ss:$16 sps:$4 sm:$0xff]   ;;  %v3209_v54 = vld [vmem:[%s4057_s5 + $0x32c] ss:$16 sps:$4 sm:$0xff]  }
  0xc7   : > { %2330 = vmatprep.subr.bf16.mxu0 %v3120_v55  ;;  %2494 = vmatprep.subr.bf16.mxu1 %v3122_v56  ;;  %v3204_v55 = vld [vmem:[%s4057_s5 + $0x320] ss:$16 sps:$4 sm:$0xff]   ;;  %v3207_v56 = vld [vmem:[%s4057_s5 + $0x328] ss:$16 sps:$4 sm:$0xff]  }
  0xca   : > { %2331 = vmatpush1.bf16.msra.mxu0 %v3124_v57  ;;  %2495 = vmatpush1.bf16.msra.mxu1 %v3125_v58  ;;  %v3212_v57 = vld [vmem:[%s4057_s5 + $0x344] ss:$16 sps:$4 sm:$0xff]   ;;  %v3215_v58 = vld [vmem:[%s4057_s5 + $0x34c] ss:$16 sps:$4 sm:$0xff]  }
  0xcb   : > { %2332 = vmatprep.subr.bf16.mxu0 %v3126_v59  ;;  %2496 = vmatprep.subr.bf16.mxu1 %v3128_v60  ;;  %v3210_v59 = vld [vmem:[%s4057_s5 + $0x340] ss:$16 sps:$4 sm:$0xff]   ;;  %v3213_v60 = vld [vmem:[%s4057_s5 + $0x348] ss:$16 sps:$4 sm:$0xff]  }
  0xce   : > { %2333 = vmatpush1.bf16.msra.mxu0 %v3130_v61  ;;  %2497 = vmatpush1.bf16.msra.mxu1 %v3131_v62  ;;  %v3218_v61 = vld [vmem:[%s4057_s5 + $0x364] ss:$16 sps:$4 sm:$0xff]   ;;  %v3221_v62 = vld [vmem:[%s4057_s5 + $0x36c] ss:$16 sps:$4 sm:$0xff]  }
  0xcf   : > { %2334 = vmatprep.subr.bf16.mxu0 %v3132_v63  ;;  %2498 = vmatprep.subr.bf16.mxu1 %v3134_v0  ;;  %v3216_v63 = vld [vmem:[%s4057_s5 + $0x360] ss:$16 sps:$4 sm:$0xff]   ;;  %v3219_v0 = vld [vmem:[%s4057_s5 + $0x368] ss:$16 sps:$4 sm:$0xff]  }
  0xd2   : > { %2335 = vmatpush1.bf16.msra.mxu0 %v3136_v2  ;;  %2499 = vmatpush1.bf16.msra.mxu1 %v3137_v3  ;;  %v3224_v2 = vld [vmem:[%s4057_s5 + $0x384] ss:$16 sps:$4 sm:$0xff]   ;;  %v3227_v3 = vld [vmem:[%s4057_s5 + $0x38c] ss:$16 sps:$4 sm:$0xff]  }
  0xd3   : > { %2336 = vmatprep.subr.bf16.mxu0 %v3138_v6  ;;  %2500 = vmatprep.subr.bf16.mxu1 %v3140_v7  ;;  %v3222_v6 = vld [vmem:[%s4057_s5 + $0x380] ss:$16 sps:$4 sm:$0xff]   ;;  %v3225_v7 = vld [vmem:[%s4057_s5 + $0x388] ss:$16 sps:$4 sm:$0xff]  }
  0xd6   : > { %2337 = vmatpush1.bf16.msra.mxu0 %v3142_v8  ;;  %2501 = vmatpush1.bf16.msra.mxu1 %v3143_v9  ;;  %v3230_v8 = vld [vmem:[%s4057_s5 + $0x3a4] ss:$16 sps:$4 sm:$0xff]   ;;  %v3233_v9 = vld [vmem:[%s4057_s5 + $0x3ac] ss:$16 sps:$4 sm:$0xff]  }
  0xd7   : > { %2338 = vmatprep.subr.bf16.mxu0 %v3144_v10  ;;  %2502 = vmatprep.subr.bf16.mxu1 %v3146_v12  ;;  %v3228_v10 = vld [vmem:[%s4057_s5 + $0x3a0] ss:$16 sps:$4 sm:$0xff]   ;;  %v3231_v12 = vld [vmem:[%s4057_s5 + $0x3a8] ss:$16 sps:$4 sm:$0xff]  }
  0xda   : > { %2339 = vmatpush1.bf16.msra.mxu0 %v3148_v13  ;;  %2503 = vmatpush1.bf16.msra.mxu1 %v3149_v14  ;;  %v3236_v13 = vld [vmem:[%s4057_s5 + $0x3c4] ss:$16 sps:$4 sm:$0xff]   ;;  %v3239_v14 = vld [vmem:[%s4057_s5 + $0x3cc] ss:$16 sps:$4 sm:$0xff]  }
  0xdb   : > { %2349 = vmatprep.subr.bf16.mxu0 %v3152_v16  ;;  %2513 = vmatprep.subr.bf16.mxu1 %v3155_v17  ;;  %v971_v16 = vcombine.high %v4052_v4, %v4052_v4  ;;  %v3234_v17 = vld [vmem:[%s4057_s5 + $0x3c0] ss:$16 sps:$4 sm:$0xff]   ;;  %v3248_v4 = vld [vmem:[%s4057_s5 + $0x404] ss:$16 sps:$4 sm:$0xff]  }
  0xdd   : > { %2341 = vmatmul.mubr.bf16.vlgmr.msra.gmra.mrb[0].mxu0 %v4143_v20  ;;  %2505 = vmatmul.mubr.bf16.vlgmr.msra.gmra.mrb[0].mxu1 %v4143_v20 }
  0xde   : > { %2350 = vmatpush1.bf16.msra.mxu0 %v3150_v18  ;;  %2514 = vmatpush1.bf16.msra.mxu1 %v3153_v19  ;;  %v3237_v18 = vld [vmem:[%s4057_s5 + $0x3c8] ss:$16 sps:$4 sm:$0xff]   ;;  %v3242_v19 = vld [vmem:[%s4057_s5 + $0x3e4] ss:$16 sps:$4 sm:$0xff]  }
  0xdf   : > { %2351 = vmatprep.subr.bf16.mxu0 %v3158_v21  ;;  %2515 = vmatprep.subr.bf16.mxu1 %v3161_v22  ;;  %v3245_v21 = vld [vmem:[%s4057_s5 + $0x3ec] ss:$16 sps:$4 sm:$0xff]   ;;  %v4210_v22 = vrot.slane %v971_v16, %v4064_v11  ;;  %v3320_v16 = vld [vmem:[%s4057_s5 + $0x584] ss:$16 sps:$4 sm:$0xff]  }
  0xe0   : > { %2381 = vmatprep.mubr.bf16.mxu0 %v1018_v24  ;;  %2545 = vmatprep.mubr.bf16.mxu1 %v1018_v24  ;;  %v3240_v24 = vld [vmem:[%s4057_s5 + $0x3e0] ss:$16 sps:$4 sm:$0xff]  }
  0xe2   : > { %2352 = vmatpush1.bf16.msra.mxu0 %v3156_v25  ;;  %2516 = vmatpush1.bf16.msra.mxu1 %v3159_v15  ;;  %v3243_v25 = vld [vmem:[%s4057_s5 + $0x3e8] ss:$16 sps:$4 sm:$0xff]   ;;  %v3251_v15 = vld [vmem:[%s4057_s5 + $0x40c] ss:$16 sps:$4 sm:$0xff]  }
  0xe3   : > { %2353 = vmatprep.subr.bf16.mxu0 %v3164_v26  ;;  %2517 = vmatprep.subr.bf16.mxu1 %v3167_v27  ;;  %v987_v26 = vcombine.high %v4210_v22, %v4210_v22  ;;  %v3246_v27 = vld [vmem:[%s4057_s5 + $0x400] ss:$16 sps:$4 sm:$0xff]  }
  0xe6   : > { %2354 = vmatpush1.bf16.msra.mxu0 %v3162_v23  ;;  %2518 = vmatpush1.bf16.msra.mxu1 %v3165_v28  ;;  %v3249_v23 = vld [vmem:[%s4057_s5 + $0x408] ss:$16 sps:$4 sm:$0xff]   ;;  %v1016_v28 = vcombine.high %v4143_v20, %v4143_v20  ;;  %v3260_v20 = vld [vmem:[%s4057_s5 + $0x444] ss:$16 sps:$4 sm:$0xff]  }
  0xe7   : > { %2355 = vmatprep.subr.bf16.mxu0 %v3170_v29  ;;  %2519 = vmatprep.subr.bf16.mxu1 %v3173_v30  ;;  %v3254_v29 = vld [vmem:[%s4057_s5 + $0x424] ss:$16 sps:$4 sm:$0xff]   ;;  %v3257_v30 = vld [vmem:[%s4057_s5 + $0x42c] ss:$16 sps:$4 sm:$0xff]  }
  0xea   : > { %2356 = vmatpush1.bf16.msra.mxu0 %v3168_v31  ;;  %2520 = vmatpush1.bf16.msra.mxu1 %v3171_v32  ;;  %v4225_v31 = vrot.slane %v987_v26, %v4064_v11  ;;  %v3252_v32 = vld [vmem:[%s4057_s5 + $0x420] ss:$16 sps:$4 sm:$0xff]   ;;  %v3335_v26 = vld [vmem:[%s4057_s5 + $0x5cc] ss:$16 sps:$4 sm:$0xff]  }
  0xeb   : > { %2357 = vmatprep.subr.bf16.mxu0 %v3176_v33  ;;  %2521 = vmatprep.subr.bf16.mxu1 %v3179_v34  ;;  %v3255_v33 = vld [vmem:[%s4057_s5 + $0x428] ss:$16 sps:$4 sm:$0xff]   ;;  %v3263_v34 = vld [vmem:[%s4057_s5 + $0x44c] ss:$16 sps:$4 sm:$0xff]  }
  0xee   : > { %2358 = vmatpush1.bf16.msra.mxu0 %v3174_v35  ;;  %2522 = vmatpush1.bf16.msra.mxu1 %v3177_v36  ;;  %v3258_v35 = vld [vmem:[%s4057_s5 + $0x440] ss:$16 sps:$4 sm:$0xff]   ;;  %v3261_v36 = vld [vmem:[%s4057_s5 + $0x448] ss:$16 sps:$4 sm:$0xff]  }
  0xef   : > { %2359 = vmatprep.subr.bf16.mxu0 %v3182_v37  ;;  %2523 = vmatprep.subr.bf16.mxu1 %v3185_v38  ;;  %v3472_v37 = vmov 0   ;;  %v3266_v38 = vld [vmem:[%s4057_s5 + $0x464] ss:$16 sps:$4 sm:$0xff]  }
  0xf0   : > { %3053 = vset.pattern.permute.xlu0 %v3472_v37  ;;  %v3351_v37 = vld [vmem:[%s4057_s5 + $0x624] ss:$16 sps:$4 sm:$0xff]  }
  0xf2   : > { %2360 = vmatpush1.bf16.msra.mxu0 %v3180_v39  ;;  %2524 = vmatpush1.bf16.msra.mxu1 %v3183_v40  ;;  %v3269_v39 = vld [vmem:[%s4057_s5 + $0x46c] ss:$16 sps:$4 sm:$0xff]   ;;  %v3264_v40 = vld [vmem:[%s4057_s5 + $0x460] ss:$16 sps:$4 sm:$0xff]  }
  0xf3   : > { %2361 = vmatprep.subr.bf16.mxu0 %v3188_v41  ;;  %2525 = vmatprep.subr.bf16.mxu1 %v3191_v42  ;;  %v3267_v41 = vld [vmem:[%s4057_s5 + $0x468] ss:$16 sps:$4 sm:$0xff]   ;;  %v3272_v42 = vld [vmem:[%s4057_s5 + $0x484] ss:$16 sps:$4 sm:$0xff]  }
  0xf6   : > { %2362 = vmatpush1.bf16.msra.mxu0 %v3186_v43  ;;  %2526 = vmatpush1.bf16.msra.mxu1 %v3189_v44  ;;  %v3275_v43 = vld [vmem:[%s4057_s5 + $0x48c] ss:$16 sps:$4 sm:$0xff]   ;;  %v3270_v44 = vld [vmem:[%s4057_s5 + $0x480] ss:$16 sps:$4 sm:$0xff]  }
  0xf7   : > { %2363 = vmatprep.subr.bf16.mxu0 %v3194_v45  ;;  %2527 = vmatprep.subr.bf16.mxu1 %v3197_v46  ;;  %v3273_v45 = vld [vmem:[%s4057_s5 + $0x488] ss:$16 sps:$4 sm:$0xff]   ;;  %v3278_v46 = vld [vmem:[%s4057_s5 + $0x4a4] ss:$16 sps:$4 sm:$0xff]  }
  0xfa   : > { %2364 = vmatpush1.bf16.msra.mxu0 %v3192_v47  ;;  %2528 = vmatpush1.bf16.msra.mxu1 %v3195_v48  ;;  %v3281_v47 = vld [vmem:[%s4057_s5 + $0x4ac] ss:$16 sps:$4 sm:$0xff]   ;;  %v3276_v48 = vld [vmem:[%s4057_s5 + $0x4a0] ss:$16 sps:$4 sm:$0xff]  }
  0xfb   : > { %2365 = vmatprep.subr.bf16.mxu0 %v3200_v49  ;;  %2529 = vmatprep.subr.bf16.mxu1 %v3203_v50  ;;  %v3279_v49 = vld [vmem:[%s4057_s5 + $0x4a8] ss:$16 sps:$4 sm:$0xff]   ;;  %v3284_v50 = vld [vmem:[%s4057_s5 + $0x4c4] ss:$16 sps:$4 sm:$0xff]  }
  0xfe   : > { %2366 = vmatpush1.bf16.msra.mxu0 %v3198_v51  ;;  %2530 = vmatpush1.bf16.msra.mxu1 %v3201_v52  ;;  %v3287_v51 = vld [vmem:[%s4057_s5 + $0x4cc] ss:$16 sps:$4 sm:$0xff]   ;;  %v3282_v52 = vld [vmem:[%s4057_s5 + $0x4c0] ss:$16 sps:$4 sm:$0xff]  }
  0xff   : > { %2367 = vmatprep.subr.bf16.mxu0 %v3206_v53  ;;  %2531 = vmatprep.subr.bf16.mxu1 %v3209_v54  ;;  %v3285_v53 = vld [vmem:[%s4057_s5 + $0x4c8] ss:$16 sps:$4 sm:$0xff]   ;;  %v3290_v54 = vld [vmem:[%s4057_s5 + $0x4e4] ss:$16 sps:$4 sm:$0xff]  }
 0x102   : > { %2368 = vmatpush1.bf16.msra.mxu0 %v3204_v55  ;;  %2532 = vmatpush1.bf16.msra.mxu1 %v3207_v56  ;;  %v3293_v55 = vld [vmem:[%s4057_s5 + $0x4ec] ss:$16 sps:$4 sm:$0xff]   ;;  %v3288_v56 = vld [vmem:[%s4057_s5 + $0x4e0] ss:$16 sps:$4 sm:$0xff]  }
 0x103   : > { %2369 = vmatprep.subr.bf16.mxu0 %v3212_v57  ;;  %2533 = vmatprep.subr.bf16.mxu1 %v3215_v58  ;;  %v3291_v57 = vld [vmem:[%s4057_s5 + $0x4e8] ss:$16 sps:$4 sm:$0xff]   ;;  %v3296_v58 = vld [vmem:[%s4057_s5 + $0x504] ss:$16 sps:$4 sm:$0xff]  }
 0x106   : > { %2370 = vmatpush1.bf16.msra.mxu0 %v3210_v59  ;;  %2534 = vmatpush1.bf16.msra.mxu1 %v3213_v60  ;;  %v3299_v59 = vld [vmem:[%s4057_s5 + $0x50c] ss:$16 sps:$4 sm:$0xff]   ;;  %v3294_v60 = vld [vmem:[%s4057_s5 + $0x500] ss:$16 sps:$4 sm:$0xff]  }
 0x107   : > { %2371 = vmatprep.subr.bf16.mxu0 %v3218_v61  ;;  %2535 = vmatprep.subr.bf16.mxu1 %v3221_v62  ;;  %v3297_v61 = vld [vmem:[%s4057_s5 + $0x508] ss:$16 sps:$4 sm:$0xff]   ;;  %v3302_v62 = vld [vmem:[%s4057_s5 + $0x524] ss:$16 sps:$4 sm:$0xff]  }
 0x10a   : > { %2372 = vmatpush1.bf16.msra.mxu0 %v3216_v63  ;;  %2536 = vmatpush1.bf16.msra.mxu1 %v3219_v0  ;;  %v3305_v63 = vld [vmem:[%s4057_s5 + $0x52c] ss:$16 sps:$4 sm:$0xff]   ;;  %v3300_v0 = vld [vmem:[%s4057_s5 + $0x520] ss:$16 sps:$4 sm:$0xff]  }
 0x10b   : > { %2373 = vmatprep.subr.bf16.mxu0 %v3224_v2  ;;  %2537 = vmatprep.subr.bf16.mxu1 %v3227_v3  ;;  %v3303_v2 = vld [vmem:[%s4057_s5 + $0x528] ss:$16 sps:$4 sm:$0xff]   ;;  %v3308_v3 = vld [vmem:[%s4057_s5 + $0x544] ss:$16 sps:$4 sm:$0xff]  }
 0x10e   : > { %2374 = vmatpush1.bf16.msra.mxu0 %v3222_v6  ;;  %2538 = vmatpush1.bf16.msra.mxu1 %v3225_v7  ;;  %v3311_v6 = vld [vmem:[%s4057_s5 + $0x54c] ss:$16 sps:$4 sm:$0xff]   ;;  %v3306_v7 = vld [vmem:[%s4057_s5 + $0x540] ss:$16 sps:$4 sm:$0xff]  }
 0x10f   : > { %2375 = vmatprep.subr.bf16.mxu0 %v3230_v8  ;;  %2539 = vmatprep.subr.bf16.mxu1 %v3233_v9  ;;  %v3309_v8 = vld [vmem:[%s4057_s5 + $0x548] ss:$16 sps:$4 sm:$0xff]   ;;  %v3314_v9 = vld [vmem:[%s4057_s5 + $0x564] ss:$16 sps:$4 sm:$0xff]  }
 0x112   : > { %2376 = vmatpush1.bf16.msra.mxu0 %v3228_v10  ;;  %2540 = vmatpush1.bf16.msra.mxu1 %v3231_v12  ;;  %v3317_v10 = vld [vmem:[%s4057_s5 + $0x56c] ss:$16 sps:$4 sm:$0xff]  }
 0x113   : > { %2377 = vmatprep.subr.bf16.mxu0 %v3236_v13  ;;  %2541 = vmatprep.subr.bf16.mxu1 %v3239_v14  ;;  %v960_v12 = vld [vmem:[#allocation2] sm:$0x1]  ;;  %v3312_v13 = vld [vmem:[%s4057_s5 + $0x560] ss:$16 sps:$4 sm:$0xff]   ;;  %v3315_v14 = vld [vmem:[%s4057_s5 + $0x568] ss:$16 sps:$4 sm:$0xff]  }
 0x114   : > { %963 = vperm.xlu0 %3053, %v960_v12   ;;  %v3405_v12 = vld [vmem:[%s4057_s5 + $0x744] ss:$16 sps:$4 sm:$0xff]  }
 0x116   : > { %2378 = vmatpush1.bf16.msra.mxu0 %v3234_v17  ;;  %2542 = vmatpush1.bf16.msra.mxu1 %v3237_v18  ;;  %v3323_v17 = vld [vmem:[%s4057_s5 + $0x58c] ss:$16 sps:$4 sm:$0xff]   ;;  %v3318_v18 = vld [vmem:[%s4057_s5 + $0x580] ss:$16 sps:$4 sm:$0xff]  }
 0x117   : > { %2379 = vmatprep.subr.bf16.mxu0 %v3242_v19  ;;  %2543 = vmatprep.subr.bf16.mxu1 %v3245_v21  ;;  %v3321_v19 = vld [vmem:[%s4057_s5 + $0x588] ss:$16 sps:$4 sm:$0xff]   ;;  %v3326_v21 = vld [vmem:[%s4057_s5 + $0x5a4] ss:$16 sps:$4 sm:$0xff]  }
 0x11a   : > { %2380 = vmatpush1.bf16.msra.mxu0 %v3240_v24  ;;  %2544 = vmatpush1.bf16.msra.mxu1 %v3243_v25  ;;  %v3329_v24 = vld [vmem:[%s4057_s5 + $0x5ac] ss:$16 sps:$4 sm:$0xff]   ;;  %v3324_v25 = vld [vmem:[%s4057_s5 + $0x5a0] ss:$16 sps:$4 sm:$0xff]  }
 0x11b   : > { %2390 = vmatprep.subr.bf16.mxu0 %v3248_v4  ;;  %2554 = vmatprep.subr.bf16.mxu1 %v3251_v15  ;;  %v3327_v4 = vld [vmem:[%s4057_s5 + $0x5a8] ss:$16 sps:$4 sm:$0xff]   ;;  %v3332_v15 = vld [vmem:[%s4057_s5 + $0x5c4] ss:$16 sps:$4 sm:$0xff]  }
 0x11d   : > { %2382 = vmatmul.mubr.bf16.vlgmr.msra.gmra.mrb[0].mxu0 %v1016_v28  ;;  %2546 = vmatmul.mubr.bf16.vlgmr.msra.gmra.mrb[0].mxu1 %v1016_v28  ;;  %v3338_v28 = vld [vmem:[%s4057_s5 + $0x5e4] ss:$16 sps:$4 sm:$0xff]  }
 0x11e   : > { %2391 = vmatpush1.bf16.msra.mxu0 %v3246_v27  ;;  %2555 = vmatpush1.bf16.msra.mxu1 %v3249_v23  ;;  %v3330_v27 = vld [vmem:[%s4057_s5 + $0x5c0] ss:$16 sps:$4 sm:$0xff]   ;;  %v3333_v23 = vld [vmem:[%s4057_s5 + $0x5c8] ss:$16 sps:$4 sm:$0xff]  }
 0x11f   : > { %2392 = vmatprep.subr.bf16.mxu0 %v3254_v29  ;;  %2556 = vmatprep.subr.bf16.mxu1 %v3257_v30  ;;  %v3341_v29 = vld [vmem:[%s4057_s5 + $0x5ec] ss:$16 sps:$4 sm:$0xff]   ;;  %v3336_v30 = vld [vmem:[%s4057_s5 + $0x5e0] ss:$16 sps:$4 sm:$0xff]  }
 0x120   : > { %2422 = vmatprep.mubr.bf16.mxu0 %v4225_v31  ;;  %2586 = vmatprep.mubr.bf16.mxu1 %v4225_v31 }
 0x122   : > { %2393 = vmatpush1.bf16.msra.mxu0 %v3252_v32  ;;  %2557 = vmatpush1.bf16.msra.mxu1 %v3255_v33  ;;  %v3339_v32 = vld [vmem:[%s4057_s5 + $0x5e8] ss:$16 sps:$4 sm:$0xff]   ;;  %v3345_v33 = vld [vmem:[%s4057_s5 + $0x604] ss:$16 sps:$4 sm:$0xff]  }
 0x123   : > { %2394 = vmatprep.subr.bf16.mxu0 %v3260_v20  ;;  %2558 = vmatprep.subr.bf16.mxu1 %v3263_v34  ;;  %v3348_v20 = vld [vmem:[%s4057_s5 + $0x60c] ss:$16 sps:$4 sm:$0xff]   ;;  %v4291_v34 = vrot.slane %v4210_v22, %v4064_v11  ;;  %v3349_v22 = vld [vmem:[%s4057_s5 + $0x620] ss:$16 sps:$4 sm:$0xff]  }
 0x126   : > { %2395 = vmatpush1.bf16.msra.mxu0 %v3258_v35  ;;  %2559 = vmatpush1.bf16.msra.mxu1 %v3261_v36  ;;  %v3343_v35 = vld [vmem:[%s4057_s5 + $0x600] ss:$16 sps:$4 sm:$0xff]   ;;  %v3346_v36 = vld [vmem:[%s4057_s5 + $0x608] ss:$16 sps:$4 sm:$0xff]  }
 0x127   : > { %2396 = vmatprep.subr.bf16.mxu0 %v3266_v38  ;;  %2560 = vmatprep.subr.bf16.mxu1 %v3269_v39  ;;  %v3354_v38 = vld [vmem:[%s4057_s5 + $0x62c] ss:$16 sps:$4 sm:$0xff]   ;;  %v1019_v39 = vcombine.high %v4225_v31, %v4225_v31  ;;  %v3355_v31 = vld [vmem:[%s4057_s5 + $0x640] ss:$16 sps:$4 sm:$0xff]  }
 0x12a   : > { %2397 = vmatpush1.bf16.msra.mxu0 %v3264_v40  ;;  %2561 = vmatpush1.bf16.msra.mxu1 %v3267_v41  ;;  %v3352_v40 = vld [vmem:[%s4057_s5 + $0x628] ss:$16 sps:$4 sm:$0xff]   ;;  %v3357_v41 = vld [vmem:[%s4057_s5 + $0x644] ss:$16 sps:$4 sm:$0xff]  }
 0x12b   : > { %2398 = vmatprep.subr.bf16.mxu0 %v3272_v42  ;;  %2562 = vmatprep.subr.bf16.mxu1 %v3275_v43  ;;  %v3360_v42 = vld [vmem:[%s4057_s5 + $0x64c] ss:$16 sps:$4 sm:$0xff]   ;;  %v3358_v43 = vld [vmem:[%s4057_s5 + $0x648] ss:$16 sps:$4 sm:$0xff]  }
 0x12e   : > { %2399 = vmatpush1.bf16.msra.mxu0 %v3270_v44  ;;  %2563 = vmatpush1.bf16.msra.mxu1 %v3273_v45  ;;  %v3363_v44 = vld [vmem:[%s4057_s5 + $0x664] ss:$16 sps:$4 sm:$0xff]   ;;  %v3366_v45 = vld [vmem:[%s4057_s5 + $0x66c] ss:$16 sps:$4 sm:$0xff]  }
 0x12f   : > { %2400 = vmatprep.subr.bf16.mxu0 %v3278_v46  ;;  %2564 = vmatprep.subr.bf16.mxu1 %v3281_v47  ;;  %v3361_v46 = vld [vmem:[%s4057_s5 + $0x660] ss:$16 sps:$4 sm:$0xff]   ;;  %v3364_v47 = vld [vmem:[%s4057_s5 + $0x668] ss:$16 sps:$4 sm:$0xff]  }
 0x132   : > { %2401 = vmatpush1.bf16.msra.mxu0 %v3276_v48  ;;  %2565 = vmatpush1.bf16.msra.mxu1 %v3279_v49  ;;  %v3369_v48 = vld [vmem:[%s4057_s5 + $0x684] ss:$16 sps:$4 sm:$0xff]   ;;  %v3372_v49 = vld [vmem:[%s4057_s5 + $0x68c] ss:$16 sps:$4 sm:$0xff]  }
 0x133   : > { %2402 = vmatprep.subr.bf16.mxu0 %v3284_v50  ;;  %2566 = vmatprep.subr.bf16.mxu1 %v3287_v51  ;;  %v3367_v50 = vld [vmem:[%s4057_s5 + $0x680] ss:$16 sps:$4 sm:$0xff]   ;;  %v3370_v51 = vld [vmem:[%s4057_s5 + $0x688] ss:$16 sps:$4 sm:$0xff]  }
 0x136   : > { %2403 = vmatpush1.bf16.msra.mxu0 %v3282_v52  ;;  %2567 = vmatpush1.bf16.msra.mxu1 %v3285_v53  ;;  %v3375_v52 = vld [vmem:[%s4057_s5 + $0x6a4] ss:$16 sps:$4 sm:$0xff]   ;;  %v3378_v53 = vld [vmem:[%s4057_s5 + $0x6ac] ss:$16 sps:$4 sm:$0xff]  }
 0x137   : > { %2404 = vmatprep.subr.bf16.mxu0 %v3290_v54  ;;  %2568 = vmatprep.subr.bf16.mxu1 %v3293_v55  ;;  %v3373_v54 = vld [vmem:[%s4057_s5 + $0x6a0] ss:$16 sps:$4 sm:$0xff]   ;;  %v3376_v55 = vld [vmem:[%s4057_s5 + $0x6a8] ss:$16 sps:$4 sm:$0xff]  }
 0x13a   : > { %2405 = vmatpush1.bf16.msra.mxu0 %v3288_v56  ;;  %2569 = vmatpush1.bf16.msra.mxu1 %v3291_v57  ;;  %v3381_v56 = vld [vmem:[%s4057_s5 + $0x6c4] ss:$16 sps:$4 sm:$0xff]   ;;  %v3384_v57 = vld [vmem:[%s4057_s5 + $0x6cc] ss:$16 sps:$4 sm:$0xff]  }
 0x13b   : > { %2406 = vmatprep.subr.bf16.mxu0 %v3296_v58  ;;  %2570 = vmatprep.subr.bf16.mxu1 %v3299_v59  ;;  %v3379_v58 = vld [vmem:[%s4057_s5 + $0x6c0] ss:$16 sps:$4 sm:$0xff]   ;;  %v3382_v59 = vld [vmem:[%s4057_s5 + $0x6c8] ss:$16 sps:$4 sm:$0xff]  }
 0x13e   : > { %2407 = vmatpush1.bf16.msra.mxu0 %v3294_v60  ;;  %2571 = vmatpush1.bf16.msra.mxu1 %v3297_v61  ;;  %v3387_v60 = vld [vmem:[%s4057_s5 + $0x6e4] ss:$16 sps:$4 sm:$0xff]   ;;  %v3390_v61 = vld [vmem:[%s4057_s5 + $0x6ec] ss:$16 sps:$4 sm:$0xff]  }
 0x13f   : > { %2408 = vmatprep.subr.bf16.mxu0 %v3302_v62  ;;  %2572 = vmatprep.subr.bf16.mxu1 %v3305_v63  ;;  %v3385_v62 = vld [vmem:[%s4057_s5 + $0x6e0] ss:$16 sps:$4 sm:$0xff]   ;;  %v3388_v63 = vld [vmem:[%s4057_s5 + $0x6e8] ss:$16 sps:$4 sm:$0xff]  }
 0x142   : > { %2409 = vmatpush1.bf16.msra.mxu0 %v3300_v0  ;;  %2573 = vmatpush1.bf16.msra.mxu1 %v3303_v2  ;;  %v3393_v0 = vld [vmem:[%s4057_s5 + $0x704] ss:$16 sps:$4 sm:$0xff]   ;;  %v3396_v2 = vld [vmem:[%s4057_s5 + $0x70c] ss:$16 sps:$4 sm:$0xff]  }
 0x143   : > { %2410 = vmatprep.subr.bf16.mxu0 %v3308_v3  ;;  %2574 = vmatprep.subr.bf16.mxu1 %v3311_v6  ;;  %v3391_v3 = vld [vmem:[%s4057_s5 + $0x700] ss:$16 sps:$4 sm:$0xff]   ;;  %v3394_v6 = vld [vmem:[%s4057_s5 + $0x708] ss:$16 sps:$4 sm:$0xff]  }
 0x146   : > { %2411 = vmatpush1.bf16.msra.mxu0 %v3306_v7  ;;  %2575 = vmatpush1.bf16.msra.mxu1 %v3309_v8  ;;  %v3399_v7 = vld [vmem:[%s4057_s5 + $0x724] ss:$16 sps:$4 sm:$0xff]   ;;  %v3402_v8 = vld [vmem:[%s4057_s5 + $0x72c] ss:$16 sps:$4 sm:$0xff]  }
 0x147   : > { %2412 = vmatprep.subr.bf16.mxu0 %v3314_v9  ;;  %2576 = vmatprep.subr.bf16.mxu1 %v3317_v10  ;;  %v3397_v9 = vld [vmem:[%s4057_s5 + $0x720] ss:$16 sps:$4 sm:$0xff]   ;;  %v3400_v10 = vld [vmem:[%s4057_s5 + $0x728] ss:$16 sps:$4 sm:$0xff]  }
 0x14a   : > { %2413 = vmatpush1.bf16.msra.mxu0 %v3312_v13  ;;  %2577 = vmatpush1.bf16.msra.mxu1 %v3315_v14  ;;  %v3408_v13 = vld [vmem:[%s4057_s5 + $0x74c] ss:$16 sps:$4 sm:$0xff]   ;;  %v3403_v14 = vld [vmem:[%s4057_s5 + $0x740] ss:$16 sps:$4 sm:$0xff]  }
 0x14b   : > { %2414 = vmatprep.subr.bf16.mxu0 %v3320_v16  ;;  %2578 = vmatprep.subr.bf16.mxu1 %v3323_v17  ;;  %v3406_v16 = vld [vmem:[%s4057_s5 + $0x748] ss:$16 sps:$4 sm:$0xff]   ;;  %v3411_v17 = vld [vmem:[%s4057_s5 + $0x764] ss:$16 sps:$4 sm:$0xff]  }
 0x14e   : > { %2415 = vmatpush1.bf16.msra.mxu0 %v3318_v18  ;;  %2579 = vmatpush1.bf16.msra.mxu1 %v3321_v19  ;;  %v3414_v18 = vld [vmem:[%s4057_s5 + $0x76c] ss:$16 sps:$4 sm:$0xff]   ;;  %v3409_v19 = vld [vmem:[%s4057_s5 + $0x760] ss:$16 sps:$4 sm:$0xff]  }
 0x14f   : > { %2416 = vmatprep.subr.bf16.mxu0 %v3326_v21  ;;  %2580 = vmatprep.subr.bf16.mxu1 %v3329_v24  ;;  %v3412_v21 = vld [vmem:[%s4057_s5 + $0x768] ss:$16 sps:$4 sm:$0xff]   ;;  %v3417_v24 = vld [vmem:[%s4057_s5 + $0x784] ss:$16 sps:$4 sm:$0xff]  }
 0x152   : > { %2417 = vmatpush1.bf16.msra.mxu0 %v3324_v25  ;;  %2581 = vmatpush1.bf16.msra.mxu1 %v3327_v4  ;;  %v3420_v25 = vld [vmem:[%s4057_s5 + $0x78c] ss:$16 sps:$4 sm:$0xff]   ;;  %v3415_v4 = vld [vmem:[%s4057_s5 + $0x780] ss:$16 sps:$4 sm:$0xff]  }
 0x153   : > { %2418 = vmatprep.subr.bf16.mxu0 %v3332_v15  ;;  %2582 = vmatprep.subr.bf16.mxu1 %v3335_v26  ;;  %v3418_v15 = vld [vmem:[%s4057_s5 + $0x788] ss:$16 sps:$4 sm:$0xff]   ;;  %v3423_v26 = vld [vmem:[%s4057_s5 + $0x7a4] ss:$16 sps:$4 sm:$0xff]  }
 0x156   : > { %2419 = vmatpush1.bf16.msra.mxu0 %v3330_v27  ;;  %2583 = vmatpush1.bf16.msra.mxu1 %v3333_v23  ;;  %v3426_v27 = vld [vmem:[%s4057_s5 + $0x7ac] ss:$16 sps:$4 sm:$0xff]   ;;  %v3421_v23 = vld [vmem:[%s4057_s5 + $0x7a0] ss:$16 sps:$4 sm:$0xff]  }
 0x157   : > { %2420 = vmatprep.subr.bf16.mxu0 %v3338_v28  ;;  %2584 = vmatprep.subr.bf16.mxu1 %v3341_v29  ;;  %v3424_v28 = vld [vmem:[%s4057_s5 + $0x7a8] ss:$16 sps:$4 sm:$0xff]   ;;  %v3429_v29 = vld [vmem:[%s4057_s5 + $0x7c4] ss:$16 sps:$4 sm:$0xff]  }
 0x15a   : > { %2421 = vmatpush1.bf16.msra.mxu0 %v3336_v30  ;;  %2585 = vmatpush1.bf16.msra.mxu1 %v3339_v32  ;;  %v3432_v30 = vld [vmem:[%s4057_s5 + $0x7cc] ss:$16 sps:$4 sm:$0xff]   ;;  %v3427_v32 = vld [vmem:[%s4057_s5 + $0x7c0] ss:$16 sps:$4 sm:$0xff]  }
 0x15b   : > { %2431 = vmatprep.subr.bf16.mxu0 %v3345_v33  ;;  %2595 = vmatprep.subr.bf16.mxu1 %v3348_v20  ;;  %v3430_v33 = vld [vmem:[%s4057_s5 + $0x7c8] ss:$16 sps:$4 sm:$0xff]   ;;  %v3435_v20 = vld [vmem:[%s4057_s5 + $0x7e4] ss:$16 sps:$4 sm:$0xff]  }
 0x15d   : > { %2423 = vmatmul.mubr.bf16.vlgmr.msra.gmra.mrb[0].mxu0 %v4291_v34  ;;  %2587 = vmatmul.mubr.bf16.vlgmr.msra.gmra.mrb[0].mxu1 %v4291_v34 }
 0x15e   : > { %2432 = vmatpush1.bf16.msra.mxu0 %v3343_v35  ;;  %2596 = vmatpush1.bf16.msra.mxu1 %v3346_v36  ;;  %v3438_v35 = vld [vmem:[%s4057_s5 + $0x7ec] ss:$16 sps:$4 sm:$0xff]   ;;  %v3433_v36 = vld [vmem:[%s4057_s5 + $0x7e0] ss:$16 sps:$4 sm:$0xff]  }
 0x15f   : > { %2433 = vmatprep.subr.bf16.mxu0 %v3351_v37  ;;  %2597 = vmatprep.subr.bf16.mxu1 %v3354_v38  ;;  %v3436_v37 = vld [vmem:[%s4057_s5 + $0x7e8] ss:$16 sps:$4 sm:$0xff]   ;;  %v1017_v38 = vcombine.high %v4291_v34, %v4291_v34 }
 0x160   : > { %2463 = vmatprep.mubr.bf16.mxu0 %v1019_v39  ;;  %2627 = vmatprep.mubr.bf16.mxu1 %v1019_v39  ;;  %v968_v39 = vsub.s32 0, %v4055_v5 }
 0x162   : > { %2434 = vmatpush1.bf16.msra.mxu0 %v3349_v22  ;;  %2598 = vmatpush1.bf16.msra.mxu1 %v3352_v40 }
 0x163   : > { %2435 = vmatprep.subr.bf16.mxu0 %v3357_v41  ;;  %2599 = vmatprep.subr.bf16.mxu1 %v3360_v42 }
 0x166   : > { %2436 = vmatpush1.bf16.msra.mxu0 %v3355_v31  ;;  %2600 = vmatpush1.bf16.msra.mxu1 %v3358_v43 }
 0x167   : > { %2437 = vmatprep.subr.bf16.mxu0 %v3363_v44  ;;  %2601 = vmatprep.subr.bf16.mxu1 %v3366_v45 }
 0x16a   : > { %2438 = vmatpush1.bf16.msra.mxu0 %v3361_v46  ;;  %2602 = vmatpush1.bf16.msra.mxu1 %v3364_v47 }
 0x16b   : > { %2439 = vmatprep.subr.bf16.mxu0 %v3369_v48  ;;  %2603 = vmatprep.subr.bf16.mxu1 %v3372_v49 }
 0x16e   : > { %2440 = vmatpush1.bf16.msra.mxu0 %v3367_v50  ;;  %2604 = vmatpush1.bf16.msra.mxu1 %v3370_v51 }
 0x16f   : > { %2441 = vmatprep.subr.bf16.mxu0 %v3375_v52  ;;  %2605 = vmatprep.subr.bf16.mxu1 %v3378_v53 }
 0x172   : > { %2442 = vmatpush1.bf16.msra.mxu0 %v3373_v54  ;;  %2606 = vmatpush1.bf16.msra.mxu1 %v3376_v55 }
 0x173   : > { %2443 = vmatprep.subr.bf16.mxu0 %v3381_v56  ;;  %2607 = vmatprep.subr.bf16.mxu1 %v3384_v57 }
 0x176   : > { %2444 = vmatpush1.bf16.msra.mxu0 %v3379_v58  ;;  %2608 = vmatpush1.bf16.msra.mxu1 %v3382_v59 }
 0x177   : > { %2445 = vmatprep.subr.bf16.mxu0 %v3387_v60  ;;  %2609 = vmatprep.subr.bf16.mxu1 %v3390_v61 }
 0x17a   : > { %2446 = vmatpush1.bf16.msra.mxu0 %v3385_v62  ;;  %2610 = vmatpush1.bf16.msra.mxu1 %v3388_v63 }
 0x17b   : > { %2447 = vmatprep.subr.bf16.mxu0 %v3393_v0  ;;  %2611 = vmatprep.subr.bf16.mxu1 %v3396_v2 }
 0x17e   : > { %2448 = vmatpush1.bf16.msra.mxu0 %v3391_v3  ;;  %2612 = vmatpush1.bf16.msra.mxu1 %v3394_v6 }
 0x17f   : > { %2449 = vmatprep.subr.bf16.mxu0 %v3399_v7  ;;  %2613 = vmatprep.subr.bf16.mxu1 %v3402_v8 }
 0x182   : > { %2450 = vmatpush1.bf16.msra.mxu0 %v3397_v9  ;;  %2614 = vmatpush1.bf16.msra.mxu1 %v3400_v10 }
 0x183   : > { %2451 = vmatprep.subr.bf16.mxu0 %v3405_v12  ;;  %2615 = vmatprep.subr.bf16.mxu1 %v3408_v13 }
 0x186   : > { %2452 = vmatpush1.bf16.msra.mxu0 %v3403_v14  ;;  %2616 = vmatpush1.bf16.msra.mxu1 %v3406_v16 }
 0x187   : > { %2453 = vmatprep.subr.bf16.mxu0 %v3411_v17  ;;  %2617 = vmatprep.subr.bf16.mxu1 %v3414_v18 }
 0x18a   : > { %2454 = vmatpush1.bf16.msra.mxu0 %v3409_v19  ;;  %2618 = vmatpush1.bf16.msra.mxu1 %v3412_v21 }
 0x18b   : > { %2455 = vmatprep.subr.bf16.mxu0 %v3417_v24  ;;  %2619 = vmatprep.subr.bf16.mxu1 %v3420_v25 }
 0x18e   : > { %2456 = vmatpush1.bf16.msra.mxu0 %v3415_v4  ;;  %2620 = vmatpush1.bf16.msra.mxu1 %v3418_v15 }
 0x18f   : > { %2457 = vmatprep.subr.bf16.mxu0 %v3423_v26  ;;  %2621 = vmatprep.subr.bf16.mxu1 %v3426_v27 }
 0x192   : > { %2458 = vmatpush1.bf16.msra.mxu0 %v3421_v23  ;;  %2622 = vmatpush1.bf16.msra.mxu1 %v3424_v28 }
 0x193   : > { %2459 = vmatprep.subr.bf16.mxu0 %v3429_v29  ;;  %2623 = vmatprep.subr.bf16.mxu1 %v3432_v30  ;;  %v964_v22 = vpop.permute.xlu0 %963 }
 0x194   : > { %v969_v40 = vrot.slane %v964_v22, %v968_v39 }
 0x196   : > { %2460 = vmatpush1.bf16.msra.mxu0 %v3427_v32  ;;  %2624 = vmatpush1.bf16.msra.mxu1 %v3430_v33 }
 0x197   : > { %2461 = vmatprep.subr.bf16.mxu0 %v3435_v20  ;;  %2625 = vmatprep.subr.bf16.mxu1 %v3438_v35 }
 0x19a   : > { %2462 = vmatpush1.bf16.msra.mxu0 %v3433_v36  ;;  %2626 = vmatpush1.bf16.msra.mxu1 %v3436_v37 }
 0x19d   : > { %2464 = vmatmul.mubr.bf16.vlgmr.msra.gmra.mrb[0].mxu0 %v1017_v38  ;;  %2628 = vmatmul.mubr.bf16.vlgmr.msra.gmra.mrb[0].mxu1 %v1017_v38 }
 0x270   : > { %v2465_v41 = vpop.f32.mrb[0].mxu0  ;;  %v2629_v42 = vpop.f32.mrb[0].mxu1 }
 0x271   : > { %v2999_v31 = vadd.f32 %v2465_v41, %v969_v40  ;;  %v3001_v43 = vadd.f32 %v2629_v42, %v969_v40  ;;  %v2467_v44 = vpop.f32.mrb[1].mxu0  ;;  %v2631_v45 = vpop.f32.mrb[1].mxu1 }
 0x272   : > { %v3000_v46 = vadd.f32 %v2467_v44, %v969_v40  ;;  %v3002_v47 = vadd.f32 %v2631_v45, %v969_v40  ;;  %v2469_v48 = vpop.f32.mrb[2].mxu0  ;;  %v2633_v49 = vpop.f32.mrb[2].mxu1 }
 0x273   : > { %3439 = vtanh.f32 %v2999_v31  ;;  %v2470_v34 = vpop.f32.mrb[3].mxu0  ;;  %v2634_v50 = vpop.f32.mrb[3].mxu1 }
 0x274   : > { %3441 = vtanh.f32 %v3001_v43 }
 0x275   : > { %3443 = vtanh.f32 %v3000_v46 }
 0x276   : > { %3445 = vtanh.f32 %v3002_v47 }
 0x27d   : > { %v3440_v5 = vpop.eup %3439 }
 0x27e   : > { %v3442_v51 = vpop.eup %3441 }
 0x27f   : > { %v3444_v52 = vpop.eup %3443 }
 0x280   : > { %v3446_v53 = vpop.eup %3445  ;;  %v2644_v54 = vcombine.low %v3440_v5, %v3444_v52 }
 0x281   : > { %v2645_v55 = vcombine.low %v3442_v51, %v3446_v53 }
 0x282   : > { %v2652_v56 = vrot.slane %v2644_v54, %v4064_v11 }
 0x283   : > { %v2659_v57 = vrot.slane %v2645_v55, %v4064_v11 }
 0x285   : > { %v2660_v58 = vcombine.low %v2652_v56, %v2659_v57 }
 0x287   : > { %v2667_v59 = vrot.slane %v2660_v58, %v4064_v11 }
 0x289   : > { %2673 = vst.msk [vmem:[%s701_s9] sm:$0xf] %vm2671_vm0, %v2667_v59 }
 0x28a PF: > { %p12_p9 = scmp.ge.s32.totalorder %s3513_s17, 4   ;;  %s4385_s14 = smov %s3465_s15 }
 0x28b   : > { %s4386_s15 = smov %s3522_s20  ;;  %s4387_s16 = smov %s3513_s17 }
 0x28c   :  { %14 = sbr.rel (!%p12_p9) target bundleno = 5 (0x5), region = 90 }

</bundles_post_ra>
